<compile_context>
chip_gen: v7x
topology: tpu7x:2x2x1
jax: 0.10.0
libtpu: 0.0.40
codegen_flags: <defaults>
</compile_context>

<pallas_src>
import functools

import jax
import jax.numpy as jnp
from jax.experimental import pallas as pl
from jax.experimental.pallas import tpu as pltpu

jax.config.update("jax_default_matmul_precision", "highest")

# ---------------- configuration (mirrors the PyTorch args) ----------------
NUM_NODES = 16      # args.num_nodes
INPUT_DIM = 2       # args.input_dim
OUTPUT_DIM = 1      # args.output_dim (not used by forward; kept for fidelity)
RNN_UNITS = 8       # args.rnn_units -> residual_dim == dilation_dim
HORIZON = 8         # args.horizon   -> input_window == output_window
NUM_LAYERS = 2      # args.num_layers
BLOCKS = 1          # args.blocks
BATCH = 2

SKIP_DIM = RNN_UNITS * 8
END_DIM = RNN_UNITS * 16
ORDER = 2           # JGCM order (support_len = 1)
EPS_BN = 1e-5
L_TOTAL = BLOCKS * NUM_LAYERS

_VMEM = pl.BlockSpec(memory_space=pltpu.MemorySpace.VMEM)


# ----------------------------- fused Pallas kernel ------------------------------
def _fused_forward_kernel(x0_ref, wstart_ref, bstart_ref,
                          pbig_ref, wfg_ref, bfg_ref,
                          wskip_ref, bskip_ref, gamma_ref, beta_ref,
                          w1_ref, b1_ref, w2_ref, b2_ref,
                          out_ref, *, batch, channels, num_nodes, horizon, num_layers):
    """Whole JSTGCN forward. Activations are (B*C, M), rows = (batch, channel), lanes = t*N + n."""
    B, C, N, T, L = batch, channels, num_nodes, horizon, num_layers
    M = T * N

    # start conv (1x1), batch folded via kron(I_B, W_start): (B*C, B*Din) @ (B*Din, M)
    x = jnp.dot(wstart_ref[...], x0_ref[...],
                preferred_element_type=jnp.float32) + bstart_ref[...]          # (B*C, M)

    # skip accumulator stays in registers/VMEM for the whole forward (rows = b*SKIP_DIM + s)
    skip = jnp.zeros((wskip_ref.shape[1], N), jnp.float32)                     # (B*S, N)

    for j in range(L):                                                         # unrolled (L = 2)
        # --- joint spatio-temporal propagation: one matmul against [P | P@G | P@G@G] ---
        y = jnp.dot(x, pbig_ref[j], preferred_element_type=jnp.float32)        # (B*C, 3M)
        # regroup the three hops into the channel (sublane) axis: rows b*3C + h*C + c
        xst = jnp.concatenate(
            [y[b * C:(b + 1) * C, h * M:(h + 1) * M]
             for b in range(B) for h in range(3)], axis=0)                     # (B*3C, M)

        # --- fused filter + gate 1x1 conv (block-diagonal over batch) ---
        fg = jnp.dot(wfg_ref[j], xst,
                     preferred_element_type=jnp.float32) + bfg_ref[j]          # (B*2C, M)
        filt = jnp.concatenate([fg[b * 2 * C: b * 2 * C + C] for b in range(B)], axis=0)
        gate = jnp.concatenate([fg[b * 2 * C + C: (b + 1) * 2 * C] for b in range(B)], axis=0)
        xg = filt * jax.nn.sigmoid(gate)                                       # (B*C, M)

        # --- skip branch: last time step == trailing N lanes, accumulated in VMEM ---
        s_last = xg[:, (T - 1) * N:]                                           # (B*C, N)
        skip = skip + jnp.dot(wskip_ref[j], s_last,
                              preferred_element_type=jnp.float32) + bskip_ref[j]

        # --- residual + BatchNorm2d (training statistics, one-pass sums) ---
        xr = xg + x                                                            # (B*C, M)
        rs = jnp.sum(xr, axis=1, keepdims=True)                                # (B*C, 1)
        rss = jnp.sum(xr * xr, axis=1, keepdims=True)
        cs = rs[0:C]
        css = rss[0:C]
        for b in range(1, B):
            cs = cs + rs[b * C:(b + 1) * C]
            css = css + rss[b * C:(b + 1) * C]
        cnt = float(B * M)
        mean = cs / cnt                                                        # (C, 1)
        var = css / cnt - mean * mean
        inv = jax.lax.rsqrt(var + EPS_BN)
        scale = gamma_ref[j] * inv
        shift = beta_ref[j] - mean * scale
        scale_r = jnp.concatenate([scale] * B, axis=0)                         # (B*C, 1)
        shift_r = jnp.concatenate([shift] * B, axis=0)
        x = xr * scale_r + shift_r

    # --- head: relu -> end_conv_1 -> relu -> end_conv_2 (block-diag over batch) ---
    h0 = jnp.maximum(skip, 0.0)                                                # (B*S, N)
    h1 = jnp.dot(w1_ref[...], h0, preferred_element_type=jnp.float32) + b1_ref[...]
    h1 = jnp.maximum(h1, 0.0)                                                  # (B*END, N)
    out_ref[...] = jnp.dot(w2_ref[...], h1,
                           preferred_element_type=jnp.float32) + b2_ref[...]   # (B*T, N)


# ------------------------------ model wrapper ------------------------------
@jax.jit
def jstgcn_forward(params, source):
    """source: (B, T, N, input_dim) as fed to the PyTorch module (it permutes to NCHW)."""
    B, T, N, Din = source.shape
    M = T * N
    C = RNN_UNITS
    eyeB = jnp.eye(B, dtype=jnp.float32)

    # activations to kernel layout: rows = (batch, in-channel), lanes = m = t*N + n
    x0 = jnp.transpose(source, (0, 3, 1, 2)).reshape(B * Din, M)

    # adaptive adjacency (parameter-only setup -> plain XLA glue)
    w_sm = jax.nn.softmax(jax.nn.relu(params['weight']), axis=-1)              # (N, 3)
    emb = params['node_embedding']                                             # (3, N, 10)
    mats = jnp.einsum('abc,acf->abf', emb, jnp.transpose(emb, (0, 2, 1)))      # (3, N, N)
    mats = jax.nn.softmax(jax.nn.relu(mats), axis=-1)
    mats = jnp.transpose(mats, (1, 0, 2))                                      # (N, 3, N)
    sp = jnp.einsum('nd,ndm->nm', w_sm, mats)                                  # (N, N)

    # sequence (temporal) matrix: eye(T) + sub-diagonal, L1-normalized per row
    seq = jnp.eye(T, dtype=jnp.float32) + jnp.eye(T, k=-1, dtype=jnp.float32)
    seq = seq / jnp.sum(jnp.abs(seq), axis=1, keepdims=True)
    mgraph = jnp.kron(jnp.eye(T, dtype=jnp.float32), sp)                       # (M, M)

    # per-layer: lane-concatenated propagation matrix and kron'd (batch-folded) weights
    pbig, wfg, bfg, wskip, bskip, gamma, beta = [], [], [], [], [], [], []
    for j, lp in enumerate(params['layers']):
        step_k = 3 ** (j % NUM_LAYERS)                                         # 3**i per layer
        seq_pow = jnp.linalg.matrix_power(seq, step_k)
        p1 = jnp.kron(seq_pow.T, jnp.eye(N, dtype=jnp.float32))                # (M, M)
        p2 = p1 @ mgraph
        p3 = p2 @ mgraph
        pbig.append(jnp.concatenate([p1, p2, p3], axis=1))                     # (M, 3M)
        wfg_cat = jnp.concatenate([lp['wf'], lp['wg']], axis=0)                # (2C, 3C)
        wfg.append(jnp.kron(eyeB, wfg_cat))                                    # (B*2C, B*3C)
        bfg.append(jnp.tile(jnp.concatenate([lp['bf'], lp['bg']]), B).reshape(-1, 1))
        wskip.append(jnp.kron(eyeB, lp['ws']))                                 # (B*S, B*C)
        bskip.append(jnp.tile(lp['bs'], B).reshape(-1, 1))
        gamma.append(lp['gamma'].reshape(-1, 1))
        beta.append(lp['beta'].reshape(-1, 1))

    kernel = functools.partial(
        _fused_forward_kernel, batch=B, channels=C, num_nodes=N, horizon=T,
        num_layers=len(params['layers']))

    out = pl.pallas_call(
        kernel,
        out_shape=jax.ShapeDtypeStruct((B * HORIZON, N), jnp.float32),
        in_specs=[_VMEM] * 14,
        out_specs=_VMEM,
    )(x0,
      jnp.kron(eyeB, params['start_w']),                  # (B*C, B*Din)
      jnp.tile(params['start_b'], B).reshape(-1, 1),      # (B*C, 1)
      jnp.stack(pbig), jnp.stack(wfg), jnp.stack(bfg),
      jnp.stack(wskip), jnp.stack(bskip), jnp.stack(gamma), jnp.stack(beta),
      jnp.kron(eyeB, params['end1_w']),                   # (B*END, B*S)
      jnp.tile(params['end1_b'], B).reshape(-1, 1),
      jnp.kron(eyeB, params['end2_w']),                   # (B*T, B*END)
      jnp.tile(params['end2_b'], B).reshape(-1, 1))

    return out.reshape(B, HORIZON, N)[..., None]          # (B, output_window, N, 1)


# ---------------------------- parameter creation ----------------------------
def init_params(key):
    keys = iter(jax.random.split(key, 64))

    def nrm(shape, scale=1.0):
        return scale * jax.random.normal(next(keys), shape, jnp.float32)

    C = RNN_UNITS
    cin = (ORDER * 1 + 1) * C      # (order * support_len + 1) * dim_in
    params = {
        'node_embedding': nrm((3, NUM_NODES, 10)),
        'weight': nrm((NUM_NODES, 3)),
        'start_w': nrm((C, INPUT_DIM), 1.0 / float(jnp.sqrt(INPUT_DIM))),
        'start_b': nrm((C,), 0.1),
        'end1_w': nrm((END_DIM, SKIP_DIM), 1.0 / float(jnp.sqrt(SKIP_DIM))),
        'end1_b': nrm((END_DIM,), 0.1),
        'end2_w': nrm((HORIZON, END_DIM), 1.0 / float(jnp.sqrt(END_DIM))),
        'end2_b': nrm((HORIZON,), 0.1),
        'layers': [],
    }
    for _ in range(L_TOTAL):
        params['layers'].append({
            'wf': nrm((C, cin), 1.0 / float(jnp.sqrt(cin))),
            'bf': nrm((C,), 0.1),
            'wg': nrm((C, cin), 1.0 / float(jnp.sqrt(cin))),
            'bg': nrm((C,), 0.1),
            'ws': nrm((SKIP_DIM, C), 1.0 / float(jnp.sqrt(C))),
            'bs': nrm((SKIP_DIM,), 0.1),
            'gamma': jnp.ones((C,), jnp.float32),     # BatchNorm2d default init
            'beta': jnp.zeros((C,), jnp.float32),
        })
    return params


# ------------------------ pure-JAX reference (PyTorch semantics) ------------------------
def ref_forward(params, source):
    x = jnp.transpose(source, (0, 3, 2, 1))                  # NCHW: (B, Din, N, T)

    def conv(w, b, t):
        return jnp.einsum('oc,bcnt->bont', w, t) + b[None, :, None, None]

    x = conv(params['start_w'], params['start_b'], x)

    w_sm = jax.nn.softmax(jax.nn.relu(params['weight']), axis=-1)
    emb = params['node_embedding']
    mats = jnp.einsum('abc,acf->abf', emb, jnp.transpose(emb, (0, 2, 1)))
    mats = jax.nn.softmax(jax.nn.relu(mats), axis=-1)
    mats = jnp.transpose(mats, (1, 0, 2))
    sp = jnp.einsum('nd,ndm->nm', w_sm, mats)

    T = HORIZON
    seq = jnp.eye(T) + jnp.eye(T, k=-1)
    seq = seq / jnp.sum(jnp.abs(seq), axis=1, keepdims=True)

    def jgcm(t, step_k, w, b):
        seq_pow = jnp.linalg.matrix_power(seq, step_k)
        xz = jnp.einsum('tk,bink->bint', seq_pow, t)
        x1 = jnp.einsum('ncvl,vw->ncwl', xz, sp)
        x2 = jnp.einsum('ncvl,vw->ncwl', x1, sp)
        return conv(w, b, jnp.concatenate([xz, x1, x2], axis=1))

    skip = 0.0
    for j, lp in enumerate(params['layers']):
        step_k = 3 ** (j % NUM_LAYERS)
        residual = x
        filt = jgcm(residual, step_k, lp['wf'], lp['bf'])
        gate = jax.nn.sigmoid(jgcm(residual, step_k, lp['wg'], lp['bg']))
        x = filt * gate
        skip = conv(lp['ws'], lp['bs'], x[:, :, :, -1:]) + skip
        x = x + residual
        mean = jnp.mean(x, axis=(0, 2, 3), keepdims=True)
        var = jnp.mean((x - mean) ** 2, axis=(0, 2, 3), keepdims=True)
        x = (x - mean) / jnp.sqrt(var + EPS_BN)
        x = x * lp['gamma'][None, :, None, None] + lp['beta'][None, :, None, None]

    y = jax.nn.relu(skip[:, :, :, -1:])
    y = jax.nn.relu(conv(params['end1_w'], params['end1_b'], y))
    y = conv(params['end2_w'], params['end2_b'], y)
    return y


if __name__ == "__main__":
    key = jax.random.PRNGKey(0)
    pkey, xkey = jax.random.split(key)
    params = init_params(pkey)
    # source layout matches the PyTorch call site: (B, T, num_nodes, input_dim)
    source = jax.random.normal(xkey, (BATCH, HORIZON, NUM_NODES, INPUT_DIM), jnp.float32)

    out = jax.block_until_ready(jstgcn_forward(params, source))
    assert out.shape == (BATCH, HORIZON, NUM_NODES, 1), out.shape

    ref = jax.block_until_ready(ref_forward(params, source))
    err = float(jnp.max(jnp.abs(out - ref)))
    if err > 5e-2:
        raise AssertionError(f"mismatch vs reference: max abs err {err}")
    print("KERNEL_OK")
</pallas_src>

<mosaic_0001>
module attributes {stable_mosaic.version = 11 : i64} {
  func.func @_fused_forward_kernel(%arg0: memref<4x128xf32, #tpu.memory_space<vmem>>, %arg1: memref<16x4xf32, #tpu.memory_space<vmem>>, %arg2: memref<16x1xf32, #tpu.memory_space<vmem>>, %arg3: memref<2x128x384xf32, #tpu.memory_space<vmem>>, %arg4: memref<2x32x48xf32, #tpu.memory_space<vmem>>, %arg5: memref<2x32x1xf32, #tpu.memory_space<vmem>>, %arg6: memref<2x128x16xf32, #tpu.memory_space<vmem>>, %arg7: memref<2x128x1xf32, #tpu.memory_space<vmem>>, %arg8: memref<2x8x1xf32, #tpu.memory_space<vmem>>, %arg9: memref<2x8x1xf32, #tpu.memory_space<vmem>>, %arg10: memref<256x128xf32, #tpu.memory_space<vmem>>, %arg11: memref<256x1xf32, #tpu.memory_space<vmem>>, %arg12: memref<16x256xf32, #tpu.memory_space<vmem>>, %arg13: memref<16x1xf32, #tpu.memory_space<vmem>>, %arg14: memref<16x16xf32, #tpu.memory_space<vmem>>) attributes {dimension_semantics = [], scalar_prefetch = 0 : i64, scratch_operands = 0 : i64, tpu.core_type = #tpu.core_type<tc>} {
    %c0 = arith.constant 0 : index
    %c0_0 = arith.constant 0 : index
    %0 = vector.load %arg1[%c0, %c0_0] : memref<16x4xf32, #tpu.memory_space<vmem>>, vector<16x4xf32>
    %c0_1 = arith.constant 0 : index
    %c0_2 = arith.constant 0 : index
    %1 = vector.load %arg0[%c0_1, %c0_2] : memref<4x128xf32, #tpu.memory_space<vmem>>, vector<4x128xf32>
    %cst = arith.constant dense<0.000000e+00> : vector<16x128xf32>
    %2 = tpu.matmul %0, %1, %cst {dimension_numbers = #tpu.dot_dimension_numbers<[1], [0], [0], [1], [0, 0, 1, 1], [], []>, precision = #tpu.contract_precision<fp32>} : vector<16x4xf32>, vector<4x128xf32>, vector<16x128xf32> -> vector<16x128xf32>
    %c0_3 = arith.constant 0 : index
    %c0_4 = arith.constant 0 : index
    %3 = vector.load %arg2[%c0_3, %c0_4] : memref<16x1xf32, #tpu.memory_space<vmem>>, vector<16x1xf32>
    %4 = vector.broadcast %3 : vector<16x1xf32> to vector<16x128xf32>
    %5 = arith.addf %2, %4 : vector<16x128xf32>
    %cst_5 = arith.constant 0.000000e+00 : f32
    %6 = vector.broadcast %cst_5 : f32 to vector<128x16xf32>
    %c0_6 = arith.constant 0 : index
    %c0_7 = arith.constant 0 : index
    %c0_8 = arith.constant 0 : index
    %7 = vector.load %arg3[%c0_6, %c0_7, %c0_8] : memref<2x128x384xf32, #tpu.memory_space<vmem>>, vector<1x128x384xf32>
    %8 = vector.shape_cast %7 : vector<1x128x384xf32> to vector<128x384xf32>
    %cst_9 = arith.constant dense<0.000000e+00> : vector<16x384xf32>
    %9 = tpu.matmul %5, %8, %cst_9 {dimension_numbers = #tpu.dot_dimension_numbers<[1], [0], [0], [1], [0, 0, 1, 1], [], []>, precision = #tpu.contract_precision<fp32>} : vector<16x128xf32>, vector<128x384xf32>, vector<16x384xf32> -> vector<16x384xf32>
    %10 = vector.extract_strided_slice %9 {offsets = [0, 0], sizes = [8, 128], strides = [1, 1]} : vector<16x384xf32> to vector<8x128xf32>
    %11 = vector.extract_strided_slice %9 {offsets = [0, 128], sizes = [8, 128], strides = [1, 1]} : vector<16x384xf32> to vector<8x128xf32>
    %12 = vector.extract_strided_slice %9 {offsets = [0, 256], sizes = [8, 128], strides = [1, 1]} : vector<16x384xf32> to vector<8x128xf32>
    %13 = vector.extract_strided_slice %9 {offsets = [8, 0], sizes = [8, 128], strides = [1, 1]} : vector<16x384xf32> to vector<8x128xf32>
    %14 = vector.extract_strided_slice %9 {offsets = [8, 128], sizes = [8, 128], strides = [1, 1]} : vector<16x384xf32> to vector<8x128xf32>
    %15 = vector.extract_strided_slice %9 {offsets = [8, 256], sizes = [8, 128], strides = [1, 1]} : vector<16x384xf32> to vector<8x128xf32>
    %16 = tpu.concatenate %10, %11, %12, %13, %14, %15 in 0 : vector<8x128xf32>, vector<8x128xf32>, vector<8x128xf32>, vector<8x128xf32>, vector<8x128xf32>, vector<8x128xf32> -> vector<48x128xf32>
    %c0_10 = arith.constant 0 : index
    %c0_11 = arith.constant 0 : index
    %c0_12 = arith.constant 0 : index
    %17 = vector.load %arg4[%c0_10, %c0_11, %c0_12] : memref<2x32x48xf32, #tpu.memory_space<vmem>>, vector<1x32x48xf32>
    %18 = vector.shape_cast %17 : vector<1x32x48xf32> to vector<32x48xf32>
    %cst_13 = arith.constant dense<0.000000e+00> : vector<32x128xf32>
    %19 = tpu.matmul %18, %16, %cst_13 {dimension_numbers = #tpu.dot_dimension_numbers<[1], [0], [0], [1], [0, 0, 1, 1], [], []>, precision = #tpu.contract_precision<fp32>} : vector<32x48xf32>, vector<48x128xf32>, vector<32x128xf32> -> vector<32x128xf32>
    %c0_14 = arith.constant 0 : index
    %c0_15 = arith.constant 0 : index
    %c0_16 = arith.constant 0 : index
    %20 = vector.load %arg5[%c0_14, %c0_15, %c0_16] : memref<2x32x1xf32, #tpu.memory_space<vmem>>, vector<1x32x1xf32>
    %21 = vector.shape_cast %20 : vector<1x32x1xf32> to vector<32x1xf32>
    %22 = vector.broadcast %21 : vector<32x1xf32> to vector<32x128xf32>
    %23 = arith.addf %19, %22 : vector<32x128xf32>
    %24 = vector.extract_strided_slice %23 {offsets = [0, 0], sizes = [8, 128], strides = [1, 1]} : vector<32x128xf32> to vector<8x128xf32>
    %25 = vector.extract_strided_slice %23 {offsets = [16, 0], sizes = [8, 128], strides = [1, 1]} : vector<32x128xf32> to vector<8x128xf32>
    %26 = tpu.concatenate %24, %25 in 0 : vector<8x128xf32>, vector<8x128xf32> -> vector<16x128xf32>
    %27 = vector.extract_strided_slice %23 {offsets = [8, 0], sizes = [8, 128], strides = [1, 1]} : vector<32x128xf32> to vector<8x128xf32>
    %28 = vector.extract_strided_slice %23 {offsets = [24, 0], sizes = [8, 128], strides = [1, 1]} : vector<32x128xf32> to vector<8x128xf32>
    %29 = tpu.concatenate %27, %28 in 0 : vector<8x128xf32>, vector<8x128xf32> -> vector<16x128xf32>
    %30 = arith.negf %29 : vector<16x128xf32>
    %31 = math.exp %30 : vector<16x128xf32>
    %cst_17 = arith.constant 1.000000e+00 : f32
    %32 = vector.broadcast %cst_17 : f32 to vector<16x128xf32>
    %33 = arith.addf %32, %31 : vector<16x128xf32>
    %34 = arith.divf %32, %33 : vector<16x128xf32>
    %35 = arith.mulf %26, %34 : vector<16x128xf32>
    %36 = vector.extract_strided_slice %35 {offsets = [0, 112], sizes = [16, 16], strides = [1, 1]} : vector<16x128xf32> to vector<16x16xf32>
    %c0_18 = arith.constant 0 : index
    %c0_19 = arith.constant 0 : index
    %c0_20 = arith.constant 0 : index
    %37 = vector.load %arg6[%c0_18, %c0_19, %c0_20] : memref<2x128x16xf32, #tpu.memory_space<vmem>>, vector<1x128x16xf32>
    %38 = vector.shape_cast %37 : vector<1x128x16xf32> to vector<128x16xf32>
    %cst_21 = arith.constant dense<0.000000e+00> : vector<128x16xf32>
    %39 = tpu.matmul %38, %36, %cst_21 {dimension_numbers = #tpu.dot_dimension_numbers<[1], [0], [0], [1], [0, 0, 1, 1], [], []>, precision = #tpu.contract_precision<fp32>} : vector<128x16xf32>, vector<16x16xf32>, vector<128x16xf32> -> vector<128x16xf32>
    %40 = arith.addf %6, %39 : vector<128x16xf32>
    %c0_22 = arith.constant 0 : index
    %c0_23 = arith.constant 0 : index
    %c0_24 = arith.constant 0 : index
    %41 = vector.load %arg7[%c0_22, %c0_23, %c0_24] : memref<2x128x1xf32, #tpu.memory_space<vmem>>, vector<1x128x1xf32>
    %42 = vector.shape_cast %41 : vector<1x128x1xf32> to vector<128x1xf32>
    %43 = vector.broadcast %42 : vector<128x1xf32> to vector<128x16xf32>
    %44 = arith.addf %40, %43 : vector<128x16xf32>
    %45 = arith.addf %35, %5 : vector<16x128xf32>
    %cst_25 = arith.constant dense<0.000000e+00> : vector<16xf32>
    %46 = vector.multi_reduction <add>, %45, %cst_25 [1] : vector<16x128xf32> to vector<16xf32>
    %47 = vector.shape_cast %46 : vector<16xf32> to vector<16x1xf32>
    %48 = arith.mulf %45, %45 : vector<16x128xf32>
    %cst_26 = arith.constant dense<0.000000e+00> : vector<16xf32>
    %49 = vector.multi_reduction <add>, %48, %cst_26 [1] : vector<16x128xf32> to vector<16xf32>
    %50 = vector.shape_cast %49 : vector<16xf32> to vector<16x1xf32>
    %51 = vector.extract_strided_slice %47 {offsets = [0, 0], sizes = [8, 1], strides = [1, 1]} : vector<16x1xf32> to vector<8x1xf32>
    %52 = vector.extract_strided_slice %50 {offsets = [0, 0], sizes = [8, 1], strides = [1, 1]} : vector<16x1xf32> to vector<8x1xf32>
    %53 = vector.extract_strided_slice %47 {offsets = [8, 0], sizes = [8, 1], strides = [1, 1]} : vector<16x1xf32> to vector<8x1xf32>
    %54 = arith.addf %51, %53 : vector<8x1xf32>
    %55 = vector.extract_strided_slice %50 {offsets = [8, 0], sizes = [8, 1], strides = [1, 1]} : vector<16x1xf32> to vector<8x1xf32>
    %56 = arith.addf %52, %55 : vector<8x1xf32>
    %cst_27 = arith.constant 2.560000e+02 : f32
    %57 = vector.broadcast %cst_27 : f32 to vector<8x1xf32>
    %58 = arith.divf %54, %57 : vector<8x1xf32>
    %cst_28 = arith.constant 2.560000e+02 : f32
    %59 = vector.broadcast %cst_28 : f32 to vector<8x1xf32>
    %60 = arith.divf %56, %59 : vector<8x1xf32>
    %61 = arith.mulf %58, %58 : vector<8x1xf32>
    %62 = arith.subf %60, %61 : vector<8x1xf32>
    %cst_29 = arith.constant 9.99999974E-6 : f32
    %63 = vector.broadcast %cst_29 : f32 to vector<8x1xf32>
    %64 = arith.addf %62, %63 : vector<8x1xf32>
    %65 = math.rsqrt %64 : vector<8x1xf32>
    %c0_30 = arith.constant 0 : index
    %c0_31 = arith.constant 0 : index
    %c0_32 = arith.constant 0 : index
    %66 = vector.load %arg8[%c0_30, %c0_31, %c0_32] : memref<2x8x1xf32, #tpu.memory_space<vmem>>, vector<1x8x1xf32>
    %67 = vector.shape_cast %66 : vector<1x8x1xf32> to vector<8x1xf32>
    %68 = arith.mulf %67, %65 : vector<8x1xf32>
    %c0_33 = arith.constant 0 : index
    %c0_34 = arith.constant 0 : index
    %c0_35 = arith.constant 0 : index
    %69 = vector.load %arg9[%c0_33, %c0_34, %c0_35] : memref<2x8x1xf32, #tpu.memory_space<vmem>>, vector<1x8x1xf32>
    %70 = vector.shape_cast %69 : vector<1x8x1xf32> to vector<8x1xf32>
    %71 = arith.mulf %58, %68 : vector<8x1xf32>
    %72 = arith.subf %70, %71 : vector<8x1xf32>
    %73 = tpu.concatenate %68, %68 in 0 : vector<8x1xf32>, vector<8x1xf32> -> vector<16x1xf32>
    %74 = tpu.concatenate %72, %72 in 0 : vector<8x1xf32>, vector<8x1xf32> -> vector<16x1xf32>
    %75 = vector.broadcast %73 : vector<16x1xf32> to vector<16x128xf32>
    %76 = arith.mulf %45, %75 : vector<16x128xf32>
    %77 = vector.broadcast %74 : vector<16x1xf32> to vector<16x128xf32>
    %78 = arith.addf %76, %77 : vector<16x128xf32>
    %c1 = arith.constant 1 : index
    %c0_36 = arith.constant 0 : index
    %c0_37 = arith.constant 0 : index
    %79 = vector.load %arg3[%c1, %c0_36, %c0_37] : memref<2x128x384xf32, #tpu.memory_space<vmem>>, vector<1x128x384xf32>
    %80 = vector.shape_cast %79 : vector<1x128x384xf32> to vector<128x384xf32>
    %cst_38 = arith.constant dense<0.000000e+00> : vector<16x384xf32>
    %81 = tpu.matmul %78, %80, %cst_38 {dimension_numbers = #tpu.dot_dimension_numbers<[1], [0], [0], [1], [0, 0, 1, 1], [], []>, precision = #tpu.contract_precision<fp32>} : vector<16x128xf32>, vector<128x384xf32>, vector<16x384xf32> -> vector<16x384xf32>
    %82 = vector.extract_strided_slice %81 {offsets = [0, 0], sizes = [8, 128], strides = [1, 1]} : vector<16x384xf32> to vector<8x128xf32>
    %83 = vector.extract_strided_slice %81 {offsets = [0, 128], sizes = [8, 128], strides = [1, 1]} : vector<16x384xf32> to vector<8x128xf32>
    %84 = vector.extract_strided_slice %81 {offsets = [0, 256], sizes = [8, 128], strides = [1, 1]} : vector<16x384xf32> to vector<8x128xf32>
    %85 = vector.extract_strided_slice %81 {offsets = [8, 0], sizes = [8, 128], strides = [1, 1]} : vector<16x384xf32> to vector<8x128xf32>
    %86 = vector.extract_strided_slice %81 {offsets = [8, 128], sizes = [8, 128], strides = [1, 1]} : vector<16x384xf32> to vector<8x128xf32>
    %87 = vector.extract_strided_slice %81 {offsets = [8, 256], sizes = [8, 128], strides = [1, 1]} : vector<16x384xf32> to vector<8x128xf32>
    %88 = tpu.concatenate %82, %83, %84, %85, %86, %87 in 0 : vector<8x128xf32>, vector<8x128xf32>, vector<8x128xf32>, vector<8x128xf32>, vector<8x128xf32>, vector<8x128xf32> -> vector<48x128xf32>
    %c1_39 = arith.constant 1 : index
    %c0_40 = arith.constant 0 : index
    %c0_41 = arith.constant 0 : index
    %89 = vector.load %arg4[%c1_39, %c0_40, %c0_41] : memref<2x32x48xf32, #tpu.memory_space<vmem>>, vector<1x32x48xf32>
    %90 = vector.shape_cast %89 : vector<1x32x48xf32> to vector<32x48xf32>
    %cst_42 = arith.constant dense<0.000000e+00> : vector<32x128xf32>
    %91 = tpu.matmul %90, %88, %cst_42 {dimension_numbers = #tpu.dot_dimension_numbers<[1], [0], [0], [1], [0, 0, 1, 1], [], []>, precision = #tpu.contract_precision<fp32>} : vector<32x48xf32>, vector<48x128xf32>, vector<32x128xf32> -> vector<32x128xf32>
    %c1_43 = arith.constant 1 : index
    %c0_44 = arith.constant 0 : index
    %c0_45 = arith.constant 0 : index
    %92 = vector.load %arg5[%c1_43, %c0_44, %c0_45] : memref<2x32x1xf32, #tpu.memory_space<vmem>>, vector<1x32x1xf32>
    %93 = vector.shape_cast %92 : vector<1x32x1xf32> to vector<32x1xf32>
    %94 = vector.broadcast %93 : vector<32x1xf32> to vector<32x128xf32>
    %95 = arith.addf %91, %94 : vector<32x128xf32>
    %96 = vector.extract_strided_slice %95 {offsets = [0, 0], sizes = [8, 128], strides = [1, 1]} : vector<32x128xf32> to vector<8x128xf32>
    %97 = vector.extract_strided_slice %95 {offsets = [16, 0], sizes = [8, 128], strides = [1, 1]} : vector<32x128xf32> to vector<8x128xf32>
    %98 = tpu.concatenate %96, %97 in 0 : vector<8x128xf32>, vector<8x128xf32> -> vector<16x128xf32>
    %99 = vector.extract_strided_slice %95 {offsets = [8, 0], sizes = [8, 128], strides = [1, 1]} : vector<32x128xf32> to vector<8x128xf32>
    %100 = vector.extract_strided_slice %95 {offsets = [24, 0], sizes = [8, 128], strides = [1, 1]} : vector<32x128xf32> to vector<8x128xf32>
    %101 = tpu.concatenate %99, %100 in 0 : vector<8x128xf32>, vector<8x128xf32> -> vector<16x128xf32>
    %102 = arith.negf %101 : vector<16x128xf32>
    %103 = math.exp %102 : vector<16x128xf32>
    %cst_46 = arith.constant 1.000000e+00 : f32
    %104 = vector.broadcast %cst_46 : f32 to vector<16x128xf32>
    %105 = arith.addf %104, %103 : vector<16x128xf32>
    %106 = arith.divf %104, %105 : vector<16x128xf32>
    %107 = arith.mulf %98, %106 : vector<16x128xf32>
    %108 = vector.extract_strided_slice %107 {offsets = [0, 112], sizes = [16, 16], strides = [1, 1]} : vector<16x128xf32> to vector<16x16xf32>
    %c1_47 = arith.constant 1 : index
    %c0_48 = arith.constant 0 : index
    %c0_49 = arith.constant 0 : index
    %109 = vector.load %arg6[%c1_47, %c0_48, %c0_49] : memref<2x128x16xf32, #tpu.memory_space<vmem>>, vector<1x128x16xf32>
    %110 = vector.shape_cast %109 : vector<1x128x16xf32> to vector<128x16xf32>
    %cst_50 = arith.constant dense<0.000000e+00> : vector<128x16xf32>
    %111 = tpu.matmul %110, %108, %cst_50 {dimension_numbers = #tpu.dot_dimension_numbers<[1], [0], [0], [1], [0, 0, 1, 1], [], []>, precision = #tpu.contract_precision<fp32>} : vector<128x16xf32>, vector<16x16xf32>, vector<128x16xf32> -> vector<128x16xf32>
    %112 = arith.addf %44, %111 : vector<128x16xf32>
    %c1_51 = arith.constant 1 : index
    %c0_52 = arith.constant 0 : index
    %c0_53 = arith.constant 0 : index
    %113 = vector.load %arg7[%c1_51, %c0_52, %c0_53] : memref<2x128x1xf32, #tpu.memory_space<vmem>>, vector<1x128x1xf32>
    %114 = vector.shape_cast %113 : vector<1x128x1xf32> to vector<128x1xf32>
    %115 = vector.broadcast %114 : vector<128x1xf32> to vector<128x16xf32>
    %116 = arith.addf %112, %115 : vector<128x16xf32>
    %cst_54 = arith.constant 0.000000e+00 : f32
    %117 = vector.broadcast %cst_54 : f32 to vector<128x16xf32>
    %118 = arith.maximumf %116, %117 : vector<128x16xf32>
    %c0_55 = arith.constant 0 : index
    %c0_56 = arith.constant 0 : index
    %119 = vector.load %arg10[%c0_55, %c0_56] : memref<256x128xf32, #tpu.memory_space<vmem>>, vector<256x128xf32>
    %cst_57 = arith.constant dense<0.000000e+00> : vector<256x16xf32>
    %120 = tpu.matmul %119, %118, %cst_57 {dimension_numbers = #tpu.dot_dimension_numbers<[1], [0], [0], [1], [0, 0, 1, 1], [], []>, precision = #tpu.contract_precision<fp32>} : vector<256x128xf32>, vector<128x16xf32>, vector<256x16xf32> -> vector<256x16xf32>
    %c0_58 = arith.constant 0 : index
    %c0_59 = arith.constant 0 : index
    %121 = vector.load %arg11[%c0_58, %c0_59] : memref<256x1xf32, #tpu.memory_space<vmem>>, vector<256x1xf32>
    %122 = vector.broadcast %121 : vector<256x1xf32> to vector<256x16xf32>
    %123 = arith.addf %120, %122 : vector<256x16xf32>
    %cst_60 = arith.constant 0.000000e+00 : f32
    %124 = vector.broadcast %cst_60 : f32 to vector<256x16xf32>
    %125 = arith.maximumf %123, %124 : vector<256x16xf32>
    %c0_61 = arith.constant 0 : index
    %c0_62 = arith.constant 0 : index
    %126 = vector.load %arg12[%c0_61, %c0_62] : memref<16x256xf32, #tpu.memory_space<vmem>>, vector<16x256xf32>
    %cst_63 = arith.constant dense<0.000000e+00> : vector<16x16xf32>
    %127 = tpu.matmul %126, %125, %cst_63 {dimension_numbers = #tpu.dot_dimension_numbers<[1], [0], [0], [1], [0, 0, 1, 1], [], []>, precision = #tpu.contract_precision<fp32>} : vector<16x256xf32>, vector<256x16xf32>, vector<16x16xf32> -> vector<16x16xf32>
    %c0_64 = arith.constant 0 : index
    %c0_65 = arith.constant 0 : index
    %128 = vector.load %arg13[%c0_64, %c0_65] : memref<16x1xf32, #tpu.memory_space<vmem>>, vector<16x1xf32>
    %129 = vector.broadcast %128 : vector<16x1xf32> to vector<16x16xf32>
    %130 = arith.addf %127, %129 : vector<16x16xf32>
    %c0_66 = arith.constant 0 : index
    %c0_67 = arith.constant 0 : index
    %131 = vector.load %arg14[%c0_66, %c0_67] : memref<16x16xf32, #tpu.memory_space<vmem>>, vector<16x16xf32>
    tpu.vector_store %arg14[%c0_66, %c0_67], %130 {strides = array<i32>} : memref<16x16xf32, #tpu.memory_space<vmem>>, vector<16x16xf32>,
    return
  }
}

</mosaic_0001>

<bundles_post_ra>
// kernel: tile.42
= control target key start
LH: loop header
LB: loop body
LE: loop exit
PB: predicated region body
PF: predicated region fallthrough
CT: control target
= control target key end

     0   :  { %s22_s0 = inlined_call_operand.vmem [shape: f32[64], index: 0, kind: input, shape index: {}]   ;;  %s23_s1 = inlined_call_operand.vmem [shape: f32[2,64], index: 1, kind: output, shape index: {}]  }
   0x1   :  { %v4_v0 = vld [vmem:[%s22_s0] ss:$0 sm:$0xff] }
   0x2   :  { %5 = vst [vmem:[%s23_s1] sm:$0x3] %v4_v0 }

// kernel: tile.63
= control target key start
LH: loop header
LB: loop body
LE: loop exit
PB: predicated region body
PF: predicated region fallthrough
CT: control target
= control target key end

     0   :  { %s22_s0 = inlined_call_operand.vmem [shape: f32[128], index: 0, kind: input, shape index: {}]   ;;  %s23_s1 = inlined_call_operand.vmem [shape: f32[2,128], index: 1, kind: output, shape index: {}]  }
   0x1   :  { %v4_v0 = vld [vmem:[%s22_s0] ss:$0 sm:$0xff] }
   0x2   :  { %5 = vst [vmem:[%s23_s1] sm:$0x3] %v4_v0 }

// kernel: tile.3
= control target key start
LH: loop header
LB: loop body
LE: loop exit
PB: predicated region body
PF: predicated region fallthrough
CT: control target
= control target key end

     0   :  { %s706_s8 = smov 125   ;;  %s707_s9 = smov 126   ;;  %vm7_vm0 = vcmask 7168   ;;  %s1293_s0 = inlined_call_operand.vmem [shape: f32[2,64], index: 0, kind: input, shape index: {}]   ;;  %s1294_s1 = inlined_call_operand.vmem [shape: f32[1,128,1], index: 1, kind: output, shape index: {}]  }
   0x1   :  { %v4_v0 = vld [vmem:[%s1293_s0] sm:$0x3]  ;;  %s705_s0 = smov 127   ;;  %s708_s10 = smov 124  }
   0x2   :  { %5 = vst [vmem:[#allocation0] sm:$0x3] %v4_v0  ;;  %s709_s11 = smov 123   ;;  %s710_s12 = smov 122  }
   0x3   :  { %s711_s13 = smov 121   ;;  %s712_s14 = smov 120  }
   0x4   :  { %s713_s15 = smov 119   ;;  %s714_s16 = smov 118  }
   0x5   :  { %s715_s17 = smov 117   ;;  %s716_s18 = smov 116  }
   0x6   :  { %s717_s19 = smov 115   ;;  %s718_s20 = smov 114  }
   0x7   :  { %s719_s21 = smov 113   ;;  %s720_s22 = smov 112  }
   0x8   :  { %s721_s23 = smov 111   ;;  %s722_s24 = smov 110  }
   0x9   :  { %v11_v1 = vld [vmem:[#allocation0] sm:$0x3]   ;;  %s723_s25 = smov 109   ;;  %s724_s26 = smov 108  }
   0xa   :  { %v27_v2 = vld [vmem:[#allocation0] sm:$0x3]   ;;  %12 = vrot.lane.b32.xlu0 %v11_v1, %s705_s0  ;;  %s725_s27 = smov 107   ;;  %s726_s28 = smov 106  }
   0xb   :  { %28 = vrot.lane.b32.xlu1 %v27_v2, %s706_s8  ;;  %v19_v3 = vld [vmem:[#allocation0] sm:$0x3]   ;;  %s727_s29 = smov 105   ;;  %s728_s30 = smov 104  }
   0xc   :  { %v35_v4 = vld [vmem:[#allocation0] sm:$0x3]   ;;  %s729_s2 = smov 103   ;;  %s730_s3 = smov 102  }
   0xd   :  { %v43_v5 = vld [vmem:[#allocation0] sm:$0x3]   ;;  %s731_s4 = smov 101   ;;  %s732_s5 = smov 100  }
   0xe   :  { %20 = vrot.lane.b32.xlu0 %v19_v3, %s707_s9  ;;  %v51_v6 = vld [vmem:[#allocation0] sm:$0x3]   ;;  %s733_s6 = smov 99   ;;  %s734_s7 = smov 98  }
   0xf   :  { %36 = vrot.lane.b32.xlu1 %v35_v4, %s708_s10  ;;  %v59_v7 = vld [vmem:[#allocation0] sm:$0x3]   ;;  %s735_s0 = smov 97   ;;  %s736_s8 = smov 96  }
  0x10   :  { %v67_v8 = vld [vmem:[#allocation0] sm:$0x3]   ;;  %s737_s9 = smov 95   ;;  %s738_s10 = smov 94  }
  0x11   :  { %v75_v9 = vld [vmem:[#allocation0] sm:$0x3]  }
  0x12   :  { %44 = vrot.lane.b32.xlu0 %v43_v5, %s709_s11  ;;  %v83_v10 = vld [vmem:[#allocation0] sm:$0x3]   ;;  %s739_s11 = smov 93  }
  0x13   :  { %52 = vrot.lane.b32.xlu1 %v51_v6, %s710_s12  ;;  %v91_v11 = vld [vmem:[#allocation0] sm:$0x3]   ;;  %s740_s12 = smov 92  }
  0x14   :  { %v99_v12 = vld [vmem:[#allocation0] sm:$0x3]  }
  0x15   :  { %v107_v13 = vld [vmem:[#allocation0] sm:$0x3]  }
  0x16   :  { %60 = vrot.lane.b32.xlu0 %v59_v7, %s711_s13  ;;  %v115_v14 = vld [vmem:[#allocation0] sm:$0x3]   ;;  %s741_s13 = smov 91  }
  0x17   :  { %68 = vrot.lane.b32.xlu1 %v67_v8, %s712_s14  ;;  %v123_v15 = vld [vmem:[#allocation0] sm:$0x3]   ;;  %s742_s14 = smov 90  }
  0x18   :  { %v131_v16 = vld [vmem:[#allocation0] sm:$0x3]  }
  0x19   :  { %v139_v17 = vld [vmem:[#allocation0] sm:$0x3]  }
  0x1a   :  { %76 = vrot.lane.b32.xlu0 %v75_v9, %s713_s15  ;;  %v147_v18 = vld [vmem:[#allocation0] sm:$0x3]   ;;  %s743_s15 = smov 89  }
  0x1b   :  { %84 = vrot.lane.b32.xlu1 %v83_v10, %s714_s16  ;;  %v155_v19 = vld [vmem:[#allocation0] sm:$0x3]   ;;  %s744_s16 = smov 88  }
  0x1c   :  { %v163_v20 = vld [vmem:[#allocation0] sm:$0x3]  }
  0x1d   :  { %v171_v21 = vld [vmem:[#allocation0] sm:$0x3]  }
  0x1e   :  { %92 = vrot.lane.b32.xlu0 %v91_v11, %s715_s17  ;;  %v179_v22 = vld [vmem:[#allocation0] sm:$0x3]   ;;  %s745_s17 = smov 87  }
  0x1f   :  { %100 = vrot.lane.b32.xlu1 %v99_v12, %s716_s18  ;;  %v187_v23 = vld [vmem:[#allocation0] sm:$0x3]   ;;  %s746_s18 = smov 86  }
  0x20   :  { %v195_v24 = vld [vmem:[#allocation0] sm:$0x3]  }
  0x21   :  { %v203_v25 = vld [vmem:[#allocation0] sm:$0x3]  }
  0x22   :  { %108 = vrot.lane.b32.xlu0 %v107_v13, %s717_s19  ;;  %v211_v26 = vld [vmem:[#allocation0] sm:$0x3]   ;;  %s747_s19 = smov 85  }
  0x23   :  { %116 = vrot.lane.b32.xlu1 %v115_v14, %s718_s20  ;;  %v219_v27 = vld [vmem:[#allocation0] sm:$0x3]   ;;  %s748_s20 = smov 84  }
  0x24   :  { %v227_v28 = vld [vmem:[#allocation0] sm:$0x3]  }
  0x25   :  { %v235_v29 = vld [vmem:[#allocation0] sm:$0x3]  }
  0x26   :  { %124 = vrot.lane.b32.xlu0 %v123_v15, %s719_s21  ;;  %v243_v30 = vld [vmem:[#allocation0] sm:$0x3]   ;;  %s749_s21 = smov 83  }
  0x27   :  { %132 = vrot.lane.b32.xlu1 %v131_v16, %s720_s22  ;;  %v251_v31 = vld [vmem:[#allocation0] sm:$0x3]   ;;  %s750_s22 = smov 82  }
  0x28   :  { %v259_v32 = vld [vmem:[#allocation0] sm:$0x3]  }
  0x29   :  { %v267_v33 = vld [vmem:[#allocation0] sm:$0x3]  }
  0x2a   :  { %140 = vrot.lane.b32.xlu0 %v139_v17, %s721_s23  ;;  %v275_v34 = vld [vmem:[#allocation0] sm:$0x3]   ;;  %s751_s23 = smov 81  }
  0x2b   :  { %148 = vrot.lane.b32.xlu1 %v147_v18, %s722_s24  ;;  %v283_v35 = vld [vmem:[#allocation0] sm:$0x3]   ;;  %s752_s24 = smov 80  }
  0x2c   :  { %v291_v36 = vld [vmem:[#allocation0] sm:$0x3]  }
  0x2d   :  { %v299_v37 = vld [vmem:[#allocation0] sm:$0x3]  }
  0x2e   :  { %156 = vrot.lane.b32.xlu0 %v155_v19, %s723_s25  ;;  %v307_v38 = vld [vmem:[#allocation0] sm:$0x3]   ;;  %s753_s25 = smov 79  }
  0x2f   :  { %164 = vrot.lane.b32.xlu1 %v163_v20, %s724_s26  ;;  %v315_v39 = vld [vmem:[#allocation0] sm:$0x3]   ;;  %s754_s26 = smov 78  }
  0x30   :  { %v323_v40 = vld [vmem:[#allocation0] sm:$0x3]  }
  0x31   :  { %v331_v41 = vld [vmem:[#allocation0] sm:$0x3]  }
  0x32   :  { %172 = vrot.lane.b32.xlu0 %v171_v21, %s725_s27  ;;  %v339_v42 = vld [vmem:[#allocation0] sm:$0x3]   ;;  %s755_s27 = smov 77  }
  0x33   :  { %180 = vrot.lane.b32.xlu1 %v179_v22, %s726_s28  ;;  %v347_v43 = vld [vmem:[#allocation0] sm:$0x3]   ;;  %s756_s28 = smov 76  }
  0x34   :  { %v355_v44 = vld [vmem:[#allocation0] sm:$0x3]  }
  0x35   :  { %v363_v45 = vld [vmem:[#allocation0] sm:$0x3]  }
  0x36   :  { %188 = vrot.lane.b32.xlu0 %v187_v23, %s727_s29  ;;  %v371_v46 = vld [vmem:[#allocation0] sm:$0x3]   ;;  %s757_s29 = smov 75  }
  0x37   :  { %196 = vrot.lane.b32.xlu1 %v195_v24, %s728_s30  ;;  %v379_v47 = vld [vmem:[#allocation0] sm:$0x3]   ;;  %s758_s30 = smov 74  }
  0x38   :  { %v387_v48 = vld [vmem:[#allocation0] sm:$0x3]  }
  0x39   :  { %v395_v49 = vld [vmem:[#allocation0] sm:$0x3]  }
  0x3a   :  { %204 = vrot.lane.b32.xlu0 %v203_v25, %s729_s2  ;;  %v403_v50 = vld [vmem:[#allocation0] sm:$0x3]   ;;  %s759_s2 = smov 73  }
  0x3b   :  { %212 = vrot.lane.b32.xlu1 %v211_v26, %s730_s3  ;;  %v411_v51 = vld [vmem:[#allocation0] sm:$0x3]   ;;  %s760_s3 = smov 72  }
  0x3c   :  { %v419_v52 = vld [vmem:[#allocation0] sm:$0x3]  }
  0x3d   :  { %v427_v53 = vld [vmem:[#allocation0] sm:$0x3]  }
  0x3e   :  { %220 = vrot.lane.b32.xlu0 %v219_v27, %s731_s4  ;;  %v435_v54 = vld [vmem:[#allocation0] sm:$0x3]  }
  0x3f   :  { %228 = vrot.lane.b32.xlu1 %v227_v28, %s732_s5  ;;  %v443_v55 = vld [vmem:[#allocation0] sm:$0x3]  }
  0x40   :  { %v451_v56 = vld [vmem:[#allocation0] sm:$0x3]  }
  0x41   :  { %v459_v57 = vld [vmem:[#allocation0] sm:$0x3]  }
  0x42   :  { %236 = vrot.lane.b32.xlu0 %v235_v29, %s733_s6  ;;  %v467_v58 = vld [vmem:[#allocation0] sm:$0x3]  }
  0x43   :  { %244 = vrot.lane.b32.xlu1 %v243_v30, %s734_s7  ;;  %v6_v59 = vld [vmem:[#allocation0] sm:$0x3]  }
  0x44   :  { %8 = vst.msk [vmem:[%s1294_s1] sm:$0x1] %vm7_vm0, %v6_v59   ;;  %515 = vst.msk [vmem:[%s1294_s1 + $0x3f] sm:$0x2] %vm7_vm0, %v6_v59   ;;  %v475_v60 = vld [vmem:[#allocation0] sm:$0x3]  }
  0x45   :  { %v483_v61 = vld [vmem:[#allocation0] sm:$0x3]  }
  0x46   :  { %252 = vrot.lane.b32.xlu0 %v251_v31, %s735_s0  ;;  %s761_s0 = smov 71   ;;  %v491_v0 = vld [vmem:[#allocation0] sm:$0x3]  }
  0x47   :  { %260 = vrot.lane.b32.xlu1 %v259_v32, %s736_s8  ;;  %s762_s8 = smov 70   ;;  %v499_v1 = vld [vmem:[#allocation0] sm:$0x3]  }
  0x48   :  { %v507_v4 = vld [vmem:[#allocation0] sm:$0x3]  }
  0x4a   :  { %268 = vrot.lane.b32.xlu0 %v267_v33, %s737_s9 }
  0x4b   :  { %276 = vrot.lane.b32.xlu1 %v275_v34, %s738_s10 }
  0x4e   :  { %284 = vrot.lane.b32.xlu0 %v283_v35, %s739_s11 }
  0x4f   :  { %292 = vrot.lane.b32.xlu1 %v291_v36, %s740_s12 }
  0x52   :  { %300 = vrot.lane.b32.xlu0 %v299_v37, %s741_s13 }
  0x53   :  { %308 = vrot.lane.b32.xlu1 %v307_v38, %s742_s14 }
  0x56   :  { %316 = vrot.lane.b32.xlu0 %v315_v39, %s743_s15 }
  0x57   :  { %324 = vrot.lane.b32.xlu1 %v323_v40, %s744_s16 }
  0x5a   :  { %332 = vrot.lane.b32.xlu0 %v331_v41, %s745_s17  ;;  %s763_s17 = smov 69  }
  0x5b   :  { %340 = vrot.lane.b32.xlu1 %v339_v42, %s746_s18  ;;  %s764_s18 = smov 68  }
  0x5e   :  { %348 = vrot.lane.b32.xlu0 %v347_v43, %s747_s19 }
  0x5f   :  { %356 = vrot.lane.b32.xlu1 %v355_v44, %s748_s20 }
  0x62   :  { %364 = vrot.lane.b32.xlu0 %v363_v45, %s749_s21 }
  0x63   :  { %372 = vrot.lane.b32.xlu1 %v371_v46, %s750_s22 }
  0x66   :  { %380 = vrot.lane.b32.xlu0 %v379_v47, %s751_s23 }
  0x67   :  { %388 = vrot.lane.b32.xlu1 %v387_v48, %s752_s24 }
  0x6a   :  { %396 = vrot.lane.b32.xlu0 %v395_v49, %s753_s25 }
  0x6b   :  { %404 = vrot.lane.b32.xlu1 %v403_v50, %s754_s26 }
  0x6e   :  { %412 = vrot.lane.b32.xlu0 %v411_v51, %s755_s27  ;;  %s765_s27 = smov 67  }
  0x6f   :  { %420 = vrot.lane.b32.xlu1 %v419_v52, %s756_s28  ;;  %s766_s28 = smov 66  }
  0x72   :  { %428 = vrot.lane.b32.xlu0 %v427_v53, %s757_s29 }
  0x73   :  { %436 = vrot.lane.b32.xlu1 %v435_v54, %s758_s30 }
  0x76   :  { %444 = vrot.lane.b32.xlu0 %v443_v55, %s759_s2 }
  0x77   :  { %452 = vrot.lane.b32.xlu1 %v451_v56, %s760_s3 }
  0x7a   :  { %460 = vrot.lane.b32.xlu0 %v459_v57, %s761_s0  ;;  %s767_s0 = smov 65  }
  0x7b   :  { %468 = vrot.lane.b32.xlu1 %v467_v58, %s762_s8 }
  0x7c   :  { %v13_v62 = vpop.permute.xlu0 %12  }
  0x7d   :  { %v29_v63 = vpop.permute.xlu1 %28   ;;  %516 = vst.msk [vmem:[%s1294_s1 + $0x1] sm:$0x1] %vm7_vm0, %v13_v62   ;;  %517 = vst.msk [vmem:[%s1294_s1 + $0x40] sm:$0x2] %vm7_vm0, %v13_v62  }
  0x7e   :  { %520 = vst.msk [vmem:[%s1294_s1 + $0x3] sm:$0x1] %vm7_vm0, %v29_v63   ;;  %521 = vst.msk [vmem:[%s1294_s1 + $0x42] sm:$0x2] %vm7_vm0, %v29_v63   ;;  %476 = vrot.lane.b32.xlu0 %v475_v60, %s763_s17 }
  0x7f   :  { %484 = vrot.lane.b32.xlu1 %v483_v61, %s764_s18 }
  0x80   :  { %v21_v2 = vpop.permute.xlu0 %20  }
  0x81   :  { %v37_v3 = vpop.permute.xlu1 %36   ;;  %518 = vst.msk [vmem:[%s1294_s1 + $0x2] sm:$0x1] %vm7_vm0, %v21_v2   ;;  %519 = vst.msk [vmem:[%s1294_s1 + $0x41] sm:$0x2] %vm7_vm0, %v21_v2  }
  0x82   :  { %522 = vst.msk [vmem:[%s1294_s1 + $0x4] sm:$0x1] %vm7_vm0, %v37_v3   ;;  %523 = vst.msk [vmem:[%s1294_s1 + $0x43] sm:$0x2] %vm7_vm0, %v37_v3   ;;  %492 = vrot.lane.b32.xlu0 %v491_v0, %s765_s27 }
  0x83   :  { %500 = vrot.lane.b32.xlu1 %v499_v1, %s766_s28 }
  0x84   :  { %v45_v5 = vpop.permute.xlu0 %44  }
  0x85   :  { %v53_v6 = vpop.permute.xlu1 %52   ;;  %524 = vst.msk [vmem:[%s1294_s1 + $0x5] sm:$0x1] %vm7_vm0, %v45_v5   ;;  %525 = vst.msk [vmem:[%s1294_s1 + $0x44] sm:$0x2] %vm7_vm0, %v45_v5  }
  0x86   :  { %526 = vst.msk [vmem:[%s1294_s1 + $0x6] sm:$0x1] %vm7_vm0, %v53_v6   ;;  %527 = vst.msk [vmem:[%s1294_s1 + $0x45] sm:$0x2] %vm7_vm0, %v53_v6   ;;  %508 = vrot.lane.b32.xlu0 %v507_v4, %s767_s0 }
  0x88   :  { %v61_v7 = vpop.permute.xlu0 %60  }
  0x89   :  { %v69_v8 = vpop.permute.xlu1 %68   ;;  %528 = vst.msk [vmem:[%s1294_s1 + $0x7] sm:$0x1] %vm7_vm0, %v61_v7   ;;  %529 = vst.msk [vmem:[%s1294_s1 + $0x46] sm:$0x2] %vm7_vm0, %v61_v7  }
  0x8a   :  { %530 = vst.msk [vmem:[%s1294_s1 + $0x8] sm:$0x1] %vm7_vm0, %v69_v8   ;;  %531 = vst.msk [vmem:[%s1294_s1 + $0x47] sm:$0x2] %vm7_vm0, %v69_v8  }
  0x8c   :  { %v77_v9 = vpop.permute.xlu0 %76  }
  0x8d   :  { %v85_v10 = vpop.permute.xlu1 %84   ;;  %532 = vst.msk [vmem:[%s1294_s1 + $0x9] sm:$0x1] %vm7_vm0, %v77_v9   ;;  %533 = vst.msk [vmem:[%s1294_s1 + $0x48] sm:$0x2] %vm7_vm0, %v77_v9  }
  0x8e   :  { %534 = vst.msk [vmem:[%s1294_s1 + $0xa] sm:$0x1] %vm7_vm0, %v85_v10   ;;  %535 = vst.msk [vmem:[%s1294_s1 + $0x49] sm:$0x2] %vm7_vm0, %v85_v10  }
  0x90   :  { %v93_v11 = vpop.permute.xlu0 %92  }
  0x91   :  { %v101_v12 = vpop.permute.xlu1 %100   ;;  %536 = vst.msk [vmem:[%s1294_s1 + $0xb] sm:$0x1] %vm7_vm0, %v93_v11   ;;  %537 = vst.msk [vmem:[%s1294_s1 + $0x4a] sm:$0x2] %vm7_vm0, %v93_v11  }
  0x92   :  { %538 = vst.msk [vmem:[%s1294_s1 + $0xc] sm:$0x1] %vm7_vm0, %v101_v12   ;;  %539 = vst.msk [vmem:[%s1294_s1 + $0x4b] sm:$0x2] %vm7_vm0, %v101_v12  }
  0x94   :  { %v109_v13 = vpop.permute.xlu0 %108  }
  0x95   :  { %v117_v14 = vpop.permute.xlu1 %116   ;;  %540 = vst.msk [vmem:[%s1294_s1 + $0xd] sm:$0x1] %vm7_vm0, %v109_v13   ;;  %541 = vst.msk [vmem:[%s1294_s1 + $0x4c] sm:$0x2] %vm7_vm0, %v109_v13  }
  0x96   :  { %542 = vst.msk [vmem:[%s1294_s1 + $0xe] sm:$0x1] %vm7_vm0, %v117_v14   ;;  %543 = vst.msk [vmem:[%s1294_s1 + $0x4d] sm:$0x2] %vm7_vm0, %v117_v14  }
  0x98   :  { %v125_v15 = vpop.permute.xlu0 %124  }
  0x99   :  { %v133_v16 = vpop.permute.xlu1 %132   ;;  %544 = vst.msk [vmem:[%s1294_s1 + $0xf] sm:$0x1] %vm7_vm0, %v125_v15   ;;  %545 = vst.msk [vmem:[%s1294_s1 + $0x4e] sm:$0x2] %vm7_vm0, %v125_v15  }
  0x9a   :  { %546 = vst.msk [vmem:[%s1294_s1 + $0x10] sm:$0x1] %vm7_vm0, %v133_v16   ;;  %547 = vst.msk [vmem:[%s1294_s1 + $0x4f] sm:$0x2] %vm7_vm0, %v133_v16  }
  0x9c   :  { %v141_v17 = vpop.permute.xlu0 %140  }
  0x9d   :  { %v149_v18 = vpop.permute.xlu1 %148   ;;  %548 = vst.msk [vmem:[%s1294_s1 + $0x11] sm:$0x1] %vm7_vm0, %v141_v17   ;;  %549 = vst.msk [vmem:[%s1294_s1 + $0x50] sm:$0x2] %vm7_vm0, %v141_v17  }
  0x9e   :  { %550 = vst.msk [vmem:[%s1294_s1 + $0x12] sm:$0x1] %vm7_vm0, %v149_v18   ;;  %551 = vst.msk [vmem:[%s1294_s1 + $0x51] sm:$0x2] %vm7_vm0, %v149_v18  }
  0xa0   :  { %v157_v19 = vpop.permute.xlu0 %156  }
  0xa1   :  { %v165_v20 = vpop.permute.xlu1 %164   ;;  %552 = vst.msk [vmem:[%s1294_s1 + $0x13] sm:$0x1] %vm7_vm0, %v157_v19   ;;  %553 = vst.msk [vmem:[%s1294_s1 + $0x52] sm:$0x2] %vm7_vm0, %v157_v19  }
  0xa2   :  { %554 = vst.msk [vmem:[%s1294_s1 + $0x14] sm:$0x1] %vm7_vm0, %v165_v20   ;;  %555 = vst.msk [vmem:[%s1294_s1 + $0x53] sm:$0x2] %vm7_vm0, %v165_v20  }
  0xa4   :  { %v173_v21 = vpop.permute.xlu0 %172  }
  0xa5   :  { %v181_v22 = vpop.permute.xlu1 %180   ;;  %556 = vst.msk [vmem:[%s1294_s1 + $0x15] sm:$0x1] %vm7_vm0, %v173_v21   ;;  %557 = vst.msk [vmem:[%s1294_s1 + $0x54] sm:$0x2] %vm7_vm0, %v173_v21  }
  0xa6   :  { %558 = vst.msk [vmem:[%s1294_s1 + $0x16] sm:$0x1] %vm7_vm0, %v181_v22   ;;  %559 = vst.msk [vmem:[%s1294_s1 + $0x55] sm:$0x2] %vm7_vm0, %v181_v22  }
  0xa8   :  { %v189_v23 = vpop.permute.xlu0 %188  }
  0xa9   :  { %v197_v24 = vpop.permute.xlu1 %196   ;;  %560 = vst.msk [vmem:[%s1294_s1 + $0x17] sm:$0x1] %vm7_vm0, %v189_v23   ;;  %561 = vst.msk [vmem:[%s1294_s1 + $0x56] sm:$0x2] %vm7_vm0, %v189_v23  }
  0xaa   :  { %562 = vst.msk [vmem:[%s1294_s1 + $0x18] sm:$0x1] %vm7_vm0, %v197_v24   ;;  %563 = vst.msk [vmem:[%s1294_s1 + $0x57] sm:$0x2] %vm7_vm0, %v197_v24  }
  0xac   :  { %v205_v25 = vpop.permute.xlu0 %204  }
  0xad   :  { %v213_v26 = vpop.permute.xlu1 %212   ;;  %564 = vst.msk [vmem:[%s1294_s1 + $0x19] sm:$0x1] %vm7_vm0, %v205_v25   ;;  %565 = vst.msk [vmem:[%s1294_s1 + $0x58] sm:$0x2] %vm7_vm0, %v205_v25  }
  0xae   :  { %566 = vst.msk [vmem:[%s1294_s1 + $0x1a] sm:$0x1] %vm7_vm0, %v213_v26   ;;  %567 = vst.msk [vmem:[%s1294_s1 + $0x59] sm:$0x2] %vm7_vm0, %v213_v26  }
  0xb0   :  { %v221_v27 = vpop.permute.xlu0 %220  }
  0xb1   :  { %v229_v28 = vpop.permute.xlu1 %228   ;;  %568 = vst.msk [vmem:[%s1294_s1 + $0x1b] sm:$0x1] %vm7_vm0, %v221_v27   ;;  %569 = vst.msk [vmem:[%s1294_s1 + $0x5a] sm:$0x2] %vm7_vm0, %v221_v27  }
  0xb2   :  { %570 = vst.msk [vmem:[%s1294_s1 + $0x1c] sm:$0x1] %vm7_vm0, %v229_v28   ;;  %571 = vst.msk [vmem:[%s1294_s1 + $0x5b] sm:$0x2] %vm7_vm0, %v229_v28  }
  0xb4   :  { %v237_v29 = vpop.permute.xlu0 %236  }
  0xb5   :  { %v245_v30 = vpop.permute.xlu1 %244   ;;  %572 = vst.msk [vmem:[%s1294_s1 + $0x1d] sm:$0x1] %vm7_vm0, %v237_v29   ;;  %573 = vst.msk [vmem:[%s1294_s1 + $0x5c] sm:$0x2] %vm7_vm0, %v237_v29  }
  0xb6   :  { %574 = vst.msk [vmem:[%s1294_s1 + $0x1e] sm:$0x1] %vm7_vm0, %v245_v30   ;;  %575 = vst.msk [vmem:[%s1294_s1 + $0x5d] sm:$0x2] %vm7_vm0, %v245_v30  }
  0xb8   :  { %v253_v31 = vpop.permute.xlu0 %252  }
  0xb9   :  { %v261_v32 = vpop.permute.xlu1 %260   ;;  %576 = vst.msk [vmem:[%s1294_s1 + $0x1f] sm:$0x1] %vm7_vm0, %v253_v31   ;;  %577 = vst.msk [vmem:[%s1294_s1 + $0x5e] sm:$0x2] %vm7_vm0, %v253_v31  }
  0xba   :  { %578 = vst.msk [vmem:[%s1294_s1 + $0x20] sm:$0x1] %vm7_vm0, %v261_v32   ;;  %579 = vst.msk [vmem:[%s1294_s1 + $0x5f] sm:$0x2] %vm7_vm0, %v261_v32  }
  0xbc   :  { %v269_v33 = vpop.permute.xlu0 %268  }
  0xbd   :  { %v277_v34 = vpop.permute.xlu1 %276   ;;  %580 = vst.msk [vmem:[%s1294_s1 + $0x21] sm:$0x1] %vm7_vm0, %v269_v33   ;;  %581 = vst.msk [vmem:[%s1294_s1 + $0x60] sm:$0x2] %vm7_vm0, %v269_v33  }
  0xbe   :  { %582 = vst.msk [vmem:[%s1294_s1 + $0x22] sm:$0x1] %vm7_vm0, %v277_v34   ;;  %583 = vst.msk [vmem:[%s1294_s1 + $0x61] sm:$0x2] %vm7_vm0, %v277_v34  }
  0xc0   :  { %v285_v35 = vpop.permute.xlu0 %284  }
  0xc1   :  { %v293_v36 = vpop.permute.xlu1 %292   ;;  %584 = vst.msk [vmem:[%s1294_s1 + $0x23] sm:$0x1] %vm7_vm0, %v285_v35   ;;  %585 = vst.msk [vmem:[%s1294_s1 + $0x62] sm:$0x2] %vm7_vm0, %v285_v35  }
  0xc2   :  { %586 = vst.msk [vmem:[%s1294_s1 + $0x24] sm:$0x1] %vm7_vm0, %v293_v36   ;;  %587 = vst.msk [vmem:[%s1294_s1 + $0x63] sm:$0x2] %vm7_vm0, %v293_v36  }
  0xc4   :  { %v301_v37 = vpop.permute.xlu0 %300  }
  0xc5   :  { %v309_v38 = vpop.permute.xlu1 %308   ;;  %588 = vst.msk [vmem:[%s1294_s1 + $0x25] sm:$0x1] %vm7_vm0, %v301_v37   ;;  %589 = vst.msk [vmem:[%s1294_s1 + $0x64] sm:$0x2] %vm7_vm0, %v301_v37  }
  0xc6   :  { %590 = vst.msk [vmem:[%s1294_s1 + $0x26] sm:$0x1] %vm7_vm0, %v309_v38   ;;  %591 = vst.msk [vmem:[%s1294_s1 + $0x65] sm:$0x2] %vm7_vm0, %v309_v38  }
  0xc8   :  { %v317_v39 = vpop.permute.xlu0 %316  }
  0xc9   :  { %v325_v40 = vpop.permute.xlu1 %324   ;;  %592 = vst.msk [vmem:[%s1294_s1 + $0x27] sm:$0x1] %vm7_vm0, %v317_v39   ;;  %593 = vst.msk [vmem:[%s1294_s1 + $0x66] sm:$0x2] %vm7_vm0, %v317_v39  }
  0xca   :  { %594 = vst.msk [vmem:[%s1294_s1 + $0x28] sm:$0x1] %vm7_vm0, %v325_v40   ;;  %595 = vst.msk [vmem:[%s1294_s1 + $0x67] sm:$0x2] %vm7_vm0, %v325_v40  }
  0xcc   :  { %v333_v41 = vpop.permute.xlu0 %332  }
  0xcd   :  { %v341_v42 = vpop.permute.xlu1 %340   ;;  %596 = vst.msk [vmem:[%s1294_s1 + $0x29] sm:$0x1] %vm7_vm0, %v333_v41   ;;  %597 = vst.msk [vmem:[%s1294_s1 + $0x68] sm:$0x2] %vm7_vm0, %v333_v41  }
  0xce   :  { %598 = vst.msk [vmem:[%s1294_s1 + $0x2a] sm:$0x1] %vm7_vm0, %v341_v42   ;;  %599 = vst.msk [vmem:[%s1294_s1 + $0x69] sm:$0x2] %vm7_vm0, %v341_v42  }
  0xd0   :  { %v349_v43 = vpop.permute.xlu0 %348  }
  0xd1   :  { %v357_v44 = vpop.permute.xlu1 %356   ;;  %600 = vst.msk [vmem:[%s1294_s1 + $0x2b] sm:$0x1] %vm7_vm0, %v349_v43   ;;  %601 = vst.msk [vmem:[%s1294_s1 + $0x6a] sm:$0x2] %vm7_vm0, %v349_v43  }
  0xd2   :  { %602 = vst.msk [vmem:[%s1294_s1 + $0x2c] sm:$0x1] %vm7_vm0, %v357_v44   ;;  %603 = vst.msk [vmem:[%s1294_s1 + $0x6b] sm:$0x2] %vm7_vm0, %v357_v44  }
  0xd4   :  { %v365_v45 = vpop.permute.xlu0 %364  }
  0xd5   :  { %v373_v46 = vpop.permute.xlu1 %372   ;;  %604 = vst.msk [vmem:[%s1294_s1 + $0x2d] sm:$0x1] %vm7_vm0, %v365_v45   ;;  %605 = vst.msk [vmem:[%s1294_s1 + $0x6c] sm:$0x2] %vm7_vm0, %v365_v45  }
  0xd6   :  { %606 = vst.msk [vmem:[%s1294_s1 + $0x2e] sm:$0x1] %vm7_vm0, %v373_v46   ;;  %607 = vst.msk [vmem:[%s1294_s1 + $0x6d] sm:$0x2] %vm7_vm0, %v373_v46  }
  0xd8   :  { %v381_v47 = vpop.permute.xlu0 %380  }
  0xd9   :  { %v389_v48 = vpop.permute.xlu1 %388   ;;  %608 = vst.msk [vmem:[%s1294_s1 + $0x2f] sm:$0x1] %vm7_vm0, %v381_v47   ;;  %609 = vst.msk [vmem:[%s1294_s1 + $0x6e] sm:$0x2] %vm7_vm0, %v381_v47  }
  0xda   :  { %610 = vst.msk [vmem:[%s1294_s1 + $0x30] sm:$0x1] %vm7_vm0, %v389_v48   ;;  %611 = vst.msk [vmem:[%s1294_s1 + $0x6f] sm:$0x2] %vm7_vm0, %v389_v48  }
  0xdc   :  { %v397_v49 = vpop.permute.xlu0 %396  }
  0xdd   :  { %v405_v50 = vpop.permute.xlu1 %404   ;;  %612 = vst.msk [vmem:[%s1294_s1 + $0x31] sm:$0x1] %vm7_vm0, %v397_v49   ;;  %613 = vst.msk [vmem:[%s1294_s1 + $0x70] sm:$0x2] %vm7_vm0, %v397_v49  }
  0xde   :  { %614 = vst.msk [vmem:[%s1294_s1 + $0x32] sm:$0x1] %vm7_vm0, %v405_v50   ;;  %615 = vst.msk [vmem:[%s1294_s1 + $0x71] sm:$0x2] %vm7_vm0, %v405_v50  }
  0xe0   :  { %v413_v51 = vpop.permute.xlu0 %412  }
  0xe1   :  { %v421_v52 = vpop.permute.xlu1 %420   ;;  %616 = vst.msk [vmem:[%s1294_s1 + $0x33] sm:$0x1] %vm7_vm0, %v413_v51   ;;  %617 = vst.msk [vmem:[%s1294_s1 + $0x72] sm:$0x2] %vm7_vm0, %v413_v51  }
  0xe2   :  { %618 = vst.msk [vmem:[%s1294_s1 + $0x34] sm:$0x1] %vm7_vm0, %v421_v52   ;;  %619 = vst.msk [vmem:[%s1294_s1 + $0x73] sm:$0x2] %vm7_vm0, %v421_v52  }
  0xe4   :  { %v429_v53 = vpop.permute.xlu0 %428  }
  0xe5   :  { %v437_v54 = vpop.permute.xlu1 %436   ;;  %620 = vst.msk [vmem:[%s1294_s1 + $0x35] sm:$0x1] %vm7_vm0, %v429_v53   ;;  %621 = vst.msk [vmem:[%s1294_s1 + $0x74] sm:$0x2] %vm7_vm0, %v429_v53  }
  0xe6   :  { %622 = vst.msk [vmem:[%s1294_s1 + $0x36] sm:$0x1] %vm7_vm0, %v437_v54   ;;  %623 = vst.msk [vmem:[%s1294_s1 + $0x75] sm:$0x2] %vm7_vm0, %v437_v54  }
  0xe8   :  { %v445_v55 = vpop.permute.xlu0 %444  }
  0xe9   :  { %v453_v56 = vpop.permute.xlu1 %452   ;;  %624 = vst.msk [vmem:[%s1294_s1 + $0x37] sm:$0x1] %vm7_vm0, %v445_v55   ;;  %625 = vst.msk [vmem:[%s1294_s1 + $0x76] sm:$0x2] %vm7_vm0, %v445_v55  }
  0xea   :  { %626 = vst.msk [vmem:[%s1294_s1 + $0x38] sm:$0x1] %vm7_vm0, %v453_v56   ;;  %627 = vst.msk [vmem:[%s1294_s1 + $0x77] sm:$0x2] %vm7_vm0, %v453_v56  }
  0xec   :  { %v461_v57 = vpop.permute.xlu0 %460  }
  0xed   :  { %v469_v58 = vpop.permute.xlu1 %468   ;;  %628 = vst.msk [vmem:[%s1294_s1 + $0x39] sm:$0x1] %vm7_vm0, %v461_v57   ;;  %629 = vst.msk [vmem:[%s1294_s1 + $0x78] sm:$0x2] %vm7_vm0, %v461_v57  }
  0xee   :  { %630 = vst.msk [vmem:[%s1294_s1 + $0x3a] sm:$0x1] %vm7_vm0, %v469_v58   ;;  %631 = vst.msk [vmem:[%s1294_s1 + $0x79] sm:$0x2] %vm7_vm0, %v469_v58  }
  0xf0   :  { %v477_v59 = vpop.permute.xlu0 %476  }
  0xf1   :  { %v485_v60 = vpop.permute.xlu1 %484   ;;  %632 = vst.msk [vmem:[%s1294_s1 + $0x3b] sm:$0x1] %vm7_vm0, %v477_v59   ;;  %633 = vst.msk [vmem:[%s1294_s1 + $0x7a] sm:$0x2] %vm7_vm0, %v477_v59  }
  0xf2   :  { %634 = vst.msk [vmem:[%s1294_s1 + $0x3c] sm:$0x1] %vm7_vm0, %v485_v60   ;;  %635 = vst.msk [vmem:[%s1294_s1 + $0x7b] sm:$0x2] %vm7_vm0, %v485_v60  }
  0xf4   :  { %v493_v61 = vpop.permute.xlu0 %492  }
  0xf5   :  { %v501_v62 = vpop.permute.xlu1 %500   ;;  %636 = vst.msk [vmem:[%s1294_s1 + $0x3d] sm:$0x1] %vm7_vm0, %v493_v61   ;;  %637 = vst.msk [vmem:[%s1294_s1 + $0x7c] sm:$0x2] %vm7_vm0, %v493_v61  }
  0xf6   :  { %638 = vst.msk [vmem:[%s1294_s1 + $0x3e] sm:$0x1] %vm7_vm0, %v501_v62   ;;  %639 = vst.msk [vmem:[%s1294_s1 + $0x7d] sm:$0x2] %vm7_vm0, %v501_v62  }
  0xf8   :  { %v509_v63 = vpop.permute.xlu0 %508  }
  0xf9   :  { %640 = vst.msk [vmem:[%s1294_s1 + $0x3f] sm:$0x1] %vm7_vm0, %v509_v63   ;;  %641 = vst.msk [vmem:[%s1294_s1 + $0x7e] sm:$0x2] %vm7_vm0, %v509_v63  }

// kernel: tile.38
= control target key start
LH: loop header
LB: loop body
LE: loop exit
PB: predicated region body
PF: predicated region fallthrough
CT: control target
= control target key end

     0   :  { %s22_s0 = inlined_call_operand.vmem [shape: f32[16], index: 0, kind: input, shape index: {}]   ;;  %s23_s1 = inlined_call_operand.vmem [shape: f32[2,16], index: 1, kind: output, shape index: {}]  }
   0x1   :  { %v4_v0 = vld [vmem:[%s22_s0] ss:$0 sm:$0xff] }
   0x2   :  { %5 = vst [vmem:[%s23_s1] sm:$0x3] %v4_v0 }

// kernel: tile.1
= control target key start
LH: loop header
LB: loop body
LE: loop exit
PB: predicated region body
PF: predicated region fallthrough
CT: control target
= control target key end

     0   :  { %s130_s8 = smov 125   ;;  %s131_s9 = smov 126   ;;  %vm7_vm0 = vcmask 7168   ;;  %s221_s0 = inlined_call_operand.vmem [shape: f32[2,16], index: 0, kind: input, shape index: {}]   ;;  %s222_s1 = inlined_call_operand.vmem [shape: f32[1,32,1], index: 1, kind: output, shape index: {}]  }
   0x1   :  { %v4_v0 = vld [vmem:[%s221_s0] sm:$0x3]  ;;  %s129_s0 = smov 127   ;;  %s132_s10 = smov 124  }
   0x2   :  { %5 = vst [vmem:[#allocation0] sm:$0x3] %v4_v0  ;;  %s133_s11 = smov 123   ;;  %s134_s12 = smov 122  }
   0x3   :  { %s135_s13 = smov 121   ;;  %s136_s14 = smov 120  }
   0x4   :  { %s137_s17 = smov 119   ;;  %s138_s18 = smov 118  }
   0x5   :  { %s139_s19 = smov 117   ;;  %s140_s20 = smov 116  }
   0x6   :  { %s141_s21 = smov 115   ;;  %s142_s22 = smov 114  }
   0x7   :  { %s143_s23 = smov 113  }
   0x9   :  { %v9_v1 = vld [vmem:[#allocation0] sm:$0x3]  }
   0xa   :  { %v21_v2 = vld [vmem:[#allocation0] sm:$0x3]   ;;  %10 = vrot.lane.b32.xlu0 %v9_v1, %s129_s0 }
   0xb   :  { %22 = vrot.lane.b32.xlu1 %v21_v2, %s130_s8  ;;  %v15_v3 = vld [vmem:[#allocation0] sm:$0x3]  }
   0xc   :  { %v27_v4 = vld [vmem:[#allocation0] sm:$0x3]  }
   0xd   :  { %v33_v5 = vld [vmem:[#allocation0] sm:$0x3]  }
   0xe   :  { %16 = vrot.lane.b32.xlu0 %v15_v3, %s131_s9  ;;  %v39_v6 = vld [vmem:[#allocation0] sm:$0x3]  }
   0xf   :  { %28 = vrot.lane.b32.xlu1 %v27_v4, %s132_s10  ;;  %v45_v7 = vld [vmem:[#allocation0] sm:$0x3]  }
  0x10   :  { %v51_v8 = vld [vmem:[#allocation0] sm:$0x3]  }
  0x11   :  { %v57_v9 = vld [vmem:[#allocation0] sm:$0x3]  }
  0x12   :  { %34 = vrot.lane.b32.xlu0 %v33_v5, %s133_s11  ;;  %v63_v10 = vld [vmem:[#allocation0] sm:$0x3]  }
  0x13   :  { %40 = vrot.lane.b32.xlu1 %v39_v6, %s134_s12  ;;  %v6_v11 = vld [vmem:[#allocation0] sm:$0x3]  }
  0x14   :  { %8 = vst.msk [vmem:[%s222_s1] ss:$16 sm:$0x3] %vm7_vm0, %v6_v11   ;;  %v69_v12 = vld [vmem:[#allocation0] sm:$0x3]  }
  0x15   :  { %v75_v13 = vld [vmem:[#allocation0] sm:$0x3]  }
  0x16   :  { %46 = vrot.lane.b32.xlu0 %v45_v7, %s135_s13  ;;  %v81_v14 = vld [vmem:[#allocation0] sm:$0x3]  }
  0x17   :  { %52 = vrot.lane.b32.xlu1 %v51_v8, %s136_s14  ;;  %v87_v15 = vld [vmem:[#allocation0] sm:$0x3]  }
  0x18   :  { %v93_v16 = vld [vmem:[#allocation0] sm:$0x3]  }
  0x1a   :  { %58 = vrot.lane.b32.xlu0 %v57_v9, %s137_s17 }
  0x1b   :  { %64 = vrot.lane.b32.xlu1 %v63_v10, %s138_s18 }
  0x1e   :  { %70 = vrot.lane.b32.xlu0 %v69_v12, %s139_s19 }
  0x1f   :  { %76 = vrot.lane.b32.xlu1 %v75_v13, %s140_s20 }
  0x22   :  { %82 = vrot.lane.b32.xlu0 %v81_v14, %s141_s21 }
  0x23   :  { %88 = vrot.lane.b32.xlu1 %v87_v15, %s142_s22 }
  0x26   :  { %94 = vrot.lane.b32.xlu0 %v93_v16, %s143_s23 }
  0x7c   :  { %v11_v17 = vpop.permute.xlu0 %10  }
  0x7d   :  { %v23_v18 = vpop.permute.xlu1 %22   ;;  %99 = vst.msk [vmem:[%s222_s1 + $0x1] ss:$16 sm:$0x3] %vm7_vm0, %v11_v17  }
  0x7e   :  { %101 = vst.msk [vmem:[%s222_s1 + $0x3] ss:$16 sm:$0x3] %vm7_vm0, %v23_v18  }
  0x80   :  { %v17_v19 = vpop.permute.xlu0 %16  }
  0x81   :  { %v29_v20 = vpop.permute.xlu1 %28   ;;  %100 = vst.msk [vmem:[%s222_s1 + $0x2] ss:$16 sm:$0x3] %vm7_vm0, %v17_v19  }
  0x82   :  { %102 = vst.msk [vmem:[%s222_s1 + $0x4] ss:$16 sm:$0x3] %vm7_vm0, %v29_v20  }
  0x84   :  { %v35_v21 = vpop.permute.xlu0 %34  }
  0x85   :  { %v41_v22 = vpop.permute.xlu1 %40   ;;  %103 = vst.msk [vmem:[%s222_s1 + $0x5] ss:$16 sm:$0x3] %vm7_vm0, %v35_v21  }
  0x86   :  { %104 = vst.msk [vmem:[%s222_s1 + $0x6] ss:$16 sm:$0x3] %vm7_vm0, %v41_v22  }
  0x88   :  { %v47_v23 = vpop.permute.xlu0 %46  }
  0x89   :  { %v53_v24 = vpop.permute.xlu1 %52   ;;  %105 = vst.msk [vmem:[%s222_s1 + $0x7] ss:$16 sm:$0x3] %vm7_vm0, %v47_v23  }
  0x8a   :  { %106 = vst.msk [vmem:[%s222_s1 + $0x8] ss:$16 sm:$0x3] %vm7_vm0, %v53_v24  }
  0x8c   :  { %v59_v25 = vpop.permute.xlu0 %58  }
  0x8d   :  { %v65_v26 = vpop.permute.xlu1 %64   ;;  %107 = vst.msk [vmem:[%s222_s1 + $0x9] ss:$16 sm:$0x3] %vm7_vm0, %v59_v25  }
  0x8e   :  { %108 = vst.msk [vmem:[%s222_s1 + $0xa] ss:$16 sm:$0x3] %vm7_vm0, %v65_v26  }
  0x90   :  { %v71_v27 = vpop.permute.xlu0 %70  }
  0x91   :  { %v77_v28 = vpop.permute.xlu1 %76   ;;  %109 = vst.msk [vmem:[%s222_s1 + $0xb] ss:$16 sm:$0x3] %vm7_vm0, %v71_v27  }
  0x92   :  { %110 = vst.msk [vmem:[%s222_s1 + $0xc] ss:$16 sm:$0x3] %vm7_vm0, %v77_v28  }
  0x94   :  { %v83_v29 = vpop.permute.xlu0 %82  }
  0x95   :  { %v89_v30 = vpop.permute.xlu1 %88   ;;  %111 = vst.msk [vmem:[%s222_s1 + $0xd] ss:$16 sm:$0x3] %vm7_vm0, %v83_v29  }
  0x96   :  { %112 = vst.msk [vmem:[%s222_s1 + $0xe] ss:$16 sm:$0x3] %vm7_vm0, %v89_v30  }
  0x98   :  { %v95_v31 = vpop.permute.xlu0 %94  }
  0x99   :  { %113 = vst.msk [vmem:[%s222_s1 + $0xf] ss:$16 sm:$0x3] %vm7_vm0, %v95_v31  }

// kernel: tile.54
= control target key start
LH: loop header
LB: loop body
LE: loop exit
PB: predicated region body
PF: predicated region fallthrough
CT: control target
= control target key end

     0   :  { %s22_s0 = inlined_call_operand.vmem [shape: f32[8], index: 0, kind: input, shape index: {}]   ;;  %s23_s1 = inlined_call_operand.vmem [shape: f32[2,8], index: 1, kind: output, shape index: {}]  }
   0x1   :  { %v4_v0 = vld [vmem:[%s22_s0] ss:$0 sm:$0xff] }
   0x2   :  { %5 = vst [vmem:[%s23_s1] sm:$0x3] %v4_v0 }

// kernel: tile.0
= control target key start
LH: loop header
LB: loop body
LE: loop exit
PB: predicated region body
PF: predicated region fallthrough
CT: control target
= control target key end

     0   :  { %s66_s8 = smov 125   ;;  %vm7_vm0 = vcmask 7168   ;;  %s67_s11 = smov 126   ;;  %s117_s0 = inlined_call_operand.vmem [shape: f32[2,8], index: 0, kind: input, shape index: {}]   ;;  %s118_s1 = inlined_call_operand.vmem [shape: f32[16,1], index: 1, kind: output, shape index: {}]  }
   0x1   :  { %v4_v0 = vld [vmem:[%s117_s0] sm:$0x3]  ;;  %s65_s0 = smov 127   ;;  %s68_s12 = smov 124  }
   0x2   :  { %5 = vst [vmem:[#allocation0] sm:$0x3] %v4_v0  ;;  %s69_s13 = smov 123   ;;  %s70_s14 = smov 122  }
   0x3   :  { %s71_s15 = smov 121  }
   0x9   :  { %v9_v1 = vld [vmem:[#allocation0] sm:$0x3]  }
   0xa   :  { %v21_v2 = vld [vmem:[#allocation0] sm:$0x3]   ;;  %10 = vrot.lane.b32.xlu0 %v9_v1, %s65_s0 }
   0xb   :  { %22 = vrot.lane.b32.xlu1 %v21_v2, %s66_s8  ;;  %v15_v3 = vld [vmem:[#allocation0] sm:$0x3]  }
   0xc   :  { %v27_v4 = vld [vmem:[#allocation0] sm:$0x3]  }
   0xd   :  { %v6_v5 = vld [vmem:[#allocation0] sm:$0x3]  }
   0xe   :  { %8 = vst.msk [vmem:[%s118_s1] ss:$8 sm:$0x3] %vm7_vm0, %v6_v5   ;;  %16 = vrot.lane.b32.xlu0 %v15_v3, %s67_s11  ;;  %v33_v6 = vld [vmem:[#allocation0] sm:$0x3]  }
   0xf   :  { %28 = vrot.lane.b32.xlu1 %v27_v4, %s68_s12  ;;  %v39_v7 = vld [vmem:[#allocation0] sm:$0x3]  }
  0x10   :  { %v45_v8 = vld [vmem:[#allocation0] sm:$0x3]  }
  0x12   :  { %34 = vrot.lane.b32.xlu0 %v33_v6, %s69_s13 }
  0x13   :  { %40 = vrot.lane.b32.xlu1 %v39_v7, %s70_s14 }
  0x16   :  { %46 = vrot.lane.b32.xlu0 %v45_v8, %s71_s15 }
  0x7c   :  { %v11_v9 = vpop.permute.xlu0 %10  }
  0x7d   :  { %v23_v10 = vpop.permute.xlu1 %22   ;;  %51 = vst.msk [vmem:[%s118_s1 + $0x1] ss:$8 sm:$0x3] %vm7_vm0, %v11_v9  }
  0x7e   :  { %53 = vst.msk [vmem:[%s118_s1 + $0x3] ss:$8 sm:$0x3] %vm7_vm0, %v23_v10  }
  0x80   :  { %v17_v11 = vpop.permute.xlu0 %16  }
  0x81   :  { %v29_v12 = vpop.permute.xlu1 %28   ;;  %52 = vst.msk [vmem:[%s118_s1 + $0x2] ss:$8 sm:$0x3] %vm7_vm0, %v17_v11  }
  0x82   :  { %54 = vst.msk [vmem:[%s118_s1 + $0x4] ss:$8 sm:$0x3] %vm7_vm0, %v29_v12  }
  0x84   :  { %v35_v13 = vpop.permute.xlu0 %34  }
  0x85   :  { %v41_v14 = vpop.permute.xlu1 %40   ;;  %55 = vst.msk [vmem:[%s118_s1 + $0x5] ss:$8 sm:$0x3] %vm7_vm0, %v35_v13  }
  0x86   :  { %56 = vst.msk [vmem:[%s118_s1 + $0x6] ss:$8 sm:$0x3] %vm7_vm0, %v41_v14  }
  0x88   :  { %v47_v15 = vpop.permute.xlu0 %46  }
  0x89   :  { %57 = vst.msk [vmem:[%s118_s1 + $0x7] ss:$8 sm:$0x3] %vm7_vm0, %v47_v15  }

// kernel: jstgcn_forward.1
= control target key start
LH: loop header
LB: loop body
LE: loop exit
PB: predicated region body
PF: predicated region fallthrough
CT: control target
= control target key end

     0   :  { %vm70_vm0 = vcmask 1043456   ;;  %vm63_vm1 = vcmask 31744   ;;  %v15602_v10 = vmov 0   ;;  %s20426_s0 = inlined_call_operand.vmem [shape: f32[4,128], index: 0, kind: input, shape index: {}]   ;;  %s20427_s1 = inlined_call_operand.vmem [shape: f32[16,4], index: 1, kind: input, shape index: {}]   ;;  %s20428_s2 = inlined_call_operand.vmem [shape: f32[16,1], index: 2, kind: input, shape index: {}]   ;;  %s20429_s3 = inlined_call_operand.vmem [shape: f32[2,128,384], index: 3, kind: input, shape index: {}]   ;;  %s20430_s4 = inlined_call_operand.vmem [shape: f32[2,32,48], index: 4, kind: input, shape index: {}]   ;;  %s20431_s5 = inlined_call_operand.vmem [shape: f32[2,32,1], index: 5, kind: input, shape index: {}]   ;;  %s20432_s6 = inlined_call_operand.vmem [shape: f32[2,128,16], index: 6, kind: input, shape index: {}]   ;;  %s20433_s7 = inlined_call_operand.vmem [shape: f32[2,128,1], index: 7, kind: input, shape index: {}]   ;;  %s20434_s8 = inlined_call_operand.vmem [shape: f32[2,8,1], index: 8, kind: input, shape index: {}]   ;;  %s20435_s9 = inlined_call_operand.vmem [shape: f32[2,8,1], index: 9, kind: input, shape index: {}]   ;;  %s20436_s10 = inlined_call_operand.vmem [shape: f32[256,128], index: 10, kind: input, shape index: {}]   ;;  %s20437_s11 = inlined_call_operand.vmem [shape: f32[256,1], index: 11, kind: input, shape index: {}]   ;;  %s20438_s12 = inlined_call_operand.vmem [shape: f32[16,256], index: 12, kind: input, shape index: {}]   ;;  %s20439_s13 = inlined_call_operand.vmem [shape: f32[16,1], index: 13, kind: input, shape index: {}]   ;;  %s20440_s14 = inlined_call_operand.hbm [shape: f32[16,16], index: 14, kind: output, shape index: {}]  }
   0x1   :  { %v50_v0 = vld [vmem:[%s20426_s0] sm:$0xf]  ;;  %v49_v2 = vld [vmem:[%s20427_s1 + $0x8] sm:$0xff]  ;;  %15558 = vset.pattern.permute.xlu0 %v15602_v10  ;;  %15559 = vset.pattern.permute.xlu1 %v15602_v10  ;;  %v566_v16 = vld [vmem:[%s20429_s3 + $0x18] sm:$0xff] }
   0x2   :  { %v48_v1 = vld [vmem:[%s20427_s1] sm:$0xff]  ;;  %v72_v3 = vsel %vm70_vm0, %v50_v0, 0  ;;  %v68_v5 = vsel %vm63_vm1, %v49_v2, 0  ;;  %v564_v11 = vld [vmem:[%s20429_s3 + $0x8] sm:$0xff]  ;;  %v617_v25 = vand.u32 4294901760, %v566_v16  ;;  %v570_v26 = vld [vmem:[%s20429_s3 + $0x38] sm:$0xff] }
   0x3   :  { %v65_v4 = vsel %vm63_vm1, %v48_v1, 0  ;;  %v51_v6 = vld [vmem:[%s20428_s2] sm:$0xff]  ;;  %v15695_v7 = vand.u32 4294901760, %v72_v3  ;;  %v15699_v9 = vand.u32 4294901760, %v68_v5  ;;  %v611_v13 = vand.u32 4294901760, %v564_v11  ;;  %v52_v20 = vld [vmem:[%s20428_s2 + $0x8] sm:$0xff] }
   0x4   :  { %v15697_v8 = vand.u32 4294901760, %v65_v4  ;;  %v567_v12 = vld [vmem:[%s20429_s3 + $0x20] sm:$0xff]  ;;  %55 = vperm.xlu0 %15558, %v51_v6   ;;  %v573_v31 = vld [vmem:[%s20429_s3 + $0x50] sm:$0xff]  ;;  %v572_v33 = vld [vmem:[%s20429_s3 + $0x48] sm:$0xff]  ;;  %v15755_v35 = vsub.f32 %v566_v16, %v617_v25  ;;  %v619_v40 = vand.u32 4294901760, %v570_v26 }
   0x5   :  { %v615_v14 = vand.u32 4294901760, %v567_v12  ;;  %v563_v15 = vld [vmem:[%s20429_s3] sm:$0xff]  ;;  %12222 = vmatprep.subr.mxu0 %v15695_v7  ;;  %v15718_v18 = vsub.f32 %v68_v5, %v15699_v9  ;;  %v15721_v19 = vsub.f32 %v72_v3, %v15695_v7  ;;  %v15729_v23 = vsub.f32 %v564_v11, %v611_v13  ;;  %v569_v32 = vld [vmem:[%s20429_s3 + $0x30] sm:$0xff]  ;;  %v576_v44 = vld [vmem:[%s20429_s3 + $0x68] sm:$0xff] }
   0x6   :  { %v15715_v17 = vsub.f32 %v65_v4, %v15697_v8  ;;  %v613_v21 = vand.u32 4294901760, %v563_v15  ;;  %12223 = vmatpush3.msra.mxu0 %v15695_v7  ;;  %v2203_v39 = vld [vmem:[%s20431_s5] sm:$0xff]  ;;  %v623_v41 = vand.u32 4294901760, %v573_v31  ;;  %v621_v42 = vand.u32 4294901760, %v569_v32  ;;  %v578_v51 = vld [vmem:[%s20429_s3 + $0x78] sm:$0xff]  ;;  %v585_v59 = vld [vmem:[%s20429_s3 + $0xb0] sm:$0xff] }
   0x7   :  { %v15727_v22 = vpack.c.bf16 %v615_v14, %v611_v13  ;;  %v15731_v24 = vsub.f32 %v567_v12, %v615_v14  ;;  %v152_v28 = vand.u32 4294901760, %v15718_v18  ;;  %v15739_v29 = vand.u32 4294901760, %v15721_v19  ;;  %v579_v49 = vld [vmem:[%s20429_s3 + $0x80] sm:$0xff]  ;;  %v582_v56 = vld [vmem:[%s20429_s3 + $0x98] sm:$0xff] }
   0x8   :  { %v142_v27 = vand.u32 4294901760, %v15715_v17  ;;  %v15741_v30 = vsub.f32 %v563_v15, %v613_v21  ;;  %60 = vperm.xlu0 %15558, %v52_v20   ;;  %v15753_v34 = vpack.c.bf16 %v617_v25, %v613_v21  ;;  %v625_v43 = vand.u32 4294901760, %v572_v33  ;;  %v575_v50 = vld [vmem:[%s20429_s3 + $0x60] sm:$0xff] }
   0x9   :  { %20999 = vst [vmem:[#allocation5_spill] sm:$0xff] %v15727_v22  ;;  %13705 = vmatprep.subr.bf16.mxu1 %v15727_v22  ;;  %v153_v37 = vsub.f32 %v15718_v18, %v152_v28  ;;  %v164_v38 = vsub.f32 %v15721_v19, %v15739_v29  ;;  %v15772_v48 = vsub.f32 %v570_v26, %v619_v40  ;;  %v627_v58 = vand.u32 4294901760, %v576_v44 }
   0xa   :  { %21000 = vst [vmem:[#allocation6_spill] sm:$0xff] %v15753_v34  ;;  %v143_v36 = vsub.f32 %v15715_v17, %v142_v27  ;;  %13707 = vmatpush1.bf16.msra.mxu1 %v15753_v34  ;;  %v15783_v52 = vpack.c.bf16 %v623_v41, %v619_v40  ;;  %v15785_v53 = vsub.f32 %v573_v31, %v623_v41 }
   0xb   :  { %v154_v46 = vand.u32 4294901760, %v153_v37  ;;  %v165_v47 = vand.u32 4294901760, %v164_v38  ;;  %v15787_v54 = vpack.c.bf16 %v625_v43, %v621_v42  ;;  %v15789_v55 = vsub.f32 %v569_v32, %v621_v42 }
   0xc   :  { %v144_v45 = vand.u32 4294901760, %v143_v36  ;;  %2209 = vperm.xlu0 %15558, %v2203_v39   ;;  %21001 = vst [vmem:[#allocation7_spill] sm:$0xff] %v15783_v52  ;;  %v15794_v57 = vsub.f32 %v572_v33, %v625_v43 }
   0xd   :  { %21002 = vst [vmem:[#allocation8_spill] sm:$0xff] %v15787_v54  ;;  %12227 = vmatprep.subr.mxu0 %v165_v47 }
   0xe   :  { %12224 = vmatprep.mubr.f32.mxu0 %v144_v45 }
   0xf   :  { %19 = vsyncpa [#allocation3], 0  ;;  %12225 = vmatmul.mubr.f32.vlgmr.msra.gmra.mrb[0].mxu0 %v154_v46  ;;  %13709 = vmatprep.subr.bf16.mxu1 %v15783_v52  ;;  %v631_v60 = vand.u32 4294901760, %v579_v49  ;;  %v629_v61 = vand.u32 4294901760, %v575_v50  ;;  %v633_v62 = vand.u32 4294901760, %v578_v51  ;;  %v15801_v63 = vsub.f32 %v576_v44, %v627_v58  ;;  %v581_v1 = vld [vmem:[%s20429_s3 + $0x90] sm:$0xff] }
  0x10   :  { %12228 = vmatpush3.msra.mxu0 %v165_v47  ;;  %12229 = vmatprep.mubr.f32.mxu0 %v15697_v8  ;;  %v635_v0 = vand.u32 4294901760, %v582_v56  ;;  %v584_v2 = vld [vmem:[%s20429_s3 + $0xa8] sm:$0xff]  ;;  %v639_v6 = vand.u32 4294901760, %v585_v59  ;;  %v591_v11 = vld [vmem:[%s20429_s3 + $0xe0] sm:$0xff]  ;;  %v637_v21 = vand.u32 4294901760, %v581_v1  ;;  %v590_v32 = vld [vmem:[%s20429_s3 + $0xd8] sm:$0xff] }
  0x11   :  { %12232 = vmatprep.subr.mxu0 %v15721_v19  ;;  %13711 = vmatpush1.bf16.msra.mxu1 %v15787_v54  ;;  %v15811_v3 = vpack.c.bf16 %v631_v60, %v627_v58  ;;  %v15813_v4 = vsub.f32 %v579_v49, %v631_v60  ;;  %v15815_v5 = vpack.c.bf16 %v633_v62, %v629_v61  ;;  %v588_v10 = vld [vmem:[%s20429_s3 + $0xc8] sm:$0xff]  ;;  %v587_v15 = vld [vmem:[%s20429_s3 + $0xc0] sm:$0xff]  ;;  %v641_v25 = vand.u32 4294901760, %v584_v2  ;;  %v605_v52 = vld [vmem:[%s20429_s3 + $0x150] sm:$0xff]  ;;  %s15604_s1 = smov 16  }
  0x12   :  { %v15823_v12 = vsub.f32 %v575_v50, %v629_v61  ;;  %v15825_v13 = vsub.f32 %v578_v51, %v633_v62  ;;  %v15827_v14 = vsub.f32 %v582_v56, %v635_v0  ;;  %v15833_v16 = vpack.c.bf16 %v639_v6, %v635_v0  ;;  %v15880_v46 = vld [vmem:[%s20429_s3 + $0x28] sm:$0xff]  ;;  %v15914_v50 = vld [vmem:[%s20429_s3 + $0x70] sm:$0xff]  ;;  %v15932_v58 = vld [vmem:[%s20429_s3 + $0xa0] sm:$0xff] }
  0x13   :  { %21003 = vst [vmem:[#allocation9_spill] sm:$0xff] %v15811_v3  ;;  %21004 = vst [vmem:[#allocation10_spill] sm:$0xff] %v15815_v5  ;;  %13713 = vmatprep.subr.bf16.mxu1 %v15811_v3  ;;  %v15835_v20 = vsub.f32 %v585_v59, %v639_v6  ;;  %v643_v26 = vand.u32 4294901760, %v588_v10  ;;  %v647_v31 = vand.u32 4294901760, %v591_v11  ;;  %v15841_v33 = vpack.c.bf16 %v641_v25, %v637_v21  ;;  %v15919_v51 = vld [vmem:[%s20429_s3 + $0x88] sm:$0xff]  ;;  %v15937_v59 = vld [vmem:[%s20429_s3 + $0xb8] sm:$0xff] }
  0x14   :  { %21005 = vst [vmem:[#allocation11_spill] sm:$0xff] %v15833_v16  ;;  %v15843_v36 = vsub.f32 %v581_v1, %v637_v21  ;;  %v15845_v37 = vsub.f32 %v584_v2, %v641_v25  ;;  %v645_v38 = vand.u32 4294901760, %v587_v15  ;;  %v649_v42 = vand.u32 4294901760, %v590_v32  ;;  %21011 = vst [vmem:[#allocation17_spill] sm:$0xff] %v15932_v58  ;;  %v15953_v0 = vld [vmem:[%s20429_s3 + $0xd0] sm:$0xff] }
  0x15   :  { %13715 = vmatpush1.bf16.msra.mxu1 %v15815_v5  ;;  %21006 = vst [vmem:[#allocation12_spill] sm:$0xff] %v15841_v33  ;;  %v15848_v39 = vpack.c.bf16 %v647_v31, %v643_v26  ;;  %v15850_v40 = vsub.f32 %v588_v10, %v643_v26  ;;  %v15852_v41 = vsub.f32 %v591_v11, %v647_v31  ;;  %v20445_v56 = vand.u32 4294901760, %v15919_v51  ;;  %v594_v11 = vld [vmem:[%s20429_s3 + $0xf8] sm:$0xff]  ;;  %v593_v26 = vld [vmem:[%s20429_s3 + $0xf0] sm:$0xff]  ;;  %v596_v31 = vld [vmem:[%s20429_s3 + $0x108] sm:$0xff] }
  0x16   :  { %13717 = vmatprep.subr.bf16.mxu1 %v15833_v16  ;;  %v15855_v43 = vsub.f32 %v587_v15, %v645_v38  ;;  %v15861_v44 = vpack.c.bf16 %v649_v42, %v645_v38  ;;  %v15863_v45 = vsub.f32 %v590_v32, %v649_v42  ;;  %21012 = vst [vmem:[#allocation18_spill] sm:$0xff] %v15937_v59  ;;  %v20444_v61 = vand.u32 4294901760, %v15932_v58  ;;  %v597_v15 = vld [vmem:[%s20429_s3 + $0x110] sm:$0xff]  ;;  %v15996_v32 = vld [vmem:[%s20429_s3 + $0x100] sm:$0xff] }
  0x17   :  { %21007 = vst [vmem:[#allocation13_spill] sm:$0xff] %v15848_v39  ;;  %12230 = vmatmul.mubr.f32.vlgmr.msra.gmra.mrb[0].mxu0 %v15699_v9  ;;  %v20443_v62 = vand.u32 4294901760, %v15937_v59  ;;  %21014 = vst [vmem:[#allocation20_spill] sm:$0xff] %v15953_v0  ;;  %v20442_v2 = vand.u32 4294901760, %v15953_v0  ;;  %v651_v21 = vand.u32 4294901760, %v594_v11  ;;  %v655_v25 = vand.u32 4294901760, %v597_v15 }
  0x18   :  { %12233 = vmatpush3.msra.mxu0 %v15721_v19  ;;  %12234 = vmatprep.mubr.f32.mxu0 %v15715_v17  ;;  %21008 = vst [vmem:[#allocation14_spill] sm:$0xff] %v15861_v44  ;;  %v15875_v19 = vld [vmem:[%s20429_s3 + $0x10] sm:$0xff]  ;;  %v653_v38 = vand.u32 4294901760, %v593_v26  ;;  %v657_v42 = vand.u32 4294901760, %v596_v31  ;;  %vm2227_vm2 = vcmask 392192   ;;  %vm3014_vm3 = vcmask 130048  }
  0x19   :  { %12237 = vmatprep.subr.mxu0 %v15695_v7  ;;  %13719 = vmatpush1.bf16.msra.mxu1 %v15841_v33  ;;  %v20450_v17 = vand.u32 4294901760, %v15875_v19  ;;  %v15966_v1 = vpack.c.bf16 %v20443_v62, %v20444_v61  ;;  %v16004_v62 = vpack.c.bf16 %v655_v25, %v651_v21  ;;  %v16053_v3 = vsub.f32 %v594_v11, %v651_v21  ;;  %v608_v11 = vld [vmem:[%s20429_s3 + $0x168] sm:$0xff] }
  0x1a   :  { %13721 = vmatprep.subr.bf16.mxu1 %v15848_v39  ;;  %v16055_v33 = vsub.f32 %v597_v15, %v655_v25  ;;  %v16073_v15 = vld [vmem:[%s20429_s3 + $0x160] sm:$0xff]  ;;  %v16075_v21 = vsub.f32 %v593_v26, %v653_v38  ;;  %v16077_v25 = vsub.f32 %v596_v31, %v657_v42 }
  0x1b   :  { %21016 = vst [vmem:[#allocation22_spill] sm:$0xff] %v15966_v1  ;;  %21018 = vst [vmem:[#allocation24_spill] sm:$0xff] %v16004_v62 }
  0x1d   :  { %13723 = vmatpush1.bf16.msra.mxu1 %v15861_v44  ;;  %v599_v44 = vld [vmem:[%s20429_s3 + $0x120] sm:$0xff] }
  0x1e   :  { %13725 = vmatprep.subr.bf16.mxu1 %v16004_v62  ;;  %v16031_v62 = vld [vmem:[%s20429_s3 + $0x130] sm:$0xff]  ;;  %v661_v39 = vand.u32 4294901760, %v599_v44 }
  0x1f   :  { %12235 = vmatmul.mubr.f32.vlgmr.msra.gmra.mrb[0].mxu0 %v15718_v18  ;;  %v15898_v18 = vld [vmem:[%s20429_s3 + $0x40] sm:$0xff]  ;;  %v21023_v16 = vand.u32 4294901760, %v16031_v62 }
  0x20   :  { %12238 = vmatpush3.msra.mxu0 %v15695_v7  ;;  %12239 = vmatprep.mubr.f32.mxu0 %v142_v27  ;;  %v20449_v27 = vand.u32 4294901760, %v15880_v46  ;;  %v16089_v34 = vsub.f32 %v599_v44, %v661_v39 }
  0x21   :  { %12242 = vmatprep.subr.mxu0 %v15739_v29 }
  0x22   :  { %v15893_v47 = vpack.c.bf16 %v20449_v27, %v20450_v17  ;;  %21028 = vst [vmem:[#allocation32_spill] sm:$0xff] %v16089_v34 }
  0x24   :  { %21009 = vst [vmem:[#allocation15_spill] sm:$0xff] %v15893_v47 }
  0x27   :  { %12240 = vmatmul.mubr.f32.vlgmr.msra.gmra.mrb[0].mxu0 %v152_v28  ;;  %v15903_v28 = vld [vmem:[%s20429_s3 + $0x58] sm:$0xff] }
  0x28   :  { %12243 = vmatpush3.msra.mxu0 %v15739_v29  ;;  %12244 = vmatprep.mubr.f32.mxu0 %v15697_v8  ;;  %v20448_v29 = vand.u32 4294901760, %v15898_v18  ;;  %v20447_v49 = vand.u32 4294901760, %v15903_v28 }
  0x29   :  { %12247 = vmatprep.subr.mxu0 %v15695_v7 }
  0x2f   :  { %12245 = vmatmul.mubr.f32.vlgmr.msra.gmra.mrb[0].mxu0 %v15699_v9 }
  0x30   :  { %12248 = vmatpush3.msra.mxu0 %v15695_v7  ;;  %12249 = vmatprep.mubr.f32.mxu0 %v15697_v8  ;;  %v15925_v7 = vpack.c.bf16 %v20447_v49, %v20448_v29  ;;  %v20446_v8 = vand.u32 4294901760, %v15914_v50  ;;  %v603_v49 = vld [vmem:[%s20429_s3 + $0x140] sm:$0xff] }
  0x31   :  { %13897 = vmatprep.subr.bf16.mxu0 %v15893_v47  ;;  %v663_v17 = vand.u32 4294901760, %v603_v49 }
  0x32   :  { %21010 = vst [vmem:[#allocation16_spill] sm:$0xff] %v15925_v7  ;;  %v15946_v60 = vpack.c.bf16 %v20445_v56, %v20446_v8  ;;  %v16007_v56 = vpack.c.bf16 %v657_v42, %v653_v38  ;;  %v600_v8 = vld [vmem:[%s20429_s3 + $0x128] sm:$0xff] }
  0x33   :  { %v659_v27 = vand.u32 4294901760, %v600_v8 }
  0x34   :  { %21013 = vst [vmem:[#allocation19_spill] sm:$0xff] %v15946_v60  ;;  %21019 = vst [vmem:[#allocation25_spill] sm:$0xff] %v16007_v56  ;;  %13727 = vmatpush1.bf16.msra.mxu1 %v16007_v56  ;;  %v606_v56 = vld [vmem:[%s20429_s3 + $0x158] sm:$0xff] }
  0x37   :  { %12250 = vmatmul.mubr.f32.vlgmr.msra.gmra.mrb[0].mxu0 %v15699_v9  ;;  %v15958_v9 = vld [vmem:[%s20429_s3 + $0xe8] sm:$0xff] }
  0x38   :  { %13899 = vmatpush3.bf16.msra.mxu0 %v15893_v47  ;;  %21015 = vst [vmem:[#allocation21_spill] sm:$0xff] %v15958_v9  ;;  %v20441_v6 = vand.u32 4294901760, %v15958_v9 }
  0x39   :  { %13901 = vmatprep.subr.bf16.mxu0 %v15925_v7 }
  0x3a   :  { %v15976_v10 = vpack.c.bf16 %v20441_v6, %v20442_v2  ;;  %v16001_v6 = vld [vmem:[%s20429_s3 + $0x118] sm:$0xff]  ;;  %v20460_v2 = vand.u32 4294901760, %v15996_v32 }
  0x3b   :  { %v20459_v61 = vand.u32 4294901760, %v16001_v6 }
  0x3c   :  { %13903 = vmatpush3.bf16.msra.mxu0 %v15925_v7  ;;  %21017 = vst [vmem:[#allocation23_spill] sm:$0xff] %v15976_v10  ;;  %v667_v7 = vand.u32 4294901760, %v606_v56 }
  0x3d   :  { %13905 = vmatprep.subr.bf16.mxu0 %v15946_v60  ;;  %v16020_v29 = vpack.c.bf16 %v20459_v61, %v20460_v2  ;;  %v16037_v2 = vld [vmem:[%s20429_s3 + $0x148] sm:$0xff] }
  0x3e   :  { %v16094_v31 = vsub.f32 %v606_v56, %v667_v7 }
  0x3f   :  { %21020 = vst [vmem:[#allocation26_spill] sm:$0xff] %v16020_v29 }
  0x40   :  { %13907 = vmatpush3.bf16.msra.mxu0 %v15946_v60  ;;  %v609_v60 = vld [vmem:[%s20429_s3 + $0x170] sm:$0xff]  ;;  %21030 = vst [vmem:[#allocation34_spill] sm:$0xff] %v16094_v31 }
  0x41   :  { %13909 = vmatprep.subr.bf16.mxu0 %v15966_v1  ;;  %v671_v26 = vand.u32 4294901760, %v609_v60 }
  0x43   :  { %v16099_v38 = vpack.c.bf16 %v671_v26, %v667_v7  ;;  %v16101_v42 = vsub.f32 %v609_v60, %v671_v26  ;;  %v20505_v60 = vand.u32 4294901760, %v15741_v30  ;;  %v21037_v26 = vand.u32 4294901760, %v15875_v19 }
  0x44   :  { %13911 = vmatpush3.bf16.msra.mxu0 %v15966_v1  ;;  %v16041_v1 = vpack.c.bf16 %v663_v17, %v659_v27 }
  0x45   :  { %13913 = vmatprep.subr.bf16.mxu0 %v15976_v10  ;;  %21031 = vst [vmem:[#allocation35_spill] sm:$0xff] %v16099_v38  ;;  %21032 = vst [vmem:[#allocation36_spill] sm:$0xff] %v16101_v42 }
  0x46   :  { %21021 = vst [vmem:[#allocation27_spill] sm:$0xff] %v16041_v1  ;;  %13729 = vmatprep.subr.bf16.mxu1 %v16041_v1  ;;  %v16087_v1 = vld [vmem:[%s20429_s3 + $0x178] sm:$0xff] }
  0x48   :  { %13915 = vmatpush3.bf16.msra.mxu0 %v15976_v10  ;;  %v602_v10 = vld [vmem:[%s20429_s3 + $0x138] sm:$0xff] }
  0x49   :  { %v665_v61 = vand.u32 4294901760, %v602_v10  ;;  %13917 = vmatprep.subr.bf16.mxu0 %v16020_v29 }
  0x4b   :  { %v16045_v5 = vpack.c.bf16 %v665_v61, %v661_v39  ;;  %v16091_v47 = vsub.f32 %v602_v10, %v665_v61  ;;  %v20493_v39 = vand.u32 4294901760, %v15729_v23 }
  0x4c   :  { %13919 = vmatpush3.bf16.msra.mxu0 %v16020_v29  ;;  %v21024_v29 = vand.u32 4294901760, %v16037_v2 }
  0x4d   :  { %21022 = vst [vmem:[#allocation28_spill] sm:$0xff] %v16045_v5  ;;  %13731 = vmatpush1.bf16.msra.mxu1 %v16045_v5  ;;  %21029 = vst [vmem:[#allocation33_spill] sm:$0xff] %v16091_v47  ;;  %v20491_v5 = vmov 0.0   ;;  %v733_v7 = vsub.f32 %v15729_v23, %v20493_v39 }
  0x4e   :  { %v16062_v54 = vpack.c.bf16 %v21024_v29, %v21023_v16  ;;  %v16079_v16 = vsub.f32 %v600_v8, %v659_v27  ;;  %v16081_v29 = vsub.f32 %v603_v49, %v663_v17  ;;  %v669_v17 = vand.u32 4294901760, %v605_v52  ;;  %707 = vmatprep.mubr.f32.mxu1 %v20491_v5  ;;  %13733 = vmatprep.subr.bf16.mxu1 %v16099_v38 }
  0x4f   :  { %v673_v27 = vand.u32 4294901760, %v608_v11  ;;  %v20495_v49 = vand.u32 4294901760, %v16073_v15  ;;  %v20494_v8 = vand.u32 4294901760, %v16087_v1 }
  0x50   :  { %21025 = vst [vmem:[#allocation29_spill] sm:$0xff] %v16062_v54  ;;  %21026 = vst [vmem:[#allocation30_spill] sm:$0xff] %v16079_v16  ;;  %13921 = vmatprep.subr.bf16.mxu0 %v16062_v54  ;;  %v16106_v61 = vsub.f32 %v605_v52, %v669_v17  ;;  %v20498_v52 = vand.u32 4294901760, %v15731_v24 }
  0x51   :  { %21027 = vst [vmem:[#allocation31_spill] sm:$0xff] %v16081_v29  ;;  %13923 = vmatpush3.bf16.msra.mxu0 %v16062_v54  ;;  %v16104_v44 = vpack.c.bf16 %v673_v27, %v669_v17  ;;  %v16108_v56 = vsub.f32 %v608_v11, %v673_v27  ;;  %v16114_v10 = vpack.c.bf16 %v20494_v8, %v20495_v49  ;;  %v21039_v27 = vand.u32 4294901760, %v15880_v46 }
  0x52   :  { %21034 = vst [vmem:[#allocation38_spill] sm:$0xff] %v16106_v61  ;;  %v16129_v17 = vsub.f32 %v15875_v19, %v21037_v26  ;;  %v734_v49 = vand.u32 4294901760, %v733_v7  ;;  %v745_v11 = vsub.f32 %v15731_v24, %v20498_v52  ;;  %v739_v19 = vsub.f32 %v15741_v30, %v20505_v60 }
  0x53   :  { %21033 = vst [vmem:[#allocation37_spill] sm:$0xff] %v16104_v44  ;;  %21035 = vst [vmem:[#allocation39_spill] sm:$0xff] %v16108_v56  ;;  %13735 = vmatpush1.bf16.msra.mxu1 %v16104_v44  ;;  %13925 = vmatprep.subr.bf16.mxu0 %v16114_v10  ;;  %v16134_v5 = vsub.f32 %v15880_v46, %v21039_v27  ;;  %v21041_v26 = vand.u32 4294901760, %v15755_v35  ;;  %v21042_v8 = vand.u32 4294901760, %v15772_v48  ;;  %v21043_v44 = vand.u32 4294901760, %v15785_v53 }
  0x54   :  { %21036 = vst [vmem:[#allocation40_spill] sm:$0xff] %v16114_v10  ;;  %21038 = vst [vmem:[#allocation41_spill] sm:$0xff] %v16129_v17  ;;  %v20516_v27 = vand.u32 4294901760, %v16129_v17  ;;  %v740_v38 = vand.u32 4294901760, %v739_v19  ;;  %v20519_v60 = vand.u32 4294901760, %v15789_v55 }
  0x55   :  { %21040 = vst [vmem:[#allocation42_spill] sm:$0xff] %v16134_v5  ;;  %13927 = vmatpush3.bf16.msra.mxu0 %v16114_v10  ;;  %v751_v46 = vsub.f32 %v15755_v35, %v21041_v26  ;;  %v20521_v39 = vand.u32 4294901760, %v16134_v5  ;;  %v757_v7 = vsub.f32 %v15772_v48, %v21042_v8  ;;  %v769_v52 = vsub.f32 %v15785_v53, %v21043_v44 }
  0x56   :  { %v746_v10 = vand.u32 4294901760, %v745_v11  ;;  %v1620_v26 = vsub.f32 %v16129_v17, %v20516_v27  ;;  %v763_v44 = vsub.f32 %v15789_v55, %v20519_v60  ;;  %v20518_v11 = vand.u32 4294901760, %v15794_v57 }
  0x57   :  { %v752_v54 = vand.u32 4294901760, %v751_v46  ;;  %v1627_v22 = vsub.f32 %v16134_v5, %v20521_v39  ;;  %v758_v9 = vand.u32 4294901760, %v757_v7  ;;  %v770_v0 = vand.u32 4294901760, %v769_v52 }
  0x58   :  { %v13736_v8 = vpack.c.bf16 %v746_v10, %v734_v49  ;;  %v1621_v19 = vand.u32 4294901760, %v1620_v26  ;;  %v764_v27 = vand.u32 4294901760, %v763_v44  ;;  %v775_v7 = vsub.f32 %v15794_v57, %v20518_v11 }
  0x59   :  { %v16163_v59 = vpack.c.bf16 %v752_v54, %v740_v38  ;;  %v1628_v46 = vand.u32 4294901760, %v1627_v22  ;;  %v16169_v58 = vpack.c.bf16 %v770_v0, %v758_v9  ;;  %v20517_v49 = vand.u32 4294901760, %v15801_v63 }
  0x5a   :  { %13737 = vmatprep.subr.bf16.mxu1 %v13736_v8  ;;  %v20520_v38 = vand.u32 4294901760, %v15813_v4  ;;  %v20528_v10 = vand.u32 4294901760, %v15823_v12  ;;  %v776_v52 = vand.u32 4294901760, %v775_v7  ;;  %v20525_v0 = vand.u32 4294901760, %v15825_v13 }
  0x5b   :  { %21044 = vst [vmem:[#allocation43_spill] sm:$0xff] %v16169_v58  ;;  %v16175_v54 = vpack.c.bf16 %v1628_v46, %v1621_v19  ;;  %v781_v22 = vsub.f32 %v15801_v63, %v20517_v49  ;;  %v20522_v11 = vand.u32 4294901760, %v15827_v14  ;;  %v20524_v39 = vand.u32 4294901760, %v15843_v36 }
  0x5c   :  { %v793_v9 = vsub.f32 %v15813_v4, %v20520_v38  ;;  %v787_v26 = vsub.f32 %v15823_v12, %v20528_v10  ;;  %v16190_v8 = vpack.c.bf16 %v776_v52, %v764_v27  ;;  %v799_v19 = vsub.f32 %v15825_v13, %v20525_v0 }
  0x5d   :  { %13929 = vmatprep.subr.bf16.mxu0 %v16175_v54  ;;  %v782_v44 = vand.u32 4294901760, %v781_v22  ;;  %v20523_v38 = vand.u32 4294901760, %v15835_v20  ;;  %v805_v27 = vsub.f32 %v15827_v14, %v20522_v11  ;;  %v811_v22 = vsub.f32 %v15843_v36, %v20524_v39 }
  0x5e   :  { %21045 = vst [vmem:[#allocation44_spill] sm:$0xff] %v16190_v8  ;;  %v794_v46 = vand.u32 4294901760, %v793_v9  ;;  %v788_v7 = vand.u32 4294901760, %v787_v26  ;;  %v800_v49 = vand.u32 4294901760, %v799_v19  ;;  %v20526_v9 = vand.u32 4294901760, %v15845_v37 }
  0x5f   :  { %v817_v52 = vsub.f32 %v15835_v20, %v20523_v38  ;;  %v806_v26 = vand.u32 4294901760, %v805_v27  ;;  %v812_v19 = vand.u32 4294901760, %v811_v22  ;;  %v20529_v0 = vand.u32 4294901760, %v15855_v43 }
  0x60   :  { %v16196_v60 = vpack.c.bf16 %v794_v46, %v782_v44  ;;  %v16200_v58 = vpack.c.bf16 %v800_v49, %v788_v7  ;;  %v823_v49 = vsub.f32 %v15845_v37, %v20526_v9  ;;  %v20527_v46 = vand.u32 4294901760, %v15850_v40 }
  0x61   :  { %v818_v44 = vand.u32 4294901760, %v817_v52  ;;  %v20532_v7 = vand.u32 4294901760, %v15852_v41  ;;  %v835_v9 = vsub.f32 %v15855_v43, %v20529_v0  ;;  %v20531_v10 = vand.u32 4294901760, %v16053_v3 }
  0x62   :  { %21046 = vst [vmem:[#allocation45_spill] sm:$0xff] %v16196_v60  ;;  %21047 = vst [vmem:[#allocation46_spill] sm:$0xff] %v16200_v58  ;;  %v824_v38 = vand.u32 4294901760, %v823_v49  ;;  %v829_v39 = vsub.f32 %v15850_v40, %v20527_v46  ;;  %v20535_v0 = vand.u32 4294901760, %v16075_v21  ;;  %v21054_v58 = vand.u32 4294901760, %v16001_v6 }
  0x63   :  { %v16217_v11 = vpack.c.bf16 %v818_v44, %v806_v26  ;;  %v841_v27 = vsub.f32 %v15852_v41, %v20532_v7  ;;  %v20530_v26 = vand.u32 4294901760, %v15863_v45  ;;  %v836_v49 = vand.u32 4294901760, %v835_v9 }
  0x64   :  { %v16226_v52 = vpack.c.bf16 %v824_v38, %v812_v19  ;;  %v830_v22 = vand.u32 4294901760, %v829_v39  ;;  %v20533_v38 = vand.u32 4294901760, %v16055_v33  ;;  %v853_v39 = vsub.f32 %v16053_v3, %v20531_v10 }
  0x65   :  { %21048 = vst [vmem:[#allocation47_spill] sm:$0xff] %v16217_v11  ;;  %v842_v44 = vand.u32 4294901760, %v841_v27  ;;  %v847_v46 = vsub.f32 %v15863_v45, %v20530_v26  ;;  %v20534_v27 = vand.u32 4294901760, %v16077_v25  ;;  %v21051_v26 = vand.u32 4294901760, %v15996_v32 }
  0x66   :  { %21049 = vst [vmem:[#allocation48_spill] sm:$0xff] %v16226_v52  ;;  %v865_v9 = vsub.f32 %v16055_v33, %v20533_v38  ;;  %v859_v10 = vsub.f32 %v16075_v21, %v20535_v0  ;;  %v20544_v60 = vand.u32 4294901760, %v16101_v42 }
  0x67   :  { %v16236_v11 = vpack.c.bf16 %v842_v44, %v830_v22  ;;  %v848_v19 = vand.u32 4294901760, %v847_v46  ;;  %v16250_v22 = vsub.f32 %v15996_v32, %v21051_v26  ;;  %v854_v46 = vand.u32 4294901760, %v853_v39 }
  0x68   :  { %v866_v7 = vand.u32 4294901760, %v865_v9  ;;  %v860_v52 = vand.u32 4294901760, %v859_v10  ;;  %v16264_v32 = vsub.f32 %v16001_v6, %v21054_v58  ;;  %v20537_v26 = vand.u32 4294901760, %v16079_v16 }
  0x69   :  { %21050 = vst [vmem:[#allocation49_spill] sm:$0xff] %v16236_v11  ;;  %21052 = vst [vmem:[#allocation50_spill] sm:$0xff] %v16250_v22  ;;  %v16252_v44 = vpack.c.bf16 %v848_v19, %v836_v49  ;;  %v871_v11 = vsub.f32 %v16077_v25, %v20534_v27  ;;  %v20536_v38 = vand.u32 4294901760, %v16250_v22  ;;  %v20538_v9 = vand.u32 4294901760, %v16081_v29 }
  0x6a   :  { %21055 = vst [vmem:[#allocation52_spill] sm:$0xff] %v16264_v32  ;;  %v16267_v49 = vpack.c.bf16 %v866_v7, %v854_v46  ;;  %v20539_v27 = vand.u32 4294901760, %v16264_v32  ;;  %v877_v10 = vsub.f32 %v16079_v16, %v20537_v26  ;;  %v20540_v58 = vand.u32 4294901760, %v16089_v34 }
  0x6b   :  { %21053 = vst [vmem:[#allocation51_spill] sm:$0xff] %v16252_v44  ;;  %v872_v19 = vand.u32 4294901760, %v871_v11  ;;  %v1690_v39 = vsub.f32 %v16250_v22, %v20536_v38  ;;  %v889_v11 = vsub.f32 %v16081_v29, %v20538_v9  ;;  %v20541_v7 = vand.u32 4294901760, %v16091_v47 }
  0x6c   :  { %21056 = vst [vmem:[#allocation53_spill] sm:$0xff] %v16267_v49  ;;  %v1697_v46 = vsub.f32 %v16264_v32, %v20539_v27  ;;  %v878_v38 = vand.u32 4294901760, %v877_v10  ;;  %v883_v26 = vsub.f32 %v16089_v34, %v20540_v58  ;;  %v21058_v49 = vand.u32 4294901760, %v16031_v62 }
  0x6d   :  { %v16278_v6 = vpack.c.bf16 %v872_v19, %v860_v52  ;;  %v1691_v0 = vand.u32 4294901760, %v1690_v39  ;;  %v890_v19 = vand.u32 4294901760, %v889_v11  ;;  %v895_v39 = vsub.f32 %v16091_v47, %v20541_v7 }
  0x6e   :  { %v16293_v52 = vsub.f32 %v16031_v62, %v21058_v49  ;;  %v21060_v9 = vand.u32 4294901760, %v16037_v2  ;;  %v20542_v10 = vand.u32 4294901760, %v16094_v31  ;;  %v1698_v27 = vand.u32 4294901760, %v1697_v46 }
  0x6f   :  { %21057 = vst [vmem:[#allocation54_spill] sm:$0xff] %v16278_v6  ;;  %v884_v44 = vand.u32 4294901760, %v883_v26  ;;  %v16306_v62 = vpack.c.bf16 %v890_v19, %v878_v38  ;;  %v896_v49 = vand.u32 4294901760, %v895_v39  ;;  %v913_v26 = vsub.f32 %v16101_v42, %v20544_v60  ;;  %v21087_v42 = vld [vmem:[#allocation21_spill] sm:$0xff] }
  0x70   :  { %21059 = vst [vmem:[#allocation55_spill] sm:$0xff] %v16293_v52  ;;  %v16301_v6 = vsub.f32 %v16037_v2, %v21060_v9  ;;  %v20543_v58 = vand.u32 4294901760, %v16293_v52  ;;  %v901_v7 = vsub.f32 %v16094_v31, %v20542_v10  ;;  %v16312_v8 = vpack.c.bf16 %v1698_v27, %v1691_v0 }
  0x71   :  { %v20546_v38 = vand.u32 4294901760, %v16106_v61  ;;  %v16321_v9 = vpack.c.bf16 %v896_v49, %v884_v44  ;;  %v20547_v0 = vand.u32 4294901760, %v16108_v56  ;;  %v914_v39 = vand.u32 4294901760, %v913_v26 }
  0x72   :  { %21061 = vst [vmem:[#allocation56_spill] sm:$0xff] %v16301_v6  ;;  %v20545_v11 = vand.u32 4294901760, %v16301_v6  ;;  %v1704_v2 = vsub.f32 %v16293_v52, %v20543_v58  ;;  %v902_v19 = vand.u32 4294901760, %v901_v7  ;;  %v21063_v58 = vand.u32 4294901760, %v16073_v15 }
  0x73   :  { %21062 = vst [vmem:[#allocation57_spill] sm:$0xff] %v16321_v9  ;;  %v907_v10 = vsub.f32 %v16106_v61, %v20546_v38  ;;  %v919_v49 = vsub.f32 %v16108_v56, %v20547_v0  ;;  %v21065_v7 = vand.u32 4294901760, %v16087_v1  ;;  %v21085_v56 = vld [vmem:[#allocation20_spill] sm:$0xff]  ;;  %v21088_v34 = vand.u32 4294901760, %v21087_v42 }
  0x74   :  { %v1711_v46 = vsub.f32 %v16301_v6, %v20545_v11  ;;  %v1705_v27 = vand.u32 4294901760, %v1704_v2  ;;  %v16333_v60 = vsub.f32 %v16073_v15, %v21063_v58  ;;  %v16345_v26 = vpack.c.bf16 %v914_v39, %v902_v19 }
  0x75   :  { %v16341_v11 = vsub.f32 %v16087_v1, %v21065_v7  ;;  %v908_v38 = vand.u32 4294901760, %v907_v10  ;;  %v16355_v1 = vpack.c.bf16 %v16134_v5, %v16129_v17 }
  0x76   :  { %21064 = vst [vmem:[#allocation58_spill] sm:$0xff] %v16333_v60  ;;  %v1712_v44 = vand.u32 4294901760, %v1711_v46  ;;  %v20548_v9 = vand.u32 4294901760, %v16333_v60  ;;  %v920_v46 = vand.u32 4294901760, %v919_v49 }
  0x77   :  { %21066 = vst [vmem:[#allocation59_spill] sm:$0xff] %v16341_v11  ;;  %v20549_v0 = vand.u32 4294901760, %v16341_v11 }
  0x78   :  { %v16350_v58 = vpack.c.bf16 %v1712_v44, %v1705_v27  ;;  %v1718_v19 = vsub.f32 %v16333_v60, %v20548_v9  ;;  %v16364_v7 = vpack.c.bf16 %v920_v46, %v908_v38  ;;  %v16389_v9 = vpack.c.bf16 %v16264_v32, %v16250_v22 }
  0x79   :  { %v1725_v27 = vsub.f32 %v16341_v11, %v20549_v0  ;;  %v16405_v44 = vpack.c.bf16 %v16341_v11, %v16333_v60  ;;  %v21070_v38 = vand.u32 4294901760, %v15903_v28  ;;  %v21072_v11 = vand.u32 4294901760, %v15919_v51 }
  0x7a   :  { %v1719_v15 = vand.u32 4294901760, %v1718_v19 }
  0x7b   :  { %v1726_v39 = vand.u32 4294901760, %v1725_v27  ;;  %21068 = vst [vmem:[#allocation61_spill] sm:$0xff] %v16405_v44  ;;  %v21069_v27 = vand.u32 4294901760, %v15898_v18  ;;  %v16415_v49 = vsub.f32 %v15903_v28, %v21070_v38  ;;  %v16425_v60 = vsub.f32 %v15919_v51, %v21072_v11  ;;  %v21075_v11 = vld [vmem:[#allocation17_spill] sm:$0xff] }
  0x7c   :  { %v21086_v44 = vand.u32 4294901760, %v21085_v56 }
  0x7d   :  { %v16381_v0 = vpack.c.bf16 %v1726_v39, %v1719_v15  ;;  %v16397_v15 = vpack.c.bf16 %v16301_v6, %v16293_v52  ;;  %v16410_v10 = vsub.f32 %v15898_v18, %v21069_v27  ;;  %v21071_v6 = vand.u32 4294901760, %v15914_v50 }
  0x7e   :  { %v16484_v31 = vsub.f32 %v21085_v56, %v21086_v44 }
  0x7f   :  { %21067 = vst [vmem:[#allocation60_spill] sm:$0xff] %v16397_v15  ;;  %v16420_v19 = vsub.f32 %v15914_v50, %v21071_v6  ;;  %v21080_v51 = vand.u32 4294901760, %v16410_v10 }
  0x81   :  { %v1634_v6 = vsub.f32 %v16410_v10, %v21080_v51 }
  0x83   :  { %v56_v46 = vpop.permute.xlu0 %55  ;;  %v1635_v47 = vand.u32 4294901760, %v1634_v6 }
  0x87   :  { %v61_v2 = vpop.permute.xlu0 %60 }
 0x10a   :  { %v12251_v39 = vpop.f32.mrb[0].mxu0 }
 0x10b   :  { %v16427_v52 = vadd.f32 %v12251_v39, %v61_v2  ;;  %v553_v18 = vpop.f32.mrb[1].mxu0  ;;  %v21076_v2 = vand.u32 4294901760, %v21075_v11 }
 0x10c   :  { %v16429_v27 = vadd.f32 %v553_v18, %v56_v46  ;;  %v21078_v18 = vld [vmem:[#allocation18_spill] sm:$0xff] }
 0x10d   :  { %21073 = vst [vmem:[#allocation62_spill] sm:$0xff] %v16427_v52  ;;  %v16434_v32 = vand.u32 4294901760, %v16427_v52  ;;  %v16444_v39 = vsub.f32 %v21075_v11, %v21076_v2  ;;  %v21079_v38 = vand.u32 4294901760, %v21078_v18  ;;  %v21081_v11 = vand.u32 4294901760, %v16415_v49 }
 0x10e   :  { %21074 = vst [vmem:[#allocation63_spill] sm:$0xff] %v16429_v27  ;;  %v16437_v50 = vand.u32 4294901760, %v16429_v27 }
 0x10f   :  { %v16448_v46 = vsub.f32 %v16427_v52, %v16434_v32  ;;  %v16453_v28 = vsub.f32 %v21078_v18, %v21079_v38  ;;  %v1641_v2 = vsub.f32 %v16415_v49, %v21081_v11  ;;  %v21083_v38 = vand.u32 4294901760, %v16420_v19 }
 0x110   :  { %v16457_v22 = vsub.f32 %v16429_v27, %v16437_v50  ;;  %v21084_v27 = vand.u32 4294901760, %v16425_v60  ;;  %v21089_v11 = vand.u32 4294901760, %v16444_v39 }
 0x111   :  { %21077 = vst [vmem:[#allocation17_spill] sm:$0xff] %v16448_v46  ;;  %v16466_v52 = vand.u32 4294901760, %v16448_v46  ;;  %v1648_v18 = vsub.f32 %v16420_v19, %v21083_v38  ;;  %v16489_v38 = vsub.f32 %v21087_v42, %v21088_v34  ;;  %v1642_v51 = vand.u32 4294901760, %v1641_v2  ;;  %v21092_v2 = vld [vmem:[#allocation43_spill] sm:$0xff] }
 0x112   :  { %v16469_v5 = vand.u32 4294901760, %v16457_v22  ;;  %v1655_v17 = vsub.f32 %v16425_v60, %v21084_v27  ;;  %v21090_v56 = vand.u32 4294901760, %v16453_v28  ;;  %v20583_v34 = vand.u32 4294901760, %v16484_v31 }
 0x113   :  { %21082 = vst [vmem:[#allocation18_spill] sm:$0xff] %v16466_v52  ;;  %v722_v61 = vsub.f32 %v16448_v46, %v16466_v52  ;;  %v1649_v16 = vand.u32 4294901760, %v1648_v18  ;;  %v1662_v46 = vsub.f32 %v16444_v39, %v21089_v11  ;;  %v20582_v42 = vand.u32 4294901760, %v16489_v38 }
 0x114   :  { %v711_v27 = vsub.f32 %v16457_v22, %v16469_v5  ;;  %v1656_v52 = vand.u32 4294901760, %v1655_v17  ;;  %v1669_v44 = vsub.f32 %v16453_v28, %v21090_v56  ;;  %v13932_v6 = vpack.c.bf16 %v1642_v51, %v1635_v47  ;;  %v21096_v51 = vld [vmem:[#allocation47_spill] sm:$0xff] }
 0x115   :  { %v723_v29 = vand.u32 4294901760, %v722_v61  ;;  %v21091_v61 = vmov 0.0   ;;  %v1663_v18 = vand.u32 4294901760, %v1662_v46  ;;  %v1683_v47 = vsub.f32 %v16489_v38, %v20582_v42  ;;  %v21095_v46 = vld [vmem:[#allocation46_spill] sm:$0xff]  ;;  %v21148_v42 = vld [vmem:[#allocation27_spill] sm:$0xff] }
 0x116   :  { %v712_v15 = vand.u32 4294901760, %v711_v27  ;;  %v13936_v17 = vpack.c.bf16 %v1656_v52, %v1649_v16  ;;  %v1670_v11 = vand.u32 4294901760, %v1669_v44  ;;  %v1676_v27 = vsub.f32 %v16484_v31, %v20583_v34  ;;  %v21094_v16 = vld [vmem:[#allocation45_spill] sm:$0xff] }
 0x117   :  { %v21098_v44 = vld [vmem:[#allocation49_spill] sm:$0xff] }
 0x118   :  { %713 = vmatmul.mubr.f32.vlgmr.msra.gmra.mrb[0].mxu1 %v712_v15  ;;  %12284 = vmatprep.mubr.f32.mxu0 %v712_v15  ;;  %v1677_v52 = vand.u32 4294901760, %v1676_v27  ;;  %v1684_v15 = vand.u32 4294901760, %v1683_v47  ;;  %v21108_v27 = vpack.c.bf16 %v15825_v13, %v15823_v12  ;;  %v21109_v47 = vpack.c.bf16 %v15835_v20, %v15827_v14  ;;  %v21149_v34 = vld [vmem:[#allocation29_spill] sm:$0xff] }
 0x119   :  { %13739 = vmatpush1.bf16.msra.mxu1 %v16163_v59  ;;  %12285 = vmatmul.mubr.f32.vlgmr.msra.gmra.mrb[2].mxu0 %v723_v29  ;;  %v21093_v59 = vld [vmem:[#allocation44_spill] sm:$0xff] }
 0x11a   :  { %13931 = vmatpush3.bf16.msra.mxu0 %v16175_v54  ;;  %12319 = vmatprep.mubr.f32.mxu0 %v16437_v50  ;;  %v13940_v54 = vpack.c.bf16 %v1670_v11, %v1663_v18  ;;  %v13944_v56 = vpack.c.bf16 %v1684_v15, %v1677_v52  ;;  %v21101_v18 = vld [vmem:[#allocation54_spill] sm:$0xff]  ;;  %v21103_v11 = vpack.c.bf16 %v15731_v24, %v15729_v23 }
 0x11b   :  { %718 = vmatprep.mubr.f32.mxu1 %v21091_v61  ;;  %13741 = vmatprep.subr.bf16.mxu1 %v21092_v2  ;;  %v21100_v2 = vld [vmem:[#allocation53_spill] sm:$0xff]  ;;  %v21112_v52 = vpack.c.bf16 %v15863_v45, %v15855_v43  ;;  %v21113_v15 = vpack.c.bf16 %v16055_v33, %v16053_v3 }
 0x11c   :  { %724 = vmatmul.mubr.f32.gmra.mrb[2].mxu1 %v723_v29  ;;  %13933 = vmatprep.subr.bf16.mxu0 %v13932_v6  ;;  %v21097_v29 = vld [vmem:[#allocation48_spill] sm:$0xff] }
 0x11d   :  { %13743 = vmatpush1.bf16.msra.mxu1 %v21093_v59  ;;  %954 = vmatprep.mubr.f32.mxu1 %v21091_v61  ;;  %v13976_v59 = vpack.c.bf16 %v16489_v38, %v16484_v31 }
 0x11e   :  { %13935 = vmatpush3.bf16.msra.mxu0 %v13932_v6  ;;  %13745 = vmatprep.subr.bf16.mxu1 %v21094_v16  ;;  %v21099_v6 = vld [vmem:[#allocation51_spill] sm:$0xff]  ;;  %v21110_v16 = vpack.c.bf16 %v15845_v37, %v15843_v36 }
 0x11f   :  { %13937 = vmatprep.subr.bf16.mxu0 %v13936_v17 }
 0x121   :  { %13747 = vmatpush1.bf16.msra.mxu1 %v21095_v46  ;;  %v21114_v46 = vpack.c.bf16 %v16077_v25, %v16075_v21 }
 0x122   :  { %13939 = vmatpush3.bf16.msra.mxu0 %v13936_v17  ;;  %13749 = vmatprep.subr.bf16.mxu1 %v21096_v51  ;;  %v21102_v17 = vld [vmem:[#allocation57_spill] sm:$0xff]  ;;  %v21115_v51 = vld [vmem:[#allocation31_spill] sm:$0xff] }
 0x123   :  { %13941 = vmatprep.subr.bf16.mxu0 %v13940_v54 }
 0x125   :  { %13751 = vmatpush1.bf16.msra.mxu1 %v21097_v29 }
 0x126   :  { %13943 = vmatpush3.bf16.msra.mxu0 %v13940_v54  ;;  %13753 = vmatprep.subr.bf16.mxu1 %v21098_v44  ;;  %v21111_v54 = vpack.c.bf16 %v15852_v41, %v15850_v40  ;;  %v21118_v44 = vld [vmem:[#allocation60_spill] sm:$0xff] }
 0x127   :  { %13945 = vmatprep.subr.bf16.mxu0 %v13944_v56 }
 0x129   :  { %13755 = vmatpush1.bf16.msra.mxu1 %v21099_v6  ;;  %v21119_v6 = vld [vmem:[#allocation33_spill] sm:$0xff] }
 0x12a   :  { %13947 = vmatpush3.bf16.msra.mxu0 %v13944_v56  ;;  %13757 = vmatprep.subr.bf16.mxu1 %v21100_v2  ;;  %v21116_v56 = vld [vmem:[#allocation30_spill] sm:$0xff]  ;;  %v21120_v2 = vld [vmem:[#allocation32_spill] sm:$0xff] }
 0x12b   :  { %13949 = vmatprep.subr.bf16.mxu0 %v16312_v8  ;;  %v21117_v29 = vpack.c.bf16 %v21115_v51, %v21116_v56 }
 0x12d   :  { %13759 = vmatpush1.bf16.msra.mxu1 %v21101_v18  ;;  %v21121_v18 = vpack.c.bf16 %v21119_v6, %v21120_v2 }
 0x12e   :  { %13951 = vmatpush3.bf16.msra.mxu0 %v16312_v8  ;;  %13761 = vmatprep.subr.bf16.mxu1 %v16306_v62  ;;  %v13964_v8 = vpack.c.bf16 %v16415_v49, %v16410_v10  ;;  %v21104_v62 = vpack.c.bf16 %v15755_v35, %v15741_v30 }
 0x12f   :  { %13953 = vmatprep.subr.bf16.mxu0 %v16350_v58 }
 0x131   :  { %13763 = vmatpush1.bf16.msra.mxu1 %v21102_v17  ;;  %v21122_v17 = vld [vmem:[#allocation36_spill] sm:$0xff] }
 0x132   :  { %13955 = vmatpush3.bf16.msra.mxu0 %v16350_v58  ;;  %13765 = vmatprep.subr.bf16.mxu1 %v16345_v26  ;;  %v13968_v26 = vpack.c.bf16 %v16425_v60, %v16420_v19  ;;  %v21106_v58 = vpack.c.bf16 %v15794_v57, %v15789_v55 }
 0x133   :  { %13957 = vmatprep.subr.bf16.mxu0 %v16381_v0 }
 0x135   :  { %13767 = vmatpush1.bf16.msra.mxu1 %v16364_v7  ;;  %v13972_v7 = vpack.c.bf16 %v16453_v28, %v16444_v39 }
 0x136   :  { %13959 = vmatpush3.bf16.msra.mxu0 %v16381_v0  ;;  %13769 = vmatprep.subr.bf16.mxu1 %v21103_v11  ;;  %v21105_v0 = vpack.c.bf16 %v15785_v53, %v15772_v48  ;;  %v21123_v11 = vld [vmem:[#allocation34_spill] sm:$0xff] }
 0x137   :  { %13961 = vmatprep.subr.bf16.mxu0 %v16355_v1 }
 0x138   :  { %956 = vmatmul.mubr.f32.vlgmr.msra.gmra.mrb[0].mxu1 %v16437_v50 }
 0x139   :  { %13771 = vmatpush1.bf16.msra.mxu1 %v21104_v62  ;;  %12320 = vmatmul.mubr.f32.vlgmr.msra.gmra.mrb[2].mxu0 %v16434_v32  ;;  %v21125_v62 = vld [vmem:[#allocation61_spill] sm:$0xff] }
 0x13a   :  { %13963 = vmatpush3.bf16.msra.mxu0 %v16355_v1  ;;  %12354 = vmatprep.mubr.f32.mxu0 %v16457_v22  ;;  %v21107_v1 = vpack.c.bf16 %v15813_v4, %v15801_v63 }
 0x13b   :  { %961 = vmatprep.mubr.f32.mxu1 %v21091_v61  ;;  %13773 = vmatprep.subr.bf16.mxu1 %v21105_v0  ;;  %v21126_v0 = vld [vmem:[#allocation39_spill] sm:$0xff] }
 0x13c   :  { %963 = vmatmul.mubr.f32.gmra.mrb[2].mxu1 %v16434_v32  ;;  %13965 = vmatprep.subr.bf16.mxu0 %v13964_v8 }
 0x13d   :  { %13775 = vmatpush1.bf16.msra.mxu1 %v21106_v58  ;;  %1097 = vmatprep.mubr.f32.mxu1 %v21091_v61  ;;  %v21129_v58 = vld [vmem:[#allocation5_spill] sm:$0xff] }
 0x13e   :  { %13967 = vmatpush3.bf16.msra.mxu0 %v13964_v8  ;;  %13777 = vmatprep.subr.bf16.mxu1 %v21107_v1  ;;  %v21124_v8 = vpack.c.bf16 %v21122_v17, %v21123_v11  ;;  %v21130_v1 = vld [vmem:[#allocation15_spill] sm:$0xff] }
 0x13f   :  { %13969 = vmatprep.subr.bf16.mxu0 %v13968_v26 }
 0x141   :  { %13779 = vmatpush1.bf16.msra.mxu1 %v21108_v27  ;;  %v21132_v27 = vld [vmem:[#allocation17_spill] sm:$0xff] }
 0x142   :  { %13971 = vmatpush3.bf16.msra.mxu0 %v13968_v26  ;;  %13781 = vmatprep.subr.bf16.mxu1 %v21109_v47  ;;  %v21133_v47 = vld [vmem:[#allocation7_spill] sm:$0xff] }
 0x143   :  { %13973 = vmatprep.subr.bf16.mxu0 %v13972_v7 }
 0x145   :  { %13783 = vmatpush1.bf16.msra.mxu1 %v21110_v16  ;;  %v21135_v16 = vld [vmem:[#allocation8_spill] sm:$0xff] }
 0x146   :  { %13975 = vmatpush3.bf16.msra.mxu0 %v13972_v7  ;;  %13785 = vmatprep.subr.bf16.mxu1 %v21111_v54  ;;  %v21131_v7 = vld [vmem:[#allocation6_spill] sm:$0xff]  ;;  %v21137_v54 = vld [vmem:[#allocation19_spill] sm:$0xff] }
 0x147   :  { %13977 = vmatprep.subr.bf16.mxu0 %v13976_v59 }
 0x149   :  { %13787 = vmatpush1.bf16.msra.mxu1 %v21112_v52  ;;  %v21138_v52 = vld [vmem:[#allocation10_spill] sm:$0xff] }
 0x14a   :  { %13979 = vmatpush3.bf16.msra.mxu0 %v13976_v59  ;;  %13789 = vmatprep.subr.bf16.mxu1 %v21113_v15  ;;  %v21134_v59 = vld [vmem:[#allocation16_spill] sm:$0xff]  ;;  %v21139_v15 = vld [vmem:[#allocation11_spill] sm:$0xff] }
 0x14b   :  { %13981 = vmatprep.subr.bf16.mxu0 %v16389_v9 }
 0x14d   :  { %13791 = vmatpush1.bf16.msra.mxu1 %v21114_v46  ;;  %v21140_v46 = vld [vmem:[#allocation22_spill] sm:$0xff] }
 0x14e   :  { %13983 = vmatpush3.bf16.msra.mxu0 %v16389_v9  ;;  %13793 = vmatprep.subr.bf16.mxu1 %v21117_v29  ;;  %v21127_v9 = vld [vmem:[#allocation38_spill] sm:$0xff]  ;;  %v21141_v29 = vld [vmem:[#allocation12_spill] sm:$0xff] }
 0x14f   :  { %13985 = vmatprep.subr.bf16.mxu0 %v21118_v44  ;;  %v21128_v26 = vpack.c.bf16 %v21126_v0, %v21127_v9 }
 0x151   :  { %13795 = vmatpush1.bf16.msra.mxu1 %v21121_v18  ;;  %v21143_v18 = vld [vmem:[#allocation23_spill] sm:$0xff] }
 0x152   :  { %13987 = vmatpush3.bf16.msra.mxu0 %v21118_v44  ;;  %13797 = vmatprep.subr.bf16.mxu1 %v21124_v8  ;;  %v21142_v44 = vld [vmem:[#allocation13_spill] sm:$0xff]  ;;  %v21144_v8 = vld [vmem:[#allocation14_spill] sm:$0xff] }
 0x153   :  { %13989 = vmatprep.subr.bf16.mxu0 %v21125_v62 }
 0x155   :  { %13799 = vmatpush1.bf16.msra.mxu1 %v21128_v26  ;;  %v21146_v26 = vld [vmem:[#allocation26_spill] sm:$0xff] }
 0x156   :  { %13991 = vmatpush3.bf16.msra.mxu0 %v21125_v62  ;;  %13801 = vmatprep.subr.bf16.mxu1 %v21129_v58  ;;  %v21145_v62 = vld [vmem:[#allocation24_spill] sm:$0xff] }
 0x157   :  { %13993 = vmatprep.subr.bf16.mxu0 %v21130_v1 }
 0x158   :  { %1100 = vmatmul.mubr.f32.vlgmr.msra.gmra.mrb[0].mxu1 %v16457_v22  ;;  %v21136_v22 = vld [vmem:[#allocation9_spill] sm:$0xff] }
 0x159   :  { %13803 = vmatpush1.bf16.msra.mxu1 %v21131_v7  ;;  %12355 = vmatmul.mubr.f32.vlgmr.msra.gmra.mrb[2].mxu0 %v21132_v27 }
 0x15a   :  { %13995 = vmatpush3.bf16.msra.mxu0 %v21130_v1  ;;  %12389 = vmatprep.mubr.f32.mxu0 %v16469_v5 }
 0x15b   :  { %1105 = vmatprep.mubr.f32.mxu1 %v21091_v61  ;;  %13805 = vmatprep.subr.bf16.mxu1 %v21133_v47 }
 0x15c   :  { %1108 = vmatmul.mubr.f32.gmra.mrb[2].mxu1 %v21132_v27  ;;  %13997 = vmatprep.subr.bf16.mxu0 %v21134_v59  ;;  %v21147_v27 = vld [vmem:[#allocation25_spill] sm:$0xff] }
 0x15d   :  { %13807 = vmatpush1.bf16.msra.mxu1 %v21135_v16  ;;  %1210 = vmatprep.mubr.f32.mxu1 %v21091_v61 }
 0x15e   :  { %13999 = vmatpush3.bf16.msra.mxu0 %v21134_v59  ;;  %13809 = vmatprep.subr.bf16.mxu1 %v21136_v22 }
 0x15f   :  { %14001 = vmatprep.subr.bf16.mxu0 %v21137_v54 }
 0x161   :  { %13811 = vmatpush1.bf16.msra.mxu1 %v21138_v52 }
 0x162   :  { %14003 = vmatpush3.bf16.msra.mxu0 %v21137_v54  ;;  %13813 = vmatprep.subr.bf16.mxu1 %v21139_v15  ;;  %v21159_v54 = vld [vmem:[#allocation37_spill] sm:$0xff] }
 0x163   :  { %14005 = vmatprep.subr.bf16.mxu0 %v21140_v46 }
 0x165   :  { %13815 = vmatpush1.bf16.msra.mxu1 %v21141_v29  ;;  %v21150_v29 = vld [vmem:[#allocation28_spill] sm:$0xff] }
 0x166   :  { %14007 = vmatpush3.bf16.msra.mxu0 %v21140_v46  ;;  %13817 = vmatprep.subr.bf16.mxu1 %v21142_v44  ;;  %v21151_v44 = vld [vmem:[#allocation35_spill] sm:$0xff]  ;;  %v21154_v46 = vld [vmem:[#allocation40_spill] sm:$0xff] }
 0x167   :  { %14009 = vmatprep.subr.bf16.mxu0 %v21143_v18 }
 0x169   :  { %13819 = vmatpush1.bf16.msra.mxu1 %v21144_v8  ;;  %v21152_v8 = vand.u32 4294901760, %v15729_v23  ;;  %v21162_v23 = vand.u32 4294901760, %v15772_v48  ;;  %v21169_v48 = vand.u32 4294901760, %v15801_v63 }
 0x16a   :  { %14011 = vmatpush3.bf16.msra.mxu0 %v21143_v18  ;;  %13821 = vmatprep.subr.bf16.mxu1 %v21145_v62  ;;  %v21153_v62 = vand.u32 4294901760, %v15731_v24  ;;  %v21163_v24 = vand.u32 4294901760, %v15785_v53  ;;  %v21170_v53 = vand.u32 4294901760, %v15813_v4  ;;  %v21175_v4 = vand.u32 4294901760, %v15827_v14 }
 0x16b   :  { %14013 = vmatprep.subr.bf16.mxu0 %v21146_v26  ;;  %v21182_v14 = vand.u32 4294901760, %v15852_v41 }
 0x16c   :  { %v13832_v18 = vpack.c.bf16 %v21153_v62, %v21152_v8  ;;  %v13836_v8 = vpack.c.bf16 %v21163_v24, %v21162_v23  ;;  %v21181_v23 = vand.u32 4294901760, %v15850_v40  ;;  %v21183_v24 = vand.u32 4294901760, %v16484_v31  ;;  %v21191_v31 = vld [vmem:[#allocation52_spill] sm:$0xff] }
 0x16d   :  { %13823 = vmatpush1.bf16.msra.mxu1 %v21147_v27  ;;  %v21155_v27 = vld [vmem:[#allocation41_spill] sm:$0xff]  ;;  %v21188_v40 = vand.u32 4294901760, %v16055_v33 }
 0x16e   :  { %14015 = vmatpush3.bf16.msra.mxu0 %v21146_v26  ;;  %13825 = vmatprep.subr.bf16.mxu1 %v21148_v42  ;;  %v21156_v15 = vand.u32 4294901760, %v21155_v27  ;;  %v21157_v26 = vld [vmem:[#allocation42_spill] sm:$0xff] }
 0x16f   :  { %14017 = vmatprep.subr.bf16.mxu0 %v21149_v34  ;;  %v21158_v52 = vand.u32 4294901760, %v21157_v26 }
 0x171   :  { %13827 = vmatpush1.bf16.msra.mxu1 %v21150_v29  ;;  %v14024_v42 = vpack.c.bf16 %v21158_v52, %v21156_v15  ;;  %v21160_v29 = vand.u32 4294901760, %v15741_v30  ;;  %v21164_v52 = vand.u32 4294901760, %v16410_v10  ;;  %v21165_v15 = vand.u32 4294901760, %v16415_v49  ;;  %v21166_v30 = vld [vmem:[#allocation18_spill] sm:$0xff] }
 0x172   :  { %14019 = vmatpush3.bf16.msra.mxu0 %v21149_v34  ;;  %13829 = vmatprep.subr.bf16.mxu1 %v21151_v44  ;;  %v21161_v34 = vand.u32 4294901760, %v15755_v35  ;;  %v21167_v35 = vand.u32 4294901760, %v15789_v55  ;;  %v21171_v10 = vand.u32 4294901760, %v16420_v19  ;;  %v21172_v49 = vand.u32 4294901760, %v16425_v60 }
 0x173   :  { %14021 = vmatprep.subr.bf16.mxu0 %v21154_v46  ;;  %v14028_v62 = vpack.c.bf16 %v21165_v15, %v21164_v52  ;;  %v21173_v55 = vand.u32 4294901760, %v15823_v12  ;;  %v21176_v19 = vand.u32 4294901760, %v15835_v20  ;;  %v21177_v60 = vand.u32 4294901760, %v16444_v39  ;;  %v21189_v15 = vld [vmem:[#allocation50_spill] sm:$0xff] }
 0x174   :  { %v13834_v22 = vpack.c.bf16 %v21161_v34, %v21160_v29  ;;  %v21168_v34 = vand.u32 4294901760, %v15794_v57  ;;  %v21174_v57 = vand.u32 4294901760, %v15825_v13  ;;  %v21179_v12 = vand.u32 4294901760, %v15843_v36 }
 0x175   :  { %13831 = vmatpush1.bf16.msra.mxu1 %v21159_v54  ;;  %v21180_v13 = vand.u32 4294901760, %v15845_v37  ;;  %v13848_v20 = vpack.c.bf16 %v21182_v14, %v21181_v23  ;;  %v21184_v39 = vand.u32 4294901760, %v16489_v38  ;;  %v21186_v36 = vand.u32 4294901760, %v15863_v45 }
 0x176   :  { %14023 = vmatpush3.bf16.msra.mxu0 %v21154_v46  ;;  %13833 = vmatprep.subr.bf16.mxu1 %v13832_v18  ;;  %v13838_v29 = vpack.c.bf16 %v21168_v34, %v21167_v35  ;;  %v13842_v63 = vpack.c.bf16 %v21174_v57, %v21173_v55  ;;  %v21178_v18 = vand.u32 4294901760, %v16453_v28  ;;  %v21187_v52 = vand.u32 4294901760, %v16053_v3  ;;  %v21205_v55 = vld [vmem:[#allocation58_spill] sm:$0xff] }
 0x177   :  { %14025 = vmatprep.subr.bf16.mxu0 %v14024_v42  ;;  %v13846_v27 = vpack.c.bf16 %v21180_v13, %v21179_v12  ;;  %v14040_v28 = vpack.c.bf16 %v21184_v39, %v21183_v24  ;;  %v21193_v35 = vand.u32 4294901760, %v16075_v21  ;;  %v21195_v34 = vand.u32 4294901760, %v21116_v56  ;;  %v21224_v12 = vld [vmem:[#allocation29_spill] sm:$0xff]  ;;  %v21225_v13 = vld [vmem:[#allocation28_spill] sm:$0xff] }
 0x178   :  { %1214 = vmatmul.mubr.f32.vlgmr.msra.gmra.mrb[0].mxu1 %v16469_v5  ;;  %v13840_v5 = vpack.c.bf16 %v21170_v53, %v21169_v48  ;;  %v14036_v26 = vpack.c.bf16 %v21178_v18, %v21177_v60  ;;  %v13852_v41 = vpack.c.bf16 %v21188_v40, %v21187_v52  ;;  %v21196_v3 = vand.u32 4294901760, %v21115_v51  ;;  %v21199_v53 = vld [vmem:[#allocation56_spill] sm:$0xff]  ;;  %v21221_v60 = vld [vmem:[#allocation26_spill] sm:$0xff]  ;;  %v21222_v18 = vld [vmem:[#allocation25_spill] sm:$0xff] }
 0x179   :  { %13835 = vmatpush1.bf16.msra.mxu1 %v13834_v22  ;;  %12390 = vmatmul.mubr.f32.vlgmr.msra.gmra.mrb[2].mxu0 %v21166_v30  ;;  %v14032_v22 = vpack.c.bf16 %v21172_v49, %v21171_v10  ;;  %v21201_v49 = vand.u32 4294901760, %v21120_v2  ;;  %v21202_v21 = vand.u32 4294901760, %v21119_v6  ;;  %v21204_v56 = vand.u32 4294901760, %v21122_v17  ;;  %v21211_v17 = vld [vmem:[#allocation9_spill] sm:$0xff]  ;;  %v2200_v39 = vld [vmem:[%s20430_s4 + $0x8] sm:$0xff]  ;;  %v2202_v52 = vld [vmem:[%s20430_s4 + $0x18] sm:$0xff] }
 0x17a   :  { %14027 = vmatpush3.bf16.msra.mxu0 %v14024_v42  ;;  %12424 = vmatprep.mubr.f32.mxu0 %v16437_v50  ;;  %v13844_v42 = vpack.c.bf16 %v21176_v19, %v21175_v4  ;;  %v13856_v33 = vpack.c.bf16 %v21196_v3, %v21195_v34  ;;  %v21206_v57 = vand.u32 4294901760, %v21205_v55  ;;  %v21210_v2 = vand.u32 4294901760, %v21126_v0  ;;  %v21213_v0 = vld [vmem:[#allocation10_spill] sm:$0xff]  ;;  %v2205_v24 = vld [vmem:[%s20431_s5 + $0x10] sm:$0xff] }
 0x17b   :  { %1219 = vmatprep.mubr.f32.mxu1 %v21091_v61  ;;  %13837 = vmatprep.subr.bf16.mxu1 %v13836_v8  ;;  %v21185_v8 = vand.u32 4294901760, %v15855_v43  ;;  %v21194_v43 = vand.u32 4294901760, %v16077_v25  ;;  %v13858_v25 = vpack.c.bf16 %v21202_v21, %v21201_v49 }
 0x17c   :  { %1223 = vmatmul.mubr.f32.gmra.mrb[2].mxu1 %v21166_v30  ;;  %14029 = vmatprep.subr.bf16.mxu0 %v14028_v62  ;;  %v21192_v30 = vand.u32 4294901760, %v21191_v31 }
 0x17d   :  { %13839 = vmatpush1.bf16.msra.mxu1 %v13838_v29  ;;  %1389 = vmatprep.mubr.f32.mxu1 %v21091_v61  ;;  %v13850_v37 = vpack.c.bf16 %v21186_v36, %v21185_v8  ;;  %v13854_v45 = vpack.c.bf16 %v21194_v43, %v21193_v35  ;;  %v21197_v29 = vld [vmem:[#allocation55_spill] sm:$0xff]  ;;  %v2201_v36 = vld [vmem:[%s20430_s4 + $0x10] sm:$0xff] }
 0x17e   :  { %14031 = vmatpush3.bf16.msra.mxu0 %v14028_v62  ;;  %13841 = vmatprep.subr.bf16.mxu1 %v13840_v5  ;;  %v21190_v62 = vand.u32 4294901760, %v21189_v15  ;;  %v21198_v48 = vand.u32 4294901760, %v21197_v29  ;;  %v21200_v5 = vand.u32 4294901760, %v21199_v53  ;;  %v2238_v15 = vsel %vm2227_vm2, %v2202_v52, 0 }
 0x17f   :  { %14033 = vmatprep.subr.bf16.mxu0 %v14032_v22 }
 0x180   :  { %v14044_v38 = vpack.c.bf16 %v21192_v30, %v21190_v62  ;;  %v14048_v10 = vpack.c.bf16 %v21200_v5, %v21198_v48  ;;  %v16826_v30 = vand.u32 4294901760, %v2238_v15 }
 0x181   :  { %13843 = vmatpush1.bf16.msra.mxu1 %v13842_v63  ;;  %v21207_v63 = vld [vmem:[#allocation59_spill] sm:$0xff] }
 0x182   :  { %14035 = vmatpush3.bf16.msra.mxu0 %v14032_v22  ;;  %13845 = vmatprep.subr.bf16.mxu1 %v13844_v42  ;;  %v21203_v22 = vand.u32 4294901760, %v21123_v11  ;;  %v21208_v4 = vand.u32 4294901760, %v21207_v63  ;;  %v21209_v42 = vand.u32 4294901760, %v21127_v9  ;;  %v21212_v11 = vld [vmem:[#allocation19_spill] sm:$0xff] }
 0x183   :  { %14037 = vmatprep.subr.bf16.mxu0 %v14036_v26  ;;  %v21214_v9 = vld [vmem:[#allocation11_spill] sm:$0xff] }
 0x184   :  { %v13860_v51 = vpack.c.bf16 %v21204_v56, %v21203_v22  ;;  %v14052_v19 = vpack.c.bf16 %v21208_v4, %v21206_v57  ;;  %v13862_v6 = vpack.c.bf16 %v21210_v2, %v21209_v42 }
 0x185   :  { %13847 = vmatpush1.bf16.msra.mxu1 %v13846_v27  ;;  %v2199_v27 = vld [vmem:[%s20430_s4] sm:$0xff] }
 0x186   :  { %14039 = vmatpush3.bf16.msra.mxu0 %v14036_v26  ;;  %13849 = vmatprep.subr.bf16.mxu1 %v13848_v20  ;;  %v21223_v26 = vld [vmem:[#allocation27_spill] sm:$0xff]  ;;  %v2206_v20 = vld [vmem:[%s20431_s5 + $0x18] sm:$0xff] }
 0x187   :  { %14041 = vmatprep.subr.bf16.mxu0 %v14040_v28 }
 0x189   :  { %13851 = vmatpush1.bf16.msra.mxu1 %v13850_v37  ;;  %v2235_v37 = vsel %vm2227_vm2, %v2201_v36, 0 }
 0x18a   :  { %14043 = vmatpush3.bf16.msra.mxu0 %v14040_v28  ;;  %13853 = vmatprep.subr.bf16.mxu1 %v13852_v41  ;;  %v2232_v28 = vsel %vm2227_vm2, %v2200_v39, 0  ;;  %v16822_v41 = vand.u32 4294901760, %v2235_v37 }
 0x18b   :  { %14045 = vmatprep.subr.bf16.mxu0 %v14044_v38  ;;  %v16810_v8 = vand.u32 4294901760, %v2232_v28 }
 0x18d   :  { %13855 = vmatpush1.bf16.msra.mxu1 %v13854_v45  ;;  %v16820_v40 = vsub.f32 %v2232_v28, %v16810_v8  ;;  %v16829_v45 = vsub.f32 %v2235_v37, %v16822_v41 }
 0x18e   :  { %14047 = vmatpush3.bf16.msra.mxu0 %v14044_v38  ;;  %13857 = vmatprep.subr.bf16.mxu1 %v13856_v33 }
 0x18f   :  { %14049 = vmatprep.subr.bf16.mxu0 %v14048_v10  ;;  %v2323_v62 = vand.u32 4294901760, %v16820_v40  ;;  %v2333_v57 = vand.u32 4294901760, %v16829_v45 }
 0x191   :  { %13859 = vmatpush1.bf16.msra.mxu1 %v13858_v25  ;;  %v2324_v53 = vsub.f32 %v16820_v40, %v2323_v62  ;;  %v16837_v25 = vsub.f32 %v2238_v15, %v16826_v30 }
 0x192   :  { %14051 = vmatpush3.bf16.msra.mxu0 %v14048_v10  ;;  %13861 = vmatprep.subr.bf16.mxu1 %v13860_v51 }
 0x193   :  { %14053 = vmatprep.subr.bf16.mxu0 %v14052_v19  ;;  %v2325_v28 = vand.u32 4294901760, %v2324_v53 }
 0x195   :  { %13863 = vmatpush1.bf16.msra.mxu1 %v13862_v6 }
 0x196   :  { %14055 = vmatpush3.bf16.msra.mxu0 %v14052_v19  ;;  %13865 = vmatprep.subr.bf16.mxu1 %v21129_v58  ;;  %v21215_v58 = vld [vmem:[#allocation22_spill] sm:$0xff] }
 0x197   :  { %14057 = vmatprep.subr.bf16.mxu0 %v21130_v1 }
 0x198   :  { %1391 = vmatmul.mubr.f32.vlgmr.msra.gmra.mrb[0].mxu1 %v16437_v50 }
 0x199   :  { %13867 = vmatpush1.bf16.msra.mxu1 %v21131_v7  ;;  %12425 = vmatmul.mubr.f32.vlgmr.msra.gmra.mrb[2].mxu0 %v16434_v32  ;;  %v21217_v7 = vld [vmem:[#allocation13_spill] sm:$0xff] }
 0x19a   :  { %14059 = vmatpush3.bf16.msra.mxu0 %v21130_v1  ;;  %12459 = vmatprep.mubr.f32.mxu0 %v16437_v50  ;;  %v21216_v1 = vld [vmem:[#allocation12_spill] sm:$0xff] }
 0x19b   :  { %1396 = vmatprep.mubr.f32.mxu1 %v21091_v61  ;;  %13869 = vmatprep.subr.bf16.mxu1 %v21133_v47  ;;  %v21218_v47 = vld [vmem:[#allocation23_spill] sm:$0xff] }
 0x19c   :  { %1398 = vmatmul.mubr.f32.gmra.mrb[2].mxu1 %v16434_v32  ;;  %14061 = vmatprep.subr.bf16.mxu0 %v21134_v59 }
 0x19d   :  { %13871 = vmatpush1.bf16.msra.mxu1 %v21135_v16  ;;  %1500 = vmatprep.mubr.f32.mxu1 %v21091_v61  ;;  %v21220_v16 = vld [vmem:[#allocation24_spill] sm:$0xff] }
 0x19e   :  { %14063 = vmatpush3.bf16.msra.mxu0 %v21134_v59  ;;  %13873 = vmatprep.subr.bf16.mxu1 %v21211_v17  ;;  %v21219_v59 = vld [vmem:[#allocation14_spill] sm:$0xff] }
 0x19f   :  { %14065 = vmatprep.subr.bf16.mxu0 %v21212_v11 }
 0x1a1   :  { %13875 = vmatpush1.bf16.msra.mxu1 %v21213_v0 }
 0x1a2   :  { %14067 = vmatpush3.bf16.msra.mxu0 %v21212_v11  ;;  %13877 = vmatprep.subr.bf16.mxu1 %v21214_v9 }
 0x1a3   :  { %14069 = vmatprep.subr.bf16.mxu0 %v21215_v58 }
 0x1a5   :  { %13879 = vmatpush1.bf16.msra.mxu1 %v21216_v1  ;;  %v2343_v1 = vand.u32 4294901760, %v16837_v25 }
 0x1a6   :  { %14071 = vmatpush3.bf16.msra.mxu0 %v21215_v58  ;;  %13881 = vmatprep.subr.bf16.mxu1 %v21217_v7 }
 0x1a7   :  { %14073 = vmatprep.subr.bf16.mxu0 %v21218_v47  ;;  %v2344_v52 = vsub.f32 %v16837_v25, %v2343_v1 }
 0x1a9   :  { %13883 = vmatpush1.bf16.msra.mxu1 %v21219_v59 }
 0x1aa   :  { %14075 = vmatpush3.bf16.msra.mxu0 %v21218_v47  ;;  %13885 = vmatprep.subr.bf16.mxu1 %v21220_v16 }
 0x1ab   :  { %14077 = vmatprep.subr.bf16.mxu0 %v21221_v60 }
 0x1ad   :  { %13887 = vmatpush1.bf16.msra.mxu1 %v21222_v18 }
 0x1ae   :  { %14079 = vmatpush3.bf16.msra.mxu0 %v21221_v60  ;;  %13889 = vmatprep.subr.bf16.mxu1 %v21223_v26 }
 0x1af   :  { %14081 = vmatprep.subr.bf16.mxu0 %v21224_v12 }
 0x1b1   :  { %13891 = vmatpush1.bf16.msra.mxu1 %v21225_v13 }
 0x1b2   :  { %14083 = vmatpush3.bf16.msra.mxu0 %v21224_v12  ;;  %13893 = vmatprep.subr.bf16.mxu1 %v21151_v44  ;;  %v2229_v44 = vsel %vm2227_vm2, %v2199_v27, 0  ;;  %v2334_v27 = vsub.f32 %v16829_v45, %v2333_v57 }
 0x1b3   :  { %14085 = vmatprep.subr.bf16.mxu0 %v21154_v46  ;;  %v16788_v23 = vand.u32 4294901760, %v2229_v44 }
 0x1b5   :  { %13895 = vmatpush1.bf16.msra.mxu1 %v21159_v54  ;;  %v16791_v54 = vsub.f32 %v2229_v44, %v16788_v23 }
 0x1b6   :  { %14087 = vmatpush3.bf16.msra.mxu0 %v21154_v46 }
 0x1b8   :  { %1502 = vmatmul.mubr.f32.vlgmr.msra.gmra.mrb[0].mxu1 %v16437_v50  ;;  %v2313_v50 = vand.u32 4294901760, %v16791_v54 }
 0x1b9   :  { %12460 = vmatmul.mubr.f32.vlgmr.msra.gmra.mrb[2].mxu0 %v16434_v32  ;;  %1507 = vmatprep.mubr.f32.mxu1 %v21091_v61 }
 0x1ba   :  { %v2314_v46 = vsub.f32 %v16791_v54, %v2313_v50 }
 0x1bc   :  { %1509 = vmatmul.mubr.f32.gmra.mrb[2].mxu1 %v16434_v32  ;;  %v2315_v14 = vand.u32 4294901760, %v2314_v46  ;;  %v2204_v32 = vld [vmem:[%s20431_s5 + $0x8] sm:$0xff] }
 0x1bd   :  { %2214 = vperm.xlu1 %15559, %v2204_v32  }
 0x1be   :  { %12474 = vmatprep.mubr.f32.mxu1 %v2315_v14 }
 0x1c1   :  { %2224 = vperm.xlu1 %15559, %v2206_v20  }
 0x1c5   :  { %2219 = vperm.xlu1 %15559, %v2205_v24  }
 0x28b   :  { %v1503_v31 = vpop.f32.mrb[0].mxu1 }
 0x28c   :  { %v2241_v38 = vand.u32 4294901760, %v1503_v31  ;;  %v1505_v35 = vpop.f32.mrb[1].mxu1  ;;  %v12461_v43 = vpop.f32.mrb[2].mxu0 }
 0x28d   :  { %v2244_v34 = vand.u32 4294901760, %v1505_v35  ;;  %v2256_v3 = vand.u32 4294901760, %v12461_v43  ;;  %v2189_v33 = vpop.f32.mrb[3].mxu0 }
 0x28e   :  { %v2353_v29 = vsub.f32 %v1503_v31, %v2241_v38  ;;  %v2247_v48 = vand.u32 4294901760, %v2189_v33  ;;  %v2335_v31 = vand.u32 4294901760, %v2334_v27 }
 0x28f   :  { %v16834_v5 = vpack.c.bf16 %v2244_v34, %v2241_v38  ;;  %v2360_v10 = vsub.f32 %v1505_v35, %v2244_v34  ;;  %v2388_v49 = vsub.f32 %v12461_v43, %v2256_v3  ;;  %v1510_v21 = vpop.f32.mrb[2].mxu1  ;;  %v2345_v35 = vand.u32 4294901760, %v2344_v52 }
 0x290   :  { %v2354_v22 = vand.u32 4294901760, %v2353_v29  ;;  %v2367_v56 = vsub.f32 %v2189_v33, %v2247_v48  ;;  %v2250_v51 = vand.u32 4294901760, %v1510_v21  ;;  %v1512_v55 = vpop.f32.mrb[3].mxu1 }
 0x291   :  { %v2361_v63 = vand.u32 4294901760, %v2360_v10  ;;  %v2389_v4 = vand.u32 4294901760, %v2388_v49  ;;  %v2253_v19 = vand.u32 4294901760, %v1512_v55  ;;  %14089 = vmatprep.subr.bf16.mxu1 %v16834_v5  ;;  %v14112_v42 = vpack.c.bf16 %v2360_v10, %v2353_v29 }
 0x292   :  { %v2355_v2 = vsub.f32 %v2353_v29, %v2354_v22  ;;  %v2368_v6 = vand.u32 4294901760, %v2367_v56  ;;  %v16841_v17 = vpack.c.bf16 %v2250_v51, %v2247_v48  ;;  %v2374_v11 = vsub.f32 %v1510_v21, %v2250_v51  ;;  %14091 = vmatpush3.bf16.msra.mxu1 %v16834_v5 }
 0x293   :  { %v2362_v0 = vsub.f32 %v2360_v10, %v2361_v63  ;;  %v16844_v9 = vpack.c.bf16 %v2256_v3, %v2253_v19  ;;  %v2381_v58 = vsub.f32 %v1512_v55, %v2253_v19  ;;  %v2390_v60 = vsub.f32 %v2388_v49, %v2389_v4 }
 0x294   :  { %v2369_v7 = vsub.f32 %v2367_v56, %v2368_v6  ;;  %v2375_v47 = vand.u32 4294901760, %v2374_v11  ;;  %14093 = vmatprep.subr.bf16.mxu1 %v16841_v17  ;;  %v2356_v59 = vand.u32 4294901760, %v2355_v2  ;;  %v14116_v16 = vpack.c.bf16 %v2374_v11, %v2367_v56 }
 0x295   :  { %v2382_v18 = vand.u32 4294901760, %v2381_v58  ;;  %v2363_v26 = vand.u32 4294901760, %v2362_v0  ;;  %v14120_v12 = vpack.c.bf16 %v2388_v49, %v2381_v58  ;;  %v14136_v44 = vpack.c.bf16 %v2361_v63, %v2354_v22  ;;  %v2210_v49 = vpop.permute.xlu0 %2209 }
 0x296   :  { %v2376_v13 = vsub.f32 %v2374_v11, %v2375_v47  ;;  %14095 = vmatpush3.bf16.msra.mxu1 %v16841_v17  ;;  %v14140_v46 = vpack.c.bf16 %v2375_v47, %v2368_v6  ;;  %v2370_v24 = vand.u32 4294901760, %v2369_v7  ;;  %v2391_v37 = vand.u32 4294901760, %v2390_v60  ;;  %v21229_v6 = vld [vmem:[#allocation62_spill] sm:$0xff]  ;;  %v2898_v60 = vld [vmem:[%s20432_s6 + $0x20] sm:$0xff] }
 0x297   :  { %v2383_v14 = vsub.f32 %v2381_v58, %v2382_v18  ;;  %14097 = vmatprep.subr.bf16.mxu1 %v16844_v9  ;;  %v14100_v32 = vpack.c.bf16 %v2363_v26, %v2356_v59  ;;  %v14144_v20 = vpack.c.bf16 %v2389_v4, %v2382_v18  ;;  %v2896_v58 = vld [vmem:[%s20432_s6 + $0x10] sm:$0xff]  ;;  %v2897_v7 = vld [vmem:[%s20432_s6 + $0x18] sm:$0xff]  ;;  %v2899_v26 = vld [vmem:[%s20432_s6 + $0x28] sm:$0xff]  ;;  %v3028_v27 = vsel %vm3014_vm3, %v2898_v60, 0 }
 0x298   :  { %v2377_v39 = vand.u32 4294901760, %v2376_v13  ;;  %v3022_v47 = vsel %vm3014_vm3, %v2896_v58, 0 }
 0x299   :  { %v2384_v36 = vand.u32 4294901760, %v2383_v14  ;;  %v16938_v18 = vand.u32 4294901760, %v3022_v47 }
 0x29a   :  { %14099 = vmatpush3.bf16.msra.mxu1 %v16844_v9  ;;  %v14104_v15 = vpack.c.bf16 %v2377_v39, %v2370_v24  ;;  %v2901_v24 = vld [vmem:[%s20432_s6 + $0x38] sm:$0xff] }
 0x29b   :  { %14101 = vmatprep.subr.bf16.mxu1 %v14100_v32  ;;  %v14108_v38 = vpack.c.bf16 %v2391_v37, %v2384_v36  ;;  %21232 = vst [vmem:[#allocation45_spill] sm:$0xff] %v16938_v18 }
 0x29d   :  { %12475 = vmatmul.mubr.f32.vlgmr.msra.gmra.mrb[4].mxu1 %v2325_v28  ;;  %v2902_v28 = vld [vmem:[%s20432_s6 + $0x40] sm:$0xff] }
 0x29e   :  { %14103 = vmatpush3.bf16.msra.mxu1 %v14100_v32  ;;  %12477 = vmatprep.mubr.f32.mxu1 %v2335_v31  ;;  %v16955_v32 = vsub.f32 %v3022_v47, %v16938_v18 }
 0x29f   :  { %14105 = vmatprep.subr.bf16.mxu1 %v14104_v15 }
 0x2a1   :  { %12478 = vmatmul.mubr.f32.gmra.mrb[6].mxu1 %v2345_v35  ;;  %v20602_v35 = vand.u32 4294901760, %v16955_v32 }
 0x2a2   :  { %14107 = vmatpush3.bf16.msra.mxu1 %v14104_v15  ;;  %12492 = vmatprep.mubr.f32.mxu1 %v16788_v23 }
 0x2a3   :  { %14109 = vmatprep.subr.bf16.mxu1 %v14108_v38 }
 0x2a6   :  { %14111 = vmatpush3.bf16.msra.mxu1 %v14108_v38  ;;  %v3037_v38 = vsel %vm3014_vm3, %v2901_v24, 0 }
 0x2a7   :  { %14113 = vmatprep.subr.bf16.mxu1 %v14112_v42 }
 0x2a9   :  { %12493 = vmatmul.mubr.f32.vlgmr.msra.gmra.mrb[4].mxu1 %v16810_v8 }
 0x2aa   :  { %14115 = vmatpush3.bf16.msra.mxu1 %v14112_v42  ;;  %12495 = vmatprep.mubr.f32.mxu1 %v16822_v41  ;;  %v21227_v42 = vld [vmem:[#allocation63_spill] sm:$0xff] }
 0x2ab   :  { %14117 = vmatprep.subr.bf16.mxu1 %v14116_v16 }
 0x2ad   :  { %12496 = vmatmul.mubr.f32.gmra.mrb[6].mxu1 %v16826_v30 }
 0x2ae   :  { %14119 = vmatpush3.bf16.msra.mxu1 %v14116_v16  ;;  %12510 = vmatprep.mubr.f32.mxu1 %v16791_v54  ;;  %v2215_v54 = vpop.permute.xlu1 %2214  ;;  %v3025_v16 = vsel %vm3014_vm3, %v2897_v7, 0 }
 0x2af   :  { %14121 = vmatprep.subr.bf16.mxu1 %v14120_v12  ;;  %v16946_v13 = vand.u32 4294901760, %v3025_v16 }
 0x2b1   :  { %21233 = vst [vmem:[#allocation46_spill] sm:$0xff] %v16946_v13  ;;  %v16963_v39 = vsub.f32 %v3025_v16, %v16946_v13 }
 0x2b2   :  { %14123 = vmatpush3.bf16.msra.mxu1 %v14120_v12  ;;  %v2900_v12 = vld [vmem:[%s20432_s6 + $0x30] sm:$0xff] }
 0x2b3   :  { %14125 = vmatprep.subr.bf16.mxu1 %v16834_v5  ;;  %v3034_v14 = vsel %vm3014_vm3, %v2900_v12, 0  ;;  %v2907_v12 = vld [vmem:[%s20432_s6 + $0x68] sm:$0xff] }
 0x2b4   :  { %v16971_v15 = vand.u32 4294901760, %v3034_v14 }
 0x2b5   :  { %12511 = vmatmul.mubr.f32.vlgmr.msra.gmra.mrb[4].mxu1 %v16820_v40 }
 0x2b6   :  { %14127 = vmatpush3.bf16.msra.mxu1 %v16834_v5  ;;  %12513 = vmatprep.mubr.f32.mxu1 %v16829_v45  ;;  %v2225_v45 = vpop.permute.xlu1 %2224  ;;  %21236 = vst [vmem:[#allocation49_spill] sm:$0xff] %v16971_v15 }
 0x2b7   :  { %14129 = vmatprep.subr.bf16.mxu1 %v16841_v17 }
 0x2b9   :  { %12514 = vmatmul.mubr.f32.gmra.mrb[6].mxu1 %v16837_v25 }
 0x2ba   :  { %14131 = vmatpush3.bf16.msra.mxu1 %v16841_v17  ;;  %12528 = vmatprep.mubr.f32.mxu1 %v2313_v50  ;;  %v2220_v55 = vpop.permute.xlu1 %2219 }
 0x2bb   :  { %14133 = vmatprep.subr.bf16.mxu1 %v16844_v9 }
 0x2be   :  { %14135 = vmatpush3.bf16.msra.mxu1 %v16844_v9 }
 0x2bf   :  { %14137 = vmatprep.subr.bf16.mxu1 %v14136_v44 }
 0x2c1   :  { %12529 = vmatmul.mubr.f32.vlgmr.msra.gmra.mrb[4].mxu1 %v2323_v62 }
 0x2c2   :  { %14139 = vmatpush3.bf16.msra.mxu1 %v14136_v44  ;;  %12531 = vmatprep.mubr.f32.mxu1 %v2333_v57 }
 0x2c3   :  { %14141 = vmatprep.subr.bf16.mxu1 %v14140_v46 }
 0x2c5   :  { %12532 = vmatmul.mubr.f32.gmra.mrb[6].mxu1 %v2343_v1 }
 0x2c6   :  { %14143 = vmatpush3.bf16.msra.mxu1 %v14140_v46  ;;  %12546 = vmatprep.mubr.f32.mxu1 %v16788_v23  ;;  %v3031_v46 = vsel %vm3014_vm3, %v2899_v26, 0 }
 0x2c7   :  { %14145 = vmatprep.subr.bf16.mxu1 %v14144_v20  ;;  %v16969_v52 = vand.u32 4294901760, %v3031_v46 }
 0x2c9   :  { %21235 = vst [vmem:[#allocation48_spill] sm:$0xff] %v16969_v52 }
 0x2ca   :  { %14147 = vmatpush3.bf16.msra.mxu1 %v14144_v20  ;;  %v16957_v20 = vand.u32 4294901760, %v3028_v27 }
 0x2cb   :  { %14149 = vmatprep.subr.bf16.mxu1 %v16834_v5 }
 0x2cc   :  { %21234 = vst [vmem:[#allocation47_spill] sm:$0xff] %v16957_v20 }
 0x2cd   :  { %12547 = vmatmul.mubr.f32.vlgmr.msra.gmra.mrb[4].mxu1 %v16810_v8 }
 0x2ce   :  { %14151 = vmatpush3.bf16.msra.mxu1 %v16834_v5  ;;  %12549 = vmatprep.mubr.f32.mxu1 %v16822_v41 }
 0x2cf   :  { %14153 = vmatprep.subr.bf16.mxu1 %v16841_v17 }
 0x2d1   :  { %12550 = vmatmul.mubr.f32.gmra.mrb[6].mxu1 %v16826_v30 }
 0x2d2   :  { %14155 = vmatpush3.bf16.msra.mxu1 %v16841_v17  ;;  %12564 = vmatprep.mubr.f32.mxu1 %v16788_v23 }
 0x2d3   :  { %14157 = vmatprep.subr.bf16.mxu1 %v16844_v9 }
 0x2d6   :  { %14159 = vmatpush3.bf16.msra.mxu1 %v16844_v9  ;;  %v2895_v9 = vld [vmem:[%s20432_s6 + $0x8] sm:$0xff] }
 0x2d7   :  { %v3019_v1 = vsel %vm3014_vm3, %v2895_v9, 0 }
 0x2d8   :  { %v16932_v59 = vand.u32 4294901760, %v3019_v1 }
 0x2d9   :  { %12565 = vmatmul.mubr.f32.vlgmr.msra.gmra.mrb[4].mxu1 %v16810_v8 }
 0x2da   :  { %12567 = vmatprep.mubr.f32.mxu1 %v16822_v41  ;;  %21231 = vst [vmem:[#allocation44_spill] sm:$0xff] %v16932_v59  ;;  %v16950_v44 = vsub.f32 %v3019_v1, %v16932_v59 }
 0x2dc   :  { %v20603_v37 = vand.u32 4294901760, %v16950_v44 }
 0x2dd   :  { %12568 = vmatmul.mubr.f32.gmra.mrb[6].mxu1 %v16826_v30  ;;  %v2894_v30 = vld [vmem:[%s20432_s6] sm:$0xff] }
 0x2de   :  { %4352 = vmatprep.mubr.f32.mxu1 %v21091_v61  ;;  %v3016_v53 = vsel %vm3014_vm3, %v2894_v30, 0 }
 0x2df   :  { %v16898_v5 = vand.u32 4294901760, %v3016_v53 }
 0x2e1   :  { %21226 = vst [vmem:[#allocation20_spill] sm:$0xff] %v16898_v5  ;;  %v16901_v10 = vsub.f32 %v3016_v53, %v16898_v5  ;;  %v3153_v53 = vsub.f32 %v16955_v32, %v20602_v35 }
 0x2e3   :  { %v20604_v21 = vand.u32 4294901760, %v16901_v10  ;;  %v3154_v58 = vand.u32 4294901760, %v3153_v53  ;;  %v2909_v53 = vld [vmem:[%s20432_s6 + $0x78] sm:$0xff] }
 0x2e5   :  { %v3133_v56 = vsub.f32 %v16901_v10, %v20604_v21 }
 0x2e7   :  { %v3134_v57 = vand.u32 4294901760, %v3133_v56 }
 0x2e9   :  { %12574 = vmatprep.mubr.f32.mxu0 %v3134_v57 }
 0x3ac   :  { %v12566_v50 = vpop.f32.mrb[4].mxu1 }
 0x3ad   :  { %v15050_v40 = vadd.f32 %v12566_v50, %v2215_v54  ;;  %v2858_v62 = vpop.f32.mrb[5].mxu1  ;;  %v16976_v54 = vsub.f32 %v3028_v27, %v16957_v20  ;;  %v3040_v50 = vsel %vm3014_vm3, %v2902_v28, 0 }
 0x3ae   :  { %v15051_v25 = vadd.f32 %v2858_v62, %v2210_v49 }
 0x3af   :  { %v11044_v43 = vmul.f32 -1.442695, %v15050_v40  ;;  %v2903_v40 = vld [vmem:[%s20432_s6 + $0x48] sm:$0xff]  ;;  %v20600_v49 = vand.u32 4294901760, %v16976_v54 }
 0x3b0   :  { %v12569_v34 = vpop.f32.mrb[6].mxu1  ;;  %v3043_v30 = vsel %vm3014_vm3, %v2903_v40, 0 }
 0x3b1   :  { %15560 = vpow2.f32 %v11044_v43  ;;  %v15052_v23 = vadd.f32 %v12569_v34, %v2225_v45  ;;  %v2870_v3 = vpop.f32.mrb[7].mxu1  ;;  %v20601_v43 = vand.u32 4294901760, %v16963_v39  ;;  %v3143_v34 = vsub.f32 %v16950_v44, %v20603_v37 }
 0x3b2   :  { %v15053_v63 = vadd.f32 %v2870_v3, %v2220_v55  ;;  %v16992_v3 = vsub.f32 %v3034_v14, %v16971_v15  ;;  %v2905_v55 = vld [vmem:[%s20432_s6 + $0x58] sm:$0xff]  ;;  %v3173_v1 = vsub.f32 %v16976_v54, %v20600_v49  ;;  %v11059_v49 = vld [vmem:[%s20429_s3 + $0x1e8] sm:$0xff] }
 0x3b3   :  { %v11045_v33 = vmul.f32 -1.442695, %v15052_v23  ;;  %v16989_v23 = vsub.f32 %v3031_v46, %v16969_v52  ;;  %v3163_v56 = vsub.f32 %v16963_v39, %v20601_v43  ;;  %v3049_v47 = vsel %vm3014_vm3, %v2905_v55, 0  ;;  %v11062_v43 = vld [vmem:[%s20429_s3 + $0x200] sm:$0xff] }
 0x3b4   :  { %v17058_v40 = vand.u32 4294901760, %v3049_v47 }
 0x3b5   :  { %15562 = vpow2.f32 %v11045_v33  ;;  %v16994_v33 = vand.u32 4294901760, %v3037_v38  ;;  %v20599_v57 = vand.u32 4294901760, %v16989_v23  ;;  %v3164_v60 = vand.u32 4294901760, %v3163_v56 }
 0x3b6   :  { %21241 = vst [vmem:[#allocation31_spill] sm:$0xff] %v17058_v40 }
 0x3b7   :  { %21237 = vst [vmem:[#allocation51_spill] sm:$0xff] %v16994_v33  ;;  %v3183_v46 = vsub.f32 %v16989_v23, %v20599_v57 }
 0x3b9   :  { %v3184_v56 = vand.u32 4294901760, %v3183_v46 }
 0x3bb   :  { %v15561_v29 = vpop.eup %15560 }
 0x3bc   :  { %v2886_v8 = vadd.f32 1.0, %v15561_v29  ;;  %v2904_v29 = vld [vmem:[%s20432_s6 + $0x50] sm:$0xff] }
 0x3be   :  { %15564 = vrcp.f32 %v2886_v8 }
 0x3bf   :  { %v15563_v41 = vpop.eup %15562 }
 0x3c0   :  { %v2887_v48 = vadd.f32 1.0, %v15563_v41 }
 0x3c2   :  { %15566 = vrcp.f32 %v2887_v48  ;;  %v17000_v48 = vand.u32 4294901760, %v3040_v50 }
 0x3c4   :  { %21238 = vst [vmem:[#allocation53_spill] sm:$0xff] %v17000_v48  ;;  %v17029_v9 = vsub.f32 %v3040_v50, %v17000_v48 }
 0x3c6   :  { %v20596_v50 = vand.u32 4294901760, %v17029_v9 }
 0x3c8   :  { %v15565_v22 = vpop.eup %15564 }
 0x3c9   :  { %v2892_v51 = vmul.f32 %v15565_v22, %v15051_v25 }
 0x3cb   :  { %3008 = vrot.lane.b32.xlu0 %v2892_v51, %s15604_s1  ;;  %v16910_v2 = vadd.f32 %v21227_v42, %v2892_v51  ;;  %v3046_v51 = vsel %vm3014_vm3, %v2904_v29, 0  ;;  %v2906_v42 = vld [vmem:[%s20432_s6 + $0x60] sm:$0xff] }
 0x3cc   :  { %v15567_v4 = vpop.eup %15566  ;;  %v17035_v7 = vand.u32 4294901760, %v3046_v51  ;;  %v3052_v26 = vsel %vm3014_vm3, %v2906_v42, 0 }
 0x3cd   :  { %v2893_v19 = vmul.f32 %v15567_v4, %v15053_v63  ;;  %21228 = vst [vmem:[#allocation21_spill] sm:$0xff] %v16910_v2  ;;  %v4173_v11 = vmul.f32 %v16910_v2, %v16910_v2  ;;  %v20598_v63 = vand.u32 4294901760, %v16992_v3  ;;  %v17019_v4 = vsub.f32 %v3037_v38, %v16994_v33 }
 0x3ce   :  { %21240 = vst [vmem:[#allocation57_spill] sm:$0xff] %v17035_v7  ;;  %v17063_v29 = vand.u32 4294901760, %v3052_v26 }
 0x3cf   :  { %3010 = vrot.lane.b32.xlu1 %v2893_v19, %s15604_s1  ;;  %v16914_v17 = vadd.f32 %v21229_v6, %v2893_v19  ;;  %v17021_v19 = vand.u32 4294901760, %v3043_v30  ;;  %v3193_v14 = vsub.f32 %v16992_v3, %v20598_v63  ;;  %v20597_v24 = vand.u32 4294901760, %v17019_v4 }
 0x3d0   :  { %21242 = vst [vmem:[#allocation30_spill] sm:$0xff] %v17063_v29 }
 0x3d1   :  { %21230 = vst [vmem:[#allocation43_spill] sm:$0xff] %v16914_v17  ;;  %v4174_v0 = vmul.f32 %v16914_v17, %v16914_v17  ;;  %21239 = vst [vmem:[#allocation54_spill] sm:$0xff] %v17021_v19  ;;  %v17052_v28 = vsub.f32 %v3043_v30, %v17021_v19  ;;  %v3194_v55 = vand.u32 4294901760, %v3193_v14  ;;  %v3203_v42 = vsub.f32 %v17019_v4, %v20597_v24 }
 0x3ea   :  { %4169 = vadd.xlane.f32.xlu0 %v16910_v2 }
 0x3ee   :  { %4175 = vadd.xlane.f32.xlu0 %v4173_v11 }
 0x3f2   :  { %4177 = vadd.xlane.f32.xlu0 %v4174_v0  ;;  %v3144_v0 = vand.u32 4294901760, %v3143_v34  ;;  %v17061_v34 = vsub.f32 %v3046_v51, %v17035_v7  ;;  %v20595_v51 = vand.u32 4294901760, %v17052_v28 }
 0x3f3   :  { %4171 = vadd.xlane.f32.xlu1 %v16914_v17 }
 0x43d   :  { %v3009_v36 = vpop.permute.xlu0 %3008 }
 0x43e   :  { %v3064_v31 = vand.u32 4294901760, %v3009_v36 }
 0x440   :  { %v16982_v62 = vsub.f32 %v3009_v36, %v3064_v31  ;;  %v2908_v36 = vld [vmem:[%s20432_s6 + $0x70] sm:$0xff] }
 0x441   :  { %v3011_v45 = vpop.permute.xlu1 %3010  ;;  %v3058_v30 = vsel %vm3014_vm3, %v2908_v36, 0 }
 0x442   :  { %v3293_v8 = vand.u32 4294901760, %v16982_v62  ;;  %v3067_v41 = vand.u32 4294901760, %v3011_v45 }
 0x444   :  { %v17007_v25 = vpack.c.bf16 %v3067_v41, %v3064_v31  ;;  %v3299_v22 = vsub.f32 %v3011_v45, %v3067_v41  ;;  %v3294_v6 = vsub.f32 %v16982_v62, %v3293_v8  ;;  %v3174_v45 = vand.u32 4294901760, %v3173_v1 }
 0x445   :  { %v20594_v1 = vand.u32 4294901760, %v17061_v34 }
 0x446   :  { %v3300_v11 = vand.u32 4294901760, %v3299_v22  ;;  %14161 = vmatprep.subr.bf16.mxu0 %v17007_v25  ;;  %v3295_v31 = vand.u32 4294901760, %v3294_v6  ;;  %v14168_v6 = vpack.c.bf16 %v3299_v22, %v16982_v62  ;;  %v3061_v62 = vsel %vm3014_vm3, %v2909_v53, 0 }
 0x447   :  { %14163 = vmatpush3.bf16.msra.mxu0 %v17007_v25  ;;  %v17097_v14 = vand.u32 4294901760, %v3061_v62  ;;  %v3233_v36 = vsub.f32 %v17061_v34, %v20594_v1 }
 0x448   :  { %v3301_v16 = vsub.f32 %v3299_v22, %v3300_v11  ;;  %v17042_v27 = vpack.c.bf16 %v3300_v11, %v3293_v8  ;;  %v3055_v8 = vsel %vm3014_vm3, %v2907_v12, 0  ;;  %v3213_v11 = vsub.f32 %v17029_v9, %v20596_v50 }
 0x449   :  { %v3204_v22 = vand.u32 4294901760, %v3203_v42  ;;  %21248 = vst [vmem:[#allocation61_spill] sm:$0xff] %v17097_v14  ;;  %v17111_v53 = vsub.f32 %v3061_v62, %v17097_v14 }
 0x44a   :  { %12575 = vmatmul.mubr.f32.vlgmr.msra.gmra.mrb[4].mxu0 %v3144_v0  ;;  %v3302_v38 = vand.u32 4294901760, %v3301_v16  ;;  %v17079_v0 = vsub.f32 %v3049_v47, %v17058_v40  ;;  %v17085_v16 = vsub.f32 %v3052_v26, %v17063_v29  ;;  %v3223_v47 = vsub.f32 %v17052_v28, %v20595_v51 }
 0x44b   :  { %12577 = vmatprep.mubr.f32.mxu0 %v3154_v58  ;;  %v17081_v58 = vand.u32 4294901760, %v3055_v8  ;;  %v3214_v26 = vand.u32 4294901760, %v3213_v11 }
 0x44c   :  { %v14164_v41 = vpack.c.bf16 %v3302_v38, %v3295_v31  ;;  %21243 = vst [vmem:[#allocation60_spill] sm:$0xff] %v17079_v0  ;;  %21245 = vst [vmem:[#allocation32_spill] sm:$0xff] %v17085_v16  ;;  %v20593_v12 = vand.u32 4294901760, %v17079_v0  ;;  %v20592_v31 = vand.u32 4294901760, %v17085_v16 }
 0x44d   :  { %21244 = vst [vmem:[#allocation33_spill] sm:$0xff] %v17081_v58  ;;  %v17095_v46 = vsub.f32 %v3055_v8, %v17081_v58 }
 0x44e   :  { %12578 = vmatmul.mubr.f32.gmra.mrb[6].mxu0 %v3164_v60  ;;  %14165 = vmatprep.subr.bf16.mxu0 %v14164_v41  ;;  %v17087_v60 = vand.u32 4294901760, %v3058_v30  ;;  %v3243_v8 = vsub.f32 %v17079_v0, %v20593_v12  ;;  %v11052_v12 = vld [vmem:[%s20429_s3 + $0x1b0] sm:$0xff] }
 0x44f   :  { %14167 = vmatpush3.bf16.msra.mxu0 %v14164_v41  ;;  %12580 = vmatprep.mubr.f32.mxu0 %v3174_v45  ;;  %21247 = vst [vmem:[#allocation34_spill] sm:$0xff] %v17095_v46  ;;  %v3224_v45 = vand.u32 4294901760, %v3223_v47  ;;  %v20591_v41 = vand.u32 4294901760, %v17095_v46 }
 0x450   :  { %21246 = vst [vmem:[#allocation36_spill] sm:$0xff] %v17087_v60  ;;  %14169 = vmatprep.subr.bf16.mxu0 %v14168_v6  ;;  %v17104_v38 = vsub.f32 %v3058_v30, %v17087_v60  ;;  %v3244_v42 = vand.u32 4294901760, %v3243_v8 }
 0x451   :  { %v3263_v11 = vsub.f32 %v17095_v46, %v20591_v41  ;;  %v11053_v41 = vld [vmem:[%s20429_s3 + $0x1b8] sm:$0xff] }
 0x452   :  { %12581 = vmatmul.mubr.f32.gmra.mrb[8].mxu0 %v3184_v56  ;;  %21249 = vst [vmem:[#allocation39_spill] sm:$0xff] %v17104_v38  ;;  %v3234_v56 = vand.u32 4294901760, %v3233_v36  ;;  %v20590_v30 = vand.u32 4294901760, %v17104_v38 }
 0x453   :  { %12583 = vmatprep.mubr.f32.mxu0 %v3194_v55  ;;  %v3253_v55 = vsub.f32 %v17085_v16, %v20592_v31  ;;  %v11056_v31 = vld [vmem:[%s20429_s3 + $0x1d0] sm:$0xff] }
 0x454   :  { %v3273_v62 = vsub.f32 %v17104_v38, %v20590_v30 }
 0x455   :  { %v3254_v47 = vand.u32 4294901760, %v3253_v55  ;;  %v17135_v55 = vld [vmem:[%s20429_s3 + $0x1a0] sm:$0xff] }
 0x456   :  { %12584 = vmatmul.mubr.f32.gmra.mrb[10].mxu0 %v3204_v22  ;;  %v20589_v22 = vand.u32 4294901760, %v17111_v53 }
 0x457   :  { %12586 = vmatprep.mubr.f32.mxu0 %v3214_v26  ;;  %v3264_v26 = vand.u32 4294901760, %v3263_v11  ;;  %v20605_v11 = vand.u32 4294901760, %v17135_v55 }
 0x458   :  { %v3283_v36 = vsub.f32 %v17111_v53, %v20589_v22 }
 0x45a   :  { %12587 = vmatmul.mubr.f32.gmra.mrb[12].mxu0 %v3224_v45  ;;  %v3274_v45 = vand.u32 4294901760, %v3273_v62  ;;  %v3284_v8 = vand.u32 4294901760, %v3283_v36  ;;  %v11049_v62 = vld [vmem:[%s20429_s3 + $0x198] sm:$0xff] }
 0x45b   :  { %12589 = vmatprep.mubr.f32.mxu0 %v3234_v56  ;;  %v17130_v56 = vld [vmem:[%s20429_s3 + $0x188] sm:$0xff]  ;;  %v4262_v36 = vand.u32 4294901760, %v11049_v62 }
 0x45d   :  { %v17157_v30 = vsub.f32 %v11049_v62, %v4262_v36  ;;  %v11055_v62 = vld [vmem:[%s20429_s3 + $0x1c8] sm:$0xff] }
 0x45e   :  { %12590 = vmatmul.mubr.f32.gmra.mrb[14].mxu0 %v3244_v42  ;;  %v20606_v42 = vand.u32 4294901760, %v17130_v56 }
 0x45f   :  { %12592 = vmatprep.mubr.f32.mxu0 %v3254_v47  ;;  %v11046_v47 = vld [vmem:[%s20429_s3 + $0x180] sm:$0xff] }
 0x462   :  { %12593 = vmatmul.mubr.f32.gmra.mrb[16].mxu0 %v3264_v26  ;;  %v4258_v26 = vand.u32 4294901760, %v11046_v47 }
 0x463   :  { %12595 = vmatprep.mubr.f32.mxu0 %v3274_v45  ;;  %v17150_v45 = vpack.c.bf16 %v20605_v11, %v20606_v42  ;;  %v11065_v42 = vld [vmem:[%s20429_s3 + $0x218] sm:$0xff] }
 0x464   :  { %v17155_v22 = vsub.f32 %v11046_v47, %v4258_v26  ;;  %v4264_v47 = vand.u32 4294901760, %v11053_v41 }
 0x465   :  { %21250 = vst [vmem:[#allocation38_spill] sm:$0xff] %v17150_v45  ;;  %14185 = vmatprep.subr.bf16.mxu1 %v17150_v45 }
 0x466   :  { %12596 = vmatmul.mubr.f32.gmra.mrb[18].mxu0 %v3284_v8  ;;  %v17153_v8 = vpack.c.bf16 %v4262_v36, %v4258_v26  ;;  %v4266_v26 = vand.u32 4294901760, %v11052_v12  ;;  %v4270_v36 = vand.u32 4294901760, %v11055_v62  ;;  %v17178_v51 = vsub.f32 %v11053_v41, %v4264_v47 }
 0x467   :  { %12602 = vmatprep.mubr.f32.mxu0 %v16898_v5  ;;  %v4276_v41 = vand.u32 4294901760, %v11062_v43 }
 0x468   :  { %21251 = vst [vmem:[#allocation5_spill] sm:$0xff] %v17153_v8  ;;  %14187 = vmatpush1.bf16.msra.mxu1 %v17153_v8  ;;  %v17182_v24 = vsub.f32 %v11052_v12, %v4266_v26  ;;  %v17185_v63 = vpack.c.bf16 %v4270_v36, %v4266_v26  ;;  %v17187_v57 = vsub.f32 %v11055_v62, %v4270_v36  ;;  %v4272_v12 = vand.u32 4294901760, %v11059_v49 }
 0x469   :  { %v17208_v35 = vsub.f32 %v11062_v43, %v4276_v41  ;;  %v11064_v43 = vld [vmem:[%s20429_s3 + $0x210] sm:$0xff] }
 0x46a   :  { %12603 = vmatmul.mubr.f32.vlgmr.msra.gmra.mrb[4].mxu0 %v16932_v59  ;;  %21253 = vst [vmem:[#allocation6_spill] sm:$0xff] %v17185_v63  ;;  %v17204_v26 = vpack.c.bf16 %v4276_v41, %v4272_v12  ;;  %v17206_v36 = vsub.f32 %v11059_v49, %v4272_v12  ;;  %v4280_v49 = vand.u32 4294901760, %v11065_v42  ;;  %v11067_v12 = vld [vmem:[%s20429_s3 + $0x228] sm:$0xff]  ;;  %v4282_v41 = vand.u32 4294901760, %v11064_v43 }
 0x46b   :  { %14171 = vmatpush3.bf16.msra.mxu0 %v14168_v6  ;;  %12605 = vmatprep.mubr.f32.mxu0 %v16938_v18  ;;  %v4268_v6 = vand.u32 4294901760, %v11056_v31 }
 0x46c   :  { %14173 = vmatprep.subr.bf16.mxu0 %v17007_v25  ;;  %21254 = vst [vmem:[#allocation17_spill] sm:$0xff] %v17204_v26  ;;  %v17238_v8 = vsub.f32 %v11064_v43, %v4282_v41 }
 0x46d   :  { %v17176_v1 = vpack.c.bf16 %v4268_v6, %v4264_v47  ;;  %v17180_v50 = vsub.f32 %v11056_v31, %v4268_v6  ;;  %v11058_v31 = vld [vmem:[%s20429_s3 + $0x1e0] sm:$0xff]  ;;  %v11061_v47 = vld [vmem:[%s20429_s3 + $0x1f8] sm:$0xff] }
 0x46e   :  { %12606 = vmatmul.mubr.f32.gmra.mrb[6].mxu0 %v16946_v13  ;;  %v4274_v6 = vand.u32 4294901760, %v11058_v31  ;;  %v4278_v62 = vand.u32 4294901760, %v11061_v47  ;;  %v11100_v13 = vld [vmem:[%s20431_s5 + $0x30] sm:$0xff] }
 0x46f   :  { %21252 = vst [vmem:[#allocation15_spill] sm:$0xff] %v17176_v1  ;;  %12608 = vmatprep.mubr.f32.mxu0 %v16957_v20  ;;  %14189 = vmatprep.subr.bf16.mxu1 %v17176_v1 }
 0x470   :  { %14191 = vmatpush1.bf16.msra.mxu1 %v17185_v63  ;;  %v17210_v37 = vsub.f32 %v11058_v31, %v4274_v6  ;;  %v17213_v21 = vpack.c.bf16 %v4278_v62, %v4274_v6  ;;  %v17215_v11 = vsub.f32 %v11061_v47, %v4278_v62  ;;  %v11068_v63 = vld [vmem:[%s20429_s3 + $0x230] sm:$0xff]  ;;  %v4286_v47 = vand.u32 4294901760, %v11067_v12 }
 0x471   :  { %14193 = vmatprep.subr.bf16.mxu1 %v17204_v26  ;;  %v4284_v31 = vand.u32 4294901760, %v11068_v63  ;;  %v17234_v62 = vsub.f32 %v11065_v42, %v4280_v49  ;;  %v11074_v42 = vld [vmem:[%s20429_s3 + $0x260] sm:$0xff] }
 0x472   :  { %12609 = vmatmul.mubr.f32.gmra.mrb[8].mxu0 %v16969_v52  ;;  %21255 = vst [vmem:[#allocation7_spill] sm:$0xff] %v17213_v21  ;;  %v17241_v45 = vpack.c.bf16 %v4286_v47, %v4282_v41  ;;  %v17243_v61 = vsub.f32 %v11067_v12, %v4286_v47  ;;  %v4292_v43 = vand.u32 4294901760, %v11074_v42 }
 0x473   :  { %12611 = vmatprep.mubr.f32.mxu0 %v16971_v15  ;;  %v17232_v6 = vpack.c.bf16 %v4284_v31, %v4280_v49  ;;  %v17236_v1 = vsub.f32 %v11068_v63, %v4284_v31 }
 0x474   :  { %14195 = vmatpush1.bf16.msra.mxu1 %v17213_v21  ;;  %21257 = vst [vmem:[#allocation8_spill] sm:$0xff] %v17241_v45  ;;  %v11071_v21 = vld [vmem:[%s20429_s3 + $0x248] sm:$0xff]  ;;  %v17258_v12 = vsub.f32 %v11074_v42, %v4292_v43 }
 0x475   :  { %21256 = vst [vmem:[#allocation16_spill] sm:$0xff] %v17232_v6  ;;  %14197 = vmatprep.subr.bf16.mxu1 %v17232_v6  ;;  %v4288_v63 = vand.u32 4294901760, %v11071_v21 }
 0x476   :  { %12612 = vmatmul.mubr.f32.gmra.mrb[10].mxu0 %v16994_v33  ;;  %21260 = vst [vmem:[#allocation41_spill] sm:$0xff] %v17258_v12  ;;  %v21269_v33 = vand.u32 4294901760, %v17135_v55 }
 0x477   :  { %v4170_v26 = vpop.xlane.xlu0 %4169  ;;  %12614 = vmatprep.mubr.f32.mxu0 %v17000_v48  ;;  %v17254_v49 = vpack.c.bf16 %v4292_v43, %v4288_v63  ;;  %v17256_v31 = vsub.f32 %v11071_v21, %v4288_v63 }
 0x478   :  { %14199 = vmatpush1.bf16.msra.mxu1 %v17241_v45 }
 0x479   :  { %21258 = vst [vmem:[#allocation35_spill] sm:$0xff] %v17254_v49  ;;  %21259 = vst [vmem:[#allocation40_spill] sm:$0xff] %v17256_v31  ;;  %14201 = vmatprep.subr.bf16.mxu1 %v17254_v49 }
 0x47a   :  { %12615 = vmatmul.mubr.f32.gmra.mrb[12].mxu0 %v17021_v19 }
 0x47b   :  { %v4176_v41 = vpop.xlane.xlu0 %4175  ;;  %12617 = vmatprep.mubr.f32.mxu0 %v17035_v7  ;;  %v11098_v7 = vld [vmem:[%s20431_s5 + $0x20] sm:$0xff] }
 0x47e   :  { %12618 = vmatmul.mubr.f32.gmra.mrb[14].mxu0 %v17058_v40  ;;  %v11079_v40 = vld [vmem:[%s20429_s3 + $0x288] sm:$0xff] }
 0x47f   :  { %v4178_v47 = vpop.xlane.xlu0 %4177  ;;  %12620 = vmatprep.mubr.f32.mxu0 %v17063_v29  ;;  %v11076_v29 = vld [vmem:[%s20429_s3 + $0x270] sm:$0xff] }
 0x480   :  { %v4172_v6 = vpop.xlane.xlu1 %4171  ;;  %v4180_v45 = vadd.f32 %v4178_v47, %v4176_v41  ;;  %v11073_v41 = vld [vmem:[%s20429_s3 + $0x258] sm:$0xff]  ;;  %v4190_v47 = vld [vmem:[%s20435_s9] sm:$0xff] }
 0x481   :  { %v4179_v17 = vadd.f32 %v4172_v6, %v4170_v26  ;;  %v11070_v6 = vld [vmem:[%s20429_s3 + $0x240] sm:$0xff] }
 0x482   :  { %12621 = vmatmul.mubr.f32.gmra.mrb[16].mxu0 %v17081_v58  ;;  %v4183_v21 = vmul.f32 0.00390625, %v4180_v45 }
 0x483   :  { %v4182_v2 = vmul.f32 0.00390625, %v4179_v17  ;;  %12623 = vmatprep.mubr.f32.mxu0 %v17087_v60  ;;  %v4188_v17 = vld [vmem:[%s20434_s8] sm:$0xff] }
 0x485   :  { %v4184_v42 = vmul.f32 %v4182_v2, %v4182_v2 }
 0x486   :  { %12624 = vmatmul.mubr.f32.gmra.mrb[18].mxu0 %v17097_v14 }
 0x487   :  { %v4185_v63 = vsub.f32 %v4183_v21, %v4184_v42  ;;  %12630 = vmatprep.mubr.f32.mxu0 %v16901_v10  ;;  %v4290_v21 = vand.u32 4294901760, %v11070_v6  ;;  %v4294_v42 = vand.u32 4294901760, %v11073_v41 }
 0x489   :  { %v4186_v43 = vadd.f32 1e-05, %v4185_v63  ;;  %v17299_v49 = vpack.c.bf16 %v4294_v42, %v4290_v21  ;;  %v17301_v14 = vsub.f32 %v11070_v6, %v4290_v21  ;;  %v17303_v60 = vsub.f32 %v11073_v41, %v4294_v42 }
 0x48a   :  { %12631 = vmatmul.mubr.f32.vlgmr.msra.gmra.mrb[4].mxu0 %v16950_v44  ;;  %v4298_v41 = vand.u32 4294901760, %v11076_v29  ;;  %v4302_v21 = vand.u32 4294901760, %v11079_v40 }
 0x48b   :  { %15568 = vrsqrt.f32 %v4186_v43  ;;  %14175 = vmatpush3.bf16.msra.mxu0 %v17007_v25  ;;  %12633 = vmatprep.mubr.f32.mxu0 %v16955_v32  ;;  %v11077_v43 = vld [vmem:[%s20429_s3 + $0x278] sm:$0xff]  ;;  %21261 = vst [vmem:[#allocation42_spill] sm:$0xff] %v17299_v49  ;;  %21262 = vst [vmem:[#allocation37_spill] sm:$0xff] %v17301_v14 }
 0x48c   :  { %14177 = vmatprep.subr.bf16.mxu0 %v17042_v27  ;;  %21263 = vst [vmem:[#allocation18_spill] sm:$0xff] %v17303_v60  ;;  %14203 = vmatpush1.bf16.msra.mxu1 %v17299_v49  ;;  %v17326_v19 = vpack.c.bf16 %v4302_v21, %v4298_v41  ;;  %v21268_v49 = vand.u32 4294901760, %v17130_v56 }
 0x48e   :  { %12634 = vmatmul.mubr.f32.gmra.mrb[6].mxu0 %v16963_v39  ;;  %21267 = vst [vmem:[#allocation56_spill] sm:$0xff] %v17326_v19  ;;  %v17346_v48 = vsub.f32 %v17130_v56, %v21268_v49  ;;  %v11089_v56 = vld [vmem:[%s20429_s3 + $0x2d8] sm:$0xff]  ;;  %v11088_v49 = vld [vmem:[%s20429_s3 + $0x2d0] sm:$0xff] }
 0x48f   :  { %12636 = vmatprep.mubr.f32.mxu0 %v16976_v54 }
 0x490   :  { %v20697_v5 = vand.u32 4294901760, %v17346_v48 }
 0x492   :  { %12637 = vmatmul.mubr.f32.gmra.mrb[8].mxu0 %v16989_v23 }
 0x493   :  { %12639 = vmatprep.mubr.f32.mxu0 %v16992_v3 }
 0x495   :  { %v15569_v45 = vpop.eup %15568 }
 0x496   :  { %v4189_v26 = vmul.f32 %v15569_v45, %v4188_v17  ;;  %12640 = vmatmul.mubr.f32.gmra.mrb[10].mxu0 %v17019_v4  ;;  %v11080_v17 = vld [vmem:[%s20429_s3 + $0x290] sm:$0xff]  ;;  %v11099_v45 = vld [vmem:[%s20431_s5 + $0x28] sm:$0xff] }
 0x497   :  { %12642 = vmatprep.mubr.f32.mxu0 %v17029_v9  ;;  %v4300_v58 = vand.u32 4294901760, %v11080_v17 }
 0x498   :  { %v4191_v63 = vmul.f32 %v4189_v26, %v4182_v2  ;;  %4195 = vperm.xlu1 %15559, %v4189_v26   ;;  %v4296_v2 = vand.u32 4294901760, %v11077_v43 }
 0x49a   :  { %12643 = vmatmul.mubr.f32.gmra.mrb[12].mxu0 %v17052_v28  ;;  %v4192_v26 = vsub.f32 %v4190_v47, %v4191_v63  ;;  %v17314_v6 = vsub.f32 %v11077_v43, %v4296_v2  ;;  %v11101_v47 = vld [vmem:[%s20431_s5 + $0x38] sm:$0xff]  ;;  %v17319_v42 = vpack.c.bf16 %v4300_v58, %v4296_v2  ;;  %v17321_v63 = vsub.f32 %v11080_v17, %v4300_v58  ;;  %v11083_v43 = vld [vmem:[%s20429_s3 + $0x2a8] sm:$0xff]  ;;  %v11082_v2 = vld [vmem:[%s20429_s3 + $0x2a0] sm:$0xff] }
 0x49b   :  { %12645 = vmatprep.mubr.f32.mxu0 %v17061_v34  ;;  %v4304_v58 = vand.u32 4294901760, %v11083_v43  ;;  %v4306_v15 = vand.u32 4294901760, %v11082_v2 }
 0x49c   :  { %21264 = vst [vmem:[#allocation50_spill] sm:$0xff] %v17314_v6  ;;  %5861 = vperm.xlu1 %15559, %v11099_v45   ;;  %4202 = vperm.xlu0 %15558, %v4192_v26   ;;  %21265 = vst [vmem:[#allocation52_spill] sm:$0xff] %v17319_v42  ;;  %v11086_v45 = vld [vmem:[%s20429_s3 + $0x2c0] sm:$0xff]  ;;  %v11085_v26 = vld [vmem:[%s20429_s3 + $0x2b8] sm:$0xff] }
 0x49d   :  { %21266 = vst [vmem:[#allocation55_spill] sm:$0xff] %v17321_v63  ;;  %14205 = vmatprep.subr.bf16.mxu1 %v17319_v42  ;;  %v4308_v17 = vand.u32 4294901760, %v11086_v45  ;;  %v17351_v42 = vsub.f32 %v17135_v55, %v21269_v33  ;;  %v4310_v52 = vand.u32 4294901760, %v11085_v26  ;;  %v11092_v33 = vld [vmem:[%s20429_s3 + $0x2f0] sm:$0xff]  ;;  %v17381_v63 = vsub.f32 %v11079_v40, %v4302_v21 }
 0x49e   :  { %12646 = vmatmul.mubr.f32.gmra.mrb[14].mxu0 %v17079_v0  ;;  %14207 = vmatpush1.bf16.msra.mxu1 %v17326_v19  ;;  %v4316_v55 = vand.u32 4294901760, %v11092_v33  ;;  %v4314_v19 = vand.u32 4294901760, %v11088_v49  ;;  %v17383_v6 = vsub.f32 %v11083_v43, %v4304_v58  ;;  %v17387_v0 = vsub.f32 %v11082_v2, %v4306_v15 }
 0x49f   :  { %12648 = vmatprep.mubr.f32.mxu0 %v17085_v16  ;;  %v17354_v20 = vpack.c.bf16 %v4308_v17, %v4304_v58  ;;  %v17359_v18 = vpack.c.bf16 %v4310_v52, %v4306_v15  ;;  %21273 = vst [vmem:[#allocation19_spill] sm:$0xff] %v17381_v63  ;;  %v17385_v16 = vsub.f32 %v11086_v45, %v4308_v17  ;;  %v21285_v15 = vand.u32 4294901760, %v17351_v42 }
 0x4a0   :  { %5871 = vperm.xlu1 %15559, %v11101_v47   ;;  %5856 = vperm.xlu0 %15558, %v11098_v7   ;;  %v4312_v7 = vand.u32 4294901760, %v11089_v56  ;;  %v11091_v47 = vld [vmem:[%s20429_s3 + $0x2e8] sm:$0xff]  ;;  %21274 = vst [vmem:[#allocation10_spill] sm:$0xff] %v17383_v6  ;;  %21276 = vst [vmem:[#allocation22_spill] sm:$0xff] %v17387_v0  ;;  %v17400_v40 = vsub.f32 %v11088_v49, %v4314_v19  ;;  %v20696_v43 = vand.u32 4294901760, %v17155_v22  ;;  %v21286_v17 = vand.u32 4294901760, %v16950_v44 }
 0x4a1   :  { %21270 = vst [vmem:[#allocation58_spill] sm:$0xff] %v17354_v20  ;;  %21271 = vst [vmem:[#allocation59_spill] sm:$0xff] %v17359_v18  ;;  %14209 = vmatprep.subr.bf16.mxu1 %v17354_v20  ;;  %v4318_v59 = vand.u32 4294901760, %v11091_v47  ;;  %v17396_v20 = vsub.f32 %v11092_v33, %v4316_v55  ;;  %v4390_v21 = vsub.f32 %v17351_v42, %v21285_v15  ;;  %v20690_v44 = vand.u32 4294901760, %v17182_v24 }
 0x4a2   :  { %12649 = vmatmul.mubr.f32.gmra.mrb[16].mxu0 %v17095_v46  ;;  %14211 = vmatpush1.bf16.msra.mxu1 %v17359_v18  ;;  %v17379_v46 = vsub.f32 %v11076_v29, %v4298_v41  ;;  %21275 = vst [vmem:[#allocation11_spill] sm:$0xff] %v17385_v16  ;;  %v17391_v18 = vpack.c.bf16 %v4316_v55, %v4312_v7  ;;  %21282 = vst [vmem:[#allocation26_spill] sm:$0xff] %v17400_v40  ;;  %v21284_v41 = vand.u32 4294901760, %v16901_v10 }
 0x4a3   :  { %12651 = vmatprep.mubr.f32.mxu0 %v17104_v38  ;;  %v17389_v38 = vsub.f32 %v11085_v26, %v4310_v52  ;;  %v17393_v60 = vsub.f32 %v11089_v56, %v4312_v7  ;;  %21280 = vst [vmem:[#allocation14_spill] sm:$0xff] %v17396_v20  ;;  %v17402_v29 = vsub.f32 %v11091_v47, %v4318_v59  ;;  %v4391_v45 = vand.u32 4294901760, %v4390_v21 }
 0x4a4   :  { %5866 = vperm.xlu1 %15559, %v11100_v13   ;;  %21272 = vst [vmem:[#allocation9_spill] sm:$0xff] %v17379_v46  ;;  %21278 = vst [vmem:[#allocation13_spill] sm:$0xff] %v17391_v18  ;;  %v17398_v13 = vpack.c.bf16 %v4318_v59, %v4314_v19  ;;  %14213 = vmatprep.subr.bf16.mxu1 %v17391_v18  ;;  %v4378_v52 = vsub.f32 %v17346_v48, %v20697_v5  ;;  %v20695_v59 = vand.u32 4294901760, %v17157_v30 }
 0x4a5   :  { %21277 = vst [vmem:[#allocation12_spill] sm:$0xff] %v17389_v38  ;;  %21279 = vst [vmem:[#allocation23_spill] sm:$0xff] %v17393_v60  ;;  %v20693_v19 = vand.u32 4294901760, %v17178_v51  ;;  %v4384_v58 = vsub.f32 %v17155_v22, %v20696_v43  ;;  %v21287_v56 = vand.u32 4294901760, %v16955_v32  ;;  %v20691_v55 = vand.u32 4294901760, %v17180_v50 }
 0x4a6   :  { %12652 = vmatmul.mubr.f32.gmra.mrb[18].mxu0 %v17111_v53  ;;  %21281 = vst [vmem:[#allocation24_spill] sm:$0xff] %v17398_v13  ;;  %21283 = vst [vmem:[#allocation25_spill] sm:$0xff] %v17402_v29  ;;  %14215 = vmatpush1.bf16.msra.mxu1 %v17398_v13  ;;  %v4379_v10 = vand.u32 4294901760, %v4378_v52  ;;  %v4396_v2 = vsub.f32 %v17157_v30, %v20695_v59  ;;  %v4408_v32 = vsub.f32 %v17182_v24, %v20690_v44  ;;  %v21310_v59 = vld [vmem:[#allocation20_spill] sm:$0xff] }
 0x4a7   :  { %12658 = vmatprep.mubr.f32.mxu0 %v21284_v41  ;;  %v4402_v26 = vsub.f32 %v17178_v51, %v20693_v19  ;;  %v4385_v7 = vand.u32 4294901760, %v4384_v58  ;;  %v4414_v41 = vsub.f32 %v17180_v50, %v20691_v55  ;;  %v21288_v52 = vand.u32 4294901760, %v16963_v39 }
 0x4a8   :  { %v14216_v33 = vpack.c.bf16 %v4391_v45, %v4379_v10  ;;  %v4397_v49 = vand.u32 4294901760, %v4396_v2  ;;  %v20686_v21 = vand.u32 4294901760, %v17206_v36  ;;  %v21289_v10 = vand.u32 4294901760, %v16976_v54 }
 0x4a9   :  { %v4403_v47 = vand.u32 4294901760, %v4402_v26  ;;  %v4415_v45 = vand.u32 4294901760, %v4414_v41  ;;  %v4409_v58 = vand.u32 4294901760, %v4408_v32  ;;  %v20677_v39 = vand.u32 4294901760, %v17208_v35 }
 0x4aa   :  { %12659 = vmatmul.mubr.f32.vlgmr.msra.gmra.mrb[4].mxu0 %v21286_v17  ;;  %14217 = vmatprep.subr.bf16.mxu1 %v14216_v33  ;;  %v17443_v15 = vpack.c.bf16 %v4397_v49, %v4385_v7  ;;  %v4426_v2 = vsub.f32 %v17206_v36, %v20686_v21  ;;  %v20678_v26 = vand.u32 4294901760, %v17210_v37  ;;  %v20685_v54 = vand.u32 4294901760, %v17215_v11  ;;  %v21301_v21 = vld [vmem:[#allocation50_spill] sm:$0xff] }
 0x4ab   :  { %14179 = vmatpush3.bf16.msra.mxu0 %v17042_v27  ;;  %12661 = vmatprep.mubr.f32.mxu0 %v21287_v56  ;;  %v20687_v27 = vand.u32 4294901760, %v17187_v57  ;;  %v17456_v56 = vpack.c.bf16 %v4415_v45, %v4403_v47  ;;  %v21290_v7 = vand.u32 4294901760, %v16989_v23  ;;  %v4438_v41 = vsub.f32 %v17208_v35, %v20677_v39 }
 0x4ac   :  { %14181 = vmatprep.subr.bf16.mxu0 %v17007_v25  ;;  %v4427_v49 = vand.u32 4294901760, %v4426_v2  ;;  %v4432_v32 = vsub.f32 %v17210_v37, %v20678_v26  ;;  %v20682_v2 = vand.u32 4294901760, %v17234_v62  ;;  %v21292_v39 = vand.u32 4294901760, %v17019_v4 }
 0x4ad   :  { %v4420_v17 = vsub.f32 %v17187_v57, %v20687_v27  ;;  %v4439_v23 = vand.u32 4294901760, %v4438_v41  ;;  %v20692_v27 = vand.u32 4294901760, %v21301_v21  ;;  %v20710_v18 = vand.u32 4294901760, %v17400_v40 }
 0x4ae   :  { %12662 = vmatmul.mubr.f32.gmra.mrb[6].mxu0 %v21288_v52  ;;  %v21291_v52 = vand.u32 4294901760, %v16992_v3  ;;  %v4433_v45 = vand.u32 4294901760, %v4432_v32  ;;  %v20679_v3 = vand.u32 4294901760, %v17238_v8  ;;  %v4450_v41 = vsub.f32 %v17234_v62, %v20682_v2 }
 0x4af   :  { %12664 = vmatprep.mubr.f32.mxu0 %v21289_v10  ;;  %v4421_v33 = vand.u32 4294901760, %v4420_v17  ;;  %v4444_v10 = vsub.f32 %v17215_v11, %v20685_v54  ;;  %v17478_v26 = vpack.c.bf16 %v4439_v23, %v4427_v49 }
 0x4b0   :  { %v4456_v4 = vsub.f32 %v17238_v8, %v20679_v3  ;;  %v4451_v49 = vand.u32 4294901760, %v4450_v41  ;;  %v20684_v3 = vand.u32 4294901760, %v17258_v12  ;;  %v20689_v41 = vand.u32 4294901760, %v17301_v14 }
 0x4b1   :  { %v17469_v47 = vpack.c.bf16 %v4421_v33, %v4409_v58  ;;  %v4445_v17 = vand.u32 4294901760, %v4444_v10  ;;  %v21293_v58 = vand.u32 4294901760, %v17029_v9  ;;  %v21294_v9 = vand.u32 4294901760, %v17052_v28 }
 0x4b2   :  { %12665 = vmatmul.mubr.f32.gmra.mrb[8].mxu0 %v21290_v7  ;;  %v20680_v7 = vand.u32 4294901760, %v17236_v1  ;;  %v4457_v10 = vand.u32 4294901760, %v4456_v4  ;;  %v21296_v4 = vld [vmem:[#allocation18_spill] sm:$0xff] }
 0x4b3   :  { %12667 = vmatprep.mubr.f32.mxu0 %v21291_v52  ;;  %v17483_v33 = vpack.c.bf16 %v4445_v17, %v4433_v45  ;;  %v21295_v45 = vand.u32 4294901760, %v17061_v34  ;;  %v20688_v34 = vand.u32 4294901760, %v21296_v4 }
 0x4b4   :  { %v4462_v32 = vsub.f32 %v17236_v1, %v20680_v7 }
 0x4b6   :  { %12668 = vmatmul.mubr.f32.gmra.mrb[10].mxu0 %v21292_v39  ;;  %v20681_v39 = vand.u32 4294901760, %v17243_v61  ;;  %v4463_v52 = vand.u32 4294901760, %v4462_v32  ;;  %v4486_v32 = vsub.f32 %v17258_v12, %v20684_v3  ;;  %v4492_v3 = vsub.f32 %v21296_v4, %v20688_v34 }
 0x4b7   :  { %12670 = vmatprep.mubr.f32.mxu0 %v21293_v58  ;;  %v20683_v58 = vand.u32 4294901760, %v17256_v31  ;;  %v20699_v34 = vand.u32 4294901760, %v17379_v46 }
 0x4b8   :  { %v4468_v23 = vsub.f32 %v17243_v61, %v20681_v39  ;;  %v17502_v17 = vpack.c.bf16 %v4463_v52, %v4451_v49 }
 0x4b9   :  { %v4474_v28 = vsub.f32 %v17256_v31, %v20683_v58  ;;  %v4487_v58 = vand.u32 4294901760, %v4486_v32 }
 0x4ba   :  { %12671 = vmatmul.mubr.f32.gmra.mrb[12].mxu0 %v21294_v9  ;;  %v4469_v7 = vand.u32 4294901760, %v4468_v23  ;;  %v21297_v9 = vld [vmem:[#allocation60_spill] sm:$0xff]  ;;  %v4480_v23 = vsub.f32 %v17301_v14, %v20689_v41  ;;  %v21306_v41 = vld [vmem:[#allocation39_spill] sm:$0xff] }
 0x4bb   :  { %12673 = vmatprep.mubr.f32.mxu0 %v21295_v45  ;;  %v21298_v49 = vand.u32 4294901760, %v21297_v9  ;;  %v21299_v45 = vld [vmem:[#allocation32_spill] sm:$0xff]  ;;  %v4475_v2 = vand.u32 4294901760, %v4474_v28  ;;  %v21303_v28 = vld [vmem:[#allocation55_spill] sm:$0xff]  ;;  %v21307_v44 = vand.u32 4294901760, %v21306_v41 }
 0x4bc   :  { %v17516_v52 = vpack.c.bf16 %v4469_v7, %v4457_v10  ;;  %v21300_v39 = vand.u32 4294901760, %v21299_v45  ;;  %v4481_v54 = vand.u32 4294901760, %v4480_v23  ;;  %v11048_v7 = vld [vmem:[%s20429_s3 + $0x190] sm:$0xff]  ;;  %v11051_v10 = vld [vmem:[%s20429_s3 + $0x1a8] sm:$0xff]  ;;  %v20694_v32 = vand.u32 4294901760, %v21303_v28 }
 0x4bd   :  { %v17533_v9 = vpack.c.bf16 %v4487_v58, %v4475_v2  ;;  %v4498_v23 = vsub.f32 %v21301_v21, %v20692_v27  ;;  %v5161_v58 = vand.u32 4294901760, %v11048_v7  ;;  %v4504_v27 = vsub.f32 %v17379_v46, %v20699_v34  ;;  %v21314_v34 = vld [vmem:[#allocation44_spill] sm:$0xff] }
 0x4be   :  { %12674 = vmatmul.mubr.f32.gmra.mrb[14].mxu0 %v21298_v49  ;;  %v21304_v49 = vld [vmem:[#allocation34_spill] sm:$0xff]  ;;  %v4510_v2 = vsub.f32 %v21303_v28, %v20694_v32  ;;  %v20701_v32 = vand.u32 4294901760, %v17385_v16  ;;  %v17681_v46 = vld [vmem:[%s20429_s3 + $0x208] sm:$0xff] }
 0x4bf   :  { %12676 = vmatprep.mubr.f32.mxu0 %v21300_v39  ;;  %21302 = vst [vmem:[#allocation27_spill] sm:$0xff] %v17533_v9  ;;  %v4493_v39 = vand.u32 4294901760, %v4492_v3  ;;  %v21305_v45 = vand.u32 4294901760, %v21304_v49  ;;  %v20698_v3 = vand.u32 4294901760, %v17381_v63  ;;  %v5164_v49 = vand.u32 4294901760, %v11051_v10  ;;  %v21321_v9 = vld [vmem:[#allocation48_spill] sm:$0xff] }
 0x4c0   :  { %v4511_v19 = vand.u32 4294901760, %v4510_v2  ;;  %v4505_v41 = vand.u32 4294901760, %v4504_v27  ;;  %v20704_v27 = vand.u32 4294901760, %v17387_v0 }
 0x4c1   :  { %v17544_v55 = vpack.c.bf16 %v4493_v39, %v4481_v54  ;;  %v21309_v54 = vand.u32 4294901760, %v17111_v53  ;;  %v20700_v39 = vand.u32 4294901760, %v17383_v6  ;;  %v17563_v5 = vpack.c.bf16 %v5164_v49, %v5161_v58 }
 0x4c2   :  { %12677 = vmatmul.mubr.f32.gmra.mrb[16].mxu0 %v21305_v45  ;;  %v4499_v45 = vand.u32 4294901760, %v4498_v23  ;;  %v4534_v53 = vsub.f32 %v17385_v16, %v20701_v32  ;;  %v17676_v16 = vld [vmem:[%s20429_s3 + $0x1f0] sm:$0xff] }
 0x4c3   :  { %12679 = vmatprep.mubr.f32.mxu0 %v21307_v44  ;;  %21308 = vst [vmem:[#allocation29_spill] sm:$0xff] %v17544_v55  ;;  %v4516_v44 = vsub.f32 %v17381_v63, %v20698_v3  ;;  %21312 = vst [vmem:[#allocation63_spill] sm:$0xff] %v17563_v5  ;;  %v4522_v2 = vsub.f32 %v17383_v6, %v20700_v39  ;;  %v20705_v3 = vand.u32 4294901760, %v17389_v38  ;;  %v21315_v39 = vld [vmem:[#allocation45_spill] sm:$0xff]  ;;  %v21328_v55 = vld [vmem:[#allocation30_spill] sm:$0xff] }
 0x4c4   :  { %v17561_v23 = vpack.c.bf16 %v4511_v19, %v4499_v45  ;;  %v4535_v45 = vand.u32 4294901760, %v4534_v53  ;;  %v20709_v53 = vand.u32 4294901760, %v17396_v20 }
 0x4c5   :  { %v4517_v43 = vand.u32 4294901760, %v4516_v44  ;;  %v4523_v19 = vand.u32 4294901760, %v4522_v2  ;;  %v4528_v44 = vsub.f32 %v17387_v0, %v20704_v27  ;;  %v4540_v32 = vsub.f32 %v17389_v38, %v20705_v3  ;;  %v21317_v27 = vld [vmem:[#allocation46_spill] sm:$0xff]  ;;  %v21330_v0 = vld [vmem:[#allocation36_spill] sm:$0xff] }
 0x4c6   :  { %12680 = vmatmul.mubr.f32.gmra.mrb[18].mxu0 %v21309_v54  ;;  %21311 = vst [vmem:[#allocation28_spill] sm:$0xff] %v17561_v23  ;;  %v4558_v3 = vsub.f32 %v17396_v20, %v20709_v53  ;;  %v17607_v23 = vsub.f32 %v11048_v7, %v5161_v58  ;;  %v17609_v53 = vsub.f32 %v11051_v10, %v5164_v49  ;;  %v17658_v49 = vld [vmem:[%s20429_s3 + $0x1c0] sm:$0xff]  ;;  %v17663_v58 = vld [vmem:[%s20429_s3 + $0x1d8] sm:$0xff] }
 0x4c7   :  { %12686 = vmatprep.mubr.f32.mxu0 %v21310_v59  ;;  %v17572_v54 = vpack.c.bf16 %v4517_v43, %v4505_v41  ;;  %v20708_v43 = vand.u32 4294901760, %v17393_v60  ;;  %v17586_v41 = vpack.c.bf16 %v4535_v45, %v4523_v19  ;;  %v4529_v2 = vand.u32 4294901760, %v4528_v44  ;;  %v21318_v19 = vld [vmem:[#allocation47_spill] sm:$0xff]  ;;  %v17701_v20 = vld [vmem:[%s20429_s3 + $0x238] sm:$0xff] }
 0x4c8   :  { %v4541_v13 = vand.u32 4294901760, %v4540_v32  ;;  %v4559_v32 = vand.u32 4294901760, %v4558_v3  ;;  %21319 = vst [vmem:[#allocation32_spill] sm:$0xff] %v17607_v23  ;;  %21320 = vst [vmem:[#allocation34_spill] sm:$0xff] %v17609_v53  ;;  %v17621_v7 = vpack.c.bf16 %v17609_v53, %v17607_v23  ;;  %v20731_v38 = vand.u32 4294901760, %v17658_v49 }
 0x4c9   :  { %21313 = vst [vmem:[#allocation62_spill] sm:$0xff] %v17572_v54  ;;  %21316 = vst [vmem:[#allocation60_spill] sm:$0xff] %v17586_v41  ;;  %v20711_v54 = vand.u32 4294901760, %v17402_v29  ;;  %v20730_v6 = vand.u32 4294901760, %v17663_v58 }
 0x4ca   :  { %12687 = vmatmul.mubr.f32.vlgmr.msra.gmra.mrb[4].mxu0 %v21314_v34  ;;  %v17599_v45 = vpack.c.bf16 %v4541_v13, %v4529_v2 }
 0x4cb   :  { %14183 = vmatpush3.bf16.msra.mxu0 %v17007_v25  ;;  %12689 = vmatprep.mubr.f32.mxu0 %v21315_v39  ;;  %v4546_v25 = vsub.f32 %v17393_v60, %v20708_v43  ;;  %v4552_v43 = vsub.f32 %v17400_v40, %v20710_v18  ;;  %v4564_v41 = vsub.f32 %v17402_v29, %v20711_v54  ;;  %v21322_v18 = vld [vmem:[#allocation49_spill] sm:$0xff]  ;;  %v20733_v40 = vand.u32 4294901760, %v17676_v16  ;;  %v17696_v60 = vld [vmem:[%s20429_s3 + $0x220] sm:$0xff] }
 0x4cc   :  { %14377 = vmatprep.subr.bf16.mxu0 %v17563_v5  ;;  %v17689_v54 = vpack.c.bf16 %v20730_v6, %v20731_v38  ;;  %v20732_v29 = vand.u32 4294901760, %v17681_v46  ;;  %v20737_v6 = vand.u32 4294901760, %v17696_v60  ;;  %v20736_v38 = vand.u32 4294901760, %v17701_v20 }
 0x4cd   :  { %v4547_v44 = vand.u32 4294901760, %v4546_v25  ;;  %v4553_v3 = vand.u32 4294901760, %v4552_v43  ;;  %v4565_v2 = vand.u32 4294901760, %v4564_v41  ;;  %v21325_v43 = vld [vmem:[#allocation54_spill] sm:$0xff]  ;;  %v21327_v25 = vld [vmem:[#allocation31_spill] sm:$0xff]  ;;  %v21329_v41 = vld [vmem:[#allocation33_spill] sm:$0xff] }
 0x4ce   :  { %12690 = vmatmul.mubr.f32.gmra.mrb[6].mxu0 %v21317_v27  ;;  %21332 = vst [vmem:[#allocation39_spill] sm:$0xff] %v17689_v54 }
 0x4cf   :  { %12692 = vmatprep.mubr.f32.mxu0 %v21318_v19  ;;  %v17614_v13 = vpack.c.bf16 %v4559_v32, %v4547_v44  ;;  %v17623_v10 = vpack.c.bf16 %v4565_v2, %v4553_v3  ;;  %v21323_v44 = vld [vmem:[#allocation51_spill] sm:$0xff]  ;;  %v21324_v2 = vld [vmem:[#allocation53_spill] sm:$0xff] }
 0x4d0   :  { %v21326_v32 = vld [vmem:[#allocation57_spill] sm:$0xff] }
 0x4d1   :  { %v21331_v3 = vld [vmem:[#allocation61_spill] sm:$0xff] }
 0x4d2   :  { %12693 = vmatmul.mubr.f32.gmra.mrb[8].mxu0 %v21321_v9 }
 0x4d3   :  { %12695 = vmatprep.mubr.f32.mxu0 %v21322_v18 }
 0x4d6   :  { %12696 = vmatmul.mubr.f32.gmra.mrb[10].mxu0 %v21323_v44 }
 0x4d7   :  { %12698 = vmatprep.mubr.f32.mxu0 %v21324_v2 }
 0x4da   :  { %12699 = vmatmul.mubr.f32.gmra.mrb[12].mxu0 %v21325_v43 }
 0x4db   :  { %12701 = vmatprep.mubr.f32.mxu0 %v21326_v32 }
 0x4de   :  { %12702 = vmatmul.mubr.f32.gmra.mrb[14].mxu0 %v21327_v25 }
 0x4df   :  { %12704 = vmatprep.mubr.f32.mxu0 %v21328_v55 }
 0x4e2   :  { %12705 = vmatmul.mubr.f32.gmra.mrb[16].mxu0 %v21329_v41 }
 0x4e3   :  { %12707 = vmatprep.mubr.f32.mxu0 %v21330_v0 }
 0x4e6   :  { %12708 = vmatmul.mubr.f32.gmra.mrb[18].mxu0 %v21331_v3 }
 0x4e7   :  { %12714 = vmatprep.mubr.f32.mxu0 %v21310_v59  ;;  %v17711_v59 = vpack.c.bf16 %v20732_v29, %v20733_v40  ;;  %v17733_v29 = vpack.c.bf16 %v20736_v38, %v20737_v6 }
 0x4e9   :  { %21333 = vst [vmem:[#allocation20_spill] sm:$0xff] %v17711_v59  ;;  %21334 = vst [vmem:[#allocation44_spill] sm:$0xff] %v17733_v29 }
 0x4ea   :  { %12715 = vmatmul.mubr.f32.vlgmr.msra.gmra.mrb[4].mxu0 %v21314_v34  ;;  %v17718_v34 = vld [vmem:[%s20429_s3 + $0x250] sm:$0xff] }
 0x4eb   :  { %14379 = vmatpush3.bf16.msra.mxu0 %v17563_v5  ;;  %12717 = vmatprep.mubr.f32.mxu0 %v21315_v39  ;;  %v17723_v39 = vld [vmem:[%s20429_s3 + $0x268] sm:$0xff]  ;;  %v20741_v40 = vand.u32 4294901760, %v17718_v34 }
 0x4ec   :  { %14381 = vmatprep.subr.bf16.mxu0 %v17689_v54  ;;  %v20740_v5 = vand.u32 4294901760, %v17723_v39 }
 0x4ee   :  { %12718 = vmatmul.mubr.f32.gmra.mrb[6].mxu0 %v21317_v27  ;;  %v17740_v27 = vld [vmem:[%s20429_s3 + $0x280] sm:$0xff]  ;;  %v17755_v38 = vpack.c.bf16 %v20740_v5, %v20741_v40  ;;  %v17791_v40 = vld [vmem:[%s20429_s3 + $0x2f8] sm:$0xff] }
 0x4ef   :  { %14383 = vmatpush3.bf16.msra.mxu0 %v17689_v54  ;;  %12720 = vmatprep.mubr.f32.mxu0 %v21318_v19  ;;  %v17745_v19 = vld [vmem:[%s20429_s3 + $0x298] sm:$0xff]  ;;  %v20747_v6 = vand.u32 4294901760, %v17740_v27  ;;  %v20753_v63 = vand.u32 4294901760, %v17791_v40 }
 0x4f0   :  { %14385 = vmatprep.subr.bf16.mxu0 %v17711_v59  ;;  %21335 = vst [vmem:[#allocation45_spill] sm:$0xff] %v17755_v38  ;;  %v20746_v54 = vand.u32 4294901760, %v17745_v19 }
 0x4f2   :  { %12721 = vmatmul.mubr.f32.gmra.mrb[8].mxu0 %v21321_v9  ;;  %v17762_v9 = vld [vmem:[%s20429_s3 + $0x2b0] sm:$0xff] }
 0x4f3   :  { %14387 = vmatpush3.bf16.msra.mxu0 %v17711_v59  ;;  %12723 = vmatprep.mubr.f32.mxu0 %v21322_v18  ;;  %v17767_v18 = vld [vmem:[%s20429_s3 + $0x2c8] sm:$0xff]  ;;  %v20752_v5 = vand.u32 4294901760, %v17762_v9  ;;  %v17779_v59 = vpack.c.bf16 %v20746_v54, %v20747_v6 }
 0x4f4   :  { %14389 = vmatprep.subr.bf16.mxu0 %v17733_v29  ;;  %v21337_v54 = vand.u32 4294901760, %v17767_v18 }
 0x4f5   :  { %21336 = vst [vmem:[#allocation46_spill] sm:$0xff] %v17779_v59 }
 0x4f6   :  { %12724 = vmatmul.mubr.f32.gmra.mrb[10].mxu0 %v21323_v44  ;;  %v17800_v6 = vpack.c.bf16 %v21337_v54, %v20752_v5 }
 0x4f7   :  { %14391 = vmatpush3.bf16.msra.mxu0 %v17733_v29  ;;  %12726 = vmatprep.mubr.f32.mxu0 %v21324_v2  ;;  %v17786_v2 = vld [vmem:[%s20429_s3 + $0x2e0] sm:$0xff]  ;;  %v21339_v29 = vand.u32 4294901760, %v17607_v23 }
 0x4f8   :  { %14393 = vmatprep.subr.bf16.mxu0 %v17755_v38  ;;  %21338 = vst [vmem:[#allocation47_spill] sm:$0xff] %v17800_v6  ;;  %v20754_v44 = vand.u32 4294901760, %v17786_v2 }
 0x4fa   :  { %12727 = vmatmul.mubr.f32.gmra.mrb[12].mxu0 %v21325_v43  ;;  %v5265_v43 = vsub.f32 %v17607_v23, %v21339_v29  ;;  %v17819_v54 = vpack.c.bf16 %v20753_v63, %v20754_v44  ;;  %v21345_v44 = vld [vmem:[#allocation43_spill] sm:$0xff]  ;;  %v21347_v23 = vand.u32 4294901760, %v17681_v46 }
 0x4fb   :  { %14395 = vmatpush3.bf16.msra.mxu0 %v17755_v38  ;;  %12729 = vmatprep.mubr.f32.mxu0 %v21326_v32  ;;  %v21340_v38 = vand.u32 4294901760, %v17609_v53 }
 0x4fc   :  { %14397 = vmatprep.subr.bf16.mxu0 %v17779_v59  ;;  %21341 = vst [vmem:[#allocation48_spill] sm:$0xff] %v17819_v54  ;;  %v5266_v5 = vand.u32 4294901760, %v5265_v43 }
 0x4fd   :  { %v5272_v32 = vsub.f32 %v17609_v53, %v21340_v38 }
 0x4fe   :  { %12730 = vmatmul.mubr.f32.gmra.mrb[14].mxu0 %v21327_v25  ;;  %v21342_v25 = vand.u32 4294901760, %v17658_v49 }
 0x4ff   :  { %14399 = vmatpush3.bf16.msra.mxu0 %v17779_v59  ;;  %12732 = vmatprep.mubr.f32.mxu0 %v21328_v55  ;;  %v5273_v29 = vand.u32 4294901760, %v5272_v32 }
 0x500   :  { %14401 = vmatprep.subr.bf16.mxu0 %v17800_v6  ;;  %v17830_v43 = vsub.f32 %v17658_v49, %v21342_v25  ;;  %v17847_v49 = vsub.f32 %v17681_v46, %v21347_v23  ;;  %v21352_v23 = vand.u32 4294901760, %v17718_v34 }
 0x501   :  { %v14408_v38 = vpack.c.bf16 %v5273_v29, %v5266_v5 }
 0x502   :  { %12733 = vmatmul.mubr.f32.gmra.mrb[16].mxu0 %v21329_v41  ;;  %v21343_v41 = vand.u32 4294901760, %v17663_v58 }
 0x503   :  { %14403 = vmatpush3.bf16.msra.mxu0 %v17800_v6  ;;  %12735 = vmatprep.mubr.f32.mxu0 %v21330_v0  ;;  %v21344_v0 = vld [vmem:[#allocation21_spill] sm:$0xff] }
 0x504   :  { %14405 = vmatprep.subr.bf16.mxu0 %v17819_v54  ;;  %v17835_v32 = vsub.f32 %v17663_v58, %v21343_v41  ;;  %v20759_v58 = vand.u32 4294901760, %v17830_v43 }
 0x506   :  { %12736 = vmatmul.mubr.f32.gmra.mrb[18].mxu0 %v21331_v3  ;;  %v21346_v3 = vand.u32 4294901760, %v17676_v16  ;;  %v20762_v41 = vand.u32 4294901760, %v17835_v32 }
 0x507   :  { %14407 = vmatpush3.bf16.msra.mxu0 %v17819_v54 }
 0x508   :  { %14409 = vmatprep.subr.bf16.mxu0 %v14408_v38  ;;  %v17842_v53 = vsub.f32 %v17676_v16, %v21346_v3 }
 0x517   :  { %v4196_v55 = vpop.permute.xlu1 %4195 }
 0x518   :  { %v4198_v63 = vmul.f32 %v4196_v55, %v21344_v0  ;;  %v4199_v5 = vmul.f32 %v4196_v55, %v21345_v44  ;;  %v21348_v0 = vand.u32 4294901760, %v17696_v60  ;;  %v21349_v55 = vand.u32 4294901760, %v17701_v20 }
 0x51a   :  { %v17854_v44 = vsub.f32 %v17696_v60, %v21348_v0  ;;  %v17859_v16 = vsub.f32 %v17701_v20, %v21349_v55  ;;  %v5279_v60 = vsub.f32 %v17830_v43, %v20759_v58  ;;  %v5286_v20 = vsub.f32 %v17835_v32, %v20762_v41 }
 0x51b   :  { %v4203_v29 = vpop.permute.xlu0 %4202  ;;  %v21356_v41 = vand.u32 4294901760, %v17842_v53  ;;  %v21357_v0 = vand.u32 4294901760, %v17847_v49 }
 0x51c   :  { %v4205_v25 = vadd.f32 %v4203_v29, %v4198_v63  ;;  %v4206_v54 = vadd.f32 %v4203_v29, %v4199_v5  ;;  %v5287_v59 = vand.u32 4294901760, %v5286_v20  ;;  %v21358_v21 = vand.u32 4294901760, %v17854_v44 }
 0x51d   :  { %v5293_v55 = vsub.f32 %v17842_v53, %v21356_v41  ;;  %v21359_v14 = vand.u32 4294901760, %v17859_v16 }
 0x51e   :  { %v17861_v3 = vand.u32 4294901760, %v4205_v25  ;;  %v17863_v46 = vand.u32 4294901760, %v4206_v54  ;;  %v5307_v28 = vsub.f32 %v17854_v44, %v21358_v21 }
 0x51f   :  { %v5314_v41 = vsub.f32 %v17859_v16, %v21359_v14  ;;  %v5294_v21 = vand.u32 4294901760, %v5293_v55  ;;  %v21364_v55 = vand.u32 4294901760, %v17767_v18 }
 0x520   :  { %21350 = vst [vmem:[#allocation49_spill] sm:$0xff] %v17863_v46  ;;  %v17868_v5 = vsub.f32 %v4205_v25, %v17861_v3  ;;  %v17871_v29 = vsub.f32 %v4206_v54, %v17863_v46  ;;  %v17884_v25 = vsub.f32 %v17718_v34, %v21352_v23  ;;  %v21353_v54 = vand.u32 4294901760, %v17723_v39 }
 0x521   :  { %v5300_v34 = vsub.f32 %v17847_v49, %v21357_v0 }
 0x522   :  { %21351 = vst [vmem:[#allocation51_spill] sm:$0xff] %v17871_v29  ;;  %v17889_v63 = vsub.f32 %v17723_v39, %v21353_v54  ;;  %v17892_v58 = vand.u32 4294901760, %v17868_v5  ;;  %v17895_v6 = vand.u32 4294901760, %v17871_v29  ;;  %v5280_v54 = vand.u32 4294901760, %v5279_v60 }
 0x523   :  { %v20787_v4 = vand.u32 4294901760, %v17884_v25  ;;  %v21361_v60 = vand.u32 4294901760, %v17745_v19 }
 0x524   :  { %21354 = vst [vmem:[#allocation53_spill] sm:$0xff] %v17892_v58  ;;  %21355 = vst [vmem:[#allocation54_spill] sm:$0xff] %v17895_v6  ;;  %v4356_v23 = vsub.f32 %v17868_v5, %v17892_v58  ;;  %v4367_v39 = vsub.f32 %v17871_v29, %v17895_v6  ;;  %v20786_v0 = vand.u32 4294901760, %v17889_v63  ;;  %v21360_v58 = vand.u32 4294901760, %v17740_v27 }
 0x525   :  { %v17923_v20 = vsub.f32 %v17745_v19, %v21361_v60  ;;  %v5301_v29 = vand.u32 4294901760, %v5300_v34  ;;  %v14412_v14 = vpack.c.bf16 %v5287_v59, %v5280_v54  ;;  %v21362_v59 = vmov 0.0  }
 0x526   :  { %v4357_v31 = vand.u32 4294901760, %v4356_v23  ;;  %v4368_v12 = vand.u32 4294901760, %v4367_v39  ;;  %v17918_v6 = vsub.f32 %v17740_v27, %v21360_v58  ;;  %v5308_v23 = vand.u32 4294901760, %v5307_v28 }
 0x527   :  { %v5315_v39 = vand.u32 4294901760, %v5314_v41  ;;  %v5321_v27 = vsub.f32 %v17884_v25, %v20787_v4  ;;  %v5328_v19 = vsub.f32 %v17889_v63, %v20786_v0  ;;  %v21363_v28 = vand.u32 4294901760, %v17762_v9  ;;  %v21418_v0 = vld [vmem:[#allocation35_spill] sm:$0xff]  ;;  %v21419_v4 = vld [vmem:[#allocation45_spill] sm:$0xff] }
 0x528   :  { %4358 = vmatmul.mubr.f32.vlgmr.msra.gmra.mrb[8].mxu1 %v4357_v31  ;;  %12770 = vmatprep.mubr.f32.mxu0 %v4357_v31  ;;  %v20785_v58 = vand.u32 4294901760, %v17918_v6  ;;  %v20784_v31 = vand.u32 4294901760, %v17923_v20  ;;  %v17945_v34 = vsub.f32 %v17767_v18, %v21364_v55  ;;  %v21365_v41 = vand.u32 4294901760, %v17786_v2 }
 0x529   :  { %14219 = vmatpush1.bf16.msra.mxu1 %v17443_v15  ;;  %12771 = vmatmul.mubr.f32.vlgmr.msra.gmra.mrb[20].mxu0 %v4368_v12  ;;  %v14416_v15 = vpack.c.bf16 %v5301_v29, %v5294_v21  ;;  %v14420_v54 = vpack.c.bf16 %v5315_v39, %v5308_v23  ;;  %v5329_v29 = vand.u32 4294901760, %v5328_v19 }
 0x52a   :  { %14411 = vmatpush3.bf16.msra.mxu0 %v14408_v38  ;;  %12805 = vmatprep.mubr.f32.mxu0 %v17861_v3  ;;  %v17940_v38 = vsub.f32 %v17762_v9, %v21363_v28  ;;  %v5335_v9 = vsub.f32 %v17918_v6, %v20785_v58  ;;  %v5342_v18 = vsub.f32 %v17923_v20, %v20784_v31  ;;  %v21415_v31 = vld [vmem:[#allocation16_spill] sm:$0xff] }
 0x52b   :  { %4363 = vmatprep.mubr.f32.mxu1 %v21362_v59  ;;  %14221 = vmatprep.subr.bf16.mxu1 %v17456_v56  ;;  %v5322_v56 = vand.u32 4294901760, %v5321_v27  ;;  %v17961_v60 = vsub.f32 %v17786_v2, %v21365_v41  ;;  %v21370_v41 = vld [vmem:[#allocation62_spill] sm:$0xff]  ;;  %v21416_v58 = vld [vmem:[#allocation44_spill] sm:$0xff] }
 0x52c   :  { %4369 = vmatmul.mubr.f32.gmra.mrb[10].mxu1 %v4368_v12  ;;  %14413 = vmatprep.subr.bf16.mxu0 %v14412_v14  ;;  %v20783_v12 = vand.u32 4294901760, %v17940_v38  ;;  %v5336_v23 = vand.u32 4294901760, %v5335_v9  ;;  %v5343_v39 = vand.u32 4294901760, %v5342_v18  ;;  %v21369_v9 = vld [vmem:[#allocation28_spill] sm:$0xff] }
 0x52d   :  { %14223 = vmatpush1.bf16.msra.mxu1 %v17469_v47  ;;  %4599 = vmatprep.mubr.f32.mxu1 %v21362_v59  ;;  %v20782_v47 = vand.u32 4294901760, %v17945_v34 }
 0x52e   :  { %14415 = vmatpush3.bf16.msra.mxu0 %v14412_v14  ;;  %14225 = vmatprep.subr.bf16.mxu1 %v17478_v26  ;;  %v21366_v26 = vand.u32 4294901760, %v17791_v40  ;;  %v14424_v14 = vpack.c.bf16 %v5329_v29, %v5322_v56  ;;  %v5349_v27 = vsub.f32 %v17940_v38, %v20783_v12  ;;  %v21368_v29 = vld [vmem:[#allocation29_spill] sm:$0xff]  ;;  %v21414_v12 = vld [vmem:[#allocation7_spill] sm:$0xff] }
 0x52f   :  { %14417 = vmatprep.subr.bf16.mxu0 %v14416_v15  ;;  %v5356_v2 = vsub.f32 %v17945_v34, %v20782_v47  ;;  %v21413_v47 = vld [vmem:[#allocation20_spill] sm:$0xff] }
 0x530   :  { %v17966_v21 = vsub.f32 %v17791_v40, %v21366_v26  ;;  %v20781_v40 = vand.u32 4294901760, %v17961_v60  ;;  %v21371_v26 = vld [vmem:[#allocation60_spill] sm:$0xff] }
 0x531   :  { %14227 = vmatpush1.bf16.msra.mxu1 %v17483_v33  ;;  %v21367_v33 = vld [vmem:[#allocation27_spill] sm:$0xff]  ;;  %v5357_v28 = vand.u32 4294901760, %v5356_v2  ;;  %v14452_v2 = vpack.c.bf16 %v17859_v16, %v17854_v44 }
 0x532   :  { %14419 = vmatpush3.bf16.msra.mxu0 %v14416_v15  ;;  %14229 = vmatprep.subr.bf16.mxu1 %v17502_v17  ;;  %v20780_v19 = vand.u32 4294901760, %v17966_v21  ;;  %v14428_v17 = vpack.c.bf16 %v5343_v39, %v5336_v23  ;;  %v5350_v15 = vand.u32 4294901760, %v5349_v27  ;;  %v5363_v55 = vsub.f32 %v17961_v60, %v20781_v40  ;;  %v21406_v40 = vld [vmem:[#allocation5_spill] sm:$0xff] }
 0x533   :  { %14421 = vmatprep.subr.bf16.mxu0 %v14420_v54  ;;  %v14444_v39 = vpack.c.bf16 %v17835_v32, %v17830_v43  ;;  %v21375_v27 = vpack.c.bf16 %v17187_v57, %v17182_v24 }
 0x534   :  { %v5370_v56 = vsub.f32 %v17966_v21, %v20780_v19  ;;  %v21405_v19 = vld [vmem:[#allocation63_spill] sm:$0xff] }
 0x535   :  { %14231 = vmatpush1.bf16.msra.mxu1 %v17516_v52  ;;  %v14432_v52 = vpack.c.bf16 %v5357_v28, %v5350_v15  ;;  %v14456_v15 = vpack.c.bf16 %v17889_v63, %v17884_v25  ;;  %v21379_v28 = vpack.c.bf16 %v17243_v61, %v17238_v8 }
 0x536   :  { %14423 = vmatpush3.bf16.msra.mxu0 %v14420_v54  ;;  %14233 = vmatprep.subr.bf16.mxu1 %v21367_v33  ;;  %v5364_v54 = vand.u32 4294901760, %v5363_v55  ;;  %v5371_v18 = vand.u32 4294901760, %v5370_v56  ;;  %v21377_v33 = vpack.c.bf16 %v17215_v11, %v17210_v37  ;;  %v21380_v55 = vld [vmem:[#allocation41_spill] sm:$0xff]  ;;  %v21381_v56 = vld [vmem:[#allocation40_spill] sm:$0xff] }
 0x537   :  { %14425 = vmatprep.subr.bf16.mxu0 %v14424_v14 }
 0x538   :  { %v14436_v23 = vpack.c.bf16 %v5371_v18, %v5364_v54  ;;  %v21384_v54 = vld [vmem:[#allocation37_spill] sm:$0xff] }
 0x539   :  { %14235 = vmatpush1.bf16.msra.mxu1 %v21368_v29  ;;  %v21382_v29 = vpack.c.bf16 %v21380_v55, %v21381_v56 }
 0x53a   :  { %14427 = vmatpush3.bf16.msra.mxu0 %v14424_v14  ;;  %14237 = vmatprep.subr.bf16.mxu1 %v21369_v9  ;;  %v21372_v14 = vpack.c.bf16 %v17351_v42, %v17346_v48  ;;  %v14460_v9 = vpack.c.bf16 %v17923_v20, %v17918_v6 }
 0x53b   :  { %14429 = vmatprep.subr.bf16.mxu0 %v14428_v17 }
 0x53d   :  { %14239 = vmatpush1.bf16.msra.mxu1 %v21370_v41  ;;  %v21386_v41 = vld [vmem:[#allocation55_spill] sm:$0xff] }
 0x53e   :  { %14431 = vmatpush3.bf16.msra.mxu0 %v14428_v17  ;;  %14241 = vmatprep.subr.bf16.mxu1 %v21371_v26  ;;  %v21378_v17 = vpack.c.bf16 %v17236_v1, %v17234_v62  ;;  %v21387_v26 = vld [vmem:[#allocation50_spill] sm:$0xff] }
 0x53f   :  { %14433 = vmatprep.subr.bf16.mxu0 %v14432_v52 }
 0x541   :  { %14243 = vmatpush1.bf16.msra.mxu1 %v17599_v45  ;;  %v21373_v45 = vpack.c.bf16 %v17157_v30, %v17155_v22 }
 0x542   :  { %14435 = vmatpush3.bf16.msra.mxu0 %v14432_v52  ;;  %14245 = vmatprep.subr.bf16.mxu1 %v17614_v13  ;;  %v21374_v13 = vpack.c.bf16 %v17180_v50, %v17178_v51  ;;  %v21383_v52 = vld [vmem:[#allocation18_spill] sm:$0xff] }
 0x543   :  { %14437 = vmatprep.subr.bf16.mxu0 %v14436_v23  ;;  %v21385_v18 = vpack.c.bf16 %v21383_v52, %v21384_v54 }
 0x545   :  { %14247 = vmatpush1.bf16.msra.mxu1 %v17623_v10  ;;  %v14448_v10 = vpack.c.bf16 %v17847_v49, %v17842_v53 }
 0x546   :  { %14439 = vmatpush3.bf16.msra.mxu0 %v14436_v23  ;;  %14249 = vmatprep.subr.bf16.mxu1 %v21372_v14  ;;  %v21388_v23 = vpack.c.bf16 %v21386_v41, %v21387_v26  ;;  %v14464_v14 = vpack.c.bf16 %v17945_v34, %v17940_v38 }
 0x547   :  { %14441 = vmatprep.subr.bf16.mxu0 %v17621_v7 }
 0x548   :  { %4601 = vmatmul.mubr.f32.vlgmr.msra.gmra.mrb[8].mxu1 %v17861_v3 }
 0x549   :  { %14251 = vmatpush1.bf16.msra.mxu1 %v21373_v45  ;;  %12806 = vmatmul.mubr.f32.vlgmr.msra.gmra.mrb[20].mxu0 %v17863_v46  ;;  %v21390_v45 = vld [vmem:[#allocation9_spill] sm:$0xff] }
 0x54a   :  { %14443 = vmatpush3.bf16.msra.mxu0 %v17621_v7  ;;  %12840 = vmatprep.mubr.f32.mxu0 %v17868_v5  ;;  %v21376_v7 = vpack.c.bf16 %v17208_v35, %v17206_v36 }
 0x54b   :  { %4606 = vmatprep.mubr.f32.mxu1 %v21362_v59  ;;  %14253 = vmatprep.subr.bf16.mxu1 %v21374_v13 }
 0x54c   :  { %4608 = vmatmul.mubr.f32.gmra.mrb[10].mxu1 %v17863_v46  ;;  %14445 = vmatprep.subr.bf16.mxu0 %v14444_v39 }
 0x54d   :  { %14255 = vmatpush1.bf16.msra.mxu1 %v21375_v27  ;;  %4742 = vmatprep.mubr.f32.mxu1 %v21362_v59  ;;  %v21393_v27 = vld [vmem:[#allocation10_spill] sm:$0xff] }
 0x54e   :  { %14447 = vmatpush3.bf16.msra.mxu0 %v14444_v39  ;;  %14257 = vmatprep.subr.bf16.mxu1 %v21376_v7  ;;  %v21389_v39 = vld [vmem:[#allocation19_spill] sm:$0xff] }
 0x54f   :  { %14449 = vmatprep.subr.bf16.mxu0 %v14448_v10  ;;  %v21391_v13 = vpack.c.bf16 %v21389_v39, %v21390_v45 }
 0x551   :  { %14259 = vmatpush1.bf16.msra.mxu1 %v21377_v33  ;;  %v21395_v33 = vld [vmem:[#allocation12_spill] sm:$0xff] }
 0x552   :  { %14451 = vmatpush3.bf16.msra.mxu0 %v14448_v10  ;;  %14261 = vmatprep.subr.bf16.mxu1 %v21378_v17  ;;  %v21392_v10 = vld [vmem:[#allocation11_spill] sm:$0xff]  ;;  %v21396_v17 = vld [vmem:[#allocation22_spill] sm:$0xff] }
 0x553   :  { %14453 = vmatprep.subr.bf16.mxu0 %v14452_v2  ;;  %v21394_v7 = vpack.c.bf16 %v21392_v10, %v21393_v27 }
 0x555   :  { %14263 = vmatpush1.bf16.msra.mxu1 %v21379_v28  ;;  %v21398_v28 = vld [vmem:[#allocation14_spill] sm:$0xff] }
 0x556   :  { %14455 = vmatpush3.bf16.msra.mxu0 %v14452_v2  ;;  %14265 = vmatprep.subr.bf16.mxu1 %v21382_v29  ;;  %v14468_v2 = vpack.c.bf16 %v17966_v21, %v17961_v60  ;;  %v21399_v29 = vld [vmem:[#allocation23_spill] sm:$0xff] }
 0x557   :  { %14457 = vmatprep.subr.bf16.mxu0 %v14456_v15 }
 0x559   :  { %14267 = vmatpush1.bf16.msra.mxu1 %v21385_v18  ;;  %v21400_v18 = vpack.c.bf16 %v21398_v28, %v21399_v29 }
 0x55a   :  { %14459 = vmatpush3.bf16.msra.mxu0 %v14456_v15  ;;  %14269 = vmatprep.subr.bf16.mxu1 %v21388_v23  ;;  %v21397_v15 = vpack.c.bf16 %v21395_v33, %v21396_v17  ;;  %v21401_v23 = vld [vmem:[#allocation25_spill] sm:$0xff] }
 0x55b   :  { %14461 = vmatprep.subr.bf16.mxu0 %v14460_v9 }
 0x55d   :  { %14271 = vmatpush1.bf16.msra.mxu1 %v21391_v13 }
 0x55e   :  { %14463 = vmatpush3.bf16.msra.mxu0 %v14460_v9  ;;  %14273 = vmatprep.subr.bf16.mxu1 %v21394_v7  ;;  %v21402_v9 = vld [vmem:[#allocation26_spill] sm:$0xff] }
 0x55f   :  { %14465 = vmatprep.subr.bf16.mxu0 %v14464_v14  ;;  %v21403_v13 = vpack.c.bf16 %v21401_v23, %v21402_v9  ;;  %v21404_v7 = vld [vmem:[#allocation38_spill] sm:$0xff] }
 0x561   :  { %14275 = vmatpush1.bf16.msra.mxu1 %v21397_v15  ;;  %v21407_v15 = vld [vmem:[#allocation51_spill] sm:$0xff] }
 0x562   :  { %14467 = vmatpush3.bf16.msra.mxu0 %v14464_v14  ;;  %14277 = vmatprep.subr.bf16.mxu1 %v21400_v18  ;;  %v21408_v14 = vld [vmem:[#allocation53_spill] sm:$0xff]  ;;  %v21409_v18 = vld [vmem:[#allocation15_spill] sm:$0xff] }
 0x563   :  { %14469 = vmatprep.subr.bf16.mxu0 %v14468_v2 }
 0x565   :  { %14279 = vmatpush1.bf16.msra.mxu1 %v21403_v13  ;;  %v21411_v13 = vld [vmem:[#allocation6_spill] sm:$0xff] }
 0x566   :  { %14471 = vmatpush3.bf16.msra.mxu0 %v14468_v2  ;;  %14281 = vmatprep.subr.bf16.mxu1 %v21404_v7  ;;  %v21410_v2 = vld [vmem:[#allocation39_spill] sm:$0xff] }
 0x567   :  { %14473 = vmatprep.subr.bf16.mxu0 %v21405_v19 }
 0x568   :  { %4745 = vmatmul.mubr.f32.vlgmr.msra.gmra.mrb[8].mxu1 %v17868_v5  ;;  %v21412_v5 = vld [vmem:[#allocation17_spill] sm:$0xff] }
 0x569   :  { %14283 = vmatpush1.bf16.msra.mxu1 %v21406_v40  ;;  %12841 = vmatmul.mubr.f32.vlgmr.msra.gmra.mrb[20].mxu0 %v21407_v15  ;;  %v21435_v40 = vld [vmem:[#allocation24_spill] sm:$0xff] }
 0x56a   :  { %14475 = vmatpush3.bf16.msra.mxu0 %v21405_v19  ;;  %12875 = vmatprep.mubr.f32.mxu0 %v21408_v14 }
 0x56b   :  { %4750 = vmatprep.mubr.f32.mxu1 %v21362_v59  ;;  %14285 = vmatprep.subr.bf16.mxu1 %v21409_v18 }
 0x56c   :  { %4753 = vmatmul.mubr.f32.gmra.mrb[10].mxu1 %v21407_v15  ;;  %14477 = vmatprep.subr.bf16.mxu0 %v21410_v2  ;;  %v21417_v15 = vld [vmem:[#allocation8_spill] sm:$0xff] }
 0x56d   :  { %14287 = vmatpush1.bf16.msra.mxu1 %v21411_v13  ;;  %4855 = vmatprep.mubr.f32.mxu1 %v21362_v59  ;;  %v21420_v13 = vld [vmem:[#allocation42_spill] sm:$0xff] }
 0x56e   :  { %14479 = vmatpush3.bf16.msra.mxu0 %v21410_v2  ;;  %14289 = vmatprep.subr.bf16.mxu1 %v21412_v5  ;;  %v21421_v5 = vld [vmem:[#allocation52_spill] sm:$0xff] }
 0x56f   :  { %14481 = vmatprep.subr.bf16.mxu0 %v21413_v47  ;;  %v21430_v2 = vld [vmem:[#allocation48_spill] sm:$0xff] }
 0x571   :  { %14291 = vmatpush1.bf16.msra.mxu1 %v21414_v12  ;;  %v21422_v12 = vld [vmem:[#allocation46_spill] sm:$0xff] }
 0x572   :  { %14483 = vmatpush3.bf16.msra.mxu0 %v21413_v47  ;;  %14293 = vmatprep.subr.bf16.mxu1 %v21415_v31  ;;  %v21423_v47 = vld [vmem:[#allocation56_spill] sm:$0xff]  ;;  %v21424_v31 = vld [vmem:[#allocation58_spill] sm:$0xff] }
 0x573   :  { %14485 = vmatprep.subr.bf16.mxu0 %v21416_v58 }
 0x575   :  { %14295 = vmatpush1.bf16.msra.mxu1 %v21417_v15  ;;  %v21425_v15 = vld [vmem:[#allocation47_spill] sm:$0xff] }
 0x576   :  { %14487 = vmatpush3.bf16.msra.mxu0 %v21416_v58  ;;  %14297 = vmatprep.subr.bf16.mxu1 %v21418_v0  ;;  %v21426_v58 = vld [vmem:[#allocation59_spill] sm:$0xff]  ;;  %v21427_v0 = vld [vmem:[#allocation13_spill] sm:$0xff] }
 0x577   :  { %14489 = vmatprep.subr.bf16.mxu0 %v21419_v4 }
 0x579   :  { %14299 = vmatpush1.bf16.msra.mxu1 %v21420_v13  ;;  %v21428_v13 = vand.u32 4294901760, %v17346_v48  ;;  %v21438_v48 = vand.u32 4294901760, %v17178_v51  ;;  %v21446_v51 = vand.u32 4294901760, %v17208_v35  ;;  %v21451_v35 = vand.u32 4294901760, %v17234_v62 }
 0x57a   :  { %14491 = vmatpush3.bf16.msra.mxu0 %v21419_v4  ;;  %14301 = vmatprep.subr.bf16.mxu1 %v21421_v5  ;;  %v21429_v5 = vand.u32 4294901760, %v17351_v42  ;;  %v21439_v42 = vand.u32 4294901760, %v17180_v50  ;;  %v21445_v50 = vand.u32 4294901760, %v17206_v36  ;;  %v21458_v62 = vand.u32 4294901760, %v21380_v55 }
 0x57b   :  { %14493 = vmatprep.subr.bf16.mxu0 %v21422_v12 }
 0x57c   :  { %v14312_v4 = vpack.c.bf16 %v21429_v5, %v21428_v13  ;;  %v14316_v13 = vpack.c.bf16 %v21439_v42, %v21438_v48  ;;  %v21457_v48 = vand.u32 4294901760, %v21381_v56  ;;  %v21459_v42 = vand.u32 4294901760, %v17884_v25 }
 0x57d   :  { %14303 = vmatpush1.bf16.msra.mxu1 %v21423_v47  ;;  %v21431_v47 = vld [vmem:[#allocation32_spill] sm:$0xff]  ;;  %v21464_v56 = vand.u32 4294901760, %v21386_v41  ;;  %v21466_v25 = vand.u32 4294901760, %v17923_v20 }
 0x57e   :  { %14495 = vmatpush3.bf16.msra.mxu0 %v21422_v12  ;;  %14305 = vmatprep.subr.bf16.mxu1 %v21424_v31  ;;  %v21432_v18 = vand.u32 4294901760, %v21431_v47  ;;  %v21433_v12 = vld [vmem:[#allocation34_spill] sm:$0xff] }
 0x57f   :  { %14497 = vmatprep.subr.bf16.mxu0 %v21425_v15  ;;  %v21434_v46 = vand.u32 4294901760, %v21433_v12  ;;  %v21441_v12 = vand.u32 4294901760, %v17835_v32  ;;  %v21448_v32 = vand.u32 4294901760, %v17847_v49  ;;  %v21453_v49 = vand.u32 4294901760, %v17854_v44 }
 0x580   :  { %v21460_v44 = vand.u32 4294901760, %v17889_v63 }
 0x581   :  { %14307 = vmatpush1.bf16.msra.mxu1 %v21426_v58  ;;  %v14504_v31 = vpack.c.bf16 %v21434_v46, %v21432_v18  ;;  %v21436_v58 = vand.u32 4294901760, %v17155_v22  ;;  %v21440_v46 = vand.u32 4294901760, %v17830_v43  ;;  %v21442_v22 = vld [vmem:[#allocation54_spill] sm:$0xff]  ;;  %v21447_v43 = vand.u32 4294901760, %v17842_v53 }
 0x582   :  { %14499 = vmatpush3.bf16.msra.mxu0 %v21425_v15  ;;  %14309 = vmatprep.subr.bf16.mxu1 %v21427_v0  ;;  %v21437_v15 = vand.u32 4294901760, %v17157_v30  ;;  %v21443_v30 = vand.u32 4294901760, %v17182_v24  ;;  %v21450_v24 = vand.u32 4294901760, %v17215_v11  ;;  %v21452_v53 = vand.u32 4294901760, %v17236_v1 }
 0x583   :  { %14501 = vmatprep.subr.bf16.mxu0 %v21430_v2  ;;  %v14508_v47 = vpack.c.bf16 %v21441_v12, %v21440_v46  ;;  %v21454_v18 = vand.u32 4294901760, %v17859_v16  ;;  %v21456_v11 = vand.u32 4294901760, %v17243_v61  ;;  %v14328_v1 = vpack.c.bf16 %v21458_v62, %v21457_v48  ;;  %v11095_v48 = vld [vmem:[%s20430_s4 + $0x28] sm:$0xff] }
 0x584   :  { %v14314_v19 = vpack.c.bf16 %v21437_v15, %v21436_v58  ;;  %v14520_v16 = vpack.c.bf16 %v21460_v44, %v21459_v42  ;;  %v21463_v46 = vand.u32 4294901760, %v21387_v26  ;;  %v21465_v12 = vand.u32 4294901760, %v17918_v6  ;;  %v11096_v42 = vld [vmem:[%s20430_s4 + $0x30] sm:$0xff] }
 0x585   :  { %14311 = vmatpush1.bf16.msra.mxu1 %v21435_v40  ;;  %v14516_v5 = vpack.c.bf16 %v21454_v18, %v21453_v49  ;;  %v21470_v26 = vand.u32 4294901760, %v21392_v10  ;;  %v21472_v6 = vand.u32 4294901760, %v17945_v34  ;;  %v21498_v49 = vld [vmem:[#allocation56_spill] sm:$0xff]  ;;  %v21499_v18 = vld [vmem:[#allocation58_spill] sm:$0xff]  ;;  %v5878_v62 = vsel %vm2227_vm2, %v11095_v48, 0 }
 0x586   :  { %14503 = vmatpush3.bf16.msra.mxu0 %v21430_v2  ;;  %14313 = vmatprep.subr.bf16.mxu1 %v14312_v4  ;;  %v21444_v4 = vand.u32 4294901760, %v17187_v57  ;;  %v21449_v57 = vand.u32 4294901760, %v17210_v37  ;;  %v21455_v37 = vand.u32 4294901760, %v17238_v8  ;;  %v21462_v8 = vand.u32 4294901760, %v21383_v52 }
 0x587   :  { %14505 = vmatprep.subr.bf16.mxu0 %v14504_v31  ;;  %v14332_v55 = vpack.c.bf16 %v21464_v56, %v21463_v46  ;;  %v14524_v63 = vpack.c.bf16 %v21466_v25, %v21465_v12  ;;  %v5881_v44 = vsel %vm2227_vm2, %v11096_v42, 0 }
 0x588   :  { %4859 = vmatmul.mubr.f32.vlgmr.msra.gmra.mrb[8].mxu1 %v21408_v14  ;;  %v14318_v58 = vpack.c.bf16 %v21444_v4, %v21443_v30  ;;  %v14320_v14 = vpack.c.bf16 %v21446_v51, %v21445_v50  ;;  %v14322_v36 = vpack.c.bf16 %v21450_v24, %v21449_v57  ;;  %v14326_v15 = vpack.c.bf16 %v21456_v11, %v21455_v37  ;;  %v21492_v57 = vld [vmem:[#allocation8_spill] sm:$0xff]  ;;  %v21493_v24 = vld [vmem:[#allocation35_spill] sm:$0xff] }
 0x589   :  { %14315 = vmatpush1.bf16.msra.mxu1 %v14314_v19  ;;  %12876 = vmatmul.mubr.f32.vlgmr.msra.gmra.mrb[20].mxu0 %v21442_v22  ;;  %v14512_v19 = vpack.c.bf16 %v21448_v32, %v21447_v43  ;;  %v21471_v30 = vand.u32 4294901760, %v17940_v38  ;;  %v21473_v4 = vand.u32 4294901760, %v21396_v17  ;;  %v21477_v50 = vand.u32 4294901760, %v17961_v60  ;;  %v21482_v60 = vld [vmem:[#allocation5_spill] sm:$0xff]  ;;  %v21489_v43 = vld [vmem:[#allocation7_spill] sm:$0xff]  ;;  %v21490_v32 = vld [vmem:[#allocation16_spill] sm:$0xff] }
 0x58a   :  { %14507 = vmatpush3.bf16.msra.mxu0 %v14504_v31  ;;  %12910 = vmatprep.mubr.f32.mxu0 %v17861_v3  ;;  %v14324_v31 = vpack.c.bf16 %v21452_v53, %v21451_v35  ;;  %v21478_v38 = vand.u32 4294901760, %v17966_v21  ;;  %v21479_v51 = vand.u32 4294901760, %v21402_v9  ;;  %v21480_v17 = vand.u32 4294901760, %v21401_v23  ;;  %v21483_v21 = vld [vmem:[#allocation49_spill] sm:$0xff]  ;;  %v21485_v23 = vld [vmem:[#allocation39_spill] sm:$0xff]  ;;  %v21486_v9 = vld [vmem:[#allocation6_spill] sm:$0xff] }
 0x58b   :  { %4864 = vmatprep.mubr.f32.mxu1 %v21362_v59  ;;  %14317 = vmatprep.subr.bf16.mxu1 %v14316_v13  ;;  %v21461_v13 = vand.u32 4294901760, %v21384_v54  ;;  %v21468_v54 = vand.u32 4294901760, %v21389_v39  ;;  %v14528_v20 = vpack.c.bf16 %v21472_v6, %v21471_v30  ;;  %v21495_v35 = vld [vmem:[#allocation42_spill] sm:$0xff]  ;;  %v21496_v53 = vld [vmem:[#allocation52_spill] sm:$0xff]  ;;  %v21501_v37 = vld [vmem:[#allocation59_spill] sm:$0xff] }
 0x58c   :  { %4868 = vmatmul.mubr.f32.gmra.mrb[10].mxu1 %v21442_v22  ;;  %14509 = vmatprep.subr.bf16.mxu0 %v14508_v47  ;;  %v21469_v22 = vand.u32 4294901760, %v21393_v27  ;;  %v21476_v27 = vand.u32 4294901760, %v21398_v28  ;;  %v14532_v34 = vpack.c.bf16 %v21478_v38, %v21477_v50  ;;  %v21481_v28 = vld [vmem:[#allocation63_spill] sm:$0xff] }
 0x58d   :  { %14319 = vmatpush1.bf16.msra.mxu1 %v14318_v58  ;;  %5034 = vmatprep.mubr.f32.mxu1 %v21362_v59  ;;  %v14330_v61 = vpack.c.bf16 %v21462_v8, %v21461_v13  ;;  %v21475_v58 = vand.u32 4294901760, %v21399_v29  ;;  %v21484_v29 = vld [vmem:[#allocation15_spill] sm:$0xff]  ;;  %v18274_v8 = vand.u32 4294901760, %v5881_v44 }
 0x58e   :  { %14511 = vmatpush3.bf16.msra.mxu0 %v14508_v47  ;;  %14321 = vmatprep.subr.bf16.mxu1 %v14320_v14  ;;  %v21467_v47 = vand.u32 4294901760, %v21390_v45  ;;  %v14336_v41 = vpack.c.bf16 %v21470_v26, %v21469_v22  ;;  %v21474_v45 = vand.u32 4294901760, %v21395_v33  ;;  %v14342_v33 = vpack.c.bf16 %v21480_v17, %v21479_v51  ;;  %v21488_v14 = vld [vmem:[#allocation20_spill] sm:$0xff]  ;;  %v11094_v11 = vld [vmem:[%s20430_s4 + $0x20] sm:$0xff] }
 0x58f   :  { %14513 = vmatprep.subr.bf16.mxu0 %v14512_v19  ;;  %v14340_v10 = vpack.c.bf16 %v21476_v27, %v21475_v58 }
 0x590   :  { %v14334_v52 = vpack.c.bf16 %v21468_v54, %v21467_v47  ;;  %v14338_v39 = vpack.c.bf16 %v21474_v45, %v21473_v4  ;;  %v18281_v47 = vsub.f32 %v5881_v44, %v18274_v8 }
 0x591   :  { %14323 = vmatpush1.bf16.msra.mxu1 %v14322_v36  ;;  %v21494_v36 = vld [vmem:[#allocation45_spill] sm:$0xff] }
 0x592   :  { %14515 = vmatpush3.bf16.msra.mxu0 %v14512_v19  ;;  %14325 = vmatprep.subr.bf16.mxu1 %v14324_v31  ;;  %v21491_v19 = vld [vmem:[#allocation44_spill] sm:$0xff]  ;;  %v21497_v31 = vld [vmem:[#allocation46_spill] sm:$0xff]  ;;  %v5979_v38 = vand.u32 4294901760, %v18281_v47 }
 0x593   :  { %14517 = vmatprep.subr.bf16.mxu0 %v14516_v5 }
 0x595   :  { %14327 = vmatpush1.bf16.msra.mxu1 %v14326_v15 }
 0x596   :  { %14519 = vmatpush3.bf16.msra.mxu0 %v14516_v5  ;;  %14329 = vmatprep.subr.bf16.mxu1 %v14328_v1  ;;  %v21500_v5 = vld [vmem:[#allocation47_spill] sm:$0xff]  ;;  %v18262_v1 = vand.u32 4294901760, %v5878_v62 }
 0x597   :  { %14521 = vmatprep.subr.bf16.mxu0 %v14520_v16 }
 0x598   :  { %v18272_v13 = vsub.f32 %v5878_v62, %v18262_v1 }
 0x599   :  { %14331 = vmatpush1.bf16.msra.mxu1 %v14330_v61 }
 0x59a   :  { %14523 = vmatpush3.bf16.msra.mxu0 %v14520_v16  ;;  %14333 = vmatprep.subr.bf16.mxu1 %v14332_v55  ;;  %v11097_v16 = vld [vmem:[%s20430_s4 + $0x38] sm:$0xff]  ;;  %v5969_v46 = vand.u32 4294901760, %v18272_v13 }
 0x59b   :  { %14525 = vmatprep.subr.bf16.mxu0 %v14524_v63  ;;  %v5884_v61 = vsel %vm2227_vm2, %v11097_v16, 0 }
 0x59c   :  { %v18278_v55 = vand.u32 4294901760, %v5884_v61  ;;  %v5970_v30 = vsub.f32 %v18272_v13, %v5969_v46 }
 0x59d   :  { %14335 = vmatpush1.bf16.msra.mxu1 %v14334_v52 }
 0x59e   :  { %14527 = vmatpush3.bf16.msra.mxu0 %v14524_v63  ;;  %14337 = vmatprep.subr.bf16.mxu1 %v14336_v41  ;;  %v5971_v48 = vand.u32 4294901760, %v5970_v30 }
 0x59f   :  { %14529 = vmatprep.subr.bf16.mxu0 %v14528_v20 }
 0x5a1   :  { %14339 = vmatpush1.bf16.msra.mxu1 %v14338_v39  ;;  %v18289_v39 = vsub.f32 %v5884_v61, %v18278_v55 }
 0x5a2   :  { %14531 = vmatpush3.bf16.msra.mxu0 %v14528_v20  ;;  %14341 = vmatprep.subr.bf16.mxu1 %v14340_v10 }
 0x5a3   :  { %14533 = vmatprep.subr.bf16.mxu0 %v14532_v34 }
 0x5a5   :  { %14343 = vmatpush1.bf16.msra.mxu1 %v14342_v33 }
 0x5a6   :  { %14535 = vmatpush3.bf16.msra.mxu0 %v14532_v34  ;;  %14345 = vmatprep.subr.bf16.mxu1 %v21404_v7  ;;  %v21487_v7 = vld [vmem:[#allocation17_spill] sm:$0xff] }
 0x5a7   :  { %14537 = vmatprep.subr.bf16.mxu0 %v21481_v28 }
 0x5a8   :  { %5036 = vmatmul.mubr.f32.vlgmr.msra.gmra.mrb[8].mxu1 %v17861_v3 }
 0x5a9   :  { %14347 = vmatpush1.bf16.msra.mxu1 %v21482_v60  ;;  %12911 = vmatmul.mubr.f32.vlgmr.msra.gmra.mrb[20].mxu0 %v21483_v21 }
 0x5aa   :  { %14539 = vmatpush3.bf16.msra.mxu0 %v21481_v28  ;;  %12945 = vmatprep.mubr.f32.mxu0 %v17861_v3 }
 0x5ab   :  { %5041 = vmatprep.mubr.f32.mxu1 %v21362_v59  ;;  %14349 = vmatprep.subr.bf16.mxu1 %v21484_v29 }
 0x5ac   :  { %5043 = vmatmul.mubr.f32.gmra.mrb[10].mxu1 %v21483_v21  ;;  %14541 = vmatprep.subr.bf16.mxu0 %v21485_v23 }
 0x5ad   :  { %14351 = vmatpush1.bf16.msra.mxu1 %v21486_v9  ;;  %5145 = vmatprep.mubr.f32.mxu1 %v21362_v59 }
 0x5ae   :  { %14543 = vmatpush3.bf16.msra.mxu0 %v21485_v23  ;;  %14353 = vmatprep.subr.bf16.mxu1 %v21487_v7 }
 0x5af   :  { %14545 = vmatprep.subr.bf16.mxu0 %v21488_v14 }
 0x5b1   :  { %14355 = vmatpush1.bf16.msra.mxu1 %v21489_v43 }
 0x5b2   :  { %14547 = vmatpush3.bf16.msra.mxu0 %v21488_v14  ;;  %14357 = vmatprep.subr.bf16.mxu1 %v21490_v32  ;;  %v5989_v14 = vand.u32 4294901760, %v18289_v39 }
 0x5b3   :  { %14549 = vmatprep.subr.bf16.mxu0 %v21491_v19 }
 0x5b4   :  { %v5990_v44 = vsub.f32 %v18289_v39, %v5989_v14 }
 0x5b5   :  { %14359 = vmatpush1.bf16.msra.mxu1 %v21492_v57 }
 0x5b6   :  { %14551 = vmatpush3.bf16.msra.mxu0 %v21491_v19  ;;  %14361 = vmatprep.subr.bf16.mxu1 %v21493_v24 }
 0x5b7   :  { %14553 = vmatprep.subr.bf16.mxu0 %v21494_v36 }
 0x5b9   :  { %14363 = vmatpush1.bf16.msra.mxu1 %v21495_v35 }
 0x5ba   :  { %14555 = vmatpush3.bf16.msra.mxu0 %v21494_v36  ;;  %14365 = vmatprep.subr.bf16.mxu1 %v21496_v53 }
 0x5bb   :  { %14557 = vmatprep.subr.bf16.mxu0 %v21497_v31 }
 0x5bd   :  { %14367 = vmatpush1.bf16.msra.mxu1 %v21498_v49  ;;  %v5980_v49 = vsub.f32 %v18281_v47, %v5979_v38 }
 0x5be   :  { %14559 = vmatpush3.bf16.msra.mxu0 %v21497_v31  ;;  %14369 = vmatprep.subr.bf16.mxu1 %v21499_v18 }
 0x5bf   :  { %14561 = vmatprep.subr.bf16.mxu0 %v21500_v5  ;;  %v5981_v61 = vand.u32 4294901760, %v5980_v49  ;;  %v11129_v49 = vld [vmem:[%s20433_s7 + $0xc8] sm:$0xff] }
 0x5c1   :  { %14371 = vmatpush1.bf16.msra.mxu1 %v21501_v37 }
 0x5c2   :  { %14563 = vmatpush3.bf16.msra.mxu0 %v21500_v5  ;;  %14373 = vmatprep.subr.bf16.mxu1 %v21427_v0  ;;  %v5875_v0 = vsel %vm2227_vm2, %v11094_v11, 0 }
 0x5c3   :  { %14565 = vmatprep.subr.bf16.mxu0 %v21430_v2  ;;  %v18249_v15 = vand.u32 4294901760, %v5875_v0 }
 0x5c5   :  { %14375 = vmatpush1.bf16.msra.mxu1 %v21435_v40  ;;  %v18252_v40 = vsub.f32 %v5875_v0, %v18249_v15 }
 0x5c6   :  { %14567 = vmatpush3.bf16.msra.mxu0 %v21430_v2 }
 0x5c7   :  { %v5959_v2 = vand.u32 4294901760, %v18252_v40 }
 0x5c8   :  { %5147 = vmatmul.mubr.f32.vlgmr.msra.gmra.mrb[8].mxu1 %v17861_v3 }
 0x5c9   :  { %12946 = vmatmul.mubr.f32.vlgmr.msra.gmra.mrb[20].mxu0 %v21483_v21  ;;  %5152 = vmatprep.mubr.f32.mxu1 %v21362_v59  ;;  %v5960_v3 = vsub.f32 %v18252_v40, %v5959_v2 }
 0x5cb   :  { %v5961_v59 = vand.u32 4294901760, %v5960_v3 }
 0x5cc   :  { %5154 = vmatmul.mubr.f32.gmra.mrb[10].mxu1 %v21483_v21 }
 0x5cd   :  { %12960 = vmatprep.mubr.f32.mxu1 %v5961_v59 }
 0x69b   :  { %v5148_v56 = vpop.f32.mrb[8].mxu1 }
 0x69c   :  { %v5887_v12 = vand.u32 4294901760, %v5148_v56  ;;  %v5150_v25 = vpop.f32.mrb[9].mxu1  ;;  %v12947_v63 = vpop.f32.mrb[20].mxu0 }
 0x69d   :  { %v5890_v54 = vand.u32 4294901760, %v5150_v25  ;;  %v5902_v52 = vand.u32 4294901760, %v12947_v63  ;;  %v5834_v22 = vpop.f32.mrb[21].mxu0 }
 0x69e   :  { %v5999_v26 = vsub.f32 %v5148_v56, %v5887_v12  ;;  %v5893_v41 = vand.u32 4294901760, %v5834_v22 }
 0x69f   :  { %v18286_v6 = vpack.c.bf16 %v5890_v54, %v5887_v12  ;;  %v6006_v20 = vsub.f32 %v5150_v25, %v5890_v54  ;;  %v6034_v4 = vsub.f32 %v12947_v63, %v5902_v52  ;;  %v5155_v45 = vpop.f32.mrb[10].mxu1  ;;  %v5991_v12 = vand.u32 4294901760, %v5990_v44  ;;  %v11134_v44 = vld [vmem:[%s20433_s7 + $0xf0] sm:$0xff] }
 0x6a0   :  { %v6000_v58 = vand.u32 4294901760, %v5999_v26  ;;  %v6013_v27 = vsub.f32 %v5834_v22, %v5893_v41  ;;  %v5896_v10 = vand.u32 4294901760, %v5155_v45  ;;  %v5157_v50 = vpop.f32.mrb[11].mxu1 }
 0x6a1   :  { %v6007_v34 = vand.u32 4294901760, %v6006_v20  ;;  %v6035_v51 = vand.u32 4294901760, %v6034_v4  ;;  %v5899_v17 = vand.u32 4294901760, %v5157_v50  ;;  %14569 = vmatprep.subr.bf16.mxu1 %v18286_v6  ;;  %v14592_v33 = vpack.c.bf16 %v6006_v20, %v5999_v26 }
 0x6a2   :  { %v6001_v28 = vsub.f32 %v5999_v26, %v6000_v58  ;;  %v6014_v60 = vand.u32 4294901760, %v6013_v27  ;;  %v18293_v21 = vpack.c.bf16 %v5896_v10, %v5893_v41  ;;  %v6020_v29 = vsub.f32 %v5155_v45, %v5896_v10  ;;  %14571 = vmatpush3.bf16.msra.mxu1 %v18286_v6 }
 0x6a3   :  { %v6008_v23 = vsub.f32 %v6006_v20, %v6007_v34  ;;  %v18296_v9 = vpack.c.bf16 %v5902_v52, %v5899_v17  ;;  %v6027_v7 = vsub.f32 %v5157_v50, %v5899_v17  ;;  %v6036_v24 = vsub.f32 %v6034_v4, %v6035_v51  ;;  %v5857_v20 = vpop.permute.xlu0 %5856 }
 0x6a4   :  { %v6015_v43 = vsub.f32 %v6013_v27, %v6014_v60  ;;  %v6021_v32 = vand.u32 4294901760, %v6020_v29  ;;  %14573 = vmatprep.subr.bf16.mxu1 %v18293_v21  ;;  %v6002_v19 = vand.u32 4294901760, %v6001_v28  ;;  %v14596_v57 = vpack.c.bf16 %v6020_v29, %v6013_v27  ;;  %v11120_v28 = vld [vmem:[%s20433_s7 + $0x80] sm:$0xff] }
 0x6a5   :  { %v6028_v36 = vand.u32 4294901760, %v6027_v7  ;;  %v6009_v35 = vand.u32 4294901760, %v6008_v23  ;;  %v14600_v53 = vpack.c.bf16 %v6034_v4, %v6027_v7  ;;  %v14616_v18 = vpack.c.bf16 %v6007_v34, %v6000_v58  ;;  %v11122_v23 = vld [vmem:[%s20433_s7 + $0x90] sm:$0xff] }
 0x6a6   :  { %v6022_v31 = vsub.f32 %v6020_v29, %v6021_v32  ;;  %14575 = vmatpush3.bf16.msra.mxu1 %v18293_v21  ;;  %v14620_v5 = vpack.c.bf16 %v6021_v32, %v6014_v60  ;;  %v6016_v3 = vand.u32 4294901760, %v6015_v43  ;;  %v6037_v42 = vand.u32 4294901760, %v6036_v24  ;;  %v11121_v60 = vld [vmem:[%s20433_s7 + $0x88] sm:$0xff]  ;;  %v2913_v29 = vld [vmem:[%s20433_s7 + $0x18] sm:$0xff]  ;;  %v11124_v43 = vld [vmem:[%s20433_s7 + $0xa0] sm:$0xff] }
 0x6a7   :  { %v6029_v37 = vsub.f32 %v6027_v7, %v6028_v36  ;;  %14577 = vmatprep.subr.bf16.mxu1 %v18296_v9  ;;  %v14580_v11 = vpack.c.bf16 %v6009_v35, %v6002_v19  ;;  %v14624_v0 = vpack.c.bf16 %v6035_v51, %v6028_v36  ;;  %v2910_v51 = vld [vmem:[%s20433_s7] sm:$0xff]  ;;  %v11125_v32 = vld [vmem:[%s20433_s7 + $0xa8] sm:$0xff]  ;;  %v2916_v19 = vld [vmem:[%s20433_s7 + $0x30] sm:$0xff] }
 0x6a8   :  { %v6023_v59 = vand.u32 4294901760, %v6022_v31  ;;  %v2914_v7 = vld [vmem:[%s20433_s7 + $0x20] sm:$0xff]  ;;  %v11126_v24 = vld [vmem:[%s20433_s7 + $0xb0] sm:$0xff]  ;;  %v11127_v36 = vld [vmem:[%s20433_s7 + $0xb8] sm:$0xff] }
 0x6a9   :  { %v6030_v62 = vand.u32 4294901760, %v6029_v37  ;;  %v2918_v35 = vld [vmem:[%s20433_s7 + $0x40] sm:$0xff]  ;;  %v11130_v37 = vld [vmem:[%s20433_s7 + $0xd0] sm:$0xff] }
 0x6aa   :  { %14579 = vmatpush3.bf16.msra.mxu1 %v18296_v9  ;;  %v14584_v16 = vpack.c.bf16 %v6023_v59, %v6016_v3  ;;  %v11128_v31 = vld [vmem:[%s20433_s7 + $0xc0] sm:$0xff]  ;;  %v2923_v3 = vld [vmem:[%s20433_s7 + $0x68] sm:$0xff] }
 0x6ab   :  { %14581 = vmatprep.subr.bf16.mxu1 %v14580_v11  ;;  %v14588_v56 = vpack.c.bf16 %v6037_v42, %v6030_v62  ;;  %v11132_v59 = vld [vmem:[%s20433_s7 + $0xe0] sm:$0xff]  ;;  %v2924_v62 = vld [vmem:[%s20433_s7 + $0x70] sm:$0xff]  ;;  %v2925_v42 = vld [vmem:[%s20433_s7 + $0x78] sm:$0xff] }
 0x6ad   :  { %12961 = vmatmul.mubr.f32.vlgmr.msra.gmra.mrb[12].mxu1 %v5971_v48  ;;  %v11133_v48 = vld [vmem:[%s20433_s7 + $0xe8] sm:$0xff] }
 0x6ae   :  { %14583 = vmatpush3.bf16.msra.mxu1 %v14580_v11  ;;  %12963 = vmatprep.mubr.f32.mxu1 %v5981_v61  ;;  %v11131_v11 = vld [vmem:[%s20433_s7 + $0xd8] sm:$0xff]  ;;  %v7910_v61 = vld [vmem:[%s20437_s11 + $0x80] sm:$0xff] }
 0x6af   :  { %14585 = vmatprep.subr.bf16.mxu1 %v14584_v16 }
 0x6b1   :  { %12964 = vmatmul.mubr.f32.gmra.mrb[14].mxu1 %v5991_v12  ;;  %v7894_v12 = vld [vmem:[%s20437_s11] sm:$0xff] }
 0x6b2   :  { %14587 = vmatpush3.bf16.msra.mxu1 %v14584_v16  ;;  %12978 = vmatprep.mubr.f32.mxu1 %v18249_v15  ;;  %v11135_v16 = vld [vmem:[%s20433_s7 + $0xf8] sm:$0xff] }
 0x6b3   :  { %14589 = vmatprep.subr.bf16.mxu1 %v14588_v56 }
 0x6b6   :  { %14591 = vmatpush3.bf16.msra.mxu1 %v14588_v56  ;;  %v7911_v56 = vld [vmem:[%s20437_s11 + $0x88] sm:$0xff] }
 0x6b7   :  { %14593 = vmatprep.subr.bf16.mxu1 %v14592_v33 }
 0x6b9   :  { %12979 = vmatmul.mubr.f32.vlgmr.msra.gmra.mrb[12].mxu1 %v18262_v1 }
 0x6ba   :  { %14595 = vmatpush3.bf16.msra.mxu1 %v14592_v33  ;;  %12981 = vmatprep.mubr.f32.mxu1 %v18274_v8  ;;  %v2911_v33 = vld [vmem:[%s20433_s7 + $0x8] sm:$0xff] }
 0x6bb   :  { %14597 = vmatprep.subr.bf16.mxu1 %v14596_v57 }
 0x6bd   :  { %12982 = vmatmul.mubr.f32.gmra.mrb[14].mxu1 %v18278_v55 }
 0x6be   :  { %14599 = vmatpush3.bf16.msra.mxu1 %v14596_v57  ;;  %12996 = vmatprep.mubr.f32.mxu1 %v18252_v40  ;;  %v5862_v40 = vpop.permute.xlu1 %5861  ;;  %v2917_v57 = vld [vmem:[%s20433_s7 + $0x38] sm:$0xff] }
 0x6bf   :  { %14601 = vmatprep.subr.bf16.mxu1 %v14600_v53 }
 0x6c2   :  { %14603 = vmatpush3.bf16.msra.mxu1 %v14600_v53  ;;  %v5872_v63 = vpop.permute.xlu1 %5871  ;;  %v2919_v53 = vld [vmem:[%s20433_s7 + $0x48] sm:$0xff] }
 0x6c3   :  { %14605 = vmatprep.subr.bf16.mxu1 %v18286_v6 }
 0x6c5   :  { %12997 = vmatmul.mubr.f32.vlgmr.msra.gmra.mrb[12].mxu1 %v18272_v13 }
 0x6c6   :  { %14607 = vmatpush3.bf16.msra.mxu1 %v18286_v6  ;;  %12999 = vmatprep.mubr.f32.mxu1 %v18281_v47  ;;  %v5867_v10 = vpop.permute.xlu1 %5866 }
 0x6c7   :  { %14609 = vmatprep.subr.bf16.mxu1 %v18293_v21 }
 0x6c9   :  { %13000 = vmatmul.mubr.f32.gmra.mrb[14].mxu1 %v18289_v39 }
 0x6ca   :  { %14611 = vmatpush3.bf16.msra.mxu1 %v18293_v21  ;;  %13014 = vmatprep.mubr.f32.mxu1 %v5959_v2 }
 0x6cb   :  { %14613 = vmatprep.subr.bf16.mxu1 %v18296_v9 }
 0x6ce   :  { %14615 = vmatpush3.bf16.msra.mxu1 %v18296_v9 }
 0x6cf   :  { %14617 = vmatprep.subr.bf16.mxu1 %v14616_v18 }
 0x6d1   :  { %13015 = vmatmul.mubr.f32.vlgmr.msra.gmra.mrb[12].mxu1 %v5969_v46 }
 0x6d2   :  { %14619 = vmatpush3.bf16.msra.mxu1 %v14616_v18  ;;  %13017 = vmatprep.mubr.f32.mxu1 %v5979_v38  ;;  %v2920_v18 = vld [vmem:[%s20433_s7 + $0x50] sm:$0xff] }
 0x6d3   :  { %14621 = vmatprep.subr.bf16.mxu1 %v14620_v5 }
 0x6d5   :  { %13018 = vmatmul.mubr.f32.gmra.mrb[14].mxu1 %v5989_v14  ;;  %v2915_v14 = vld [vmem:[%s20433_s7 + $0x28] sm:$0xff] }
 0x6d6   :  { %14623 = vmatpush3.bf16.msra.mxu1 %v14620_v5  ;;  %13032 = vmatprep.mubr.f32.mxu1 %v18249_v15  ;;  %v2921_v5 = vld [vmem:[%s20433_s7 + $0x58] sm:$0xff] }
 0x6d7   :  { %14625 = vmatprep.subr.bf16.mxu1 %v14624_v0 }
 0x6da   :  { %14627 = vmatpush3.bf16.msra.mxu1 %v14624_v0  ;;  %v2922_v0 = vld [vmem:[%s20433_s7 + $0x60] sm:$0xff] }
 0x6db   :  { %14629 = vmatprep.subr.bf16.mxu1 %v18286_v6 }
 0x6dd   :  { %13033 = vmatmul.mubr.f32.vlgmr.msra.gmra.mrb[12].mxu1 %v18262_v1 }
 0x6de   :  { %14631 = vmatpush3.bf16.msra.mxu1 %v18286_v6  ;;  %13035 = vmatprep.mubr.f32.mxu1 %v18274_v8 }
 0x6df   :  { %14633 = vmatprep.subr.bf16.mxu1 %v18293_v21 }
 0x6e1   :  { %13036 = vmatmul.mubr.f32.gmra.mrb[14].mxu1 %v18278_v55 }
 0x6e2   :  { %14635 = vmatpush3.bf16.msra.mxu1 %v18293_v21  ;;  %13050 = vmatprep.mubr.f32.mxu1 %v18249_v15  ;;  %v2912_v21 = vld [vmem:[%s20433_s7 + $0x10] sm:$0xff] }
 0x6e3   :  { %14637 = vmatprep.subr.bf16.mxu1 %v18296_v9 }
 0x6e6   :  { %14639 = vmatpush3.bf16.msra.mxu1 %v18296_v9  ;;  %v11123_v9 = vld [vmem:[%s20433_s7 + $0x98] sm:$0xff] }
 0x6e9   :  { %13051 = vmatmul.mubr.f32.vlgmr.msra.gmra.mrb[12].mxu1 %v18262_v1 }
 0x6ea   :  { %13053 = vmatprep.mubr.f32.mxu1 %v18274_v8  ;;  %v11104_v8 = vld [vmem:[%s20432_s6 + $0x80] sm:$0xff] }
 0x6ed   :  { %13054 = vmatmul.mubr.f32.gmra.mrb[14].mxu1 %v18278_v55  ;;  %v6566_v55 = vsel %vm3014_vm3, %v11104_v8, 0  ;;  %v7919_v8 = vld [vmem:[%s20437_s11 + $0xc8] sm:$0xff] }
 0x6ee   :  { %v18349_v30 = vand.u32 4294901760, %v6566_v55 }
 0x6f0   :  { %v18352_v6 = vsub.f32 %v6566_v55, %v18349_v30  ;;  %v7902_v55 = vld [vmem:[%s20437_s11 + $0x40] sm:$0xff] }
 0x6f2   :  { %v6682_v4 = vand.u32 4294901760, %v18352_v6 }
 0x6f4   :  { %v6683_v58 = vsub.f32 %v18352_v6, %v6682_v4 }
 0x6f6   :  { %v6684_v50 = vand.u32 4294901760, %v6683_v58  ;;  %v7903_v58 = vld [vmem:[%s20437_s11 + $0x48] sm:$0xff] }
 0x6f8   :  { %13060 = vmatprep.mubr.f32.mxu0 %v6684_v50  ;;  %v11107_v50 = vld [vmem:[%s20432_s6 + $0x98] sm:$0xff] }
 0x7bc   :  { %v13052_v2 = vpop.f32.mrb[12].mxu1 }
 0x7bd   :  { %v15070_v13 = vadd.f32 %v13052_v2, %v5862_v40  ;;  %v6504_v46 = vpop.f32.mrb[13].mxu1  ;;  %v7895_v40 = vld [vmem:[%s20437_s11 + $0x8] sm:$0xff]  ;;  %v7912_v2 = vld [vmem:[%s20437_s11 + $0x90] sm:$0xff] }
 0x7be   :  { %v15071_v45 = vadd.f32 %v6504_v46, %v5857_v20  ;;  %v7896_v46 = vld [vmem:[%s20437_s11 + $0x10] sm:$0xff]  ;;  %v11105_v20 = vld [vmem:[%s20432_s6 + $0x88] sm:$0xff] }
 0x7bf   :  { %v11102_v25 = vmul.f32 -1.442695, %v15070_v13  ;;  %v7913_v13 = vld [vmem:[%s20437_s11 + $0x98] sm:$0xff] }
 0x7c0   :  { %v13055_v47 = vpop.f32.mrb[14].mxu1 }
 0x7c1   :  { %15570 = vpow2.f32 %v11102_v25  ;;  %v15072_v54 = vadd.f32 %v13055_v47, %v5872_v63  ;;  %v6516_v15 = vpop.f32.mrb[15].mxu1  ;;  %v7897_v25 = vld [vmem:[%s20437_s11 + $0x18] sm:$0xff]  ;;  %v7914_v63 = vld [vmem:[%s20437_s11 + $0xa0] sm:$0xff]  ;;  %v7915_v47 = vld [vmem:[%s20437_s11 + $0xa8] sm:$0xff] }
 0x7c2   :  { %v15073_v38 = vadd.f32 %v6516_v15, %v5867_v10  ;;  %v7899_v15 = vld [vmem:[%s20437_s11 + $0x28] sm:$0xff] }
 0x7c3   :  { %v11103_v52 = vmul.f32 -1.442695, %v15072_v54  ;;  %v7898_v54 = vld [vmem:[%s20437_s11 + $0x20] sm:$0xff] }
 0x7c5   :  { %15572 = vpow2.f32 %v11103_v52  ;;  %v7916_v52 = vld [vmem:[%s20437_s11 + $0xb0] sm:$0xff] }
 0x7cb   :  { %v15571_v22 = vpop.eup %15570 }
 0x7cc   :  { %v6532_v26 = vadd.f32 1.0, %v15571_v22  ;;  %v7917_v22 = vld [vmem:[%s20437_s11 + $0xb8] sm:$0xff] }
 0x7ce   :  { %15574 = vrcp.f32 %v6532_v26  ;;  %v7900_v26 = vld [vmem:[%s20437_s11 + $0x30] sm:$0xff] }
 0x7cf   :  { %v15573_v1 = vpop.eup %15572 }
 0x7d0   :  { %v6533_v41 = vadd.f32 1.0, %v15573_v1  ;;  %v7901_v1 = vld [vmem:[%s20437_s11 + $0x38] sm:$0xff] }
 0x7d2   :  { %15576 = vrcp.f32 %v6533_v41  ;;  %v7918_v41 = vld [vmem:[%s20437_s11 + $0xc0] sm:$0xff] }
 0x7d8   :  { %v15575_v39 = vpop.eup %15574 }
 0x7d9   :  { %v6538_v27 = vmul.f32 %v15575_v39, %v15071_v45  ;;  %v11106_v45 = vld [vmem:[%s20432_s6 + $0x90] sm:$0xff]  ;;  %v6569_v39 = vsel %vm3014_vm3, %v11105_v20, 0 }
 0x7da   :  { %v6572_v10 = vsel %vm3014_vm3, %v11106_v45, 0 }
 0x7db   :  { %6559 = vrot.lane.b32.xlu0 %v6538_v27, %s15604_s1  ;;  %v7920_v27 = vld [vmem:[%s20437_s11 + $0xd0] sm:$0xff] }
 0x7dc   :  { %v15577_v34 = vpop.eup %15576 }
 0x7dd   :  { %v6539_v17 = vmul.f32 %v15577_v34, %v15073_v38  ;;  %v18530_v38 = vand.u32 4294901760, %v6569_v39  ;;  %v18532_v34 = vand.u32 4294901760, %v6572_v10 }
 0x7df   :  { %6561 = vrot.lane.b32.xlu1 %v6539_v17, %s15604_s1  ;;  %2928 = vperm.xlu0 %15558, %v2910_v51   ;;  %v11108_v51 = vld [vmem:[%s20432_s6 + $0xa0] sm:$0xff]  ;;  %v11109_v17 = vld [vmem:[%s20432_s6 + $0xa8] sm:$0xff] }
 0x7e3   :  { %2933 = vperm.xlu1 %15559, %v2911_v33   ;;  %7752 = vperm.xlu0 %15558, %v11120_v28   ;;  %v7921_v33 = vld [vmem:[%s20437_s11 + $0xd8] sm:$0xff]  ;;  %v7904_v28 = vld [vmem:[%s20437_s11 + $0x50] sm:$0xff] }
 0x7e7   :  { %7757 = vperm.xlu1 %15559, %v11121_v60   ;;  %2938 = vperm.xlu0 %15558, %v2912_v21   ;;  %v6575_v60 = vsel %vm3014_vm3, %v11107_v50, 0  ;;  %v11110_v21 = vld [vmem:[%s20432_s6 + $0xb0] sm:$0xff] }
 0x7eb   :  { %2943 = vperm.xlu1 %15559, %v2913_v29   ;;  %7762 = vperm.xlu0 %15558, %v11122_v23   ;;  %v18551_v29 = vsub.f32 %v6569_v39, %v18530_v38  ;;  %v6578_v23 = vsel %vm3014_vm3, %v11108_v51, 0 }
 0x7ef   :  { %7767 = vperm.xlu1 %15559, %v11123_v9   ;;  %2948 = vperm.xlu0 %15558, %v2914_v7   ;;  %v6581_v9 = vsel %vm3014_vm3, %v11109_v17, 0  ;;  %v18556_v7 = vsub.f32 %v6572_v10, %v18532_v34 }
 0x7f3   :  { %2953 = vperm.xlu1 %15559, %v2915_v14   ;;  %7772 = vperm.xlu0 %15558, %v11124_v43   ;;  %v18558_v14 = vand.u32 4294901760, %v6575_v60  ;;  %v6584_v43 = vsel %vm3014_vm3, %v11110_v21, 0 }
 0x7f7   :  { %7777 = vperm.xlu1 %15559, %v11125_v32   ;;  %2958 = vperm.xlu0 %15558, %v2916_v19   ;;  %v11111_v32 = vld [vmem:[%s20432_s6 + $0xb8] sm:$0xff] }
 0x7f8   :  { %v7905_v19 = vld [vmem:[%s20437_s11 + $0x58] sm:$0xff] }
 0x7fb   :  { %2963 = vperm.xlu1 %15559, %v2917_v57   ;;  %7782 = vperm.xlu0 %15558, %v11126_v24   ;;  %v7922_v57 = vld [vmem:[%s20437_s11 + $0xe0] sm:$0xff] }
 0x7ff   :  { %7787 = vperm.xlu1 %15559, %v11127_v36   ;;  %2968 = vperm.xlu0 %15558, %v2918_v35   ;;  %v18570_v36 = vand.u32 4294901760, %v6578_v23  ;;  %v18572_v35 = vand.u32 4294901760, %v6581_v9 }
 0x803   :  { %2973 = vperm.xlu1 %15559, %v2919_v53   ;;  %7792 = vperm.xlu0 %15558, %v11128_v31   ;;  %v11112_v53 = vld [vmem:[%s20432_s6 + $0xc0] sm:$0xff] }
 0x807   :  { %7797 = vperm.xlu1 %15559, %v11129_v49   ;;  %2978 = vperm.xlu0 %15558, %v2920_v18   ;;  %v6692_v49 = vand.u32 4294901760, %v18551_v29  ;;  %v18578_v18 = vand.u32 4294901760, %v6584_v43 }
 0x80b   :  { %2983 = vperm.xlu1 %15559, %v2921_v5   ;;  %7802 = vperm.xlu0 %15558, %v11130_v37   ;;  %v6587_v5 = vsel %vm3014_vm3, %v11111_v32, 0  ;;  %v6702_v37 = vand.u32 4294901760, %v18556_v7 }
 0x80f   :  { %7807 = vperm.xlu1 %15559, %v11131_v11   ;;  %2988 = vperm.xlu0 %15558, %v2922_v0   ;;  %v18583_v11 = vsub.f32 %v6575_v60, %v18558_v14 }
 0x813   :  { %2993 = vperm.xlu1 %15559, %v2923_v3   ;;  %7812 = vperm.xlu0 %15558, %v11132_v59   ;;  %v7923_v3 = vld [vmem:[%s20437_s11 + $0xe8] sm:$0xff]  ;;  %v7906_v59 = vld [vmem:[%s20437_s11 + $0x60] sm:$0xff] }
 0x817   :  { %7817 = vperm.xlu1 %15559, %v11133_v48   ;;  %2998 = vperm.xlu0 %15558, %v2924_v62   ;;  %v6590_v48 = vsel %vm3014_vm3, %v11112_v53, 0  ;;  %v11113_v62 = vld [vmem:[%s20432_s6 + $0xc8] sm:$0xff] }
 0x81b   :  { %3003 = vperm.xlu1 %15559, %v2925_v42   ;;  %7822 = vperm.xlu0 %15558, %v11134_v44   ;;  %v18598_v44 = vsub.f32 %v6578_v23, %v18570_v36 }
 0x81f   :  { %7827 = vperm.xlu1 %15559, %v11135_v16   ;;  %8008 = vperm.xlu0 %15558, %v7910_v61   ;;  %v18601_v16 = vsub.f32 %v6581_v9, %v18572_v35  ;;  %v18603_v61 = vand.u32 4294901760, %v6587_v5  ;;  %v7908_v9 = vld [vmem:[%s20437_s11 + $0x70] sm:$0xff] }
 0x823   :  { %8013 = vperm.xlu1 %15559, %v7911_v56   ;;  %7928 = vperm.xlu0 %15558, %v7894_v12  }
 0x827   :  { %7933 = vperm.xlu1 %15559, %v7895_v40   ;;  %8018 = vperm.xlu0 %15558, %v7912_v2   ;;  %v6693_v40 = vsub.f32 %v18551_v29, %v6692_v49  ;;  %v18610_v2 = vsub.f32 %v6584_v43, %v18578_v18 }
 0x829   :  { %v6742_v39 = vand.u32 4294901760, %v18610_v2  ;;  %v6694_v10 = vand.u32 4294901760, %v6693_v40 }
 0x82b   :  { %8023 = vperm.xlu1 %15559, %v7913_v13   ;;  %7938 = vperm.xlu0 %15558, %v7896_v46   ;;  %v11114_v13 = vld [vmem:[%s20432_s6 + $0xd0] sm:$0xff]  ;;  %v6703_v46 = vsub.f32 %v18556_v7, %v6702_v37 }
 0x82d   :  { %v6704_v50 = vand.u32 4294901760, %v6703_v46 }
 0x82f   :  { %7943 = vperm.xlu1 %15559, %v7897_v25   ;;  %8028 = vperm.xlu0 %15558, %v7914_v63   ;;  %v6712_v25 = vand.u32 4294901760, %v18583_v11  ;;  %v18619_v63 = vand.u32 4294901760, %v6590_v48 }
 0x831   :  { %v6713_v51 = vsub.f32 %v18583_v11, %v6712_v25  ;;  %v18651_v17 = vsub.f32 %v6590_v48, %v18619_v63 }
 0x833   :  { %8033 = vperm.xlu1 %15559, %v7915_v47   ;;  %7948 = vperm.xlu0 %15558, %v7898_v54   ;;  %v6593_v47 = vsel %vm3014_vm3, %v11113_v62, 0  ;;  %v6714_v48 = vand.u32 4294901760, %v6713_v51  ;;  %v6762_v62 = vand.u32 4294901760, %v18651_v17 }
 0x837   :  { %7953 = vperm.xlu1 %15559, %v7899_v15   ;;  %8038 = vperm.xlu0 %15558, %v7916_v52   ;;  %v7907_v52 = vld [vmem:[%s20437_s11 + $0x68] sm:$0xff] }
 0x83b   :  { %8043 = vperm.xlu1 %15559, %v7917_v22   ;;  %7958 = vperm.xlu0 %15558, %v7900_v26   ;;  %v7924_v22 = vld [vmem:[%s20437_s11 + $0xf0] sm:$0xff]  ;;  %v6722_v26 = vand.u32 4294901760, %v18598_v44 }
 0x83d   :  { %v6723_v43 = vsub.f32 %v18598_v44, %v6722_v26 }
 0x83f   :  { %7963 = vperm.xlu1 %15559, %v7901_v1   ;;  %8048 = vperm.xlu0 %15558, %v7918_v41   ;;  %v6732_v1 = vand.u32 4294901760, %v18601_v16  ;;  %v18633_v41 = vsub.f32 %v6587_v5, %v18603_v61  ;;  %v6743_v5 = vsub.f32 %v18610_v2, %v6742_v39 }
 0x841   :  { %v6733_v32 = vsub.f32 %v18601_v16, %v6732_v1 }
 0x843   :  { %8053 = vperm.xlu1 %15559, %v7919_v8   ;;  %7968 = vperm.xlu0 %15558, %v7902_v55   ;;  %v6596_v8 = vsel %vm3014_vm3, %v11114_v13, 0  ;;  %v11115_v55 = vld [vmem:[%s20432_s6 + $0xd8] sm:$0xff] }
 0x844   :  { %v18657_v60 = vand.u32 4294901760, %v6596_v8  ;;  %v6599_v21 = vsel %vm3014_vm3, %v11115_v55, 0  ;;  %v11119_v55 = vld [vmem:[%s20432_s6 + $0xf8] sm:$0xff] }
 0x846   :  { %v18692_v40 = vsub.f32 %v6596_v8, %v18657_v60 }
 0x847   :  { %7973 = vperm.xlu1 %15559, %v7903_v58   ;;  %8058 = vperm.xlu0 %15558, %v7920_v27   ;;  %v18642_v58 = vand.u32 4294901760, %v6593_v47  ;;  %v11116_v27 = vld [vmem:[%s20432_s6 + $0xe0] sm:$0xff] }
 0x84b   :  { %8063 = vperm.xlu1 %15559, %v7921_v33   ;;  %7978 = vperm.xlu0 %15558, %v7904_v28   ;;  %v7925_v28 = vld [vmem:[%s20437_s11 + $0xf8] sm:$0xff] }
 0x84d   :  { %v6560_v24 = vpop.permute.xlu0 %6559 }
 0x84e   :  { %v6614_v31 = vand.u32 4294901760, %v6560_v24 }
 0x84f   :  { %7983 = vperm.xlu1 %15559, %v7905_v19   ;;  %8068 = vperm.xlu0 %15558, %v7922_v57   ;;  %v6752_v19 = vand.u32 4294901760, %v18633_v41  ;;  %v6602_v57 = vsel %vm3014_vm3, %v11116_v27, 0 }
 0x850   :  { %v18585_v0 = vsub.f32 %v6560_v24, %v6614_v31  ;;  %v11117_v24 = vld [vmem:[%s20432_s6 + $0xe8] sm:$0xff]  ;;  %v18694_v13 = vand.u32 4294901760, %v6602_v57 }
 0x851   :  { %v6562_v42 = vpop.permute.xlu1 %6561  ;;  %v6605_v46 = vsel %vm3014_vm3, %v11117_v24, 0  ;;  %v6753_v8 = vsub.f32 %v18633_v41, %v6752_v19 }
 0x852   :  { %v6843_v56 = vand.u32 4294901760, %v18585_v0  ;;  %v6617_v12 = vand.u32 4294901760, %v6562_v42 }
 0x853   :  { %8073 = vperm.xlu1 %15559, %v7923_v3   ;;  %7988 = vperm.xlu0 %15558, %v7906_v59   ;;  %v18680_v3 = vsub.f32 %v6593_v47, %v18642_v58  ;;  %v11118_v59 = vld [vmem:[%s20432_s6 + $0xf0] sm:$0xff]  ;;  %v10096_v47 = vld [vmem:[%s20439_s13] sm:$0xff] }
 0x854   :  { %v18622_v54 = vpack.c.bf16 %v6617_v12, %v6614_v31  ;;  %v6849_v15 = vsub.f32 %v6562_v42, %v6617_v12  ;;  %v6844_v20 = vsub.f32 %v18585_v0, %v6843_v56  ;;  %v18686_v42 = vand.u32 4294901760, %v6599_v21  ;;  %v7909_v12 = vld [vmem:[%s20437_s11 + $0x78] sm:$0xff] }
 0x855   :  { %v6772_v27 = vand.u32 4294901760, %v18680_v3 }
 0x856   :  { %v6850_v45 = vand.u32 4294901760, %v6849_v15  ;;  %14641 = vmatprep.subr.bf16.mxu0 %v18622_v54  ;;  %v6845_v53 = vand.u32 4294901760, %v6844_v20  ;;  %v6734_v20 = vand.u32 4294901760, %v6733_v32  ;;  %v18713_v51 = vsub.f32 %v6599_v21, %v18686_v42 }
 0x857   :  { %7993 = vperm.xlu1 %15559, %v7907_v52   ;;  %8078 = vperm.xlu0 %15558, %v7924_v22   ;;  %v6724_v52 = vand.u32 4294901760, %v6723_v43  ;;  %v6608_v22 = vsel %vm3014_vm3, %v11118_v59, 0  ;;  %v18722_v43 = vsub.f32 %v6602_v57, %v18694_v13  ;;  %v6754_v21 = vand.u32 4294901760, %v6753_v8 }
 0x858   :  { %v6851_v33 = vsub.f32 %v6849_v15, %v6850_v45  ;;  %14643 = vmatpush3.bf16.msra.mxu0 %v18622_v54  ;;  %v18660_v23 = vpack.c.bf16 %v6850_v45, %v6843_v56  ;;  %v6744_v45 = vand.u32 4294901760, %v6743_v5  ;;  %v6773_v32 = vsub.f32 %v18680_v3, %v6772_v27 }
 0x859   :  { %v6792_v24 = vand.u32 4294901760, %v18713_v51  ;;  %v6802_v59 = vand.u32 4294901760, %v18722_v43 }
 0x85a   :  { %v6852_v31 = vand.u32 4294901760, %v6851_v33  ;;  %v18715_v33 = vand.u32 4294901760, %v6605_v46 }
 0x85b   :  { %13061 = vmatmul.mubr.f32.vlgmr.msra.gmra.mrb[4].mxu0 %v6694_v10  ;;  %8083 = vperm.xlu1 %15559, %v7925_v28   ;;  %v14648_v10 = vpack.c.bf16 %v6849_v15, %v18585_v0  ;;  %v10097_v28 = vld [vmem:[%s20439_s13 + $0x8] sm:$0xff]  ;;  %v18724_v0 = vand.u32 4294901760, %v6608_v22  ;;  %v6611_v15 = vsel %vm3014_vm3, %v11119_v55, 0  ;;  %v6803_v55 = vsub.f32 %v18722_v43, %v6802_v59 }
 0x85c   :  { %7998 = vperm.xlu0 %15558, %v7908_v9   ;;  %13063 = vmatprep.mubr.f32.mxu0 %v6704_v50  ;;  %v14644_v56 = vpack.c.bf16 %v6852_v31, %v6845_v53  ;;  %v6763_v50 = vsub.f32 %v18651_v17, %v6762_v62  ;;  %v6782_v9 = vand.u32 4294901760, %v18692_v40  ;;  %v18732_v53 = vsub.f32 %v6605_v46, %v18715_v33 }
 0x85d   :  { %v18734_v57 = vand.u32 4294901760, %v6611_v15 }
 0x85e   :  { %14645 = vmatprep.subr.bf16.mxu0 %v14644_v56  ;;  %v6764_v31 = vand.u32 4294901760, %v6763_v50  ;;  %v6783_v5 = vsub.f32 %v18692_v40, %v6782_v9  ;;  %v6812_v46 = vand.u32 4294901760, %v18732_v53  ;;  %v6804_v50 = vand.u32 4294901760, %v6803_v55 }
 0x85f   :  { %13064 = vmatmul.mubr.f32.gmra.mrb[6].mxu0 %v6714_v48  ;;  %8003 = vperm.xlu1 %15559, %v7909_v12   ;;  %v18741_v48 = vsub.f32 %v6608_v22, %v18724_v0  ;;  %v6793_v12 = vsub.f32 %v18713_v51, %v6792_v24 }
 0x860   :  { %10100 = vperm.xlu0 %15558, %v10096_v47   ;;  %14647 = vmatpush3.bf16.msra.mxu0 %v14644_v56  ;;  %v6774_v56 = vand.u32 4294901760, %v6773_v32  ;;  %v18748_v47 = vsub.f32 %v6611_v15, %v18734_v57 }
 0x861   :  { %14649 = vmatprep.subr.bf16.mxu0 %v14648_v10  ;;  %13066 = vmatprep.mubr.f32.mxu0 %v6724_v52  ;;  %v6784_v52 = vand.u32 4294901760, %v6783_v5  ;;  %v6822_v22 = vand.u32 4294901760, %v18741_v48 }
 0x862   :  { %v6832_v8 = vand.u32 4294901760, %v18748_v47 }
 0x863   :  { %13067 = vmatmul.mubr.f32.gmra.mrb[8].mxu0 %v6734_v20  ;;  %10105 = vperm.xlu1 %15559, %v10097_v28   ;;  %v6794_v20 = vand.u32 4294901760, %v6793_v12  ;;  %v6823_v28 = vsub.f32 %v18741_v48, %v6822_v22 }
 0x864   :  { %13069 = vmatprep.mubr.f32.mxu0 %v6744_v45  ;;  %v6813_v45 = vsub.f32 %v18732_v53, %v6812_v46 }
 0x865   :  { %v6824_v32 = vand.u32 4294901760, %v6823_v28 }
 0x866   :  { %v6814_v15 = vand.u32 4294901760, %v6813_v45 }
 0x867   :  { %13070 = vmatmul.mubr.f32.gmra.mrb[10].mxu0 %v6754_v21  ;;  %v6833_v21 = vsub.f32 %v18748_v47, %v6832_v8 }
 0x868   :  { %13072 = vmatprep.mubr.f32.mxu0 %v6764_v31 }
 0x869   :  { %v6834_v31 = vand.u32 4294901760, %v6833_v21 }
 0x86b   :  { %13073 = vmatmul.mubr.f32.gmra.mrb[12].mxu0 %v6774_v56 }
 0x86c   :  { %13075 = vmatprep.mubr.f32.mxu0 %v6784_v52 }
 0x86f   :  { %13076 = vmatmul.mubr.f32.gmra.mrb[14].mxu0 %v6794_v20  ;;  %v7870_v20 = vld [vmem:[%s20436_s10 + $0x40] sm:$0xff] }
 0x870   :  { %13078 = vmatprep.mubr.f32.mxu0 %v6804_v50 }
 0x873   :  { %13079 = vmatmul.mubr.f32.gmra.mrb[16].mxu0 %v6814_v15  ;;  %v7871_v15 = vld [vmem:[%s20436_s10 + $0x48] sm:$0xff] }
 0x874   :  { %13081 = vmatprep.mubr.f32.mxu0 %v6824_v32 }
 0x877   :  { %13082 = vmatmul.mubr.f32.gmra.mrb[18].mxu0 %v6834_v31 }
 0x878   :  { %13088 = vmatprep.mubr.f32.mxu0 %v18349_v30 }
 0x87b   :  { %13089 = vmatmul.mubr.f32.vlgmr.msra.gmra.mrb[4].mxu0 %v18530_v38 }
 0x87c   :  { %14651 = vmatpush3.bf16.msra.mxu0 %v14648_v10  ;;  %13091 = vmatprep.mubr.f32.mxu0 %v18532_v34  ;;  %v7868_v10 = vld [vmem:[%s20436_s10 + $0x30] sm:$0xff] }
 0x87d   :  { %14653 = vmatprep.subr.bf16.mxu0 %v18622_v54 }
 0x87f   :  { %13092 = vmatmul.mubr.f32.gmra.mrb[6].mxu0 %v18558_v14 }
 0x880   :  { %13094 = vmatprep.mubr.f32.mxu0 %v18570_v36 }
 0x883   :  { %13095 = vmatmul.mubr.f32.gmra.mrb[8].mxu0 %v18572_v35 }
 0x884   :  { %13097 = vmatprep.mubr.f32.mxu0 %v18578_v18 }
 0x887   :  { %13098 = vmatmul.mubr.f32.gmra.mrb[10].mxu0 %v18603_v61 }
 0x888   :  { %13100 = vmatprep.mubr.f32.mxu0 %v18619_v63 }
 0x88b   :  { %13101 = vmatmul.mubr.f32.gmra.mrb[12].mxu0 %v18642_v58 }
 0x88c   :  { %13103 = vmatprep.mubr.f32.mxu0 %v18657_v60 }
 0x88f   :  { %13104 = vmatmul.mubr.f32.gmra.mrb[14].mxu0 %v18686_v42 }
 0x890   :  { %13106 = vmatprep.mubr.f32.mxu0 %v18694_v13 }
 0x893   :  { %13107 = vmatmul.mubr.f32.gmra.mrb[16].mxu0 %v18715_v33 }
 0x894   :  { %13109 = vmatprep.mubr.f32.mxu0 %v18724_v0 }
 0x897   :  { %13110 = vmatmul.mubr.f32.gmra.mrb[18].mxu0 %v18734_v57 }
 0x898   :  { %13116 = vmatprep.mubr.f32.mxu0 %v18352_v6 }
 0x89b   :  { %13117 = vmatmul.mubr.f32.vlgmr.msra.gmra.mrb[4].mxu0 %v18551_v29 }
 0x89c   :  { %14655 = vmatpush3.bf16.msra.mxu0 %v18622_v54  ;;  %13119 = vmatprep.mubr.f32.mxu0 %v18556_v7  ;;  %v2934_v7 = vpop.permute.xlu1 %2933 }
 0x89d   :  { %14657 = vmatprep.subr.bf16.mxu0 %v18660_v23 }
 0x89f   :  { %13120 = vmatmul.mubr.f32.gmra.mrb[6].mxu0 %v18583_v11 }
 0x8a0   :  { %13122 = vmatprep.mubr.f32.mxu0 %v18598_v44 }
 0x8a3   :  { %13123 = vmatmul.mubr.f32.gmra.mrb[8].mxu0 %v18601_v16 }
 0x8a4   :  { %13125 = vmatprep.mubr.f32.mxu0 %v18610_v2 }
 0x8a7   :  { %13126 = vmatmul.mubr.f32.gmra.mrb[10].mxu0 %v18633_v41  ;;  %v7864_v41 = vld [vmem:[%s20436_s10 + $0x10] sm:$0xff] }
 0x8a8   :  { %13128 = vmatprep.mubr.f32.mxu0 %v18651_v17  ;;  %v7866_v17 = vld [vmem:[%s20436_s10 + $0x20] sm:$0xff] }
 0x8ab   :  { %13129 = vmatmul.mubr.f32.gmra.mrb[12].mxu0 %v18680_v3 }
 0x8ac   :  { %13131 = vmatprep.mubr.f32.mxu0 %v18692_v40 }
 0x8af   :  { %13132 = vmatmul.mubr.f32.gmra.mrb[14].mxu0 %v18713_v51 }
 0x8b0   :  { %13134 = vmatprep.mubr.f32.mxu0 %v18722_v43 }
 0x8b3   :  { %13135 = vmatmul.mubr.f32.gmra.mrb[16].mxu0 %v18732_v53  ;;  %v7869_v53 = vld [vmem:[%s20436_s10 + $0x38] sm:$0xff] }
 0x8b4   :  { %13137 = vmatprep.mubr.f32.mxu0 %v18741_v48  ;;  %v18962_v56 = vand.u32 4294901760, %v7869_v53 }
 0x8b6   :  { %21510 = vst [vmem:[#allocation27_spill] sm:$0xff] %v18962_v56  ;;  %v18999_v31 = vsub.f32 %v7869_v53, %v18962_v56 }
 0x8b7   :  { %13138 = vmatmul.mubr.f32.gmra.mrb[18].mxu0 %v18748_v47 }
 0x8b8   :  { %13144 = vmatprep.mubr.f32.mxu0 %v6682_v4 }
 0x8bb   :  { %13145 = vmatmul.mubr.f32.vlgmr.msra.gmra.mrb[4].mxu0 %v6692_v49 }
 0x8bc   :  { %14659 = vmatpush3.bf16.msra.mxu0 %v18660_v23  ;;  %13147 = vmatprep.mubr.f32.mxu0 %v6702_v37  ;;  %v18918_v23 = vand.u32 4294901760, %v7864_v41 }
 0x8bd   :  { %14661 = vmatprep.subr.bf16.mxu0 %v18622_v54 }
 0x8bf   :  { %13148 = vmatmul.mubr.f32.gmra.mrb[6].mxu0 %v6712_v25 }
 0x8c0   :  { %13150 = vmatprep.mubr.f32.mxu0 %v6722_v26 }
 0x8c3   :  { %13151 = vmatmul.mubr.f32.gmra.mrb[8].mxu0 %v6732_v1  ;;  %v7863_v1 = vld [vmem:[%s20436_s10 + $0x8] sm:$0xff] }
 0x8c4   :  { %13153 = vmatprep.mubr.f32.mxu0 %v6742_v39  ;;  %v7865_v39 = vld [vmem:[%s20436_s10 + $0x18] sm:$0xff] }
 0x8c7   :  { %13154 = vmatmul.mubr.f32.gmra.mrb[10].mxu0 %v6752_v19  ;;  %v18920_v19 = vand.u32 4294901760, %v7865_v39 }
 0x8c8   :  { %13156 = vmatprep.mubr.f32.mxu0 %v6762_v62  ;;  %v18924_v62 = vand.u32 4294901760, %v7866_v17 }
 0x8cb   :  { %13157 = vmatmul.mubr.f32.gmra.mrb[12].mxu0 %v6772_v27  ;;  %v18936_v27 = vsub.f32 %v7865_v39, %v18920_v19 }
 0x8cc   :  { %13159 = vmatprep.mubr.f32.mxu0 %v6782_v9  ;;  %v18946_v9 = vsub.f32 %v7866_v17, %v18924_v62 }
 0x8cd   :  { %21505 = vst [vmem:[#allocation33_spill] sm:$0xff] %v18936_v27  ;;  %v20799_v5 = vand.u32 4294901760, %v18936_v27 }
 0x8ce   :  { %21507 = vst [vmem:[#allocation61_spill] sm:$0xff] %v18946_v9  ;;  %v20797_v48 = vand.u32 4294901760, %v18946_v9 }
 0x8cf   :  { %13160 = vmatmul.mubr.f32.gmra.mrb[14].mxu0 %v6792_v24  ;;  %v18951_v24 = vand.u32 4294901760, %v7868_v10 }
 0x8d0   :  { %13162 = vmatprep.mubr.f32.mxu0 %v6802_v59  ;;  %v18996_v32 = vsub.f32 %v18946_v9, %v20797_v48 }
 0x8d1   :  { %21508 = vst [vmem:[#allocation21_spill] sm:$0xff] %v18951_v24 }
 0x8d3   :  { %13163 = vmatmul.mubr.f32.gmra.mrb[16].mxu0 %v6812_v46  ;;  %v18970_v46 = vsub.f32 %v7868_v10, %v18951_v24 }
 0x8d4   :  { %13165 = vmatprep.mubr.f32.mxu0 %v6822_v22  ;;  %v18982_v22 = vsub.f32 %v18936_v27, %v20799_v5 }
 0x8d5   :  { %21511 = vst [vmem:[#allocation29_spill] sm:$0xff] %v18970_v46 }
 0x8d7   :  { %13166 = vmatmul.mubr.f32.gmra.mrb[18].mxu0 %v6832_v8 }
 0x8d8   :  { %13172 = vmatprep.mubr.f32.mxu0 %v18349_v30 }
 0x8db   :  { %13173 = vmatmul.mubr.f32.vlgmr.msra.gmra.mrb[4].mxu0 %v18530_v38 }
 0x8dc   :  { %14663 = vmatpush3.bf16.msra.mxu0 %v18622_v54  ;;  %13175 = vmatprep.mubr.f32.mxu0 %v18532_v34 }
 0x8df   :  { %13176 = vmatmul.mubr.f32.gmra.mrb[6].mxu0 %v18558_v14 }
 0x8e0   :  { %13178 = vmatprep.mubr.f32.mxu0 %v18570_v36 }
 0x8e3   :  { %13179 = vmatmul.mubr.f32.gmra.mrb[8].mxu0 %v18572_v35 }
 0x8e4   :  { %13181 = vmatprep.mubr.f32.mxu0 %v18578_v18 }
 0x8e7   :  { %13182 = vmatmul.mubr.f32.gmra.mrb[10].mxu0 %v18603_v61 }
 0x8e8   :  { %13184 = vmatprep.mubr.f32.mxu0 %v18619_v63 }
 0x8eb   :  { %13185 = vmatmul.mubr.f32.gmra.mrb[12].mxu0 %v18642_v58 }
 0x8ec   :  { %13187 = vmatprep.mubr.f32.mxu0 %v18657_v60 }
 0x8ef   :  { %13188 = vmatmul.mubr.f32.gmra.mrb[14].mxu0 %v18686_v42 }
 0x8f0   :  { %13190 = vmatprep.mubr.f32.mxu0 %v18694_v13 }
 0x8f3   :  { %13191 = vmatmul.mubr.f32.gmra.mrb[16].mxu0 %v18715_v33 }
 0x8f4   :  { %13193 = vmatprep.mubr.f32.mxu0 %v18724_v0 }
 0x8f7   :  { %13194 = vmatmul.mubr.f32.gmra.mrb[18].mxu0 %v18734_v57 }
 0x8f8   :  { %13200 = vmatprep.mubr.f32.mxu0 %v18349_v30  ;;  %v7862_v30 = vld [vmem:[%s20436_s10] sm:$0xff] }
 0x8f9   :  { %v18869_v6 = vand.u32 4294901760, %v7862_v30 }
 0x8fb   :  { %13201 = vmatmul.mubr.f32.vlgmr.msra.gmra.mrb[4].mxu0 %v18530_v38  ;;  %v18872_v4 = vsub.f32 %v7862_v30, %v18869_v6  ;;  %v7872_v30 = vld [vmem:[%s20436_s10 + $0x50] sm:$0xff] }
 0x8fc   :  { %13203 = vmatprep.mubr.f32.mxu0 %v18532_v34 }
 0x8fd   :  { %21502 = vst [vmem:[#allocation57_spill] sm:$0xff] %v18872_v4  ;;  %v20802_v38 = vand.u32 4294901760, %v18872_v4 }
 0x8ff   :  { %13204 = vmatmul.mubr.f32.gmra.mrb[6].mxu0 %v18558_v14  ;;  %v8170_v34 = vsub.f32 %v18872_v4, %v20802_v38  ;;  %v2929_v14 = vpop.permute.xlu0 %2928 }
 0x900   :  { %13206 = vmatprep.mubr.f32.mxu0 %v18570_v36  ;;  %v7758_v36 = vpop.permute.xlu1 %7757 }
 0x901   :  { %v8171_v29 = vand.u32 4294901760, %v8170_v34 }
 0x903   :  { %13207 = vmatmul.mubr.f32.gmra.mrb[8].mxu0 %v18572_v35  ;;  %13256 = vmatprep.mubr.f32.mxu1 %v8171_v29  ;;  %v7753_v35 = vpop.permute.xlu0 %7752 }
 0x904   :  { %13209 = vmatprep.mubr.f32.mxu0 %v18578_v18  ;;  %v18878_v49 = vpop.permute.xlu1 %2943 }
 0x907   :  { %13210 = vmatmul.mubr.f32.gmra.mrb[10].mxu0 %v18603_v61  ;;  %v18880_v18 = vpop.permute.xlu0 %2938 }
 0x908   :  { %13212 = vmatprep.mubr.f32.mxu0 %v18619_v63  ;;  %v18882_v37 = vpop.permute.xlu1 %7767 }
 0x90b   :  { %13213 = vmatmul.mubr.f32.gmra.mrb[12].mxu0 %v18642_v58  ;;  %v18884_v11 = vpop.permute.xlu0 %7762  ;;  %v18911_v58 = vand.u32 4294901760, %v7863_v1 }
 0x90c   :  { %13215 = vmatprep.mubr.f32.mxu0 %v18657_v60  ;;  %v18886_v44 = vpop.permute.xlu1 %2953 }
 0x90d   :  { %v18930_v40 = vsub.f32 %v7863_v1, %v18911_v58  ;;  %v19006_v1 = vand.u32 4294901760, %v7870_v20 }
 0x90f   :  { %13216 = vmatmul.mubr.f32.gmra.mrb[14].mxu0 %v18686_v42  ;;  %v18888_v16 = vpop.permute.xlu0 %2948  ;;  %v7867_v42 = vld [vmem:[%s20436_s10 + $0x28] sm:$0xff]  ;;  %21503 = vst [vmem:[#allocation31_spill] sm:$0xff] %v18930_v40  ;;  %21512 = vst [vmem:[#allocation28_spill] sm:$0xff] %v19006_v1 }
 0x910   :  { %13218 = vmatprep.mubr.f32.mxu0 %v18694_v13  ;;  %v18890_v61 = vpop.permute.xlu1 %7777  ;;  %v18933_v13 = vsub.f32 %v7864_v41, %v18918_v23  ;;  %v18941_v51 = vand.u32 4294901760, %v7867_v42 }
 0x912   :  { %21504 = vst [vmem:[#allocation30_spill] sm:$0xff] %v18933_v13  ;;  %21506 = vst [vmem:[#allocation36_spill] sm:$0xff] %v18941_v51  ;;  %v18959_v59 = vsub.f32 %v7867_v42, %v18941_v51  ;;  %v19010_v42 = vand.u32 4294901760, %v7871_v15 }
 0x913   :  { %13219 = vmatmul.mubr.f32.gmra.mrb[16].mxu0 %v18715_v33  ;;  %v18892_v2 = vpop.permute.xlu0 %7772 }
 0x914   :  { %13221 = vmatprep.mubr.f32.mxu0 %v18724_v0  ;;  %v18894_v25 = vpop.permute.xlu1 %2963  ;;  %v20801_v0 = vand.u32 4294901760, %v18930_v40  ;;  %21509 = vst [vmem:[#allocation43_spill] sm:$0xff] %v18959_v59  ;;  %v20798_v28 = vand.u32 4294901760, %v18959_v59  ;;  %21513 = vst [vmem:[#allocation62_spill] sm:$0xff] %v19010_v42  ;;  %v19043_v38 = vsub.f32 %v7871_v15, %v19010_v42 }
 0x916   :  { %v18967_v12 = vsub.f32 %v18930_v40, %v20801_v0  ;;  %v19039_v0 = vsub.f32 %v7870_v20, %v19006_v1 }
 0x917   :  { %13222 = vmatmul.mubr.f32.gmra.mrb[18].mxu0 %v18734_v57  ;;  %v18896_v63 = vpop.permute.xlu0 %2958  ;;  %v20800_v57 = vand.u32 4294901760, %v18933_v13 }
 0x918   :  { %v18898_v54 = vpop.permute.xlu1 %7787 }
 0x919   :  { %v18977_v55 = vsub.f32 %v18933_v13, %v20800_v57 }
 0x91b   :  { %v18900_v26 = vpop.permute.xlu0 %7782 }
 0x91c   :  { %v18916_v60 = vpop.permute.xlu1 %2973 }
 0x91f   :  { %v18922_v3 = vpop.permute.xlu0 %2968 }
 0x920   :  { %v18943_v33 = vpop.permute.xlu1 %7797 }
 0x923   :  { %v18948_v43 = vpop.permute.xlu0 %7792 }
 0x924   :  { %v18972_v47 = vpop.permute.xlu1 %2983 }
 0x927   :  { %v18987_v45 = vpop.permute.xlu0 %2978 }
 0x92b   :  { %v19030_v48 = vpop.permute.xlu0 %7802 }
 0x9ce   :  { %v13202_v52 = vpop.f32.mrb[4].mxu0 }
 0x9cf   :  { %v15054_v8 = vadd.f32 %v13202_v52, %v2934_v7  ;;  %v7623_v50 = vpop.f32.mrb[5].mxu0  ;;  %v20803_v7 = vand.u32 4294901760, %v18970_v46 }
 0x9d0   :  { %v15055_v21 = vadd.f32 %v7623_v50, %v2929_v14  ;;  %v19025_v50 = vpop.permute.xlu1 %7807 }
 0x9d1   :  { %v7831_v34 = vadd.f32 %v15054_v8, %v7758_v36  ;;  %v19016_v36 = vsub.f32 %v18959_v59, %v20798_v28  ;;  %v19018_v8 = vand.u32 4294901760, %v7872_v30  ;;  %v19036_v57 = vsub.f32 %v18970_v46, %v20803_v7 }
 0x9d2   :  { %v7830_v14 = vadd.f32 %v15055_v21, %v7753_v35  ;;  %v13205_v41 = vpop.f32.mrb[6].mxu0  ;;  %v19023_v35 = vld [vmem:[%s20436_s10 + $0x58] sm:$0xff] }
 0x9d3   :  { %v7847_v10 = vmax.f32 %v7831_v34, 0.0  ;;  %v15056_v53 = vadd.f32 %v13205_v41, %v18878_v49  ;;  %v7635_v52 = vpop.f32.mrb[7].mxu0  ;;  %21514 = vst [vmem:[#allocation60_spill] sm:$0xff] %v19018_v8  ;;  %v19046_v49 = vand.u32 4294901760, %v19023_v35 }
 0x9d4   :  { %v7846_v21 = vmax.f32 %v7830_v14, 0.0  ;;  %v15057_v34 = vadd.f32 %v7635_v52, %v18880_v18 }
 0x9d5   :  { %v8090_v28 = vand.u32 4294901760, %v7847_v10  ;;  %v7833_v5 = vadd.f32 %v15056_v53, %v18882_v37  ;;  %v19051_v37 = vld [vmem:[%s20436_s10 + $0x60] sm:$0xff] }
 0x9d6   :  { %v8087_v14 = vand.u32 4294901760, %v7846_v21  ;;  %v7832_v18 = vadd.f32 %v15057_v34, %v18884_v11  ;;  %v13208_v52 = vpop.f32.mrb[8].mxu0  ;;  %v19057_v11 = vsub.f32 %v7872_v30, %v19018_v8 }
 0x9d7   :  { %v19053_v53 = vsub.f32 %v7847_v10, %v8090_v28  ;;  %v7849_v7 = vmax.f32 %v7833_v5, 0.0  ;;  %v15058_v20 = vadd.f32 %v13208_v52, %v18886_v44  ;;  %v7647_v41 = vpop.f32.mrb[9].mxu0  ;;  %v19067_v5 = vand.u32 4294901760, %v19051_v37  ;;  %v19069_v44 = vpop.permute.xlu1 %2993 }
 0x9d8   :  { %v19059_v34 = vpack.c.bf16 %v8090_v28, %v8087_v14  ;;  %v19061_v15 = vsub.f32 %v7846_v21, %v8087_v14  ;;  %v7848_v17 = vmax.f32 %v7832_v18, 0.0  ;;  %v15059_v39 = vadd.f32 %v7647_v41, %v18888_v16 }
 0x9d9   :  { %v8096_v29 = vand.u32 4294901760, %v7849_v7  ;;  %v7835_v46 = vadd.f32 %v15058_v20, %v18890_v61  ;;  %v20818_v10 = vand.u32 4294901760, %v19053_v53  ;;  %v19078_v61 = vpop.permute.xlu0 %2988 }
 0x9da   :  { %21515 = vst [vmem:[#allocation41_spill] sm:$0xff] %v19059_v34  ;;  %v8093_v52 = vand.u32 4294901760, %v7848_v17  ;;  %v7834_v30 = vadd.f32 %v15059_v39, %v18892_v2  ;;  %v13211_v28 = vpop.f32.mrb[10].mxu0  ;;  %14665 = vmatprep.subr.bf16.mxu1 %v19059_v34  ;;  %v19076_v16 = vpack.c.bf16 %v19053_v53, %v19061_v15 }
 0x9db   :  { %v19080_v41 = vsub.f32 %v7849_v7, %v8096_v29  ;;  %v7851_v14 = vmax.f32 %v7835_v46, 0.0  ;;  %v15060_v18 = vadd.f32 %v13211_v28, %v18894_v25  ;;  %v7659_v20 = vpop.f32.mrb[11].mxu0  ;;  %14667 = vmatpush3.bf16.msra.mxu1 %v19059_v34  ;;  %v8498_v2 = vsub.f32 %v19053_v53, %v20818_v10 }
 0x9dc   :  { %v19087_v39 = vpack.c.bf16 %v8096_v29, %v8093_v52  ;;  %v19089_v21 = vsub.f32 %v7848_v17, %v8093_v52  ;;  %v7850_v59 = vmax.f32 %v7834_v30, 0.0  ;;  %v15061_v9 = vadd.f32 %v7659_v20, %v18896_v63  ;;  %v7818_v20 = vpop.permute.xlu1 %7817 }
 0x9dd   :  { %v8102_v27 = vand.u32 4294901760, %v7851_v14  ;;  %v7837_v7 = vadd.f32 %v15060_v18, %v18898_v54  ;;  %v21517_v46 = vand.u32 4294901760, %v19061_v15  ;;  %v8499_v28 = vand.u32 4294901760, %v8498_v2  ;;  %v7813_v10 = vpop.permute.xlu0 %7812 }
 0x9de   :  { %21516 = vst [vmem:[#allocation40_spill] sm:$0xff] %v19087_v39  ;;  %v8099_v13 = vand.u32 4294901760, %v7850_v59  ;;  %v7836_v40 = vadd.f32 %v15061_v9, %v18900_v26  ;;  %v13214_v4 = vpop.f32.mrb[12].mxu0  ;;  %14669 = vmatprep.subr.bf16.mxu1 %v19087_v39  ;;  %v19194_v24 = vpack.c.bf16 %v19080_v41, %v19089_v21 }
 0x9df   :  { %v8491_v25 = vsub.f32 %v19061_v15, %v21517_v46  ;;  %v19100_v52 = vsub.f32 %v7851_v14, %v8102_v27  ;;  %v7853_v63 = vmax.f32 %v7837_v7, 0.0  ;;  %v15062_v54 = vadd.f32 %v13214_v4, %v18916_v60  ;;  %v7671_v30 = vpop.f32.mrb[13].mxu0  ;;  %14671 = vmatpush3.bf16.msra.mxu1 %v19087_v39 }
 0x9e0   :  { %v19104_v2 = vpack.c.bf16 %v8102_v27, %v8099_v13  ;;  %v19106_v26 = vsub.f32 %v7850_v59, %v8099_v13  ;;  %v7852_v9 = vmax.f32 %v7836_v40, 0.0  ;;  %v15063_v46 = vadd.f32 %v7671_v30, %v18922_v3 }
 0x9e1   :  { %v8492_v18 = vand.u32 4294901760, %v8491_v25  ;;  %v8108_v29 = vand.u32 4294901760, %v7853_v63  ;;  %v7839_v14 = vadd.f32 %v15062_v54, %v18943_v33  ;;  %v21519_v4 = vand.u32 4294901760, %v19089_v21 }
 0x9e2   :  { %21518 = vst [vmem:[#allocation18_spill] sm:$0xff] %v19104_v2  ;;  %v8105_v7 = vand.u32 4294901760, %v7852_v9  ;;  %v7838_v25 = vadd.f32 %v15063_v46, %v18948_v43  ;;  %v13217_v27 = vpop.f32.mrb[14].mxu0  ;;  %14673 = vmatprep.subr.bf16.mxu1 %v19104_v2  ;;  %v21520_v40 = vand.u32 4294901760, %v19080_v41 }
 0x9e3   :  { %v19110_v17 = vpack.c.bf16 %v8499_v28, %v8492_v18  ;;  %v8505_v60 = vsub.f32 %v19089_v21, %v21519_v4  ;;  %v19121_v59 = vsub.f32 %v7853_v63, %v8108_v29  ;;  %v7855_v33 = vmax.f32 %v7839_v14, 0.0  ;;  %v7683_v54 = vpop.f32.mrb[15].mxu0  ;;  %14675 = vmatpush3.bf16.msra.mxu1 %v19104_v2 }
 0x9e4   :  { %v8512_v3 = vsub.f32 %v19080_v41, %v21520_v40  ;;  %v15064_v28 = vadd.f32 %v13217_v27, %v18972_v47  ;;  %v19125_v18 = vpack.c.bf16 %v8108_v29, %v8105_v7  ;;  %v19127_v43 = vsub.f32 %v7852_v9, %v8105_v7  ;;  %v3004_v47 = vpop.permute.xlu1 %3003 }
 0x9e5   :  { %v8506_v30 = vand.u32 4294901760, %v8505_v60  ;;  %v7854_v46 = vmax.f32 %v7838_v25, 0.0  ;;  %v15065_v4 = vadd.f32 %v7683_v54, %v18987_v45  ;;  %v8114_v39 = vand.u32 4294901760, %v7855_v33  ;;  %v2999_v45 = vpop.permute.xlu0 %2998 }
 0x9e6   :  { %21521 = vst [vmem:[#allocation37_spill] sm:$0xff] %v19125_v18  ;;  %v7841_v40 = vadd.f32 %v15064_v28, %v19025_v50  ;;  %v8513_v13 = vand.u32 4294901760, %v8512_v3  ;;  %v21522_v63 = vand.u32 4294901760, %v19106_v26  ;;  %v13220_v60 = vpop.f32.mrb[16].mxu0  ;;  %14677 = vmatprep.subr.bf16.mxu1 %v19125_v18 }
 0x9e7   :  { %v8111_v27 = vand.u32 4294901760, %v7854_v46  ;;  %v7840_v2 = vadd.f32 %v15065_v4, %v19030_v48  ;;  %v19138_v7 = vsub.f32 %v7855_v33, %v8114_v39  ;;  %v15066_v25 = vadd.f32 %v13220_v60, %v19069_v44  ;;  %v7695_v3 = vpop.f32.mrb[17].mxu0  ;;  %14679 = vmatpush3.bf16.msra.mxu1 %v19125_v18 }
 0x9e8   :  { %v8519_v14 = vsub.f32 %v19106_v26, %v21522_v63  ;;  %v7857_v50 = vmax.f32 %v7841_v40, 0.0  ;;  %v19142_v28 = vpack.c.bf16 %v8513_v13, %v8506_v30  ;;  %v15067_v63 = vadd.f32 %v7695_v3, %v19078_v61 }
 0x9e9   :  { %v19144_v54 = vpack.c.bf16 %v8114_v39, %v8111_v27  ;;  %v19146_v48 = vsub.f32 %v7854_v46, %v8111_v27  ;;  %v7856_v4 = vmax.f32 %v7840_v2, 0.0  ;;  %v7843_v9 = vadd.f32 %v15066_v25, %v7818_v20  ;;  %v7828_v27 = vpop.permute.xlu1 %7827 }
 0x9ea   :  { %v8120_v29 = vand.u32 4294901760, %v7857_v50  ;;  %v8520_v34 = vand.u32 4294901760, %v8519_v14  ;;  %v21524_v33 = vand.u32 4294901760, %v19100_v52  ;;  %v7842_v60 = vadd.f32 %v15067_v63, %v7813_v10  ;;  %v13223_v8 = vpop.f32.mrb[18].mxu0 }
 0x9eb   :  { %21523 = vst [vmem:[#allocation55_spill] sm:$0xff] %v19144_v54  ;;  %v8117_v44 = vand.u32 4294901760, %v7856_v4  ;;  %14681 = vmatprep.subr.bf16.mxu1 %v19144_v54  ;;  %v21525_v39 = vand.u32 4294901760, %v19127_v43  ;;  %v7859_v61 = vmax.f32 %v7843_v9, 0.0  ;;  %v15068_v20 = vadd.f32 %v13223_v8, %v3004_v47  ;;  %v7707_v46 = vpop.f32.mrb[19].mxu0 }
 0x9ec   :  { %v8526_v40 = vsub.f32 %v19100_v52, %v21524_v33  ;;  %v19157_v30 = vsub.f32 %v7857_v50, %v8120_v29  ;;  %14683 = vmatpush3.bf16.msra.mxu1 %v19144_v54  ;;  %v7858_v3 = vmax.f32 %v7842_v60, 0.0  ;;  %v15069_v63 = vadd.f32 %v7707_v46, %v2999_v45  ;;  %v7823_v33 = vpop.permute.xlu0 %7822 }
 0x9ed   :  { %v8533_v13 = vsub.f32 %v19127_v43, %v21525_v39  ;;  %v19160_v25 = vpack.c.bf16 %v8120_v29, %v8117_v44  ;;  %v19162_v10 = vsub.f32 %v7856_v4, %v8117_v44  ;;  %v8126_v18 = vand.u32 4294901760, %v7859_v61 }
 0x9ee   :  { %v8527_v14 = vand.u32 4294901760, %v8526_v40  ;;  %v7845_v39 = vadd.f32 %v15068_v20, %v7828_v27  ;;  %v8123_v2 = vand.u32 4294901760, %v7858_v3  ;;  %v7844_v9 = vadd.f32 %v15069_v63, %v7823_v33 }
 0x9ef   :  { %21526 = vst [vmem:[#allocation50_spill] sm:$0xff] %v19160_v25  ;;  %v8534_v50 = vand.u32 4294901760, %v8533_v13  ;;  %14685 = vmatprep.subr.bf16.mxu1 %v19160_v25  ;;  %v21527_v8 = vand.u32 4294901760, %v19121_v59  ;;  %v8546_v29 = vand.u32 4294901760, %v19146_v48  ;;  %v19171_v4 = vsub.f32 %v7859_v61, %v8126_v18 }
 0x9f0   :  { %v19164_v42 = vpack.c.bf16 %v8527_v14, %v8520_v34  ;;  %v7861_v40 = vmax.f32 %v7845_v39, 0.0  ;;  %14687 = vmatpush3.bf16.msra.mxu1 %v19160_v25  ;;  %v8553_v45 = vand.u32 4294901760, %v19138_v7  ;;  %v8560_v34 = vand.u32 4294901760, %v19162_v10 }
 0x9f1   :  { %v8540_v47 = vsub.f32 %v19121_v59, %v21527_v8  ;;  %v19176_v44 = vpack.c.bf16 %v8126_v18, %v8123_v2  ;;  %v8573_v60 = vsub.f32 %v7858_v3, %v8123_v2  ;;  %v7860_v13 = vmax.f32 %v7844_v9, 0.0 }
 0x9f2   :  { %v8132_v46 = vand.u32 4294901760, %v7861_v40  ;;  %v8547_v14 = vsub.f32 %v19146_v48, %v8546_v29  ;;  %v8554_v27 = vsub.f32 %v19138_v7, %v8553_v45  ;;  %v8561_v61 = vsub.f32 %v19162_v10, %v8560_v34 }
 0x9f3   :  { %21528 = vst [vmem:[#allocation19_spill] sm:$0xff] %v19176_v44  ;;  %v8541_v20 = vand.u32 4294901760, %v8540_v47  ;;  %v8129_v63 = vand.u32 4294901760, %v7860_v13  ;;  %14689 = vmatprep.subr.bf16.mxu1 %v19176_v44  ;;  %v8567_v39 = vand.u32 4294901760, %v19157_v30  ;;  %v8574_v8 = vand.u32 4294901760, %v8573_v60 }
 0x9f4   :  { %v8594_v18 = vsub.f32 %v7861_v40, %v8132_v46  ;;  %14691 = vmatpush3.bf16.msra.mxu1 %v19176_v44  ;;  %v8548_v2 = vand.u32 4294901760, %v8547_v14  ;;  %v8555_v3 = vand.u32 4294901760, %v8554_v27  ;;  %v8562_v9 = vand.u32 4294901760, %v8561_v61 }
 0x9f5   :  { %v19182_v33 = vpack.c.bf16 %v8541_v20, %v8534_v50  ;;  %v19186_v47 = vpack.c.bf16 %v8132_v46, %v8129_v63  ;;  %v8587_v25 = vsub.f32 %v7860_v13, %v8129_v63  ;;  %v8568_v54 = vsub.f32 %v19157_v30, %v8567_v39 }
 0x9f6   :  { %v8575_v1 = vsub.f32 %v8573_v60, %v8574_v8  ;;  %v19189_v56 = vpack.c.bf16 %v8555_v3, %v8548_v2  ;;  %v8581_v50 = vand.u32 4294901760, %v19171_v4  ;;  %v8595_v20 = vand.u32 4294901760, %v8594_v18 }
 0x9f7   :  { %21529 = vst [vmem:[#allocation9_spill] sm:$0xff] %v19186_v47  ;;  %14693 = vmatprep.subr.bf16.mxu1 %v19186_v47  ;;  %v8569_v40 = vand.u32 4294901760, %v8568_v54  ;;  %v8588_v27 = vand.u32 4294901760, %v8587_v25  ;;  %v19199_v13 = vpack.c.bf16 %v19100_v52, %v19106_v26  ;;  %v19205_v63 = vpack.c.bf16 %v19121_v59, %v19127_v43 }
 0x9f8   :  { %v8576_v14 = vand.u32 4294901760, %v8575_v1  ;;  %14695 = vmatpush3.bf16.msra.mxu1 %v19186_v47  ;;  %v8582_v46 = vsub.f32 %v19171_v4, %v8581_v50  ;;  %v8596_v61 = vsub.f32 %v8594_v18, %v8595_v20  ;;  %v19209_v2 = vpack.c.bf16 %v19138_v7, %v19146_v48 }
 0x9f9   :  { %21530 = vst [vmem:[#allocation11_spill] sm:$0xff] %v19199_v13  ;;  %21531 = vst [vmem:[#allocation10_spill] sm:$0xff] %v19205_v63  ;;  %14697 = vmatprep.subr.bf16.mxu1 %v19110_v17  ;;  %v19212_v1 = vpack.c.bf16 %v8569_v40, %v8562_v9  ;;  %v8589_v54 = vsub.f32 %v8587_v25, %v8588_v27  ;;  %v19216_v3 = vpack.c.bf16 %v19157_v30, %v19162_v10  ;;  %v7875_v30 = vld [vmem:[%s20436_s10 + $0x68] sm:$0xff] }
 0x9fa   :  { %v19219_v47 = vpack.c.bf16 %v19171_v4, %v8573_v60  ;;  %v8583_v44 = vand.u32 4294901760, %v8582_v46  ;;  %v8597_v51 = vand.u32 4294901760, %v8596_v61  ;;  %v19221_v13 = vpack.c.bf16 %v8594_v18, %v8587_v25 }
 0x9fb   :  { %v21532_v63 = vand.u32 4294901760, %v19061_v15  ;;  %v21533_v7 = vand.u32 4294901760, %v19053_v53  ;;  %v21534_v9 = vand.u32 4294901760, %v18967_v12  ;;  %v8590_v10 = vand.u32 4294901760, %v8589_v54 }
 0x9fc   :  { %v21535_v4 = vand.u32 4294901760, %v19089_v21  ;;  %v21536_v60 = vand.u32 4294901760, %v19080_v41  ;;  %v21538_v15 = vand.u32 4294901760, %v19106_v26  ;;  %v21539_v53 = vand.u32 4294901760, %v19100_v52 }
 0x9fd   :  { %v19227_v48 = vpack.c.bf16 %v21533_v7, %v21532_v63  ;;  %13257 = vmatmul.mubr.f32.vlgmr.msra.gmra.mrb[16].mxu1 %v21534_v9  ;;  %v21541_v12 = vand.u32 4294901760, %v19127_v43  ;;  %v21542_v40 = vand.u32 4294901760, %v19121_v59  ;;  %v21544_v21 = vand.u32 4294901760, %v18977_v55  ;;  %v7876_v59 = vld [vmem:[%s20436_s10 + $0x70] sm:$0xff] }
 0x9fe   :  { %v19238_v25 = vpack.c.bf16 %v21536_v60, %v21535_v4  ;;  %v19244_v18 = vpack.c.bf16 %v21539_v53, %v21538_v15  ;;  %14699 = vmatpush3.bf16.msra.mxu1 %v19110_v17  ;;  %v20857_v41 = vand.u32 4294901760, %v19039_v0  ;;  %v19256_v61 = vpack.c.bf16 %v8583_v44, %v8576_v14  ;;  %v7879_v60 = vld [vmem:[%s20436_s10 + $0x88] sm:$0xff] }
 0x9ff   :  { %v19250_v46 = vpack.c.bf16 %v21542_v40, %v21541_v12  ;;  %13259 = vmatprep.mubr.f32.mxu1 %v21544_v21  ;;  %v19258_v26 = vpack.c.bf16 %v8553_v45, %v8546_v29  ;;  %v19260_v52 = vpack.c.bf16 %v8567_v39, %v8560_v34  ;;  %14701 = vmatprep.subr.bf16.mxu1 %v19142_v28  ;;  %v19276_v29 = vand.u32 4294901760, %v7875_v30 }
 0xa00   :  { %21537 = vst [vmem:[#allocation12_spill] sm:$0xff] %v19238_v25  ;;  %21540 = vst [vmem:[#allocation22_spill] sm:$0xff] %v19244_v18  ;;  %v19263_v43 = vpack.c.bf16 %v8597_v51, %v8590_v10  ;;  %v19268_v17 = vpack.c.bf16 %v8581_v50, %v8574_v8  ;;  %v19270_v55 = vpack.c.bf16 %v8595_v20, %v8588_v27  ;;  %v21549_v45 = vand.u32 4294901760, %v18982_v22 }
 0xa01   :  { %21543 = vst [vmem:[#allocation14_spill] sm:$0xff] %v19250_v46  ;;  %21545 = vst [vmem:[#allocation23_spill] sm:$0xff] %v19258_v26  ;;  %v19274_v44 = vsub.f32 %v19023_v35, %v19046_v49  ;;  %v8221_v51 = vand.u32 4294901760, %v19016_v36  ;;  %v21550_v34 = vand.u32 4294901760, %v18999_v31  ;;  %v20855_v8 = vand.u32 4294901760, %v19043_v38 }
 0xa02   :  { %21546 = vst [vmem:[#allocation25_spill] sm:$0xff] %v19260_v52  ;;  %21547 = vst [vmem:[#allocation26_spill] sm:$0xff] %v19268_v17  ;;  %13260 = vmatmul.mubr.f32.gmra.mrb[18].mxu1 %v21549_v45  ;;  %v19287_v50 = vsub.f32 %v19051_v37, %v19067_v5  ;;  %v21551_v35 = vand.u32 4294901760, %v18996_v32  ;;  %v8231_v22 = vand.u32 4294901760, %v19036_v57  ;;  %v8250_v36 = vsub.f32 %v19039_v0, %v20857_v41  ;;  %v7877_v37 = vld [vmem:[%s20436_s10 + $0x78] sm:$0xff]  ;;  %v7878_v32 = vld [vmem:[%s20436_s10 + $0x80] sm:$0xff] }
 0xa03   :  { %21548 = vst [vmem:[#allocation38_spill] sm:$0xff] %v19270_v55  ;;  %v8240_v39 = vsub.f32 %v18999_v31, %v21550_v34  ;;  %14703 = vmatpush3.bf16.msra.mxu1 %v19142_v28  ;;  %v20854_v20 = vand.u32 4294901760, %v19057_v11  ;;  %v19297_v14 = vand.u32 4294901760, %v7876_v59  ;;  %v20852_v57 = vand.u32 4294901760, %v19274_v44 }
 0xa04   :  { %13262 = vmatprep.mubr.f32.mxu1 %v21551_v35  ;;  %14705 = vmatprep.subr.bf16.mxu1 %v19164_v42  ;;  %v19308_v28 = vsub.f32 %v7875_v30, %v19276_v29  ;;  %v8260_v63 = vsub.f32 %v19043_v38, %v20855_v8  ;;  %v20851_v54 = vand.u32 4294901760, %v19287_v50  ;;  %v19314_v7 = vand.u32 4294901760, %v7877_v37  ;;  %v7881_v35 = vld [vmem:[%s20436_s10 + $0x98] sm:$0xff] }
 0xa05   :  { %v8241_v27 = vand.u32 4294901760, %v8240_v39  ;;  %v8251_v9 = vand.u32 4294901760, %v8250_v36  ;;  %v8270_v10 = vsub.f32 %v19057_v11, %v20854_v20  ;;  %v19321_v30 = vsub.f32 %v7876_v59, %v19297_v14 }
 0xa06   :  { %13263 = vmatmul.mubr.f32.gmra.mrb[20].mxu1 %v8221_v51  ;;  %v19323_v4 = vand.u32 4294901760, %v7878_v32  ;;  %v8280_v15 = vsub.f32 %v19274_v44, %v20852_v57  ;;  %v20849_v53 = vand.u32 4294901760, %v19308_v28  ;;  %v8261_v12 = vand.u32 4294901760, %v8260_v63  ;;  %v7885_v57 = vld [vmem:[%s20436_s10 + $0xb8] sm:$0xff] }
 0xa07   :  { %14707 = vmatpush3.bf16.msra.mxu1 %v19164_v42  ;;  %13265 = vmatprep.mubr.f32.mxu1 %v8231_v22  ;;  %v7880_v42 = vld [vmem:[%s20436_s10 + $0x90] sm:$0xff]  ;;  %v8290_v40 = vsub.f32 %v19287_v50, %v20851_v54  ;;  %v19340_v21 = vsub.f32 %v7877_v37, %v19314_v7  ;;  %v19342_v59 = vand.u32 4294901760, %v7879_v60  ;;  %v8271_v45 = vand.u32 4294901760, %v8270_v10  ;;  %v7882_v22 = vld [vmem:[%s20436_s10 + $0xa0] sm:$0xff] }
 0xa08   :  { %14709 = vmatprep.subr.bf16.mxu1 %v19182_v33  ;;  %v20850_v51 = vand.u32 4294901760, %v19321_v30  ;;  %v19347_v34 = vsub.f32 %v7878_v32, %v19323_v4  ;;  %v19349_v39 = vand.u32 4294901760, %v7880_v42  ;;  %v8300_v36 = vsub.f32 %v19308_v28, %v20849_v53 }
 0xa09   :  { %21552 = vst [vmem:[#allocation51_spill] sm:$0xff] %v19342_v59  ;;  %v8291_v37 = vand.u32 4294901760, %v8290_v40  ;;  %v20853_v32 = vand.u32 4294901760, %v19340_v21  ;;  %v19365_v63 = vand.u32 4294901760, %v7881_v35  ;;  %v7884_v40 = vld [vmem:[%s20436_s10 + $0xb0] sm:$0xff] }
 0xa0a   :  { %13266 = vmatmul.mubr.f32.gmra.mrb[22].mxu1 %v8241_v27  ;;  %21553 = vst [vmem:[#allocation53_spill] sm:$0xff] %v19349_v39  ;;  %v19363_v27 = vsub.f32 %v7879_v60, %v19342_v59  ;;  %v8310_v10 = vsub.f32 %v19321_v30, %v20850_v51  ;;  %v19378_v60 = vand.u32 4294901760, %v7882_v22  ;;  %v8301_v53 = vand.u32 4294901760, %v8300_v36 }
 0xa0b   :  { %14711 = vmatpush3.bf16.msra.mxu1 %v19182_v33  ;;  %13268 = vmatprep.mubr.f32.mxu1 %v8251_v9  ;;  %v8281_v33 = vand.u32 4294901760, %v8280_v15  ;;  %21554 = vst [vmem:[#allocation13_spill] sm:$0xff] %v19365_v63  ;;  %v7883_v9 = vld [vmem:[%s20436_s10 + $0xa8] sm:$0xff]  ;;  %v20856_v15 = vand.u32 4294901760, %v19347_v34  ;;  %v19393_v54 = vand.u32 4294901760, %v7884_v40 }
 0xa0c   :  { %14713 = vmatprep.subr.bf16.mxu1 %v19189_v56  ;;  %21555 = vst [vmem:[#allocation48_spill] sm:$0xff] %v19378_v60  ;;  %v20858_v51 = vand.u32 4294901760, %v19363_v27  ;;  %v8311_v36 = vand.u32 4294901760, %v8310_v10  ;;  %v19404_v20 = vsub.f32 %v7882_v22, %v19378_v60 }
 0xa0d   :  { %21558 = vst [vmem:[#allocation24_spill] sm:$0xff] %v19393_v54 }
 0xa0e   :  { %13269 = vmatmul.mubr.f32.gmra.mrb[24].mxu1 %v8261_v12  ;;  %v19376_v12 = vsub.f32 %v7880_v42, %v19349_v39  ;;  %v19391_v42 = vsub.f32 %v7881_v35, %v19365_v63  ;;  %21559 = vst [vmem:[#allocation54_spill] sm:$0xff] %v19404_v20  ;;  %v7886_v35 = vld [vmem:[%s20436_s10 + $0xc0] sm:$0xff]  ;;  %v8340_v10 = vsub.f32 %v19363_v27, %v20858_v51  ;;  %v7887_v51 = vld [vmem:[%s20436_s10 + $0xc8] sm:$0xff]  ;;  %v21566_v52 = vand.u32 4294901760, %v19404_v20 }
 0xa0f   :  { %14715 = vmatpush3.bf16.msra.mxu1 %v19189_v56  ;;  %13271 = vmatprep.mubr.f32.mxu1 %v8271_v45  ;;  %v19384_v56 = vand.u32 4294901760, %v7883_v9  ;;  %v8320_v45 = vsub.f32 %v19340_v21, %v20853_v32  ;;  %v19444_v55 = vand.u32 4294901760, %v7887_v51 }
 0xa10   :  { %14717 = vmatprep.subr.bf16.mxu1 %v19212_v1  ;;  %21557 = vst [vmem:[#allocation34_spill] sm:$0xff] %v19391_v42  ;;  %v20859_v32 = vand.u32 4294901760, %v19376_v12  ;;  %v20863_v22 = vand.u32 4294901760, %v19391_v42 }
 0xa11   :  { %21556 = vst [vmem:[#allocation32_spill] sm:$0xff] %v19384_v56  ;;  %v19411_v8 = vsub.f32 %v7883_v9, %v19384_v56  ;;  %21565 = vst [vmem:[#allocation6_spill] sm:$0xff] %v19444_v55  ;;  %v19470_v26 = vsub.f32 %v7887_v51, %v19444_v55  ;;  %v7892_v51 = vld [vmem:[%s20436_s10 + $0xf0] sm:$0xff] }
 0xa12   :  { %13272 = vmatmul.mubr.f32.gmra.mrb[26].mxu1 %v8281_v33  ;;  %v8330_v33 = vsub.f32 %v19347_v34, %v20856_v15  ;;  %v19420_v15 = vsub.f32 %v7884_v40, %v19393_v54  ;;  %v8350_v9 = vsub.f32 %v19376_v12, %v20859_v32  ;;  %v8360_v32 = vsub.f32 %v19391_v42, %v20863_v22 }
 0xa13   :  { %14719 = vmatpush3.bf16.msra.mxu1 %v19212_v1  ;;  %13274 = vmatprep.mubr.f32.mxu1 %v8291_v37  ;;  %21560 = vst [vmem:[#allocation63_spill] sm:$0xff] %v19411_v8  ;;  %v19413_v1 = vand.u32 4294901760, %v7885_v57  ;;  %v8321_v37 = vand.u32 4294901760, %v8320_v45  ;;  %v19427_v45 = vand.u32 4294901760, %v7886_v35  ;;  %v8370_v40 = vsub.f32 %v19404_v20, %v21566_v52  ;;  %21570 = vst [vmem:[#allocation7_spill] sm:$0xff] %v19470_v26 }
 0xa14   :  { %14721 = vmatprep.subr.bf16.mxu1 %v19256_v61  ;;  %21562 = vst [vmem:[#allocation49_spill] sm:$0xff] %v19420_v15  ;;  %v8331_v41 = vand.u32 4294901760, %v8330_v33  ;;  %v8341_v33 = vand.u32 4294901760, %v8340_v10  ;;  %v8351_v17 = vand.u32 4294901760, %v8350_v9  ;;  %v7889_v10 = vld [vmem:[%s20436_s10 + $0xd8] sm:$0xff] }
 0xa15   :  { %21561 = vst [vmem:[#allocation5_spill] sm:$0xff] %v19413_v1  ;;  %21563 = vst [vmem:[#allocation15_spill] sm:$0xff] %v19427_v45  ;;  %v19472_v46 = vand.u32 4294901760, %v7889_v10  ;;  %v8371_v18 = vand.u32 4294901760, %v8370_v40 }
 0xa16   :  { %13275 = vmatmul.mubr.f32.gmra.mrb[28].mxu1 %v8301_v53  ;;  %v20870_v53 = vand.u32 4294901760, %v19420_v15 }
 0xa17   :  { %14723 = vmatpush3.bf16.msra.mxu1 %v19256_v61  ;;  %13277 = vmatprep.mubr.f32.mxu1 %v8311_v36  ;;  %v7888_v61 = vld [vmem:[%s20436_s10 + $0xd0] sm:$0xff]  ;;  %v19438_v36 = vsub.f32 %v7885_v57, %v19413_v1  ;;  %v19451_v57 = vsub.f32 %v7886_v35, %v19427_v45  ;;  %v8361_v35 = vand.u32 4294901760, %v8360_v32  ;;  %21571 = vst [vmem:[#allocation16_spill] sm:$0xff] %v19472_v46  ;;  %v7891_v32 = vld [vmem:[%s20436_s10 + $0xe8] sm:$0xff] }
 0xa18   :  { %14725 = vmatprep.subr.bf16.mxu1 %v19263_v43  ;;  %v8390_v22 = vsub.f32 %v19420_v15, %v20870_v53  ;;  %v19491_v53 = vsub.f32 %v7889_v10, %v19472_v46  ;;  %v19493_v25 = vand.u32 4294901760, %v7891_v32 }
 0xa19   :  { %21564 = vst [vmem:[#allocation39_spill] sm:$0xff] %v19438_v36  ;;  %21567 = vst [vmem:[#allocation17_spill] sm:$0xff] %v19451_v57  ;;  %v20877_v52 = vand.u32 4294901760, %v19438_v36  ;;  %v21575_v15 = vand.u32 4294901760, %v19451_v57 }
 0xa1a   :  { %13278 = vmatmul.mubr.f32.gmra.mrb[30].mxu1 %v8321_v37  ;;  %v19453_v37 = vand.u32 4294901760, %v7888_v61  ;;  %v8391_v40 = vand.u32 4294901760, %v8390_v22  ;;  %21573 = vst [vmem:[#allocation8_spill] sm:$0xff] %v19491_v53  ;;  %21574 = vst [vmem:[#allocation35_spill] sm:$0xff] %v19493_v25  ;;  %v7893_v22 = vld [vmem:[%s20436_s10 + $0xf8] sm:$0xff] }
 0xa1b   :  { %14727 = vmatpush3.bf16.msra.mxu1 %v19263_v43  ;;  %13280 = vmatprep.mubr.f32.mxu1 %v8331_v41  ;;  %v7890_v41 = vld [vmem:[%s20436_s10 + $0xe0] sm:$0xff]  ;;  %v21569_v43 = vand.u32 4294901760, %v19411_v8 }
 0xa1c   :  { %21568 = vst [vmem:[#allocation20_spill] sm:$0xff] %v19453_v37  ;;  %14729 = vmatprep.subr.bf16.mxu1 %v19076_v16  ;;  %v19476_v20 = vsub.f32 %v7888_v61, %v19453_v37  ;;  %v20882_v61 = vand.u32 4294901760, %v19470_v26 }
 0xa1d   :  { %v8380_v9 = vsub.f32 %v19411_v8, %v21569_v43  ;;  %v19478_v43 = vand.u32 4294901760, %v7890_v41  ;;  %v8410_v8 = vsub.f32 %v19451_v57, %v21575_v15  ;;  %v19512_v15 = vsub.f32 %v7891_v32, %v19493_v25 }
 0xa1e   :  { %13281 = vmatmul.mubr.f32.gmra.mrb[32].mxu1 %v8341_v33  ;;  %v21578_v57 = vand.u32 4294901760, %v19476_v20 }
 0xa1f   :  { %13283 = vmatprep.mubr.f32.mxu1 %v8351_v17  ;;  %21572 = vst [vmem:[#allocation44_spill] sm:$0xff] %v19478_v43  ;;  %v8381_v33 = vand.u32 4294901760, %v8380_v9  ;;  %v8400_v17 = vsub.f32 %v19438_v36, %v20877_v52  ;;  %v19500_v42 = vsub.f32 %v7890_v41, %v19478_v43  ;;  %v19502_v52 = vand.u32 4294901760, %v7892_v51 }
 0xa20   :  { %v19514_v9 = vand.u32 4294901760, %v7893_v22  ;;  %v8411_v41 = vand.u32 4294901760, %v8410_v8  ;;  %v8430_v36 = vsub.f32 %v19476_v20, %v21578_v57 }
 0xa21   :  { %21576 = vst [vmem:[#allocation45_spill] sm:$0xff] %v19502_v52  ;;  %v8401_v10 = vand.u32 4294901760, %v8400_v17  ;;  %v20891_v17 = vand.u32 4294901760, %v19500_v42 }
 0xa22   :  { %13284 = vmatmul.mubr.f32.gmra.mrb[34].mxu1 %v8361_v35  ;;  %v20885_v35 = vand.u32 4294901760, %v19491_v53  ;;  %21577 = vst [vmem:[#allocation42_spill] sm:$0xff] %v19514_v9  ;;  %v8431_v8 = vand.u32 4294901760, %v8430_v36 }
 0xa23   :  { %13286 = vmatprep.mubr.f32.mxu1 %v8371_v18  ;;  %v8420_v18 = vsub.f32 %v19470_v26, %v20882_v61  ;;  %v20890_v26 = vand.u32 4294901760, %v19512_v15  ;;  %v8450_v57 = vsub.f32 %v19500_v42, %v20891_v17  ;;  %v21600_v17 = vld [vmem:[#allocation19_spill] sm:$0xff] }
 0xa24   :  { %v8440_v32 = vsub.f32 %v19491_v53, %v20885_v35 }
 0xa25   :  { %v8421_v61 = vand.u32 4294901760, %v8420_v18  ;;  %v8460_v18 = vsub.f32 %v19512_v15, %v20890_v26  ;;  %v8451_v53 = vand.u32 4294901760, %v8450_v57  ;;  %v21581_v57 = vld [vmem:[#allocation21_spill] sm:$0xff]  ;;  %v21599_v26 = vld [vmem:[#allocation50_spill] sm:$0xff] }
 0xa26   :  { %13287 = vmatmul.mubr.f32.gmra.mrb[36].mxu1 %v8381_v33  ;;  %v19521_v33 = vsub.f32 %v7892_v51, %v19502_v52 }
 0xa27   :  { %13289 = vmatprep.mubr.f32.mxu1 %v8391_v40  ;;  %v19528_v40 = vsub.f32 %v7893_v22, %v19514_v9  ;;  %v8461_v22 = vand.u32 4294901760, %v8460_v18  ;;  %v21584_v18 = vld [vmem:[#allocation28_spill] sm:$0xff] }
 0xa28   :  { %v20889_v51 = vand.u32 4294901760, %v19521_v33 }
 0xa29   :  { %v20888_v35 = vand.u32 4294901760, %v19528_v40 }
 0xa2a   :  { %13290 = vmatmul.mubr.f32.gmra.mrb[38].mxu1 %v8401_v10  ;;  %v8441_v10 = vand.u32 4294901760, %v8440_v32  ;;  %v8470_v36 = vsub.f32 %v19521_v33, %v20889_v51  ;;  %v21598_v51 = vld [vmem:[#allocation55_spill] sm:$0xff] }
 0xa2b   :  { %13292 = vmatprep.mubr.f32.mxu1 %v8411_v41  ;;  %v8480_v41 = vsub.f32 %v19528_v40, %v20888_v35  ;;  %v21597_v35 = vld [vmem:[#allocation37_spill] sm:$0xff] }
 0xa2d   :  { %v8481_v32 = vand.u32 4294901760, %v8480_v41  ;;  %v21592_v41 = vld [vmem:[#allocation33_spill] sm:$0xff] }
 0xa2e   :  { %13293 = vmatmul.mubr.f32.gmra.mrb[40].mxu1 %v8421_v61  ;;  %v8471_v61 = vand.u32 4294901760, %v8470_v36  ;;  %v21586_v36 = vld [vmem:[#allocation60_spill] sm:$0xff] }
 0xa2f   :  { %13295 = vmatprep.mubr.f32.mxu1 %v8431_v8  ;;  %v21580_v8 = vld [vmem:[#allocation36_spill] sm:$0xff] }
 0xa32   :  { %13296 = vmatmul.mubr.f32.gmra.mrb[42].mxu1 %v8441_v10  ;;  %v21582_v10 = vld [vmem:[#allocation10_spill] sm:$0xff] }
 0xa33   :  { %13298 = vmatprep.mubr.f32.mxu1 %v8451_v53  ;;  %v21579_v53 = vld [vmem:[#allocation11_spill] sm:$0xff] }
 0xa36   :  { %13299 = vmatmul.mubr.f32.gmra.mrb[44].mxu1 %v8461_v22  ;;  %v21591_v22 = vld [vmem:[#allocation40_spill] sm:$0xff] }
 0xa37   :  { %13301 = vmatprep.mubr.f32.mxu1 %v8471_v61  ;;  %v21593_v61 = vld [vmem:[#allocation61_spill] sm:$0xff] }
 0xa3a   :  { %13302 = vmatmul.mubr.f32.gmra.mrb[46].mxu1 %v8481_v32  ;;  %v21594_v32 = vld [vmem:[#allocation18_spill] sm:$0xff] }
 0xa3b   :  { %13336 = vmatprep.mubr.f32.mxu1 %v18869_v6 }
 0xa3e   :  { %13337 = vmatmul.mubr.f32.vlgmr.msra.gmra.mrb[16].mxu1 %v18911_v58 }
 0xa3f   :  { %14731 = vmatpush3.bf16.msra.mxu1 %v19076_v16  ;;  %13339 = vmatprep.mubr.f32.mxu1 %v18918_v23  ;;  %v21583_v16 = vld [vmem:[#allocation27_spill] sm:$0xff] }
 0xa40   :  { %14733 = vmatprep.subr.bf16.mxu1 %v19194_v24 }
 0xa42   :  { %13340 = vmatmul.mubr.f32.gmra.mrb[18].mxu1 %v18920_v19 }
 0xa43   :  { %14735 = vmatpush3.bf16.msra.mxu1 %v19194_v24  ;;  %13342 = vmatprep.mubr.f32.mxu1 %v18924_v62  ;;  %v21585_v24 = vld [vmem:[#allocation62_spill] sm:$0xff] }
 0xa44   :  { %14737 = vmatprep.subr.bf16.mxu1 %v21579_v53 }
 0xa46   :  { %13343 = vmatmul.mubr.f32.gmra.mrb[20].mxu1 %v21580_v8 }
 0xa47   :  { %14739 = vmatpush3.bf16.msra.mxu1 %v21579_v53  ;;  %13345 = vmatprep.mubr.f32.mxu1 %v21581_v57  ;;  %v21595_v53 = vld [vmem:[#allocation43_spill] sm:$0xff] }
 0xa48   :  { %14741 = vmatprep.subr.bf16.mxu1 %v21582_v10 }
 0xa4a   :  { %13346 = vmatmul.mubr.f32.gmra.mrb[22].mxu1 %v21583_v16 }
 0xa4b   :  { %14743 = vmatpush3.bf16.msra.mxu1 %v21582_v10  ;;  %13348 = vmatprep.mubr.f32.mxu1 %v21584_v18  ;;  %v21596_v10 = vld [vmem:[#allocation29_spill] sm:$0xff] }
 0xa4c   :  { %14745 = vmatprep.subr.bf16.mxu1 %v19209_v2 }
 0xa4e   :  { %13349 = vmatmul.mubr.f32.gmra.mrb[24].mxu1 %v21585_v24 }
 0xa4f   :  { %14747 = vmatpush3.bf16.msra.mxu1 %v19209_v2  ;;  %13351 = vmatprep.mubr.f32.mxu1 %v21586_v36  ;;  %v21587_v2 = vld [vmem:[#allocation41_spill] sm:$0xff] }
 0xa50   :  { %14749 = vmatprep.subr.bf16.mxu1 %v19216_v3 }
 0xa52   :  { %13352 = vmatmul.mubr.f32.gmra.mrb[26].mxu1 %v19046_v49 }
 0xa53   :  { %14751 = vmatpush3.bf16.msra.mxu1 %v19216_v3  ;;  %13354 = vmatprep.mubr.f32.mxu1 %v19067_v5  ;;  %v21590_v3 = vld [vmem:[#allocation30_spill] sm:$0xff] }
 0xa54   :  { %14753 = vmatprep.subr.bf16.mxu1 %v19219_v47 }
 0xa56   :  { %13355 = vmatmul.mubr.f32.gmra.mrb[28].mxu1 %v19276_v29 }
 0xa57   :  { %14755 = vmatpush3.bf16.msra.mxu1 %v19219_v47  ;;  %13357 = vmatprep.mubr.f32.mxu1 %v19297_v14  ;;  %v21588_v47 = vld [vmem:[#allocation57_spill] sm:$0xff] }
 0xa58   :  { %14757 = vmatprep.subr.bf16.mxu1 %v19221_v13 }
 0xa5a   :  { %13358 = vmatmul.mubr.f32.gmra.mrb[30].mxu1 %v19314_v7 }
 0xa5b   :  { %14759 = vmatpush3.bf16.msra.mxu1 %v19221_v13  ;;  %13360 = vmatprep.mubr.f32.mxu1 %v19323_v4  ;;  %v21589_v13 = vld [vmem:[#allocation31_spill] sm:$0xff] }
 0xa5c   :  { %14761 = vmatprep.subr.bf16.mxu1 %v21587_v2 }
 0xa5e   :  { %13361 = vmatmul.mubr.f32.gmra.mrb[32].mxu1 %v19342_v59  ;;  %v21615_v59 = vand.u32 4294901760, %v21593_v61 }
 0xa5f   :  { %13363 = vmatprep.mubr.f32.mxu1 %v19349_v39  ;;  %v21614_v39 = vand.u32 4294901760, %v21592_v41 }
 0xa62   :  { %13364 = vmatmul.mubr.f32.gmra.mrb[34].mxu1 %v19365_v63  ;;  %v21613_v63 = vld [vmem:[#allocation12_spill] sm:$0xff] }
 0xa63   :  { %13366 = vmatprep.mubr.f32.mxu1 %v19378_v60  ;;  %v21612_v60 = vand.u32 4294901760, %v21590_v3 }
 0xa66   :  { %13367 = vmatmul.mubr.f32.gmra.mrb[36].mxu1 %v19384_v56  ;;  %v21611_v56 = vand.u32 4294901760, %v21589_v13 }
 0xa67   :  { %13369 = vmatprep.mubr.f32.mxu1 %v19393_v54  ;;  %v21610_v54 = vand.u32 4294901760, %v21588_v47 }
 0xa6a   :  { %13370 = vmatmul.mubr.f32.gmra.mrb[38].mxu1 %v19413_v1  ;;  %v21609_v1 = vld [vmem:[#allocation8_spill] sm:$0xff] }
 0xa6b   :  { %13372 = vmatprep.mubr.f32.mxu1 %v19427_v45  ;;  %v21608_v45 = vld [vmem:[#allocation7_spill] sm:$0xff] }
 0xa6e   :  { %13373 = vmatmul.mubr.f32.gmra.mrb[40].mxu1 %v19444_v55  ;;  %v21607_v55 = vld [vmem:[#allocation17_spill] sm:$0xff] }
 0xa6f   :  { %13375 = vmatprep.mubr.f32.mxu1 %v19453_v37  ;;  %v21606_v37 = vld [vmem:[#allocation39_spill] sm:$0xff] }
 0xa72   :  { %13376 = vmatmul.mubr.f32.gmra.mrb[42].mxu1 %v19472_v46  ;;  %v21605_v46 = vld [vmem:[#allocation49_spill] sm:$0xff] }
 0xa73   :  { %13378 = vmatprep.mubr.f32.mxu1 %v19478_v43  ;;  %v21604_v43 = vld [vmem:[#allocation63_spill] sm:$0xff] }
 0xa76   :  { %13379 = vmatmul.mubr.f32.gmra.mrb[44].mxu1 %v19493_v25  ;;  %v21603_v25 = vld [vmem:[#allocation54_spill] sm:$0xff] }
 0xa77   :  { %13381 = vmatprep.mubr.f32.mxu1 %v19502_v52  ;;  %v21602_v52 = vld [vmem:[#allocation34_spill] sm:$0xff] }
 0xa7a   :  { %13382 = vmatmul.mubr.f32.gmra.mrb[46].mxu1 %v19514_v9  ;;  %v21601_v9 = vld [vmem:[#allocation9_spill] sm:$0xff] }
 0xa7b   :  { %13416 = vmatprep.mubr.f32.mxu1 %v21588_v47  ;;  %v21616_v47 = vld [vmem:[#allocation22_spill] sm:$0xff] }
 0xa7e   :  { %13417 = vmatmul.mubr.f32.vlgmr.msra.gmra.mrb[16].mxu1 %v21589_v13  ;;  %v21624_v13 = vand.u32 4294901760, %v19057_v11 }
 0xa7f   :  { %14763 = vmatpush3.bf16.msra.mxu1 %v21587_v2  ;;  %13419 = vmatprep.mubr.f32.mxu1 %v21590_v3  ;;  %v21625_v3 = vld [vmem:[#allocation25_spill] sm:$0xff] }
 0xa80   :  { %14765 = vmatprep.subr.bf16.mxu1 %v21591_v22 }
 0xa82   :  { %13420 = vmatmul.mubr.f32.gmra.mrb[18].mxu1 %v21592_v41  ;;  %v21628_v41 = vld [vmem:[#allocation26_spill] sm:$0xff] }
 0xa83   :  { %14767 = vmatpush3.bf16.msra.mxu1 %v21591_v22  ;;  %13422 = vmatprep.mubr.f32.mxu1 %v21593_v61  ;;  %v21631_v61 = vld [vmem:[#allocation38_spill] sm:$0xff] }
 0xa84   :  { %14769 = vmatprep.subr.bf16.mxu1 %v21594_v32 }
 0xa86   :  { %13423 = vmatmul.mubr.f32.gmra.mrb[20].mxu1 %v21595_v53 }
 0xa87   :  { %14771 = vmatpush3.bf16.msra.mxu1 %v21594_v32  ;;  %13425 = vmatprep.mubr.f32.mxu1 %v21596_v10 }
 0xa88   :  { %14773 = vmatprep.subr.bf16.mxu1 %v21597_v35 }
 0xa8a   :  { %13426 = vmatmul.mubr.f32.gmra.mrb[22].mxu1 %v18999_v31 }
 0xa8b   :  { %14775 = vmatpush3.bf16.msra.mxu1 %v21597_v35  ;;  %13428 = vmatprep.mubr.f32.mxu1 %v19039_v0 }
 0xa8c   :  { %14777 = vmatprep.subr.bf16.mxu1 %v21598_v51 }
 0xa8e   :  { %13429 = vmatmul.mubr.f32.gmra.mrb[24].mxu1 %v19043_v38 }
 0xa8f   :  { %14779 = vmatpush3.bf16.msra.mxu1 %v21598_v51  ;;  %13431 = vmatprep.mubr.f32.mxu1 %v19057_v11  ;;  %v21630_v11 = vand.u32 4294901760, %v19321_v30 }
 0xa90   :  { %14781 = vmatprep.subr.bf16.mxu1 %v21599_v26 }
 0xa92   :  { %13432 = vmatmul.mubr.f32.gmra.mrb[26].mxu1 %v19274_v44 }
 0xa93   :  { %14783 = vmatpush3.bf16.msra.mxu1 %v21599_v26  ;;  %13434 = vmatprep.mubr.f32.mxu1 %v19287_v50 }
 0xa94   :  { %14785 = vmatprep.subr.bf16.mxu1 %v21600_v17 }
 0xa96   :  { %13435 = vmatmul.mubr.f32.gmra.mrb[28].mxu1 %v19308_v28 }
 0xa97   :  { %14787 = vmatpush3.bf16.msra.mxu1 %v21600_v17  ;;  %13437 = vmatprep.mubr.f32.mxu1 %v19321_v30  ;;  %v21636_v30 = vand.u32 4294901760, %v21602_v52 }
 0xa98   :  { %14789 = vmatprep.subr.bf16.mxu1 %v21601_v9 }
 0xa9a   :  { %13438 = vmatmul.mubr.f32.gmra.mrb[30].mxu1 %v19340_v21 }
 0xa9b   :  { %14791 = vmatpush3.bf16.msra.mxu1 %v21601_v9  ;;  %13440 = vmatprep.mubr.f32.mxu1 %v19347_v34 }
 0xa9c   :  { %14793 = vmatprep.subr.bf16.mxu1 %v19227_v48 }
 0xa9e   :  { %13441 = vmatmul.mubr.f32.gmra.mrb[32].mxu1 %v19363_v27 }
 0xa9f   :  { %13443 = vmatprep.mubr.f32.mxu1 %v19376_v12 }
 0xaa2   :  { %13444 = vmatmul.mubr.f32.gmra.mrb[34].mxu1 %v21602_v52  ;;  %v21643_v52 = vand.u32 4294901760, %v19476_v20 }
 0xaa3   :  { %13446 = vmatprep.mubr.f32.mxu1 %v21603_v25 }
 0xaa6   :  { %13447 = vmatmul.mubr.f32.gmra.mrb[36].mxu1 %v21604_v43 }
 0xaa7   :  { %13449 = vmatprep.mubr.f32.mxu1 %v21605_v46 }
 0xaaa   :  { %13450 = vmatmul.mubr.f32.gmra.mrb[38].mxu1 %v21606_v37 }
 0xaab   :  { %13452 = vmatprep.mubr.f32.mxu1 %v21607_v55 }
 0xaae   :  { %13453 = vmatmul.mubr.f32.gmra.mrb[40].mxu1 %v21608_v45 }
 0xaaf   :  { %13455 = vmatprep.mubr.f32.mxu1 %v19476_v20  ;;  %v21649_v20 = vld [vmem:[#allocation51_spill] sm:$0xff] }
 0xab2   :  { %13456 = vmatmul.mubr.f32.gmra.mrb[42].mxu1 %v21609_v1 }
 0xab3   :  { %13458 = vmatprep.mubr.f32.mxu1 %v19500_v42 }
 0xab6   :  { %13459 = vmatmul.mubr.f32.gmra.mrb[44].mxu1 %v19512_v15 }
 0xab7   :  { %13461 = vmatprep.mubr.f32.mxu1 %v19521_v33 }
 0xaba   :  { %13462 = vmatmul.mubr.f32.gmra.mrb[46].mxu1 %v19528_v40 }
 0xabb   :  { %13496 = vmatprep.mubr.f32.mxu1 %v21610_v54  ;;  %v21617_v54 = vand.u32 4294901760, %v21595_v53  ;;  %v21635_v53 = vand.u32 4294901760, %v19376_v12  ;;  %v21642_v12 = vand.u32 4294901760, %v21608_v45  ;;  %v21653_v45 = vld [vmem:[#allocation32_spill] sm:$0xff] }
 0xabe   :  { %13497 = vmatmul.mubr.f32.vlgmr.msra.gmra.mrb[16].mxu1 %v21611_v56  ;;  %v21620_v56 = vand.u32 4294901760, %v18999_v31  ;;  %v21626_v31 = vand.u32 4294901760, %v19274_v44  ;;  %v21632_v44 = vand.u32 4294901760, %v19340_v21  ;;  %v21638_v21 = vand.u32 4294901760, %v21604_v43 }
 0xabf   :  { %14795 = vmatpush3.bf16.msra.mxu1 %v19227_v48  ;;  %13499 = vmatprep.mubr.f32.mxu1 %v21612_v60  ;;  %v21618_v48 = vand.u32 4294901760, %v21596_v10  ;;  %v21619_v60 = vld [vmem:[#allocation14_spill] sm:$0xff]  ;;  %v21637_v10 = vand.u32 4294901760, %v21603_v25  ;;  %v21644_v25 = vand.u32 4294901760, %v21609_v1  ;;  %v21645_v43 = vand.u32 4294901760, %v19500_v42  ;;  %v21651_v42 = vld [vmem:[#allocation13_spill] sm:$0xff] }
 0xac0   :  { %14797 = vmatprep.subr.bf16.mxu1 %v21613_v63  ;;  %v21652_v1 = vld [vmem:[#allocation48_spill] sm:$0xff] }
 0xac2   :  { %13500 = vmatmul.mubr.f32.gmra.mrb[18].mxu1 %v21614_v39  ;;  %v21621_v39 = vand.u32 4294901760, %v19039_v0  ;;  %v21627_v0 = vand.u32 4294901760, %v19287_v50  ;;  %v21633_v50 = vand.u32 4294901760, %v19347_v34  ;;  %v21639_v34 = vand.u32 4294901760, %v21605_v46 }
 0xac3   :  { %14799 = vmatpush3.bf16.msra.mxu1 %v21613_v63  ;;  %13502 = vmatprep.mubr.f32.mxu1 %v21615_v59  ;;  %v21622_v59 = vld [vmem:[#allocation23_spill] sm:$0xff]  ;;  %v21623_v63 = vand.u32 4294901760, %v19043_v38  ;;  %v21629_v38 = vand.u32 4294901760, %v19308_v28  ;;  %v21634_v28 = vand.u32 4294901760, %v19363_v27  ;;  %v21641_v27 = vand.u32 4294901760, %v21607_v55 }
 0xac4   :  { %14801 = vmatprep.subr.bf16.mxu1 %v21616_v47  ;;  %v21646_v46 = vand.u32 4294901760, %v19512_v15  ;;  %v21648_v55 = vand.u32 4294901760, %v19528_v40  ;;  %v21655_v15 = vld [vmem:[#allocation5_spill] sm:$0xff]  ;;  %v21659_v40 = vld [vmem:[#allocation16_spill] sm:$0xff] }
 0xac6   :  { %13503 = vmatmul.mubr.f32.gmra.mrb[20].mxu1 %v21617_v54 }
 0xac7   :  { %14803 = vmatpush3.bf16.msra.mxu1 %v21616_v47  ;;  %13505 = vmatprep.mubr.f32.mxu1 %v21618_v48  ;;  %v21640_v47 = vand.u32 4294901760, %v21606_v37  ;;  %v21647_v37 = vand.u32 4294901760, %v19521_v33  ;;  %v21657_v33 = vld [vmem:[#allocation6_spill] sm:$0xff] }
 0xac8   :  { %14805 = vmatprep.subr.bf16.mxu1 %v21619_v60 }
 0xaca   :  { %13506 = vmatmul.mubr.f32.gmra.mrb[22].mxu1 %v21620_v56 }
 0xacb   :  { %14807 = vmatpush3.bf16.msra.mxu1 %v21619_v60  ;;  %13508 = vmatprep.mubr.f32.mxu1 %v21621_v39 }
 0xacc   :  { %14809 = vmatprep.subr.bf16.mxu1 %v21622_v59 }
 0xace   :  { %13509 = vmatmul.mubr.f32.gmra.mrb[24].mxu1 %v21623_v63 }
 0xacf   :  { %14811 = vmatpush3.bf16.msra.mxu1 %v21622_v59  ;;  %13511 = vmatprep.mubr.f32.mxu1 %v21624_v13  ;;  %v10092_v13 = vld [vmem:[%s20438_s12] sm:$0xff] }
 0xad0   :  { %14813 = vmatprep.subr.bf16.mxu1 %v21625_v3 }
 0xad2   :  { %13512 = vmatmul.mubr.f32.gmra.mrb[26].mxu1 %v21626_v31 }
 0xad3   :  { %14815 = vmatpush3.bf16.msra.mxu1 %v21625_v3  ;;  %13514 = vmatprep.mubr.f32.mxu1 %v21627_v0  ;;  %v10095_v3 = vld [vmem:[%s20438_s12 + $0x18] sm:$0xff]  ;;  %v19843_v0 = vand.u32 4294901760, %v10092_v13 }
 0xad4   :  { %14817 = vmatprep.subr.bf16.mxu1 %v21628_v41 }
 0xad5   :  { %21666 = vst [vmem:[#allocation56_spill] sm:$0xff] %v19843_v0 }
 0xad6   :  { %13515 = vmatmul.mubr.f32.gmra.mrb[28].mxu1 %v21629_v38 }
 0xad7   :  { %14819 = vmatpush3.bf16.msra.mxu1 %v21628_v41  ;;  %13517 = vmatprep.mubr.f32.mxu1 %v21630_v11  ;;  %v10094_v41 = vld [vmem:[%s20438_s12 + $0x10] sm:$0xff]  ;;  %v19850_v11 = vand.u32 4294901760, %v10095_v3 }
 0xad8   :  { %14821 = vmatprep.subr.bf16.mxu1 %v21631_v61 }
 0xad9   :  { %21667 = vst [vmem:[#allocation58_spill] sm:$0xff] %v19850_v11 }
 0xada   :  { %13518 = vmatmul.mubr.f32.gmra.mrb[30].mxu1 %v21632_v44  ;;  %v19855_v44 = vsub.f32 %v10092_v13, %v19843_v0 }
 0xadb   :  { %14823 = vmatpush3.bf16.msra.mxu1 %v21631_v61  ;;  %13520 = vmatprep.mubr.f32.mxu1 %v21633_v50  ;;  %v19852_v61 = vand.u32 4294901760, %v10094_v41  ;;  %v19858_v50 = vsub.f32 %v10095_v3, %v19850_v11 }
 0xadc   :  { %14825 = vmatprep.subr.bf16.mxu1 %v21587_v2  ;;  %21669 = vst [vmem:[#allocation59_spill] sm:$0xff] %v19855_v44 }
 0xadd   :  { %21668 = vst [vmem:[#allocation47_spill] sm:$0xff] %v19852_v61  ;;  %21670 = vst [vmem:[#allocation11_spill] sm:$0xff] %v19858_v50 }
 0xade   :  { %13521 = vmatmul.mubr.f32.gmra.mrb[32].mxu1 %v21634_v28 }
 0xadf   :  { %13523 = vmatprep.mubr.f32.mxu1 %v21635_v53 }
 0xae2   :  { %13524 = vmatmul.mubr.f32.gmra.mrb[34].mxu1 %v21636_v30  ;;  %v19865_v30 = vsub.f32 %v10094_v41, %v19852_v61 }
 0xae3   :  { %13526 = vmatprep.mubr.f32.mxu1 %v21637_v10 }
 0xae4   :  { %21671 = vst [vmem:[#allocation36_spill] sm:$0xff] %v19865_v30 }
 0xae6   :  { %13527 = vmatmul.mubr.f32.gmra.mrb[36].mxu1 %v21638_v21  ;;  %v20924_v21 = vand.u32 4294901760, %v19855_v44 }
 0xae7   :  { %13529 = vmatprep.mubr.f32.mxu1 %v21639_v34 }
 0xaea   :  { %13530 = vmatmul.mubr.f32.gmra.mrb[38].mxu1 %v21640_v47 }
 0xaeb   :  { %13532 = vmatprep.mubr.f32.mxu1 %v21641_v27  ;;  %v20923_v27 = vand.u32 4294901760, %v19858_v50 }
 0xaee   :  { %13533 = vmatmul.mubr.f32.gmra.mrb[40].mxu1 %v21642_v12 }
 0xaef   :  { %13535 = vmatprep.mubr.f32.mxu1 %v21643_v52 }
 0xaf2   :  { %13536 = vmatmul.mubr.f32.gmra.mrb[42].mxu1 %v21644_v25  ;;  %v20922_v25 = vand.u32 4294901760, %v19865_v30 }
 0xaf3   :  { %13538 = vmatprep.mubr.f32.mxu1 %v21645_v43 }
 0xaf6   :  { %13539 = vmatmul.mubr.f32.gmra.mrb[44].mxu1 %v21646_v46 }
 0xaf7   :  { %13541 = vmatprep.mubr.f32.mxu1 %v21647_v37 }
 0xafa   :  { %13542 = vmatmul.mubr.f32.gmra.mrb[46].mxu1 %v21648_v55  ;;  %v19875_v55 = vsub.f32 %v19855_v44, %v20924_v21 }
 0xafb   :  { %13576 = vmatprep.mubr.f32.mxu1 %v18869_v6 }
 0xafe   :  { %13577 = vmatmul.mubr.f32.vlgmr.msra.gmra.mrb[16].mxu1 %v18911_v58 }
 0xaff   :  { %14827 = vmatpush3.bf16.msra.mxu1 %v21587_v2  ;;  %13579 = vmatprep.mubr.f32.mxu1 %v18918_v23  ;;  %v21661_v2 = vld [vmem:[#allocation35_spill] sm:$0xff] }
 0xb00   :  { %14829 = vmatprep.subr.bf16.mxu1 %v21591_v22 }
 0xb02   :  { %13580 = vmatmul.mubr.f32.gmra.mrb[18].mxu1 %v18920_v19 }
 0xb03   :  { %14831 = vmatpush3.bf16.msra.mxu1 %v21591_v22  ;;  %13582 = vmatprep.mubr.f32.mxu1 %v18924_v62  ;;  %v21662_v22 = vld [vmem:[#allocation45_spill] sm:$0xff] }
 0xb04   :  { %14833 = vmatprep.subr.bf16.mxu1 %v21594_v32 }
 0xb06   :  { %13583 = vmatmul.mubr.f32.gmra.mrb[20].mxu1 %v21580_v8 }
 0xb07   :  { %14835 = vmatpush3.bf16.msra.mxu1 %v21594_v32  ;;  %13585 = vmatprep.mubr.f32.mxu1 %v21581_v57  ;;  %v21663_v32 = vld [vmem:[#allocation42_spill] sm:$0xff] }
 0xb08   :  { %14837 = vmatprep.subr.bf16.mxu1 %v21597_v35 }
 0xb0a   :  { %13586 = vmatmul.mubr.f32.gmra.mrb[22].mxu1 %v21583_v16 }
 0xb0b   :  { %14839 = vmatpush3.bf16.msra.mxu1 %v21597_v35  ;;  %13588 = vmatprep.mubr.f32.mxu1 %v21584_v18  ;;  %v21654_v35 = vld [vmem:[#allocation24_spill] sm:$0xff] }
 0xb0c   :  { %14841 = vmatprep.subr.bf16.mxu1 %v21598_v51 }
 0xb0e   :  { %13589 = vmatmul.mubr.f32.gmra.mrb[24].mxu1 %v21585_v24 }
 0xb0f   :  { %14843 = vmatpush3.bf16.msra.mxu1 %v21598_v51  ;;  %13591 = vmatprep.mubr.f32.mxu1 %v21586_v36  ;;  %v21660_v51 = vld [vmem:[#allocation44_spill] sm:$0xff] }
 0xb10   :  { %14845 = vmatprep.subr.bf16.mxu1 %v21599_v26 }
 0xb12   :  { %13592 = vmatmul.mubr.f32.gmra.mrb[26].mxu1 %v19046_v49 }
 0xb13   :  { %14847 = vmatpush3.bf16.msra.mxu1 %v21599_v26  ;;  %13594 = vmatprep.mubr.f32.mxu1 %v19067_v5  ;;  %v21650_v26 = vld [vmem:[#allocation53_spill] sm:$0xff] }
 0xb14   :  { %14849 = vmatprep.subr.bf16.mxu1 %v21600_v17 }
 0xb16   :  { %13595 = vmatmul.mubr.f32.gmra.mrb[28].mxu1 %v19276_v29 }
 0xb17   :  { %14851 = vmatpush3.bf16.msra.mxu1 %v21600_v17  ;;  %13597 = vmatprep.mubr.f32.mxu1 %v19297_v14  ;;  %v21656_v17 = vld [vmem:[#allocation15_spill] sm:$0xff] }
 0xb18   :  { %14853 = vmatprep.subr.bf16.mxu1 %v21601_v9 }
 0xb1a   :  { %13598 = vmatmul.mubr.f32.gmra.mrb[30].mxu1 %v19314_v7 }
 0xb1b   :  { %14855 = vmatpush3.bf16.msra.mxu1 %v21601_v9  ;;  %13600 = vmatprep.mubr.f32.mxu1 %v19323_v4  ;;  %v21658_v9 = vld [vmem:[#allocation20_spill] sm:$0xff] }
 0xb1e   :  { %13601 = vmatmul.mubr.f32.gmra.mrb[32].mxu1 %v21649_v20 }
 0xb1f   :  { %13603 = vmatprep.mubr.f32.mxu1 %v21650_v26 }
 0xb22   :  { %13604 = vmatmul.mubr.f32.gmra.mrb[34].mxu1 %v21651_v42 }
 0xb23   :  { %13606 = vmatprep.mubr.f32.mxu1 %v21652_v1 }
 0xb26   :  { %13607 = vmatmul.mubr.f32.gmra.mrb[36].mxu1 %v21653_v45 }
 0xb27   :  { %13609 = vmatprep.mubr.f32.mxu1 %v21654_v35 }
 0xb2a   :  { %13610 = vmatmul.mubr.f32.gmra.mrb[38].mxu1 %v21655_v15 }
 0xb2b   :  { %13612 = vmatprep.mubr.f32.mxu1 %v21656_v17 }
 0xb2e   :  { %13613 = vmatmul.mubr.f32.gmra.mrb[40].mxu1 %v21657_v33 }
 0xb2f   :  { %13615 = vmatprep.mubr.f32.mxu1 %v21658_v9 }
 0xb32   :  { %13616 = vmatmul.mubr.f32.gmra.mrb[42].mxu1 %v21659_v40 }
 0xb33   :  { %13618 = vmatprep.mubr.f32.mxu1 %v21660_v51 }
 0xb36   :  { %13619 = vmatmul.mubr.f32.gmra.mrb[44].mxu1 %v21661_v2 }
 0xb37   :  { %13621 = vmatprep.mubr.f32.mxu1 %v21662_v22 }
 0xb3a   :  { %13622 = vmatmul.mubr.f32.gmra.mrb[46].mxu1 %v21663_v32 }
 0xb3b   :  { %13656 = vmatprep.mubr.f32.mxu1 %v18869_v6  ;;  %v19799_v6 = vpop.permute.xlu1 %8013 }
 0xb3e   :  { %13657 = vmatmul.mubr.f32.vlgmr.msra.gmra.mrb[16].mxu1 %v18911_v58  ;;  %v19801_v58 = vpop.permute.xlu0 %8008 }
 0xb3f   :  { %13659 = vmatprep.mubr.f32.mxu1 %v18918_v23  ;;  %v7934_v23 = vpop.permute.xlu1 %7933 }
 0xb42   :  { %13660 = vmatmul.mubr.f32.gmra.mrb[18].mxu1 %v18920_v19  ;;  %v10093_v19 = vld [vmem:[%s20438_s12 + $0x8] sm:$0xff]  ;;  %s15605_s12 = smov [#allocation2]  }
 0xb43   :  { %13662 = vmatprep.mubr.f32.mxu1 %v18924_v62  ;;  %v7929_v62 = vpop.permute.xlu0 %7928  ;;  %s11033_s15 = sshll.u32 %s15605_s12, 4  ;;  %s11034_s15 = int_to_ptr.vmem [resolvable:$true] %s11033_s15 }
 0xb44   :  { %s15578_s16 = scalar_lea.vmem %s11034_s15, 256  ;;  %p15583_p1 = scmp.lt.s32.totalorder %s11034_s15, %s11034_s15 }
 0xb45   :  { %p15579_p0 = scmp.ne.s32.totalorder %s11034_s15, %s15578_s16  ;;  %p15584_p2 = scmp.lt.s32.totalorder %s15578_s16, %s15578_s16 }
 0xb46   :  { %13663 = vmatmul.mubr.f32.gmra.mrb[20].mxu1 %v21580_v8 }
 0xb47   :  { %13665 = vmatprep.mubr.f32.mxu1 %v21581_v57  ;;  %p15585_p3 = por %p15584_p2, %p15583_p1 }
 0xb49   :  { %p15586_p4 = pnand %p15585_p3, %p15579_p0 }
 0xb4a   :  { %13666 = vmatmul.mubr.f32.gmra.mrb[22].mxu1 %v21583_v16 }
 0xb4b   :  { %13668 = vmatprep.mubr.f32.mxu1 %v21584_v18 }
 0xb4e   :  { %13669 = vmatmul.mubr.f32.gmra.mrb[24].mxu1 %v21585_v24 }
 0xb4f   :  { %13671 = vmatprep.mubr.f32.mxu1 %v21586_v36 }
 0xb52   :  { %13672 = vmatmul.mubr.f32.gmra.mrb[26].mxu1 %v19046_v49  ;;  %v19806_v49 = vand.u32 4294901760, %v10093_v19 }
 0xb53   :  { %13674 = vmatprep.mubr.f32.mxu1 %v19067_v5 }
 0xb54   :  { %21664 = vst [vmem:[#allocation52_spill] sm:$0xff] %v19806_v49  ;;  %v19809_v5 = vsub.f32 %v10093_v19, %v19806_v49 }
 0xb56   :  { %13675 = vmatmul.mubr.f32.gmra.mrb[28].mxu1 %v19276_v29  ;;  %21665 = vst [vmem:[#allocation46_spill] sm:$0xff] %v19809_v5  ;;  %v20925_v29 = vand.u32 4294901760, %v19809_v5 }
 0xb57   :  { %13677 = vmatprep.mubr.f32.mxu1 %v19297_v14  ;;  %v19812_v14 = vpop.permute.xlu1 %8023 }
 0xb5a   :  { %13678 = vmatmul.mubr.f32.gmra.mrb[30].mxu1 %v19314_v7  ;;  %v19814_v7 = vpop.permute.xlu0 %8018 }
 0xb5b   :  { %13680 = vmatprep.mubr.f32.mxu1 %v19323_v4  ;;  %v10207_v4 = vsub.f32 %v19809_v5, %v20925_v29  ;;  %v7944_v57 = vpop.permute.xlu1 %7943 }
 0xb5d   :  { %v10208_v8 = vand.u32 4294901760, %v10207_v4 }
 0xb5e   :  { %13681 = vmatmul.mubr.f32.gmra.mrb[32].mxu1 %v21649_v20  ;;  %v7939_v16 = vpop.permute.xlu0 %7938 }
 0xb5f   :  { %13683 = vmatprep.mubr.f32.mxu1 %v21650_v26  ;;  %10209 = vmatprep.mubr.f32.mxu0 %v10208_v8  ;;  %v19819_v18 = vpop.permute.xlu1 %8033 }
 0xb62   :  { %13684 = vmatmul.mubr.f32.gmra.mrb[34].mxu1 %v21651_v42  ;;  %v19821_v24 = vpop.permute.xlu0 %8028 }
 0xb63   :  { %13686 = vmatprep.mubr.f32.mxu1 %v21652_v1  ;;  %v7954_v36 = vpop.permute.xlu1 %7953 }
 0xb66   :  { %13687 = vmatmul.mubr.f32.gmra.mrb[36].mxu1 %v21653_v45  ;;  %v7949_v54 = vpop.permute.xlu0 %7948  ;;  %v19882_v45 = vsub.f32 %v19858_v50, %v20923_v27 }
 0xb67   :  { %13689 = vmatprep.mubr.f32.mxu1 %v21654_v35  ;;  %v19823_v48 = vpop.permute.xlu1 %8043 }
 0xb6a   :  { %13690 = vmatmul.mubr.f32.gmra.mrb[38].mxu1 %v21655_v15  ;;  %v19825_v60 = vpop.permute.xlu0 %8038 }
 0xb6b   :  { %13692 = vmatprep.mubr.f32.mxu1 %v21656_v17  ;;  %v19827_v56 = vpop.permute.xlu1 %7963 }
 0xb6e   :  { %13693 = vmatmul.mubr.f32.gmra.mrb[40].mxu1 %v21657_v33  ;;  %v19829_v39 = vpop.permute.xlu0 %7958 }
 0xb6f   :  { %13695 = vmatprep.mubr.f32.mxu1 %v21658_v9  ;;  %v19831_v59 = vpop.permute.xlu1 %8053  ;;  %v19889_v9 = vsub.f32 %v19865_v30, %v20922_v25 }
 0xb72   :  { %13696 = vmatmul.mubr.f32.gmra.mrb[42].mxu1 %v21659_v40  ;;  %v19833_v63 = vpop.permute.xlu0 %8048 }
 0xb73   :  { %13698 = vmatprep.mubr.f32.mxu1 %v21660_v51  ;;  %v19841_v31 = vpop.permute.xlu1 %7973 }
 0xb76   :  { %13699 = vmatmul.mubr.f32.gmra.mrb[44].mxu1 %v21661_v2  ;;  %v19848_v38 = vpop.permute.xlu0 %7968 }
 0xb77   :  { %13701 = vmatprep.mubr.f32.mxu1 %v21662_v22  ;;  %v19860_v28 = vpop.permute.xlu1 %8063 }
 0xb7a   :  { %13702 = vmatmul.mubr.f32.gmra.mrb[46].mxu1 %v21663_v32  ;;  %v19862_v53 = vpop.permute.xlu0 %8058 }
 0xb7b   :  { %v19870_v43 = vpop.permute.xlu1 %7983 }
 0xb7e   :  { %v19877_v20 = vpop.permute.xlu0 %7978 }
 0xc11   :  { %v13658_v10 = vpop.f32.mrb[16].mxu1 }
 0xc12   :  { %v15074_v34 = vadd.f32 %v13658_v10, %v7934_v23  ;;  %v9870_v47 = vpop.f32.mrb[17].mxu1  ;;  %v19903_v10 = vpop.permute.xlu0 %8068 }
 0xc13   :  { %v15075_v12 = vadd.f32 %v9870_v47, %v7929_v62 }
 0xc14   :  { %v10061_v52 = vmax.f32 %v15074_v34, 0.0 }
 0xc15   :  { %v10060_v46 = vmax.f32 %v15075_v12, 0.0  ;;  %v13661_v37 = vpop.f32.mrb[18].mxu1 }
 0xc16   :  { %v10112_v26 = vand.u32 4294901760, %v10061_v52  ;;  %v15076_v42 = vadd.f32 %v13661_v37, %v7944_v57  ;;  %v9882_v1 = vpop.f32.mrb[19].mxu1  ;;  %v19898_v57 = vpop.permute.xlu1 %8073 }
 0xc17   :  { %v10109_v35 = vand.u32 4294901760, %v10060_v46  ;;  %v15077_v15 = vadd.f32 %v9882_v1, %v7939_v16  ;;  %v7989_v27 = vpop.permute.xlu0 %7988 }
 0xc18   :  { %v19884_v17 = vsub.f32 %v10061_v52, %v10112_v26  ;;  %v10063_v33 = vmax.f32 %v15076_v42, 0.0 }
 0xc19   :  { %v19891_v40 = vpack.c.bf16 %v10112_v26, %v10109_v35  ;;  %v19893_v51 = vsub.f32 %v10060_v46, %v10109_v35  ;;  %v10062_v2 = vmax.f32 %v15077_v15, 0.0  ;;  %v13664_v22 = vpop.f32.mrb[20].mxu1 }
 0xc1a   :  { %v20928_v23 = vand.u32 4294901760, %v19884_v17  ;;  %v10118_v19 = vand.u32 4294901760, %v10063_v33  ;;  %v15078_v62 = vadd.f32 %v13664_v22, %v7954_v36  ;;  %v9894_v4 = vpop.f32.mrb[21].mxu1 }
 0xc1b   :  { %21672 = vst [vmem:[#allocation21_spill] sm:$0xff] %v19891_v40  ;;  %v20930_v16 = vand.u32 4294901760, %v19893_v51  ;;  %v10115_v13 = vand.u32 4294901760, %v10062_v2  ;;  %v15079_v3 = vadd.f32 %v9894_v4, %v7949_v54 }
 0xc1c   :  { %v10246_v34 = vsub.f32 %v19884_v17, %v20928_v23  ;;  %v19908_v47 = vsub.f32 %v10063_v33, %v10118_v19  ;;  %v10065_v36 = vmax.f32 %v15078_v62, 0.0 }
 0xc1d   :  { %v10239_v52 = vsub.f32 %v19893_v51, %v20930_v16  ;;  %v19914_v46 = vpack.c.bf16 %v10118_v19, %v10115_v13  ;;  %v19916_v54 = vsub.f32 %v10062_v2, %v10115_v13  ;;  %v10064_v37 = vmax.f32 %v15079_v3, 0.0  ;;  %v13667_v26 = vpop.f32.mrb[22].mxu1 }
 0xc1e   :  { %v10247_v42 = vand.u32 4294901760, %v10246_v34  ;;  %v20926_v1 = vand.u32 4294901760, %v19908_v47  ;;  %v10124_v35 = vand.u32 4294901760, %v10065_v36  ;;  %v15080_v15 = vadd.f32 %v13667_v26, %v19827_v56  ;;  %v9906_v33 = vpop.f32.mrb[23].mxu1  ;;  %v7994_v34 = vpop.permute.xlu1 %7993 }
 0xc1f   :  { %21673 = vst [vmem:[#allocation10_spill] sm:$0xff] %v19914_v46  ;;  %v10240_v22 = vand.u32 4294901760, %v10239_v52  ;;  %v20927_v62 = vand.u32 4294901760, %v19916_v54  ;;  %v10121_v4 = vand.u32 4294901760, %v10064_v37  ;;  %v15081_v25 = vadd.f32 %v9906_v33, %v19829_v39 }
 0xc20   :  { %v10260_v2 = vsub.f32 %v19908_v47, %v20926_v1  ;;  %v19925_v19 = vsub.f32 %v10065_v36, %v10124_v35  ;;  %v10067_v13 = vmax.f32 %v15080_v15, 0.0 }
 0xc21   :  { %v10253_v56 = vsub.f32 %v19916_v54, %v20927_v62  ;;  %v19932_v52 = vpack.c.bf16 %v10124_v35, %v10121_v4  ;;  %v19934_v26 = vsub.f32 %v10064_v37, %v10121_v4  ;;  %v10066_v39 = vmax.f32 %v15081_v25, 0.0  ;;  %v13670_v33 = vpop.f32.mrb[24].mxu1 }
 0xc22   :  { %v10261_v21 = vand.u32 4294901760, %v10260_v2  ;;  %v20929_v36 = vand.u32 4294901760, %v19925_v19  ;;  %v10130_v29 = vand.u32 4294901760, %v10067_v13  ;;  %v15082_v15 = vadd.f32 %v13670_v33, %v19841_v31  ;;  %v9918_v41 = vpop.f32.mrb[25].mxu1 }
 0xc23   :  { %21674 = vst [vmem:[#allocation27_spill] sm:$0xff] %v19932_v52  ;;  %v10254_v3 = vand.u32 4294901760, %v10253_v56  ;;  %v20931_v12 = vand.u32 4294901760, %v19934_v26  ;;  %v10127_v8 = vand.u32 4294901760, %v10066_v39  ;;  %v15083_v1 = vadd.f32 %v9918_v41, %v19848_v38 }
 0xc24   :  { %v10274_v37 = vsub.f32 %v19925_v19, %v20929_v36  ;;  %v19943_v25 = vsub.f32 %v10067_v13, %v10130_v29  ;;  %v10069_v35 = vmax.f32 %v15082_v15, 0.0  ;;  %v19945_v4 = vpack.c.bf16 %v10247_v42, %v10240_v22  ;;  %v19956_v15 = vpop.permute.xlu1 %8083 }
 0xc25   :  { %v10267_v31 = vsub.f32 %v19934_v26, %v20931_v12  ;;  %v19950_v2 = vpack.c.bf16 %v10130_v29, %v10127_v8  ;;  %v19952_v56 = vsub.f32 %v10066_v39, %v10127_v8  ;;  %v10068_v33 = vmax.f32 %v15083_v1, 0.0  ;;  %v13673_v62 = vpop.f32.mrb[26].mxu1  ;;  %v19960_v12 = vpop.permute.xlu0 %8078 }
 0xc26   :  { %v10275_v38 = vand.u32 4294901760, %v10274_v37  ;;  %v20936_v41 = vand.u32 4294901760, %v19943_v25  ;;  %v10136_v23 = vand.u32 4294901760, %v10069_v35  ;;  %v15084_v13 = vadd.f32 %v13673_v62, %v19870_v43  ;;  %v9930_v36 = vpop.f32.mrb[27].mxu1 }
 0xc27   :  { %21675 = vst [vmem:[#allocation28_spill] sm:$0xff] %v19950_v2  ;;  %v10268_v42 = vand.u32 4294901760, %v10267_v31  ;;  %v20939_v22 = vand.u32 4294901760, %v19952_v56  ;;  %v10133_v16 = vand.u32 4294901760, %v10068_v33  ;;  %v15085_v29 = vadd.f32 %v9930_v36, %v19877_v20 }
 0xc28   :  { %v10288_v8 = vsub.f32 %v19943_v25, %v20936_v41  ;;  %v19965_v1 = vsub.f32 %v10069_v35, %v10136_v23  ;;  %v10071_v39 = vmax.f32 %v15084_v13, 0.0  ;;  %v19967_v37 = vpack.c.bf16 %v10261_v21, %v10254_v3 }
 0xc29   :  { %v10281_v43 = vsub.f32 %v19952_v56, %v20939_v22  ;;  %v19972_v62 = vpack.c.bf16 %v10136_v23, %v10133_v16  ;;  %v19974_v31 = vsub.f32 %v10068_v33, %v10133_v16  ;;  %v10070_v20 = vmax.f32 %v15085_v29, 0.0  ;;  %v13676_v36 = vpop.f32.mrb[28].mxu1  ;;  %v8004_v29 = vpop.permute.xlu1 %8003 }
 0xc2a   :  { %21676 = vst [vmem:[#allocation62_spill] sm:$0xff] %v19967_v37  ;;  %v10289_v32 = vand.u32 4294901760, %v10288_v8  ;;  %v20942_v30 = vand.u32 4294901760, %v19965_v1  ;;  %v10142_v50 = vand.u32 4294901760, %v10071_v39  ;;  %v15086_v41 = vadd.f32 %v13676_v36, %v7994_v34  ;;  %v9942_v35 = vpop.f32.mrb[29].mxu1 }
 0xc2b   :  { %21677 = vst [vmem:[#allocation60_spill] sm:$0xff] %v19972_v62  ;;  %v10282_v44 = vand.u32 4294901760, %v10281_v43  ;;  %v20949_v21 = vand.u32 4294901760, %v19974_v31  ;;  %v10139_v3 = vand.u32 4294901760, %v10070_v20  ;;  %v15087_v13 = vadd.f32 %v9942_v35, %v7989_v27  ;;  %v7999_v35 = vpop.permute.xlu0 %7998 }
 0xc2c   :  { %v10302_v23 = vsub.f32 %v19965_v1, %v20942_v30  ;;  %v19981_v22 = vsub.f32 %v10071_v39, %v10142_v50  ;;  %v10073_v16 = vmax.f32 %v15086_v41, 0.0  ;;  %v19983_v33 = vpack.c.bf16 %v10275_v38, %v10268_v42 }
 0xc2d   :  { %v10295_v34 = vsub.f32 %v19974_v31, %v20949_v21  ;;  %v19988_v8 = vpack.c.bf16 %v10142_v50, %v10139_v3  ;;  %v19990_v43 = vsub.f32 %v10070_v20, %v10139_v3  ;;  %v10072_v36 = vmax.f32 %v15087_v13, 0.0  ;;  %v13679_v27 = vpop.f32.mrb[30].mxu1 }
 0xc2e   :  { %21678 = vst [vmem:[#allocation41_spill] sm:$0xff] %v19983_v33  ;;  %v10303_v5 = vand.u32 4294901760, %v10302_v23  ;;  %v20950_v30 = vand.u32 4294901760, %v19981_v22  ;;  %v10148_v39 = vand.u32 4294901760, %v10073_v16  ;;  %v15088_v61 = vadd.f32 %v13679_v27, %v8004_v29  ;;  %v9954_v41 = vpop.f32.mrb[31].mxu1 }
 0xc2f   :  { %21679 = vst [vmem:[#allocation57_spill] sm:$0xff] %v19988_v8  ;;  %v10296_v38 = vand.u32 4294901760, %v10295_v34  ;;  %v20951_v42 = vand.u32 4294901760, %v19990_v43  ;;  %v10145_v11 = vand.u32 4294901760, %v10072_v36  ;;  %v15089_v0 = vadd.f32 %v9954_v41, %v7999_v35 }
 0xc30   :  { %v10316_v50 = vsub.f32 %v19981_v22, %v20950_v30  ;;  %v19997_v20 = vsub.f32 %v10073_v16, %v10148_v39  ;;  %v10075_v3 = vmax.f32 %v15088_v61, 0.0  ;;  %v19999_v13 = vpack.c.bf16 %v10289_v32, %v10282_v44 }
 0xc31   :  { %v10309_v23 = vsub.f32 %v19990_v43, %v20951_v42  ;;  %v20004_v29 = vpack.c.bf16 %v10148_v39, %v10145_v11  ;;  %v20006_v34 = vsub.f32 %v10072_v36, %v10145_v11  ;;  %v10074_v27 = vmax.f32 %v15089_v0, 0.0  ;;  %v13682_v21 = vpop.f32.mrb[32].mxu1 }
 0xc32   :  { %21680 = vst [vmem:[#allocation31_spill] sm:$0xff] %v19999_v13  ;;  %v10317_v35 = vand.u32 4294901760, %v10316_v50  ;;  %v20954_v41 = vand.u32 4294901760, %v19997_v20  ;;  %v10154_v33 = vand.u32 4294901760, %v10075_v3  ;;  %v15090_v16 = vadd.f32 %v13682_v21, %v19799_v6  ;;  %v9966_v30 = vpop.f32.mrb[33].mxu1 }
 0xc33   :  { %21681 = vst [vmem:[#allocation30_spill] sm:$0xff] %v20004_v29  ;;  %v10310_v61 = vand.u32 4294901760, %v10309_v23  ;;  %v20955_v44 = vand.u32 4294901760, %v20006_v34  ;;  %v10151_v32 = vand.u32 4294901760, %v10074_v27  ;;  %v15091_v13 = vadd.f32 %v9966_v30, %v19801_v58 }
 0xc34   :  { %v10330_v11 = vsub.f32 %v19997_v20, %v20954_v41  ;;  %v20015_v36 = vsub.f32 %v10075_v3, %v10154_v33  ;;  %v10077_v0 = vmax.f32 %v15090_v16, 0.0  ;;  %v20017_v39 = vpack.c.bf16 %v10303_v5, %v10296_v38 }
 0xc35   :  { %v10323_v6 = vsub.f32 %v20006_v34, %v20955_v44  ;;  %v20022_v21 = vpack.c.bf16 %v10154_v33, %v10151_v32  ;;  %v20024_v50 = vsub.f32 %v10074_v27, %v10151_v32  ;;  %v10076_v23 = vmax.f32 %v15091_v13, 0.0  ;;  %v13685_v42 = vpop.f32.mrb[34].mxu1 }
 0xc36   :  { %21682 = vst [vmem:[#allocation40_spill] sm:$0xff] %v20017_v39  ;;  %v10331_v58 = vand.u32 4294901760, %v10330_v11  ;;  %v20956_v30 = vand.u32 4294901760, %v20015_v36  ;;  %v10160_v49 = vand.u32 4294901760, %v10077_v0  ;;  %v15092_v3 = vadd.f32 %v13685_v42, %v19812_v14  ;;  %v9978_v41 = vpop.f32.mrb[35].mxu1 }
 0xc37   :  { %21683 = vst [vmem:[#allocation33_spill] sm:$0xff] %v20022_v21  ;;  %v10324_v16 = vand.u32 4294901760, %v10323_v6  ;;  %v20957_v5 = vand.u32 4294901760, %v20024_v50  ;;  %v10157_v38 = vand.u32 4294901760, %v10076_v23  ;;  %v15093_v39 = vadd.f32 %v9978_v41, %v19814_v7 }
 0xc38   :  { %v10344_v33 = vsub.f32 %v20015_v36, %v20956_v30  ;;  %v20033_v27 = vsub.f32 %v10077_v0, %v10160_v49  ;;  %v10079_v13 = vmax.f32 %v15092_v3, 0.0  ;;  %v20035_v32 = vpack.c.bf16 %v10317_v35, %v10310_v61 }
 0xc39   :  { %v10337_v14 = vsub.f32 %v20024_v50, %v20957_v5  ;;  %v20040_v42 = vsub.f32 %v10076_v23, %v10157_v38  ;;  %v10078_v11 = vmax.f32 %v15093_v39, 0.0  ;;  %v13688_v6 = vpop.f32.mrb[36].mxu1  ;;  %v20042_v44 = vpack.c.bf16 %v10160_v49, %v10157_v38 }
 0xc3a   :  { %21684 = vst [vmem:[#allocation61_spill] sm:$0xff] %v20035_v32  ;;  %v10345_v7 = vand.u32 4294901760, %v10344_v33  ;;  %v20960_v41 = vand.u32 4294901760, %v20033_v27  ;;  %v10166_v37 = vand.u32 4294901760, %v10079_v13  ;;  %v15094_v0 = vadd.f32 %v13688_v6, %v19819_v18  ;;  %v9990_v30 = vpop.f32.mrb[37].mxu1 }
 0xc3b   :  { %21685 = vst [vmem:[#allocation18_spill] sm:$0xff] %v20040_v42  ;;  %21686 = vst [vmem:[#allocation43_spill] sm:$0xff] %v20042_v44  ;;  %v10338_v3 = vand.u32 4294901760, %v10337_v14  ;;  %v20961_v35 = vand.u32 4294901760, %v20040_v42  ;;  %v10163_v61 = vand.u32 4294901760, %v10078_v11  ;;  %v15095_v32 = vadd.f32 %v9990_v30, %v19821_v24  ;;  %14857 = vmatprep.subr.bf16.mxu0 %v20042_v44 }
 0xc3c   :  { %v20049_v23 = vsub.f32 %v10079_v13, %v10166_v37  ;;  %v10081_v39 = vmax.f32 %v15094_v0, 0.0  ;;  %14859 = vmatpush3.bf16.msra.mxu0 %v19891_v40  ;;  %v10358_v49 = vsub.f32 %v20033_v27, %v20960_v41  ;;  %v20055_v38 = vpack.c.bf16 %v10331_v58, %v10324_v16 }
 0xc3d   :  { %v20057_v18 = vsub.f32 %v10078_v11, %v10163_v61  ;;  %v10080_v33 = vmax.f32 %v15095_v32, 0.0  ;;  %v13691_v14 = vpop.f32.mrb[38].mxu1  ;;  %v20059_v6 = vpack.c.bf16 %v10166_v37, %v10163_v61  ;;  %v10351_v24 = vsub.f32 %v20040_v42, %v20961_v35 }
 0xc3e   :  { %21687 = vst [vmem:[#allocation29_spill] sm:$0xff] %v20055_v38  ;;  %v20964_v30 = vand.u32 4294901760, %v20049_v23  ;;  %v10172_v13 = vand.u32 4294901760, %v10081_v39  ;;  %v15096_v0 = vadd.f32 %v13691_v14, %v19823_v48  ;;  %v10002_v5 = vpop.f32.mrb[39].mxu1  ;;  %v10359_v40 = vand.u32 4294901760, %v10358_v49 }
 0xc3f   :  { %21688 = vst [vmem:[#allocation37_spill] sm:$0xff] %v20059_v6  ;;  %v10169_v16 = vand.u32 4294901760, %v10080_v33  ;;  %v15097_v11 = vadd.f32 %v10002_v5, %v19825_v60  ;;  %14861 = vmatprep.subr.bf16.mxu0 %v20059_v6  ;;  %v10352_v37 = vand.u32 4294901760, %v10351_v24  ;;  %v20075_v48 = vpack.c.bf16 %v10345_v7, %v10338_v3 }
 0xc40   :  { %v20069_v32 = vsub.f32 %v10081_v39, %v10172_v13  ;;  %v10083_v61 = vmax.f32 %v15096_v0, 0.0  ;;  %14863 = vmatpush3.bf16.msra.mxu0 %v19914_v46  ;;  %v10372_v41 = vsub.f32 %v20049_v23, %v20964_v30  ;;  %v21691_v46 = vand.u32 4294901760, %v20057_v18 }
 0xc41   :  { %21689 = vst [vmem:[#allocation55_spill] sm:$0xff] %v20075_v48  ;;  %v20077_v49 = vsub.f32 %v10080_v33, %v10169_v16  ;;  %v10082_v14 = vmax.f32 %v15097_v11, 0.0  ;;  %v13694_v35 = vpop.f32.mrb[40].mxu1  ;;  %v20079_v58 = vpack.c.bf16 %v10172_v13, %v10169_v16  ;;  %v20081_v60 = vpack.c.bf16 %v10359_v40, %v10352_v37 }
 0xc42   :  { %v20967_v5 = vand.u32 4294901760, %v20069_v32  ;;  %v10178_v39 = vand.u32 4294901760, %v10083_v61  ;;  %v15098_v24 = vadd.f32 %v13694_v35, %v19831_v59  ;;  %v10014_v0 = vpop.f32.mrb[41].mxu1  ;;  %v10365_v30 = vsub.f32 %v20057_v18, %v21691_v46 }
 0xc43   :  { %21690 = vst [vmem:[#allocation50_spill] sm:$0xff] %v20079_v58  ;;  %v10175_v3 = vand.u32 4294901760, %v10082_v14  ;;  %v15099_v33 = vadd.f32 %v10014_v0, %v19833_v63  ;;  %14865 = vmatprep.subr.bf16.mxu0 %v20079_v58  ;;  %v10373_v13 = vand.u32 4294901760, %v10372_v41  ;;  %v21693_v63 = vand.u32 4294901760, %v20077_v49 }
 0xc44   :  { %v20091_v40 = vsub.f32 %v10083_v61, %v10178_v39  ;;  %v10085_v16 = vmax.f32 %v15098_v24, 0.0  ;;  %14867 = vmatpush3.bf16.msra.mxu0 %v19932_v52  ;;  %v10366_v11 = vand.u32 4294901760, %v10365_v30  ;;  %v10386_v59 = vsub.f32 %v20069_v32, %v20967_v5 }
 0xc45   :  { %v20097_v35 = vsub.f32 %v10082_v14, %v10175_v3  ;;  %v10084_v46 = vmax.f32 %v15099_v33, 0.0  ;;  %v13697_v37 = vpop.f32.mrb[42].mxu1  ;;  %v20099_v7 = vpack.c.bf16 %v10178_v39, %v10175_v3  ;;  %v10379_v41 = vsub.f32 %v20077_v49, %v21693_v63 }
 0xc46   :  { %v20972_v61 = vand.u32 4294901760, %v20091_v40  ;;  %v10184_v24 = vand.u32 4294901760, %v10085_v16  ;;  %v15100_v0 = vadd.f32 %v13697_v37, %v19860_v28  ;;  %v10026_v30 = vpop.f32.mrb[43].mxu1  ;;  %v20106_v52 = vpack.c.bf16 %v10373_v13, %v10366_v11 }
 0xc47   :  { %21692 = vst [vmem:[#allocation19_spill] sm:$0xff] %v20099_v7  ;;  %v10181_v14 = vand.u32 4294901760, %v10084_v46  ;;  %v15101_v33 = vadd.f32 %v10026_v30, %v19862_v53  ;;  %14869 = vmatprep.subr.bf16.mxu0 %v20099_v7  ;;  %v10380_v39 = vand.u32 4294901760, %v10379_v41  ;;  %v10387_v63 = vand.u32 4294901760, %v10386_v59 }
 0xc48   :  { %v20111_v3 = vsub.f32 %v10085_v16, %v10184_v24  ;;  %v10087_v58 = vmax.f32 %v15100_v0, 0.0  ;;  %14871 = vmatpush3.bf16.msra.mxu0 %v19950_v2  ;;  %v10400_v28 = vsub.f32 %v20091_v40, %v20972_v61  ;;  %v21695_v53 = vand.u32 4294901760, %v20097_v35 }
 0xc49   :  { %v20117_v13 = vsub.f32 %v10084_v46, %v10181_v14  ;;  %v10086_v11 = vmax.f32 %v15101_v33, 0.0  ;;  %v13700_v37 = vpop.f32.mrb[44].mxu1  ;;  %v20119_v5 = vpack.c.bf16 %v10184_v24, %v10181_v14  ;;  %v20126_v2 = vpack.c.bf16 %v10387_v63, %v10380_v39 }
 0xc4a   :  { %v10393_v41 = vsub.f32 %v20097_v35, %v21695_v53  ;;  %v20977_v16 = vand.u32 4294901760, %v20111_v3  ;;  %v10190_v0 = vand.u32 4294901760, %v10087_v58  ;;  %v15102_v30 = vadd.f32 %v13700_v37, %v19898_v57  ;;  %v10038_v59 = vpop.f32.mrb[45].mxu1 }
 0xc4b   :  { %21694 = vst [vmem:[#allocation9_spill] sm:$0xff] %v20119_v5  ;;  %v10187_v46 = vand.u32 4294901760, %v10086_v11  ;;  %v15103_v33 = vadd.f32 %v10038_v59, %v19903_v10  ;;  %14873 = vmatprep.subr.bf16.mxu0 %v20119_v5  ;;  %v10401_v53 = vand.u32 4294901760, %v10400_v28  ;;  %v21697_v10 = vand.u32 4294901760, %v20117_v13 }
 0xc4c   :  { %v10394_v24 = vand.u32 4294901760, %v10393_v41  ;;  %v20131_v14 = vsub.f32 %v10087_v58, %v10190_v0  ;;  %v10089_v7 = vmax.f32 %v15102_v30, 0.0  ;;  %14875 = vmatpush3.bf16.msra.mxu0 %v19972_v62  ;;  %v10414_v57 = vsub.f32 %v20111_v3, %v20977_v16 }
 0xc4d   :  { %v20137_v39 = vsub.f32 %v10086_v11, %v10187_v46  ;;  %v10088_v63 = vmax.f32 %v15103_v33, 0.0  ;;  %v13703_v37 = vpop.f32.mrb[46].mxu1  ;;  %v20139_v61 = vpack.c.bf16 %v10190_v0, %v10187_v46  ;;  %v10407_v41 = vsub.f32 %v20117_v13, %v21697_v10 }
 0xc4e   :  { %v20982_v58 = vand.u32 4294901760, %v20131_v14  ;;  %v10196_v30 = vand.u32 4294901760, %v10089_v7  ;;  %v15104_v59 = vadd.f32 %v13703_v37, %v19956_v15  ;;  %v10050_v28 = vpop.f32.mrb[47].mxu1  ;;  %v20146_v62 = vpack.c.bf16 %v10401_v53, %v10394_v24 }
 0xc4f   :  { %21696 = vst [vmem:[#allocation34_spill] sm:$0xff] %v20139_v61  ;;  %v20983_v16 = vand.u32 4294901760, %v20137_v39  ;;  %v10193_v11 = vand.u32 4294901760, %v10088_v63  ;;  %v15105_v33 = vadd.f32 %v10050_v28, %v19960_v12  ;;  %14877 = vmatprep.subr.bf16.mxu0 %v20139_v61  ;;  %v10408_v0 = vand.u32 4294901760, %v10407_v41 }
 0xc50   :  { %v20151_v46 = vsub.f32 %v10089_v7, %v10196_v30  ;;  %v10091_v5 = vmax.f32 %v15104_v59, 0.0  ;;  %14879 = vmatpush3.bf16.msra.mxu0 %v19988_v8  ;;  %v10415_v10 = vand.u32 4294901760, %v10414_v57  ;;  %v10428_v15 = vsub.f32 %v20131_v14, %v20982_v58 }
 0xc51   :  { %v20157_v24 = vsub.f32 %v10088_v63, %v10193_v11  ;;  %v10090_v53 = vmax.f32 %v15105_v33, 0.0  ;;  %v20159_v37 = vpack.c.bf16 %v10196_v30, %v10193_v11  ;;  %v10421_v12 = vsub.f32 %v20137_v39, %v20983_v16 }
 0xc52   :  { %v10441_v7 = vand.u32 4294901760, %v20151_v46  ;;  %v10202_v41 = vand.u32 4294901760, %v10091_v5  ;;  %v20165_v59 = vpack.c.bf16 %v10415_v10, %v10408_v0  ;;  %v10429_v28 = vand.u32 4294901760, %v10428_v15 }
 0xc53   :  { %21698 = vst [vmem:[#allocation54_spill] sm:$0xff] %v20159_v37  ;;  %v10434_v57 = vand.u32 4294901760, %v20157_v24  ;;  %v10199_v8 = vand.u32 4294901760, %v10090_v53  ;;  %14881 = vmatprep.subr.bf16.mxu0 %v20159_v37  ;;  %v10422_v63 = vand.u32 4294901760, %v10421_v12  ;;  %v14942_v37 = vpack.c.bf16 %v19981_v22, %v19990_v43 }
 0xc54   :  { %v20171_v11 = vsub.f32 %v10091_v5, %v10202_v41  ;;  %14883 = vmatpush3.bf16.msra.mxu0 %v20004_v29  ;;  %v10442_v33 = vsub.f32 %v20151_v46, %v10441_v7  ;;  %v14944_v10 = vpack.c.bf16 %v20151_v46, %v20157_v24  ;;  %v14950_v6 = vpack.c.bf16 %v20015_v36, %v20024_v50 }
 0xc55   :  { %v20179_v15 = vsub.f32 %v10090_v53, %v10199_v8  ;;  %v20181_v58 = vpack.c.bf16 %v10202_v41, %v10199_v8  ;;  %v14908_v12 = vpack.c.bf16 %v10429_v28, %v10422_v63  ;;  %v10435_v16 = vsub.f32 %v20157_v24, %v10434_v57 }
 0xc56   :  { %v10455_v5 = vand.u32 4294901760, %v20171_v11  ;;  %v10443_v30 = vand.u32 4294901760, %v10442_v33  ;;  %v14934_v8 = vpack.c.bf16 %v19943_v25, %v19952_v56  ;;  %v14936_v41 = vpack.c.bf16 %v20111_v3, %v20117_v13 }
 0xc57   :  { %21699 = vst [vmem:[#allocation63_spill] sm:$0xff] %v20181_v58  ;;  %v10448_v0 = vand.u32 4294901760, %v20179_v15  ;;  %14885 = vmatprep.subr.bf16.mxu0 %v20181_v58  ;;  %v10436_v53 = vand.u32 4294901760, %v10435_v16  ;;  %v14938_v63 = vpack.c.bf16 %v19965_v1, %v19974_v31  ;;  %v14940_v33 = vpack.c.bf16 %v20131_v14, %v20137_v39 }
 0xc58   :  { %14887 = vmatpush3.bf16.msra.mxu0 %v20022_v21  ;;  %v10456_v28 = vsub.f32 %v20171_v11, %v10455_v5  ;;  %v14946_v21 = vpack.c.bf16 %v19997_v20, %v20006_v34  ;;  %v14948_v61 = vpack.c.bf16 %v20171_v11, %v20179_v15  ;;  %v21700_v44 = vand.u32 4294901760, %v20040_v42 }
 0xc59   :  { %14889 = vmatprep.subr.bf16.mxu0 %v20081_v60  ;;  %v14912_v16 = vpack.c.bf16 %v10443_v30, %v10436_v53  ;;  %v10449_v29 = vsub.f32 %v20179_v15, %v10448_v0  ;;  %v21701_v60 = vand.u32 4294901760, %v20033_v27  ;;  %v21702_v53 = vand.u32 4294901760, %v19875_v55 }
 0xc5a   :  { %v10457_v58 = vand.u32 4294901760, %v10456_v28  ;;  %v21703_v24 = vand.u32 4294901760, %v19893_v51  ;;  %v21704_v28 = vand.u32 4294901760, %v19884_v17  ;;  %v21705_v11 = vand.u32 4294901760, %v20057_v18 }
 0xc5b   :  { %v20217_v30 = vpack.c.bf16 %v21701_v60, %v21700_v44  ;;  %10215 = vmatmul.mubr.f32.vlgmr.msra.gmra.mrb[22].mxu0 %v21702_v53  ;;  %v10450_v46 = vand.u32 4294901760, %v10449_v29  ;;  %v21706_v15 = vand.u32 4294901760, %v20049_v23  ;;  %v21707_v42 = vand.u32 4294901760, %v19916_v54 }
 0xc5c   :  { %v20225_v48 = vpack.c.bf16 %v21704_v28, %v21703_v24  ;;  %v21708_v44 = vand.u32 4294901760, %v19908_v47  ;;  %14891 = vmatpush3.bf16.msra.mxu0 %v19945_v4  ;;  %v21709_v55 = vand.u32 4294901760, %v19882_v45  ;;  %v21710_v29 = vand.u32 4294901760, %v20077_v49 }
 0xc5d   :  { %v20231_v38 = vpack.c.bf16 %v21706_v15, %v21705_v11  ;;  %v21711_v53 = vand.u32 4294901760, %v20069_v32  ;;  %v21713_v28 = vand.u32 4294901760, %v19934_v26  ;;  %v21714_v11 = vand.u32 4294901760, %v19925_v19  ;;  %14893 = vmatprep.subr.bf16.mxu0 %v20106_v52 }
 0xc5e   :  { %v20237_v60 = vpack.c.bf16 %v21708_v44, %v21707_v42  ;;  %10224 = vmatprep.mubr.f32.mxu0 %v21709_v55  ;;  %v21716_v42 = vand.u32 4294901760, %v20097_v35  ;;  %v21717_v44 = vand.u32 4294901760, %v20091_v40  ;;  %v14916_v45 = vpack.c.bf16 %v10457_v58, %v10450_v46 }
 0xc5f   :  { %v20246_v24 = vpack.c.bf16 %v21711_v53, %v21710_v29  ;;  %v20252_v15 = vpack.c.bf16 %v21714_v11, %v21713_v28  ;;  %v21718_v55 = vand.u32 4294901760, %v19952_v56  ;;  %v21719_v29 = vand.u32 4294901760, %v19943_v25 }
 0xc60   :  { %v20258_v4 = vpack.c.bf16 %v21717_v44, %v21716_v42  ;;  %v21721_v28 = vand.u32 4294901760, %v20111_v3  ;;  %v21723_v42 = vand.u32 4294901760, %v19965_v1  ;;  %v21724_v52 = vand.u32 4294901760, %v20137_v39 }
 0xc61   :  { %21712 = vst [vmem:[#allocation49_spill] sm:$0xff] %v20246_v24  ;;  %21715 = vst [vmem:[#allocation39_spill] sm:$0xff] %v20252_v15  ;;  %v20265_v53 = vpack.c.bf16 %v21719_v29, %v21718_v55  ;;  %v21720_v24 = vand.u32 4294901760, %v20117_v13  ;;  %v21722_v15 = vand.u32 4294901760, %v19974_v31  ;;  %v21725_v56 = vand.u32 4294901760, %v20131_v14  ;;  %v21733_v55 = vld [vmem:[#allocation62_spill] sm:$0xff] }
 0xc62   :  { %v21726_v25 = vand.u32 4294901760, %v19990_v43  ;;  %v21727_v13 = vand.u32 4294901760, %v19981_v22  ;;  %v20291_v3 = vpack.c.bf16 %v10441_v7, %v10434_v57  ;;  %v21728_v31 = vand.u32 4294901760, %v20006_v34  ;;  %14895 = vmatpush3.bf16.msra.mxu0 %v21733_v55  ;;  %v21734_v7 = vld [vmem:[#allocation52_spill] sm:$0xff]  ;;  %v21740_v57 = vld [vmem:[#allocation55_spill] sm:$0xff] }
 0xc63   :  { %v20271_v11 = vpack.c.bf16 %v21721_v28, %v21720_v24  ;;  %v20277_v44 = vpack.c.bf16 %v21723_v42, %v21722_v15  ;;  %v20283_v58 = vpack.c.bf16 %v21725_v56, %v21724_v52  ;;  %v21729_v1 = vand.u32 4294901760, %v19997_v20  ;;  %14897 = vmatprep.subr.bf16.mxu0 %v20126_v2  ;;  %v21735_v20 = vld [vmem:[#allocation41_spill] sm:$0xff]  ;;  %v21737_v34 = vld [vmem:[#allocation40_spill] sm:$0xff]  ;;  %v21741_v2 = vld [vmem:[#allocation18_spill] sm:$0xff] }
 0xc64   :  { %v20289_v46 = vpack.c.bf16 %v21727_v13, %v21726_v25  ;;  %v21730_v39 = vand.u32 4294901760, %v19889_v9  ;;  %v20301_v14 = vpack.c.bf16 %v10455_v5, %v10448_v0  ;;  %v21731_v15 = vand.u32 4294901760, %v20024_v50  ;;  %v21736_v9 = vld [vmem:[#allocation31_spill] sm:$0xff]  ;;  %v21739_v50 = vld [vmem:[#allocation29_spill] sm:$0xff]  ;;  %v21745_v5 = vld [vmem:[#allocation58_spill] sm:$0xff] }
 0xc65   :  { %v20297_v24 = vpack.c.bf16 %v21729_v1, %v21728_v31  ;;  %v21732_v43 = vand.u32 4294901760, %v20015_v36  ;;  %v21738_v36 = vld [vmem:[#allocation61_spill] sm:$0xff]  ;;  %v21742_v0 = vpack.c.bf16 %v20033_v27, %v21741_v2  ;;  %v21749_v27 = vld [vmem:[#allocation46_spill] sm:$0xff]  ;;  %v21750_v29 = vpack.c.bf16 %v20069_v32, %v20077_v49 }
 0xc66   :  { %10230 = vmatmul.mubr.f32.gmra.mrb[24].mxu0 %v21730_v39  ;;  %v21759_v32 = vld [vmem:[#allocation10_spill] sm:$0xff]  ;;  %v21760_v49 = vand.u32 4294901760, %v21749_v27  ;;  %v21772_v28 = vld [vmem:[#allocation33_spill] sm:$0xff] }
 0xc67   :  { %v20307_v22 = vpack.c.bf16 %v21732_v43, %v21731_v15  ;;  %10460 = vmatprep.mubr.f32.mxu0 %v21734_v7  ;;  %14899 = vmatpush3.bf16.msra.mxu0 %v21735_v20 }
 0xc68   :  { %14901 = vmatprep.subr.bf16.mxu0 %v20146_v62  ;;  %v21743_v62 = vld [vmem:[#allocation56_spill] sm:$0xff]  ;;  %v21776_v25 = vld [vmem:[#allocation49_spill] sm:$0xff] }
 0xc6b   :  { %14903 = vmatpush3.bf16.msra.mxu0 %v21736_v9 }
 0xc6c   :  { %14905 = vmatprep.subr.bf16.mxu0 %v20165_v59  ;;  %v21744_v59 = vpack.c.bf16 %v19884_v17, %v19893_v51  ;;  %v21751_v17 = vpack.c.bf16 %v19925_v19, %v19934_v26  ;;  %v21752_v51 = vpack.c.bf16 %v20091_v40, %v20097_v35  ;;  %v21756_v19 = vld [vmem:[#allocation11_spill] sm:$0xff]  ;;  %v21757_v26 = vld [vmem:[#allocation37_spill] sm:$0xff]  ;;  %v21764_v35 = vld [vmem:[#allocation28_spill] sm:$0xff] }
 0xc6d   :  { %v21763_v40 = vld [vmem:[#allocation19_spill] sm:$0xff]  ;;  %v21774_v52 = vand.u32 4294901760, %v21756_v19 }
 0xc6f   :  { %14907 = vmatpush3.bf16.msra.mxu0 %v21737_v34 }
 0xc70   :  { %14909 = vmatprep.subr.bf16.mxu0 %v14908_v12  ;;  %v21746_v12 = vpack.c.bf16 %v20049_v23, %v20057_v18  ;;  %v21755_v23 = vld [vmem:[#allocation21_spill] sm:$0xff]  ;;  %v21758_v18 = vld [vmem:[#allocation36_spill] sm:$0xff] }
 0xc71   :  { %v21775_v56 = vand.u32 4294901760, %v21758_v18 }
 0xc73   :  { %14911 = vmatpush3.bf16.msra.mxu0 %v21738_v36 }
 0xc74   :  { %14913 = vmatprep.subr.bf16.mxu0 %v14912_v16  ;;  %v21747_v16 = vld [vmem:[#allocation47_spill] sm:$0xff] }
 0xc77   :  { %14915 = vmatpush3.bf16.msra.mxu0 %v21739_v50 }
 0xc78   :  { %14917 = vmatprep.subr.bf16.mxu0 %v14916_v45  ;;  %v21748_v45 = vpack.c.bf16 %v19908_v47, %v19916_v54  ;;  %v21753_v47 = vld [vmem:[#allocation43_spill] sm:$0xff] }
 0xc79   :  { %v21754_v54 = vld [vmem:[#allocation59_spill] sm:$0xff] }
 0xc7a   :  { %v21773_v42 = vand.u32 4294901760, %v21754_v54 }
 0xc7b   :  { %14919 = vmatpush3.bf16.msra.mxu0 %v21740_v57 }
 0xc7c   :  { %14921 = vmatprep.subr.bf16.mxu0 %v21742_v0 }
 0xc7e   :  { %10462 = vmatmul.mubr.f32.vlgmr.msra.gmra.mrb[26].mxu0 %v21743_v62 }
 0xc7f   :  { %14923 = vmatpush3.bf16.msra.mxu0 %v21744_v59  ;;  %10467 = vmatprep.mubr.f32.mxu0 %v21745_v5 }
 0xc80   :  { %14925 = vmatprep.subr.bf16.mxu0 %v21746_v12 }
 0xc82   :  { %10469 = vmatmul.mubr.f32.gmra.mrb[28].mxu0 %v21747_v16 }
 0xc83   :  { %14927 = vmatpush3.bf16.msra.mxu0 %v21748_v45  ;;  %10604 = vmatprep.mubr.f32.mxu0 %v21749_v27 }
 0xc84   :  { %14929 = vmatprep.subr.bf16.mxu0 %v21750_v29 }
 0xc87   :  { %14931 = vmatpush3.bf16.msra.mxu0 %v21751_v17 }
 0xc88   :  { %14933 = vmatprep.subr.bf16.mxu0 %v21752_v51 }
 0xc8b   :  { %14935 = vmatpush3.bf16.msra.mxu0 %v14934_v8  ;;  %v21768_v8 = vld [vmem:[#allocation57_spill] sm:$0xff] }
 0xc8c   :  { %14937 = vmatprep.subr.bf16.mxu0 %v14936_v41  ;;  %v21769_v41 = vld [vmem:[#allocation54_spill] sm:$0xff] }
 0xc8f   :  { %14939 = vmatpush3.bf16.msra.mxu0 %v14938_v63  ;;  %v21770_v63 = vld [vmem:[#allocation30_spill] sm:$0xff] }
 0xc90   :  { %14941 = vmatprep.subr.bf16.mxu0 %v14940_v33  ;;  %v21771_v33 = vld [vmem:[#allocation63_spill] sm:$0xff] }
 0xc93   :  { %14943 = vmatpush3.bf16.msra.mxu0 %v14942_v37  ;;  %v21766_v37 = vld [vmem:[#allocation60_spill] sm:$0xff] }
 0xc94   :  { %14945 = vmatprep.subr.bf16.mxu0 %v14944_v10  ;;  %v21767_v10 = vld [vmem:[#allocation34_spill] sm:$0xff] }
 0xc97   :  { %14947 = vmatpush3.bf16.msra.mxu0 %v14946_v21  ;;  %v21761_v21 = vld [vmem:[#allocation50_spill] sm:$0xff] }
 0xc98   :  { %14949 = vmatprep.subr.bf16.mxu0 %v14948_v61  ;;  %v21765_v61 = vld [vmem:[#allocation9_spill] sm:$0xff] }
 0xc9b   :  { %14951 = vmatpush3.bf16.msra.mxu0 %v14950_v6  ;;  %v21762_v6 = vld [vmem:[#allocation27_spill] sm:$0xff] }
 0xc9c   :  { %14953 = vmatprep.subr.bf16.mxu0 %v21753_v47 }
 0xc9e   :  { %10607 = vmatmul.mubr.f32.vlgmr.msra.gmra.mrb[30].mxu0 %v21754_v54 }
 0xc9f   :  { %14955 = vmatpush3.bf16.msra.mxu0 %v21755_v23  ;;  %10613 = vmatprep.mubr.f32.mxu0 %v21756_v19 }
 0xca0   :  { %14957 = vmatprep.subr.bf16.mxu0 %v21757_v26 }
 0xca2   :  { %10616 = vmatmul.mubr.f32.gmra.mrb[32].mxu0 %v21758_v18 }
 0xca3   :  { %14959 = vmatpush3.bf16.msra.mxu0 %v21759_v32  ;;  %10720 = vmatprep.mubr.f32.mxu0 %v21760_v49 }
 0xca4   :  { %14961 = vmatprep.subr.bf16.mxu0 %v21761_v21 }
 0xca7   :  { %14963 = vmatpush3.bf16.msra.mxu0 %v21762_v6 }
 0xca8   :  { %14965 = vmatprep.subr.bf16.mxu0 %v21763_v40 }
 0xcab   :  { %14967 = vmatpush3.bf16.msra.mxu0 %v21764_v35 }
 0xcac   :  { %14969 = vmatprep.subr.bf16.mxu0 %v21765_v61 }
 0xcaf   :  { %14971 = vmatpush3.bf16.msra.mxu0 %v21766_v37 }
 0xcb0   :  { %14973 = vmatprep.subr.bf16.mxu0 %v21767_v10 }
 0xcb3   :  { %14975 = vmatpush3.bf16.msra.mxu0 %v21768_v8 }
 0xcb4   :  { %14977 = vmatprep.subr.bf16.mxu0 %v21769_v41 }
 0xcb7   :  { %14979 = vmatpush3.bf16.msra.mxu0 %v21770_v63 }
 0xcb8   :  { %14981 = vmatprep.subr.bf16.mxu0 %v21771_v33 }
 0xcbb   :  { %14983 = vmatpush3.bf16.msra.mxu0 %v21772_v28 }
 0xcbc   :  { %14985 = vmatprep.subr.bf16.mxu0 %v20217_v30  ;;  %v21777_v30 = vld [vmem:[#allocation39_spill] sm:$0xff] }
 0xcbe   :  { %10724 = vmatmul.mubr.f32.vlgmr.msra.gmra.mrb[34].mxu0 %v21773_v42 }
 0xcbf   :  { %14987 = vmatpush3.bf16.msra.mxu0 %v20225_v48  ;;  %10731 = vmatprep.mubr.f32.mxu0 %v21774_v52 }
 0xcc0   :  { %14989 = vmatprep.subr.bf16.mxu0 %v20231_v38 }
 0xcc2   :  { %10735 = vmatmul.mubr.f32.gmra.mrb[36].mxu0 %v21775_v56 }
 0xcc3   :  { %14991 = vmatpush3.bf16.msra.mxu0 %v20237_v60  ;;  %10901 = vmatprep.mubr.f32.mxu0 %v21734_v7 }
 0xcc4   :  { %14993 = vmatprep.subr.bf16.mxu0 %v21776_v25 }
 0xcc7   :  { %14995 = vmatpush3.bf16.msra.mxu0 %v21777_v30 }
 0xcc8   :  { %14997 = vmatprep.subr.bf16.mxu0 %v20258_v4 }
 0xccb   :  { %14999 = vmatpush3.bf16.msra.mxu0 %v20265_v53 }
 0xccc   :  { %15001 = vmatprep.subr.bf16.mxu0 %v20271_v11 }
 0xccf   :  { %15003 = vmatpush3.bf16.msra.mxu0 %v20277_v44 }
 0xcd0   :  { %15005 = vmatprep.subr.bf16.mxu0 %v20283_v58  ;;  %v10101_v58 = vpop.permute.xlu0 %10100 }
 0xcd3   :  { %15007 = vmatpush3.bf16.msra.mxu0 %v20289_v46 }
 0xcd4   :  { %15009 = vmatprep.subr.bf16.mxu0 %v20291_v3 }
 0xcd7   :  { %15011 = vmatpush3.bf16.msra.mxu0 %v20297_v24  ;;  %v10106_v24 = vpop.permute.xlu1 %10105 }
 0xcd8   :  { %15013 = vmatprep.subr.bf16.mxu0 %v20301_v14 }
 0xcdb   :  { %15015 = vmatpush3.bf16.msra.mxu0 %v20307_v22 }
 0xcdc   :  { %15017 = vmatprep.subr.bf16.mxu0 %v21753_v47 }
 0xcde   :  { %10903 = vmatmul.mubr.f32.vlgmr.msra.gmra.mrb[38].mxu0 %v21743_v62 }
 0xcdf   :  { %15019 = vmatpush3.bf16.msra.mxu0 %v21755_v23  ;;  %10908 = vmatprep.mubr.f32.mxu0 %v21745_v5 }
 0xce0   :  { %15021 = vmatprep.subr.bf16.mxu0 %v21757_v26 }
 0xce2   :  { %10910 = vmatmul.mubr.f32.gmra.mrb[40].mxu0 %v21747_v16 }
 0xce3   :  { %15023 = vmatpush3.bf16.msra.mxu0 %v21759_v32  ;;  %11012 = vmatprep.mubr.f32.mxu0 %v21734_v7 }
 0xce4   :  { %15025 = vmatprep.subr.bf16.mxu0 %v21761_v21 }
 0xce7   :  { %15027 = vmatpush3.bf16.msra.mxu0 %v21762_v6 }
 0xce8   :  { %15029 = vmatprep.subr.bf16.mxu0 %v21763_v40 }
 0xceb   :  { %15031 = vmatpush3.bf16.msra.mxu0 %v21764_v35 }
 0xcec   :  { %15033 = vmatprep.subr.bf16.mxu0 %v21765_v61 }
 0xcef   :  { %15035 = vmatpush3.bf16.msra.mxu0 %v21766_v37 }
 0xcf0   :  { %15037 = vmatprep.subr.bf16.mxu0 %v21767_v10 }
 0xcf3   :  { %15039 = vmatpush3.bf16.msra.mxu0 %v21768_v8 }
 0xcf4   :  { %15041 = vmatprep.subr.bf16.mxu0 %v21769_v41 }
 0xcf7   :  { %15043 = vmatpush3.bf16.msra.mxu0 %v21770_v63 }
 0xcf8   :  { %15045 = vmatprep.subr.bf16.mxu0 %v21771_v33 }
 0xcfb   :  { %15047 = vmatpush3.bf16.msra.mxu0 %v21772_v28 }
 0xcfe   :  { %11014 = vmatmul.mubr.f32.vlgmr.msra.gmra.mrb[42].mxu0 %v21743_v62 }
 0xcff   :  { %11019 = vmatprep.mubr.f32.mxu0 %v21745_v5 }
 0xd02   :  { %11021 = vmatmul.mubr.f32.gmra.mrb[44].mxu0 %v21747_v16 }
 0xd2e   :  { %v12026_v38 = vpop.f32.mrb[22].mxu0 }
 0xd2f   :  { %v12027_v48 = vpop.f32.mrb[23].mxu0 }
 0xd30   :  { %v12028_v60 = vadd.f32 %v12027_v48, %v12026_v38 }
 0xd32   :  { %v10217_v46 = vadd.f32 %v12028_v60, %v10101_v58 }
 0xd39   :  { %v12029_v4 = vpop.f32.mrb[24].mxu0 }
 0xd3a   :  { %v12030_v53 = vpop.f32.mrb[25].mxu0 }
 0xd3b   :  { %v12031_v11 = vadd.f32 %v12030_v53, %v12029_v4 }
 0xd3d   :  { %v10232_v14 = vadd.f32 %v12031_v11, %v10106_v24 }
 0xd51   :  { %v12064_v44 = vpop.f32.mrb[26].mxu0 }
 0xd52   :  { %v12065_v13 = vpop.f32.mrb[27].mxu0 }
 0xd53   :  { %v12066_v3 = vadd.f32 %v12065_v13, %v12064_v44 }
 0xd55   :  { %v10464_v31 = vadd.f32 %v12066_v3, %v10217_v46  ;;  %v12067_v1 = vpop.f32.mrb[28].mxu0 }
 0xd56   :  { %v12068_v39 = vpop.f32.mrb[29].mxu0 }
 0xd57   :  { %v12069_v15 = vadd.f32 %v12068_v39, %v12067_v1 }
 0xd59   :  { %v10471_v43 = vadd.f32 %v12069_v15, %v10232_v14 }
 0xd71   :  { %v12102_v22 = vpop.f32.mrb[30].mxu0 }
 0xd72   :  { %v12103_v55 = vpop.f32.mrb[31].mxu0 }
 0xd73   :  { %v12104_v7 = vadd.f32 %v12103_v55, %v12102_v22 }
 0xd75   :  { %v10609_v20 = vadd.f32 %v12104_v7, %v10464_v31  ;;  %v12105_v9 = vpop.f32.mrb[32].mxu0 }
 0xd76   :  { %v12106_v34 = vpop.f32.mrb[33].mxu0 }
 0xd77   :  { %v12107_v36 = vadd.f32 %v12106_v34, %v12105_v9 }
 0xd79   :  { %v10618_v50 = vadd.f32 %v12107_v36, %v10471_v43 }
 0xd91   :  { %v12140_v57 = vpop.f32.mrb[34].mxu0 }
 0xd92   :  { %v12141_v2 = vpop.f32.mrb[35].mxu0 }
 0xd93   :  { %v12142_v0 = vadd.f32 %v12141_v2, %v12140_v57 }
 0xd95   :  { %v10726_v62 = vadd.f32 %v12142_v0, %v10609_v20  ;;  %v12143_v59 = vpop.f32.mrb[36].mxu0 }
 0xd96   :  { %v12144_v5 = vpop.f32.mrb[37].mxu0 }
 0xd97   :  { %v12145_v12 = vadd.f32 %v12144_v5, %v12143_v59 }
 0xd99   :  { %v10737_v16 = vadd.f32 %v12145_v12, %v10618_v50 }
 0xdb1   :  { %v12178_v45 = vpop.f32.mrb[38].mxu0 }
 0xdb2   :  { %v12179_v27 = vpop.f32.mrb[39].mxu0 }
 0xdb3   :  { %v12180_v29 = vadd.f32 %v12179_v27, %v12178_v45 }
 0xdb5   :  { %v10905_v17 = vadd.f32 %v12180_v29, %v10726_v62  ;;  %v12181_v51 = vpop.f32.mrb[40].mxu0 }
 0xdb6   :  { %v12182_v47 = vpop.f32.mrb[41].mxu0 }
 0xdb7   :  { %v12183_v54 = vadd.f32 %v12182_v47, %v12181_v51 }
 0xdb9   :  { %v10912_v23 = vadd.f32 %v12183_v54, %v10737_v16 }
 0xdd1   :  { %v12216_v19 = vpop.f32.mrb[42].mxu0 }
 0xdd2   :  { %v12217_v26 = vpop.f32.mrb[43].mxu0 }
 0xdd3   :  { %v12218_v18 = vadd.f32 %v12217_v26, %v12216_v19 }
 0xdd5   :  { %v11016_v32 = vadd.f32 %v12218_v18, %v10905_v17  ;;  %v12219_v49 = vpop.f32.mrb[44].mxu0 }
 0xdd6   :  { %v12220_v21 = vpop.f32.mrb[45].mxu0 }
 0xdd7   :  { %11026 = vst.msk [vmem:[#allocation2] sm:$0xff] %vm3014_vm3, %v11016_v32  ;;  %v12221_v6 = vadd.f32 %v12220_v21, %v12219_v49 }
 0xdd9   :  { %v11023_v40 = vadd.f32 %v12221_v6, %v10912_v23 }
 0xddb   :  { %11027 = vst.msk [vmem:[#allocation2 + $0x8] sm:$0xff] %vm3014_vm3, %v11023_v40 }
 0xddc   :  { %15589 = shalt.err (!%p15586_p4)
}
 0xddd   :  { %s15590_s19 = scalar_lea.hbm %s20440_s14, 256 }
 0xdde   :  { %p15591_p5 = scmp.ne.s32.totalorder %s20440_s14, %s15590_s19  ;;  %p15594_p6 = scmp.lt.u32.totalorder %s15590_s19, %s20440_s14 }
 0xde0   :  { %p15596_p7 = pnand %p15594_p6, %p15591_p5 }
 0xde2   :  { %15599 = shalt.err (!%p15596_p7)
}
 0xde3   :  { %s15606_s1 = smov 128   ;;  %s15607_s23 = smov 8  }
 0xde4   :  { %11039 = dma.vmem_to_hbm [thread:$0]  %s11034_s15, 256, %s20440_s14, [#allocation3], %s15606_s1, %s15606_s1, %s15607_s23  }
 0xde5   :  { %15600 = dma.done.wait [#allocation3], 256  }
 0xde6   :  { %15601 = vsyncadd [#allocation3], 4294967040 }
 0xde7   :  { %11043 = vsyncpa [#allocation3], 1 }

</bundles_post_ra>
